<compile_context>
chip_gen: v5e
topology: v5e:2x2
jax: 0.10.0
libtpu: 0.0.40
codegen_flags: <defaults>
</compile_context>

<pallas_src>
import jax
import jax.numpy as jnp
from jax.experimental import pallas as pl
from jax.experimental.pallas import tpu as pltpu

BN_EPS = 1e-5
POOL = 4
K1 = 80          # conv1 kernel size
S1 = 16          # conv1 stride
K1_TAPS = K1 // S1
CHUNK = 128      # layer-1 time-chunk (rows); multiple of 8 (sublanes) and POOL


# --------------------------------------------------------------------------
# Fused kernel (built as a closure over the static layer geometry)
# --------------------------------------------------------------------------
def _make_kernel(B, t1, tp1, t2, tp2, t3, tp3, t4, C1, C2):
    f32 = jnp.float32

    def kernel(x_ref,
               w1_ref, b1_ref, g1_ref, be1_ref,
               w2_ref, b2_ref, g2_ref, be2_ref,
               w3_ref, b3_ref, g3_ref, be3_ref,
               w4_ref, b4_ref, g4_ref, be4_ref,
               fcw_ref, fcb_ref,
               o_ref,
               y1, p1, y2, p2, y3, p3, y4, hm):
        """Entire M5 forward, fully resident in VMEM.

        x_ref  : (B*t1, 80)   im2col'ed raw signal (conv1 taps folded into K)
        w1_ref : (80, C1)     conv1 weights
        wN_ref : (3, Cin, Cout) conv2-4 weights, one (Cin, Cout) slab per tap
        bN/gN/beN : (1, Cout) conv bias / BN gamma / BN beta
        fcw_ref: (C2, n_out), fcb_ref: (1, n_out)
        o_ref  : (B, n_out)   log-probabilities
        yN     : flattened pre-BN conv outputs; pN: pooled layer outputs
        hm     : (B, C2)      per-sample global average pool (head input)
        """

        def bn_affine(s1, s2, n_rows, g_ref, be_ref):
            # Training-mode BN: biased variance over (batch, time).
            # NOTE: E[x^2]-E[x]^2 in f32 — fine at init-scale activations.
            inv_n = 1.0 / float(n_rows)
            mean = s1 * inv_n
            var = s2 * inv_n - mean * mean
            scale = jax.lax.rsqrt(var + BN_EPS) * g_ref[...]
            shift = be_ref[...] - mean * scale
            return scale, shift

        def pooled_rows(y_scr, raw_start, n_pool, scale, shift):
            # BN affine + ReLU fused into a vectorized stride-4 max-pool read.
            res = y_scr[pl.ds(raw_start, n_pool, stride=POOL), :] * scale + shift
            for q in range(1, POOL):
                res = jnp.maximum(
                    res,
                    y_scr[pl.ds(raw_start + q, n_pool, stride=POOL), :] * scale
                    + shift)
            return jnp.maximum(res, 0.0)          # relu(max) == max(relu)

        # ---------------- Layer 1: Conv1d(1->C1, k=80, stride=16) ------------
        # One K=80 matmul per 128-row chunk (taps in K, batch in M); BN sums
        # accumulated on the fly; chunking keeps the accumulator ~16 vregs.
        M1 = B * t1
        w1 = w1_ref[...]
        b1 = b1_ref[...]
        s1 = jnp.zeros((1, C1), f32)
        s2 = jnp.zeros((1, C1), f32)
        for start in range(0, M1, CHUNK):
            n = min(CHUNK, M1 - start)
            acc = jnp.dot(x_ref[pl.ds(start, n), :], w1,
                          preferred_element_type=f32) + b1
            y1[pl.ds(start, n), :] = acc
            s1 = s1 + jnp.sum(acc, axis=0, keepdims=True)
            s2 = s2 + jnp.sum(acc * acc, axis=0, keepdims=True)
        scale1, shift1 = bn_affine(s1, s2, M1, g1_ref, be1_ref)
        # Pool over the flattened rows (valid because t1 % POOL == 0), chunked.
        MP1 = B * tp1
        for pstart in range(0, MP1, CHUNK):
            pn = min(CHUNK, MP1 - pstart)
            p1[pl.ds(pstart, pn), :] = pooled_rows(
                y1, POOL * pstart, pn, scale1, shift1)

        # ---------------- Layers 2-4: Conv1d(k=3, stride=1) ------------------
        def small_layer(p_in, tp_in, t_out, c_out, w_ref, b_ref, g_ref, be_ref,
                        y_scr, p_out, mean_out):
            taps = w_ref.shape[0]
            bias = b_ref[...]
            a1 = jnp.zeros((1, c_out), f32)
            a2 = jnp.zeros((1, c_out), f32)
            for b in range(B):
                acc = jnp.dot(p_in[pl.ds(b * tp_in, t_out), :], w_ref[0],
                              preferred_element_type=f32)
                for m in range(1, taps):
                    acc = acc + jnp.dot(p_in[pl.ds(b * tp_in + m, t_out), :],
                                        w_ref[m], preferred_element_type=f32)
                acc = acc + bias
                y_scr[pl.ds(b * t_out, t_out), :] = acc
                a1 = a1 + jnp.sum(acc, axis=0, keepdims=True)
                a2 = a2 + jnp.sum(acc * acc, axis=0, keepdims=True)
            sc, sh = bn_affine(a1, a2, B * t_out, g_ref, be_ref)
            tp = t_out // POOL
            for b in range(B):
                pooled = pooled_rows(y_scr, b * t_out, tp, sc, sh)
                if mean_out is None:
                    p_out[pl.ds(b * tp, tp), :] = pooled
                else:
                    # Fold the head's global average pool into the last layer.
                    mean_out[pl.ds(b, 1), :] = jnp.mean(pooled, axis=0,
                                                        keepdims=True)

        small_layer(p1, tp1, t2, C1, w2_ref, b2_ref, g2_ref, be2_ref, y2, p2, None)
        small_layer(p2, tp2, t3, C2, w3_ref, b3_ref, g3_ref, be3_ref, y3, p3, None)
        small_layer(p3, tp3, t4, C2, w4_ref, b4_ref, g4_ref, be4_ref, y4, None, hm)

        # ---------------- Head: Linear + log_softmax (batched, one store) ----
        logits = jnp.dot(hm[...], fcw_ref[...],
                         preferred_element_type=f32) + fcb_ref[...]
        z = logits - jnp.max(logits, axis=-1, keepdims=True)
        o_ref[...] = z - jnp.log(jnp.sum(jnp.exp(z), axis=-1, keepdims=True))

    return kernel


# --------------------------------------------------------------------------
# Wrapper (weight/input re-layout is cheap XLA glue; single pallas_call)
# --------------------------------------------------------------------------
def m5_forward(x_ncl, params):
    """x_ncl: (B, 1, L) like the PyTorch module.  Returns (B, 1, n_output) log-probs."""
    B, n_in, L = x_ncl.shape
    if n_in != 1:
        raise NotImplementedError("M5 Pallas kernel assumes n_input == 1")
    C1 = params["w1"].shape[0]
    C2 = params["w3"].shape[0]
    n_out = params["fcw"].shape[0]

    # Static layer geometry.
    t1 = (L - K1) // S1 + 1
    if t1 % POOL != 0:
        raise NotImplementedError("conv1 output length must be a multiple of 4")
    tp1 = t1 // POOL
    t2 = tp1 - 2
    tp2 = t2 // POOL
    t3 = tp2 - 2
    tp3 = t3 // POOL
    t4 = tp3 - 2

    # im2col for conv1: (B*t1, 80) rows, so the in-kernel conv is one K=80
    # matmul per chunk (taps folded into K, batch folded into M).
    n_blocks = t1 + K1_TAPS - 1
    xr = x_ncl[:, 0, :n_blocks * S1].reshape(B, n_blocks, S1)
    xim = jnp.concatenate([xr[:, m:m + t1, :] for m in range(K1_TAPS)], axis=-1)
    xim = xim.reshape(B * t1, K1).astype(jnp.float32)

    # Conv weights in channels-last matmul layout.
    w1 = params["w1"].reshape(C1, K1).T                       # (80, C1)
    w2 = jnp.transpose(params["w2"], (2, 1, 0))               # (3, C1, C1)
    w3 = jnp.transpose(params["w3"], (2, 1, 0))               # (3, C1, C2)
    w4 = jnp.transpose(params["w4"], (2, 1, 0))               # (3, C2, C2)
    fcw = params["fcw"].T                                     # (C2, n_out)

    row = lambda v: v.reshape(1, -1)
    vmem = pl.BlockSpec(memory_space=pltpu.MemorySpace.VMEM)

    kernel = _make_kernel(B, t1, tp1, t2, tp2, t3, tp3, t4, C1, C2)

    out = pl.pallas_call(
        kernel,
        out_shape=jax.ShapeDtypeStruct((B, n_out), jnp.float32),
        in_specs=[vmem] * 19,
        out_specs=vmem,
        scratch_shapes=[
            pltpu.VMEM((B * t1, C1), jnp.float32),    # y1: pre-BN conv1 output
            pltpu.VMEM((B * tp1, C1), jnp.float32),   # p1: pooled layer-1 output
            pltpu.VMEM((B * t2, C1), jnp.float32),    # y2
            pltpu.VMEM((B * tp2, C1), jnp.float32),   # p2
            pltpu.VMEM((B * t3, C2), jnp.float32),    # y3
            pltpu.VMEM((B * tp3, C2), jnp.float32),   # p3
            pltpu.VMEM((B * t4, C2), jnp.float32),    # y4
            pltpu.VMEM((B, C2), jnp.float32),         # hm: global-avg-pool rows
        ],
    )(xim,
      w1, row(params["b1"]), row(params["g1"]), row(params["be1"]),
      w2, row(params["b2"]), row(params["g2"]), row(params["be2"]),
      w3, row(params["b3"]), row(params["g3"]), row(params["be3"]),
      w4, row(params["b4"]), row(params["g4"]), row(params["be4"]),
      fcw, row(params["fcb"]))
    return out[:, None, :]                            # (B, 1, n_output)


# --------------------------------------------------------------------------
# Pure-JAX reference (mirrors the PyTorch module in train mode) for validation
# --------------------------------------------------------------------------
def _ref_forward(x, params):
    hp = jax.lax.Precision.HIGHEST

    def conv1d(y, w, b, stride):
        out = jax.lax.conv_general_dilated(
            y, w, window_strides=(stride,), padding="VALID",
            dimension_numbers=("NCH", "OIH", "NCH"), precision=hp)
        return out + b[None, :, None]

    def bn_relu_pool(y, g, be):
        mean = jnp.mean(y, axis=(0, 2), keepdims=True)
        var = jnp.mean((y - mean) ** 2, axis=(0, 2), keepdims=True)
        a = (y - mean) * jax.lax.rsqrt(var + BN_EPS)
        a = jnp.maximum(a * g[None, :, None] + be[None, :, None], 0.0)
        n, c, t = a.shape
        tp = t // POOL
        return jnp.max(a[:, :, :tp * POOL].reshape(n, c, tp, POOL), axis=-1)

    y = bn_relu_pool(conv1d(x, params["w1"], params["b1"], S1), params["g1"], params["be1"])
    y = bn_relu_pool(conv1d(y, params["w2"], params["b2"], 1), params["g2"], params["be2"])
    y = bn_relu_pool(conv1d(y, params["w3"], params["b3"], 1), params["g3"], params["be3"])
    y = bn_relu_pool(conv1d(y, params["w4"], params["b4"], 1), params["g4"], params["be4"])
    xm = jnp.mean(y, axis=-1)                    # avg_pool1d over the full length
    logits = jnp.dot(xm, params["fcw"].T, precision=hp) + params["fcb"][None, :]
    return jax.nn.log_softmax(logits, axis=-1)[:, None, :]


# --------------------------------------------------------------------------
# Deterministic parameter init (PyTorch-style fan-in uniform; BN gamma=1, beta=0)
# --------------------------------------------------------------------------
def _uniform(key, shape, fan_in):
    bound = 1.0 / (fan_in ** 0.5)
    return jax.random.uniform(key, shape, jnp.float32, -bound, bound)


def init_params(key, n_input=1, n_output=35, n_channel=32):
    ks = jax.random.split(key, 10)
    p = {}
    p["w1"] = _uniform(ks[0], (n_channel, n_input, 80), n_input * 80)
    p["b1"] = _uniform(ks[1], (n_channel,), n_input * 80)
    p["g1"], p["be1"] = jnp.ones((n_channel,)), jnp.zeros((n_channel,))
    p["w2"] = _uniform(ks[2], (n_channel, n_channel, 3), n_channel * 3)
    p["b2"] = _uniform(ks[3], (n_channel,), n_channel * 3)
    p["g2"], p["be2"] = jnp.ones((n_channel,)), jnp.zeros((n_channel,))
    p["w3"] = _uniform(ks[4], (2 * n_channel, n_channel, 3), n_channel * 3)
    p["b3"] = _uniform(ks[5], (2 * n_channel,), n_channel * 3)
    p["g3"], p["be3"] = jnp.ones((2 * n_channel,)), jnp.zeros((2 * n_channel,))
    p["w4"] = _uniform(ks[6], (2 * n_channel, 2 * n_channel, 3), 2 * n_channel * 3)
    p["b4"] = _uniform(ks[7], (2 * n_channel,), 2 * n_channel * 3)
    p["g4"], p["be4"] = jnp.ones((2 * n_channel,)), jnp.zeros((2 * n_channel,))
    p["fcw"] = _uniform(ks[8], (n_output, 2 * n_channel), 2 * n_channel)
    p["fcb"] = _uniform(ks[9], (n_output,), 2 * n_channel)
    return p


# --------------------------------------------------------------------------
if __name__ == "__main__":
    key = jax.random.PRNGKey(0)
    k_x, k_p = jax.random.split(key)

    B, n_input, L = 2, 1, 8000   # smallest "nice" length that survives all 4 pools
    x = jax.random.normal(k_x, (B, n_input, L), jnp.float32)
    params = init_params(k_p)

    fwd = jax.jit(m5_forward)
    out = jax.block_until_ready(fwd(x, params))

    assert out.shape == (B, 1, 35), out.shape
    assert bool(jnp.all(jnp.isfinite(out)))
    # log_softmax rows must exponentiate to ~1
    assert bool(jnp.allclose(jnp.sum(jnp.exp(out), axis=-1), 1.0, atol=1e-4))
    # cross-check against a pure-JAX reference of the PyTorch module
    ref = jax.jit(_ref_forward)(x, params)
    err = float(jnp.max(jnp.abs(out - ref)))
    assert bool(jnp.allclose(out, ref, atol=5e-3, rtol=2e-3)), err
    print("KERNEL_OK")
</pallas_src>

<mosaic_0001>
module attributes {stable_mosaic.version = 11 : i64} {
  func.func @kernel(%arg0: memref<992x80xf32, #tpu.memory_space<vmem>>, %arg1: memref<80x32xf32, #tpu.memory_space<vmem>>, %arg2: memref<1x32xf32, #tpu.memory_space<vmem>>, %arg3: memref<1x32xf32, #tpu.memory_space<vmem>>, %arg4: memref<1x32xf32, #tpu.memory_space<vmem>>, %arg5: memref<3x32x32xf32, #tpu.memory_space<vmem>>, %arg6: memref<1x32xf32, #tpu.memory_space<vmem>>, %arg7: memref<1x32xf32, #tpu.memory_space<vmem>>, %arg8: memref<1x32xf32, #tpu.memory_space<vmem>>, %arg9: memref<3x32x64xf32, #tpu.memory_space<vmem>>, %arg10: memref<1x64xf32, #tpu.memory_space<vmem>>, %arg11: memref<1x64xf32, #tpu.memory_space<vmem>>, %arg12: memref<1x64xf32, #tpu.memory_space<vmem>>, %arg13: memref<3x64x64xf32, #tpu.memory_space<vmem>>, %arg14: memref<1x64xf32, #tpu.memory_space<vmem>>, %arg15: memref<1x64xf32, #tpu.memory_space<vmem>>, %arg16: memref<1x64xf32, #tpu.memory_space<vmem>>, %arg17: memref<64x35xf32, #tpu.memory_space<vmem>>, %arg18: memref<1x35xf32, #tpu.memory_space<vmem>>, %arg19: memref<2x35xf32, #tpu.memory_space<vmem>>, %arg20: memref<992x32xf32, #tpu.memory_space<vmem>>, %arg21: memref<248x32xf32, #tpu.memory_space<vmem>>, %arg22: memref<244x32xf32, #tpu.memory_space<vmem>>, %arg23: memref<60x32xf32, #tpu.memory_space<vmem>>, %arg24: memref<56x64xf32, #tpu.memory_space<vmem>>, %arg25: memref<14x64xf32, #tpu.memory_space<vmem>>, %arg26: memref<10x64xf32, #tpu.memory_space<vmem>>, %arg27: memref<2x64xf32, #tpu.memory_space<vmem>>) attributes {dimension_semantics = [], scalar_prefetch = 0 : i64, scratch_operands = 8 : i64, tpu.core_type = #tpu.core_type<tc>} {
    %c0 = arith.constant 0 : index
    %c0_0 = arith.constant 0 : index
    %0 = vector.load %arg1[%c0, %c0_0] : memref<80x32xf32, #tpu.memory_space<vmem>>, vector<80x32xf32>
    %c0_1 = arith.constant 0 : index
    %c0_2 = arith.constant 0 : index
    %1 = vector.load %arg2[%c0_1, %c0_2] : memref<1x32xf32, #tpu.memory_space<vmem>>, vector<1x32xf32>
    %cst = arith.constant 0.000000e+00 : f32
    %2 = vector.broadcast %cst : f32 to vector<1x32xf32>
    %cst_3 = arith.constant 0.000000e+00 : f32
    %3 = vector.broadcast %cst_3 : f32 to vector<1x32xf32>
    %c0_4 = arith.constant 0 : index
    %c0_5 = arith.constant 0 : index
    %4 = vector.load %arg0[%c0_4, %c0_5] : memref<992x80xf32, #tpu.memory_space<vmem>>, vector<128x80xf32>
    %cst_6 = arith.constant dense<0.000000e+00> : vector<128x32xf32>
    %5 = tpu.matmul %4, %0, %cst_6 {dimension_numbers = #tpu.dot_dimension_numbers<[1], [0], [0], [1], [0, 0, 1, 1], [], []>} : vector<128x80xf32>, vector<80x32xf32>, vector<128x32xf32> -> vector<128x32xf32>
    %6 = vector.broadcast %1 : vector<1x32xf32> to vector<128x32xf32>
    %7 = arith.addf %5, %6 : vector<128x32xf32>
    %c0_7 = arith.constant 0 : index
    %c0_8 = arith.constant 0 : index
    %8 = vector.load %arg20[%c0_7, %c0_8] : memref<992x32xf32, #tpu.memory_space<vmem>>, vector<128x32xf32>
    tpu.vector_store %arg20[%c0_7, %c0_8], %7 {strides = array<i32>} : memref<992x32xf32, #tpu.memory_space<vmem>>, vector<128x32xf32>,
    %cst_9 = arith.constant dense<0.000000e+00> : vector<32xf32>
    %9 = vector.multi_reduction <add>, %7, %cst_9 [0] : vector<128x32xf32> to vector<32xf32>
    %10 = vector.shape_cast %9 : vector<32xf32> to vector<1x32xf32>
    %11 = arith.addf %2, %10 : vector<1x32xf32>
    %12 = arith.mulf %7, %7 : vector<128x32xf32>
    %cst_10 = arith.constant dense<0.000000e+00> : vector<32xf32>
    %13 = vector.multi_reduction <add>, %12, %cst_10 [0] : vector<128x32xf32> to vector<32xf32>
    %14 = vector.shape_cast %13 : vector<32xf32> to vector<1x32xf32>
    %15 = arith.addf %3, %14 : vector<1x32xf32>
    %c128 = arith.constant 128 : index
    %c0_11 = arith.constant 0 : index
    %16 = vector.load %arg0[%c128, %c0_11] : memref<992x80xf32, #tpu.memory_space<vmem>>, vector<128x80xf32>
    %cst_12 = arith.constant dense<0.000000e+00> : vector<128x32xf32>
    %17 = tpu.matmul %16, %0, %cst_12 {dimension_numbers = #tpu.dot_dimension_numbers<[1], [0], [0], [1], [0, 0, 1, 1], [], []>} : vector<128x80xf32>, vector<80x32xf32>, vector<128x32xf32> -> vector<128x32xf32>
    %18 = vector.broadcast %1 : vector<1x32xf32> to vector<128x32xf32>
    %19 = arith.addf %17, %18 : vector<128x32xf32>
    %c128_13 = arith.constant 128 : index
    %c0_14 = arith.constant 0 : index
    %20 = vector.load %arg20[%c128_13, %c0_14] : memref<992x32xf32, #tpu.memory_space<vmem>>, vector<128x32xf32>
    tpu.vector_store %arg20[%c128_13, %c0_14], %19 {strides = array<i32>} : memref<992x32xf32, #tpu.memory_space<vmem>>, vector<128x32xf32>,
    %cst_15 = arith.constant dense<0.000000e+00> : vector<32xf32>
    %21 = vector.multi_reduction <add>, %19, %cst_15 [0] : vector<128x32xf32> to vector<32xf32>
    %22 = vector.shape_cast %21 : vector<32xf32> to vector<1x32xf32>
    %23 = arith.addf %11, %22 : vector<1x32xf32>
    %24 = arith.mulf %19, %19 : vector<128x32xf32>
    %cst_16 = arith.constant dense<0.000000e+00> : vector<32xf32>
    %25 = vector.multi_reduction <add>, %24, %cst_16 [0] : vector<128x32xf32> to vector<32xf32>
    %26 = vector.shape_cast %25 : vector<32xf32> to vector<1x32xf32>
    %27 = arith.addf %15, %26 : vector<1x32xf32>
    %c256 = arith.constant 256 : index
    %c0_17 = arith.constant 0 : index
    %28 = vector.load %arg0[%c256, %c0_17] : memref<992x80xf32, #tpu.memory_space<vmem>>, vector<128x80xf32>
    %cst_18 = arith.constant dense<0.000000e+00> : vector<128x32xf32>
    %29 = tpu.matmul %28, %0, %cst_18 {dimension_numbers = #tpu.dot_dimension_numbers<[1], [0], [0], [1], [0, 0, 1, 1], [], []>} : vector<128x80xf32>, vector<80x32xf32>, vector<128x32xf32> -> vector<128x32xf32>
    %30 = vector.broadcast %1 : vector<1x32xf32> to vector<128x32xf32>
    %31 = arith.addf %29, %30 : vector<128x32xf32>
    %c256_19 = arith.constant 256 : index
    %c0_20 = arith.constant 0 : index
    %32 = vector.load %arg20[%c256_19, %c0_20] : memref<992x32xf32, #tpu.memory_space<vmem>>, vector<128x32xf32>
    tpu.vector_store %arg20[%c256_19, %c0_20], %31 {strides = array<i32>} : memref<992x32xf32, #tpu.memory_space<vmem>>, vector<128x32xf32>,
    %cst_21 = arith.constant dense<0.000000e+00> : vector<32xf32>
    %33 = vector.multi_reduction <add>, %31, %cst_21 [0] : vector<128x32xf32> to vector<32xf32>
    %34 = vector.shape_cast %33 : vector<32xf32> to vector<1x32xf32>
    %35 = arith.addf %23, %34 : vector<1x32xf32>
    %36 = arith.mulf %31, %31 : vector<128x32xf32>
    %cst_22 = arith.constant dense<0.000000e+00> : vector<32xf32>
    %37 = vector.multi_reduction <add>, %36, %cst_22 [0] : vector<128x32xf32> to vector<32xf32>
    %38 = vector.shape_cast %37 : vector<32xf32> to vector<1x32xf32>
    %39 = arith.addf %27, %38 : vector<1x32xf32>
    %c384 = arith.constant 384 : index
    %c0_23 = arith.constant 0 : index
    %40 = vector.load %arg0[%c384, %c0_23] : memref<992x80xf32, #tpu.memory_space<vmem>>, vector<128x80xf32>
    %cst_24 = arith.constant dense<0.000000e+00> : vector<128x32xf32>
    %41 = tpu.matmul %40, %0, %cst_24 {dimension_numbers = #tpu.dot_dimension_numbers<[1], [0], [0], [1], [0, 0, 1, 1], [], []>} : vector<128x80xf32>, vector<80x32xf32>, vector<128x32xf32> -> vector<128x32xf32>
    %42 = vector.broadcast %1 : vector<1x32xf32> to vector<128x32xf32>
    %43 = arith.addf %41, %42 : vector<128x32xf32>
    %c384_25 = arith.constant 384 : index
    %c0_26 = arith.constant 0 : index
    %44 = vector.load %arg20[%c384_25, %c0_26] : memref<992x32xf32, #tpu.memory_space<vmem>>, vector<128x32xf32>
    tpu.vector_store %arg20[%c384_25, %c0_26], %43 {strides = array<i32>} : memref<992x32xf32, #tpu.memory_space<vmem>>, vector<128x32xf32>,
    %cst_27 = arith.constant dense<0.000000e+00> : vector<32xf32>
    %45 = vector.multi_reduction <add>, %43, %cst_27 [0] : vector<128x32xf32> to vector<32xf32>
    %46 = vector.shape_cast %45 : vector<32xf32> to vector<1x32xf32>
    %47 = arith.addf %35, %46 : vector<1x32xf32>
    %48 = arith.mulf %43, %43 : vector<128x32xf32>
    %cst_28 = arith.constant dense<0.000000e+00> : vector<32xf32>
    %49 = vector.multi_reduction <add>, %48, %cst_28 [0] : vector<128x32xf32> to vector<32xf32>
    %50 = vector.shape_cast %49 : vector<32xf32> to vector<1x32xf32>
    %51 = arith.addf %39, %50 : vector<1x32xf32>
    %c512 = arith.constant 512 : index
    %c0_29 = arith.constant 0 : index
    %52 = vector.load %arg0[%c512, %c0_29] : memref<992x80xf32, #tpu.memory_space<vmem>>, vector<128x80xf32>
    %cst_30 = arith.constant dense<0.000000e+00> : vector<128x32xf32>
    %53 = tpu.matmul %52, %0, %cst_30 {dimension_numbers = #tpu.dot_dimension_numbers<[1], [0], [0], [1], [0, 0, 1, 1], [], []>} : vector<128x80xf32>, vector<80x32xf32>, vector<128x32xf32> -> vector<128x32xf32>
    %54 = vector.broadcast %1 : vector<1x32xf32> to vector<128x32xf32>
    %55 = arith.addf %53, %54 : vector<128x32xf32>
    %c512_31 = arith.constant 512 : index
    %c0_32 = arith.constant 0 : index
    %56 = vector.load %arg20[%c512_31, %c0_32] : memref<992x32xf32, #tpu.memory_space<vmem>>, vector<128x32xf32>
    tpu.vector_store %arg20[%c512_31, %c0_32], %55 {strides = array<i32>} : memref<992x32xf32, #tpu.memory_space<vmem>>, vector<128x32xf32>,
    %cst_33 = arith.constant dense<0.000000e+00> : vector<32xf32>
    %57 = vector.multi_reduction <add>, %55, %cst_33 [0] : vector<128x32xf32> to vector<32xf32>
    %58 = vector.shape_cast %57 : vector<32xf32> to vector<1x32xf32>
    %59 = arith.addf %47, %58 : vector<1x32xf32>
    %60 = arith.mulf %55, %55 : vector<128x32xf32>
    %cst_34 = arith.constant dense<0.000000e+00> : vector<32xf32>
    %61 = vector.multi_reduction <add>, %60, %cst_34 [0] : vector<128x32xf32> to vector<32xf32>
    %62 = vector.shape_cast %61 : vector<32xf32> to vector<1x32xf32>
    %63 = arith.addf %51, %62 : vector<1x32xf32>
    %c640 = arith.constant 640 : index
    %c0_35 = arith.constant 0 : index
    %64 = vector.load %arg0[%c640, %c0_35] : memref<992x80xf32, #tpu.memory_space<vmem>>, vector<128x80xf32>
    %cst_36 = arith.constant dense<0.000000e+00> : vector<128x32xf32>
    %65 = tpu.matmul %64, %0, %cst_36 {dimension_numbers = #tpu.dot_dimension_numbers<[1], [0], [0], [1], [0, 0, 1, 1], [], []>} : vector<128x80xf32>, vector<80x32xf32>, vector<128x32xf32> -> vector<128x32xf32>
    %66 = vector.broadcast %1 : vector<1x32xf32> to vector<128x32xf32>
    %67 = arith.addf %65, %66 : vector<128x32xf32>
    %c640_37 = arith.constant 640 : index
    %c0_38 = arith.constant 0 : index
    %68 = vector.load %arg20[%c640_37, %c0_38] : memref<992x32xf32, #tpu.memory_space<vmem>>, vector<128x32xf32>
    tpu.vector_store %arg20[%c640_37, %c0_38], %67 {strides = array<i32>} : memref<992x32xf32, #tpu.memory_space<vmem>>, vector<128x32xf32>,
    %cst_39 = arith.constant dense<0.000000e+00> : vector<32xf32>
    %69 = vector.multi_reduction <add>, %67, %cst_39 [0] : vector<128x32xf32> to vector<32xf32>
    %70 = vector.shape_cast %69 : vector<32xf32> to vector<1x32xf32>
    %71 = arith.addf %59, %70 : vector<1x32xf32>
    %72 = arith.mulf %67, %67 : vector<128x32xf32>
    %cst_40 = arith.constant dense<0.000000e+00> : vector<32xf32>
    %73 = vector.multi_reduction <add>, %72, %cst_40 [0] : vector<128x32xf32> to vector<32xf32>
    %74 = vector.shape_cast %73 : vector<32xf32> to vector<1x32xf32>
    %75 = arith.addf %63, %74 : vector<1x32xf32>
    %c768 = arith.constant 768 : index
    %c0_41 = arith.constant 0 : index
    %76 = vector.load %arg0[%c768, %c0_41] : memref<992x80xf32, #tpu.memory_space<vmem>>, vector<128x80xf32>
    %cst_42 = arith.constant dense<0.000000e+00> : vector<128x32xf32>
    %77 = tpu.matmul %76, %0, %cst_42 {dimension_numbers = #tpu.dot_dimension_numbers<[1], [0], [0], [1], [0, 0, 1, 1], [], []>} : vector<128x80xf32>, vector<80x32xf32>, vector<128x32xf32> -> vector<128x32xf32>
    %78 = vector.broadcast %1 : vector<1x32xf32> to vector<128x32xf32>
    %79 = arith.addf %77, %78 : vector<128x32xf32>
    %c768_43 = arith.constant 768 : index
    %c0_44 = arith.constant 0 : index
    %80 = vector.load %arg20[%c768_43, %c0_44] : memref<992x32xf32, #tpu.memory_space<vmem>>, vector<128x32xf32>
    tpu.vector_store %arg20[%c768_43, %c0_44], %79 {strides = array<i32>} : memref<992x32xf32, #tpu.memory_space<vmem>>, vector<128x32xf32>,
    %cst_45 = arith.constant dense<0.000000e+00> : vector<32xf32>
    %81 = vector.multi_reduction <add>, %79, %cst_45 [0] : vector<128x32xf32> to vector<32xf32>
    %82 = vector.shape_cast %81 : vector<32xf32> to vector<1x32xf32>
    %83 = arith.addf %71, %82 : vector<1x32xf32>
    %84 = arith.mulf %79, %79 : vector<128x32xf32>
    %cst_46 = arith.constant dense<0.000000e+00> : vector<32xf32>
    %85 = vector.multi_reduction <add>, %84, %cst_46 [0] : vector<128x32xf32> to vector<32xf32>
    %86 = vector.shape_cast %85 : vector<32xf32> to vector<1x32xf32>
    %87 = arith.addf %75, %86 : vector<1x32xf32>
    %c896 = arith.constant 896 : index
    %c0_47 = arith.constant 0 : index
    %88 = vector.load %arg0[%c896, %c0_47] : memref<992x80xf32, #tpu.memory_space<vmem>>, vector<96x80xf32>
    %cst_48 = arith.constant dense<0.000000e+00> : vector<96x32xf32>
    %89 = tpu.matmul %88, %0, %cst_48 {dimension_numbers = #tpu.dot_dimension_numbers<[1], [0], [0], [1], [0, 0, 1, 1], [], []>} : vector<96x80xf32>, vector<80x32xf32>, vector<96x32xf32> -> vector<96x32xf32>
    %90 = vector.broadcast %1 : vector<1x32xf32> to vector<96x32xf32>
    %91 = arith.addf %89, %90 : vector<96x32xf32>
    %c896_49 = arith.constant 896 : index
    %c0_50 = arith.constant 0 : index
    %92 = vector.load %arg20[%c896_49, %c0_50] : memref<992x32xf32, #tpu.memory_space<vmem>>, vector<96x32xf32>
    tpu.vector_store %arg20[%c896_49, %c0_50], %91 {strides = array<i32>} : memref<992x32xf32, #tpu.memory_space<vmem>>, vector<96x32xf32>,
    %cst_51 = arith.constant dense<0.000000e+00> : vector<32xf32>
    %93 = vector.multi_reduction <add>, %91, %cst_51 [0] : vector<96x32xf32> to vector<32xf32>
    %94 = vector.shape_cast %93 : vector<32xf32> to vector<1x32xf32>
    %95 = arith.addf %83, %94 : vector<1x32xf32>
    %96 = arith.mulf %91, %91 : vector<96x32xf32>
    %cst_52 = arith.constant dense<0.000000e+00> : vector<32xf32>
    %97 = vector.multi_reduction <add>, %96, %cst_52 [0] : vector<96x32xf32> to vector<32xf32>
    %98 = vector.shape_cast %97 : vector<32xf32> to vector<1x32xf32>
    %99 = arith.addf %87, %98 : vector<1x32xf32>
    %cst_53 = arith.constant 0.00100806449 : f32
    %100 = vector.broadcast %cst_53 : f32 to vector<1x32xf32>
    %101 = arith.mulf %95, %100 : vector<1x32xf32>
    %cst_54 = arith.constant 0.00100806449 : f32
    %102 = vector.broadcast %cst_54 : f32 to vector<1x32xf32>
    %103 = arith.mulf %99, %102 : vector<1x32xf32>
    %104 = arith.mulf %101, %101 : vector<1x32xf32>
    %105 = arith.subf %103, %104 : vector<1x32xf32>
    %cst_55 = arith.constant 9.99999974E-6 : f32
    %106 = vector.broadcast %cst_55 : f32 to vector<1x32xf32>
    %107 = arith.addf %105, %106 : vector<1x32xf32>
    %108 = math.rsqrt %107 : vector<1x32xf32>
    %c0_56 = arith.constant 0 : index
    %c0_57 = arith.constant 0 : index
    %109 = vector.load %arg3[%c0_56, %c0_57] : memref<1x32xf32, #tpu.memory_space<vmem>>, vector<1x32xf32>
    %110 = arith.mulf %108, %109 : vector<1x32xf32>
    %c0_58 = arith.constant 0 : index
    %c0_59 = arith.constant 0 : index
    %111 = vector.load %arg4[%c0_58, %c0_59] : memref<1x32xf32, #tpu.memory_space<vmem>>, vector<1x32xf32>
    %112 = arith.mulf %101, %110 : vector<1x32xf32>
    %113 = arith.subf %111, %112 : vector<1x32xf32>
    %c0_60 = arith.constant 0 : index
    %c0_61 = arith.constant 0 : index
    %114 = tpu.strided_load %arg20[%c0_60, %c0_61] {strides = array<i32: 4, 1>} : memref<992x32xf32, #tpu.memory_space<vmem>>, vector<128x32xf32>
    %115 = vector.broadcast %110 : vector<1x32xf32> to vector<128x32xf32>
    %116 = arith.mulf %114, %115 : vector<128x32xf32>
    %117 = vector.broadcast %113 : vector<1x32xf32> to vector<128x32xf32>
    %118 = arith.addf %116, %117 : vector<128x32xf32>
    %c1 = arith.constant 1 : index
    %c0_62 = arith.constant 0 : index
    %119 = tpu.strided_load %arg20[%c1, %c0_62] {strides = array<i32: 4, 1>} : memref<992x32xf32, #tpu.memory_space<vmem>>, vector<128x32xf32>
    %120 = vector.broadcast %110 : vector<1x32xf32> to vector<128x32xf32>
    %121 = arith.mulf %119, %120 : vector<128x32xf32>
    %122 = vector.broadcast %113 : vector<1x32xf32> to vector<128x32xf32>
    %123 = arith.addf %121, %122 : vector<128x32xf32>
    %124 = arith.maximumf %118, %123 : vector<128x32xf32>
    %c2 = arith.constant 2 : index
    %c0_63 = arith.constant 0 : index
    %125 = tpu.strided_load %arg20[%c2, %c0_63] {strides = array<i32: 4, 1>} : memref<992x32xf32, #tpu.memory_space<vmem>>, vector<128x32xf32>
    %126 = vector.broadcast %110 : vector<1x32xf32> to vector<128x32xf32>
    %127 = arith.mulf %125, %126 : vector<128x32xf32>
    %128 = vector.broadcast %113 : vector<1x32xf32> to vector<128x32xf32>
    %129 = arith.addf %127, %128 : vector<128x32xf32>
    %130 = arith.maximumf %124, %129 : vector<128x32xf32>
    %c3 = arith.constant 3 : index
    %c0_64 = arith.constant 0 : index
    %131 = tpu.strided_load %arg20[%c3, %c0_64] {strides = array<i32: 4, 1>} : memref<992x32xf32, #tpu.memory_space<vmem>>, vector<128x32xf32>
    %132 = vector.broadcast %110 : vector<1x32xf32> to vector<128x32xf32>
    %133 = arith.mulf %131, %132 : vector<128x32xf32>
    %134 = vector.broadcast %113 : vector<1x32xf32> to vector<128x32xf32>
    %135 = arith.addf %133, %134 : vector<128x32xf32>
    %136 = arith.maximumf %130, %135 : vector<128x32xf32>
    %cst_65 = arith.constant 0.000000e+00 : f32
    %137 = vector.broadcast %cst_65 : f32 to vector<128x32xf32>
    %138 = arith.maximumf %136, %137 : vector<128x32xf32>
    %c0_66 = arith.constant 0 : index
    %c0_67 = arith.constant 0 : index
    %139 = vector.load %arg21[%c0_66, %c0_67] : memref<248x32xf32, #tpu.memory_space<vmem>>, vector<128x32xf32>
    tpu.vector_store %arg21[%c0_66, %c0_67], %138 {strides = array<i32>} : memref<248x32xf32, #tpu.memory_space<vmem>>, vector<128x32xf32>,
    %c512_68 = arith.constant 512 : index
    %c0_69 = arith.constant 0 : index
    %140 = tpu.strided_load %arg20[%c512_68, %c0_69] {strides = array<i32: 4, 1>} : memref<992x32xf32, #tpu.memory_space<vmem>>, vector<120x32xf32>
    %141 = vector.broadcast %110 : vector<1x32xf32> to vector<120x32xf32>
    %142 = arith.mulf %140, %141 : vector<120x32xf32>
    %143 = vector.broadcast %113 : vector<1x32xf32> to vector<120x32xf32>
    %144 = arith.addf %142, %143 : vector<120x32xf32>
    %c513 = arith.constant 513 : index
    %c0_70 = arith.constant 0 : index
    %145 = tpu.strided_load %arg20[%c513, %c0_70] {strides = array<i32: 4, 1>} : memref<992x32xf32, #tpu.memory_space<vmem>>, vector<120x32xf32>
    %146 = vector.broadcast %110 : vector<1x32xf32> to vector<120x32xf32>
    %147 = arith.mulf %145, %146 : vector<120x32xf32>
    %148 = vector.broadcast %113 : vector<1x32xf32> to vector<120x32xf32>
    %149 = arith.addf %147, %148 : vector<120x32xf32>
    %150 = arith.maximumf %144, %149 : vector<120x32xf32>
    %c514 = arith.constant 514 : index
    %c0_71 = arith.constant 0 : index
    %151 = tpu.strided_load %arg20[%c514, %c0_71] {strides = array<i32: 4, 1>} : memref<992x32xf32, #tpu.memory_space<vmem>>, vector<120x32xf32>
    %152 = vector.broadcast %110 : vector<1x32xf32> to vector<120x32xf32>
    %153 = arith.mulf %151, %152 : vector<120x32xf32>
    %154 = vector.broadcast %113 : vector<1x32xf32> to vector<120x32xf32>
    %155 = arith.addf %153, %154 : vector<120x32xf32>
    %156 = arith.maximumf %150, %155 : vector<120x32xf32>
    %c515 = arith.constant 515 : index
    %c0_72 = arith.constant 0 : index
    %157 = tpu.strided_load %arg20[%c515, %c0_72] {strides = array<i32: 4, 1>} : memref<992x32xf32, #tpu.memory_space<vmem>>, vector<120x32xf32>
    %158 = vector.broadcast %110 : vector<1x32xf32> to vector<120x32xf32>
    %159 = arith.mulf %157, %158 : vector<120x32xf32>
    %160 = vector.broadcast %113 : vector<1x32xf32> to vector<120x32xf32>
    %161 = arith.addf %159, %160 : vector<120x32xf32>
    %162 = arith.maximumf %156, %161 : vector<120x32xf32>
    %cst_73 = arith.constant 0.000000e+00 : f32
    %163 = vector.broadcast %cst_73 : f32 to vector<120x32xf32>
    %164 = arith.maximumf %162, %163 : vector<120x32xf32>
    %c128_74 = arith.constant 128 : index
    %c0_75 = arith.constant 0 : index
    %165 = vector.load %arg21[%c128_74, %c0_75] : memref<248x32xf32, #tpu.memory_space<vmem>>, vector<120x32xf32>
    tpu.vector_store %arg21[%c128_74, %c0_75], %164 {strides = array<i32>} : memref<248x32xf32, #tpu.memory_space<vmem>>, vector<120x32xf32>,
    %c0_76 = arith.constant 0 : index
    %c0_77 = arith.constant 0 : index
    %166 = vector.load %arg6[%c0_76, %c0_77] : memref<1x32xf32, #tpu.memory_space<vmem>>, vector<1x32xf32>
    %cst_78 = arith.constant 0.000000e+00 : f32
    %167 = vector.broadcast %cst_78 : f32 to vector<1x32xf32>
    %cst_79 = arith.constant 0.000000e+00 : f32
    %168 = vector.broadcast %cst_79 : f32 to vector<1x32xf32>
    %c0_80 = arith.constant 0 : index
    %c0_81 = arith.constant 0 : index
    %169 = vector.load %arg21[%c0_80, %c0_81] : memref<248x32xf32, #tpu.memory_space<vmem>>, vector<122x32xf32>
    %c0_82 = arith.constant 0 : index
    %c0_83 = arith.constant 0 : index
    %c0_84 = arith.constant 0 : index
    %170 = vector.load %arg5[%c0_82, %c0_83, %c0_84] : memref<3x32x32xf32, #tpu.memory_space<vmem>>, vector<1x32x32xf32>
    %171 = vector.shape_cast %170 : vector<1x32x32xf32> to vector<32x32xf32>
    %cst_85 = arith.constant dense<0.000000e+00> : vector<122x32xf32>
    %172 = tpu.matmul %169, %171, %cst_85 {dimension_numbers = #tpu.dot_dimension_numbers<[1], [0], [0], [1], [0, 0, 1, 1], [], []>} : vector<122x32xf32>, vector<32x32xf32>, vector<122x32xf32> -> vector<122x32xf32>
    %c1_86 = arith.constant 1 : index
    %c0_87 = arith.constant 0 : index
    %173 = vector.load %arg21[%c1_86, %c0_87] : memref<248x32xf32, #tpu.memory_space<vmem>>, vector<122x32xf32>
    %c1_88 = arith.constant 1 : index
    %c0_89 = arith.constant 0 : index
    %c0_90 = arith.constant 0 : index
    %174 = vector.load %arg5[%c1_88, %c0_89, %c0_90] : memref<3x32x32xf32, #tpu.memory_space<vmem>>, vector<1x32x32xf32>
    %175 = vector.shape_cast %174 : vector<1x32x32xf32> to vector<32x32xf32>
    %cst_91 = arith.constant dense<0.000000e+00> : vector<122x32xf32>
    %176 = tpu.matmul %173, %175, %cst_91 {dimension_numbers = #tpu.dot_dimension_numbers<[1], [0], [0], [1], [0, 0, 1, 1], [], []>} : vector<122x32xf32>, vector<32x32xf32>, vector<122x32xf32> -> vector<122x32xf32>
    %177 = arith.addf %172, %176 : vector<122x32xf32>
    %c2_92 = arith.constant 2 : index
    %c0_93 = arith.constant 0 : index
    %178 = vector.load %arg21[%c2_92, %c0_93] : memref<248x32xf32, #tpu.memory_space<vmem>>, vector<122x32xf32>
    %c2_94 = arith.constant 2 : index
    %c0_95 = arith.constant 0 : index
    %c0_96 = arith.constant 0 : index
    %179 = vector.load %arg5[%c2_94, %c0_95, %c0_96] : memref<3x32x32xf32, #tpu.memory_space<vmem>>, vector<1x32x32xf32>
    %180 = vector.shape_cast %179 : vector<1x32x32xf32> to vector<32x32xf32>
    %cst_97 = arith.constant dense<0.000000e+00> : vector<122x32xf32>
    %181 = tpu.matmul %178, %180, %cst_97 {dimension_numbers = #tpu.dot_dimension_numbers<[1], [0], [0], [1], [0, 0, 1, 1], [], []>} : vector<122x32xf32>, vector<32x32xf32>, vector<122x32xf32> -> vector<122x32xf32>
    %182 = arith.addf %177, %181 : vector<122x32xf32>
    %183 = vector.broadcast %166 : vector<1x32xf32> to vector<122x32xf32>
    %184 = arith.addf %182, %183 : vector<122x32xf32>
    %c0_98 = arith.constant 0 : index
    %c0_99 = arith.constant 0 : index
    %185 = vector.load %arg22[%c0_98, %c0_99] : memref<244x32xf32, #tpu.memory_space<vmem>>, vector<122x32xf32>
    tpu.vector_store %arg22[%c0_98, %c0_99], %184 {strides = array<i32>} : memref<244x32xf32, #tpu.memory_space<vmem>>, vector<122x32xf32>,
    %cst_100 = arith.constant dense<0.000000e+00> : vector<32xf32>
    %186 = vector.multi_reduction <add>, %184, %cst_100 [0] : vector<122x32xf32> to vector<32xf32>
    %187 = vector.shape_cast %186 : vector<32xf32> to vector<1x32xf32>
    %188 = arith.addf %167, %187 : vector<1x32xf32>
    %189 = arith.mulf %184, %184 : vector<122x32xf32>
    %cst_101 = arith.constant dense<0.000000e+00> : vector<32xf32>
    %190 = vector.multi_reduction <add>, %189, %cst_101 [0] : vector<122x32xf32> to vector<32xf32>
    %191 = vector.shape_cast %190 : vector<32xf32> to vector<1x32xf32>
    %192 = arith.addf %168, %191 : vector<1x32xf32>
    %c124 = arith.constant 124 : index
    %c0_102 = arith.constant 0 : index
    %193 = vector.load %arg21[%c124, %c0_102] : memref<248x32xf32, #tpu.memory_space<vmem>>, vector<122x32xf32>
    %c0_103 = arith.constant 0 : index
    %c0_104 = arith.constant 0 : index
    %c0_105 = arith.constant 0 : index
    %194 = vector.load %arg5[%c0_103, %c0_104, %c0_105] : memref<3x32x32xf32, #tpu.memory_space<vmem>>, vector<1x32x32xf32>
    %195 = vector.shape_cast %194 : vector<1x32x32xf32> to vector<32x32xf32>
    %cst_106 = arith.constant dense<0.000000e+00> : vector<122x32xf32>
    %196 = tpu.matmul %193, %195, %cst_106 {dimension_numbers = #tpu.dot_dimension_numbers<[1], [0], [0], [1], [0, 0, 1, 1], [], []>} : vector<122x32xf32>, vector<32x32xf32>, vector<122x32xf32> -> vector<122x32xf32>
    %c125 = arith.constant 125 : index
    %c0_107 = arith.constant 0 : index
    %197 = vector.load %arg21[%c125, %c0_107] : memref<248x32xf32, #tpu.memory_space<vmem>>, vector<122x32xf32>
    %c1_108 = arith.constant 1 : index
    %c0_109 = arith.constant 0 : index
    %c0_110 = arith.constant 0 : index
    %198 = vector.load %arg5[%c1_108, %c0_109, %c0_110] : memref<3x32x32xf32, #tpu.memory_space<vmem>>, vector<1x32x32xf32>
    %199 = vector.shape_cast %198 : vector<1x32x32xf32> to vector<32x32xf32>
    %cst_111 = arith.constant dense<0.000000e+00> : vector<122x32xf32>
    %200 = tpu.matmul %197, %199, %cst_111 {dimension_numbers = #tpu.dot_dimension_numbers<[1], [0], [0], [1], [0, 0, 1, 1], [], []>} : vector<122x32xf32>, vector<32x32xf32>, vector<122x32xf32> -> vector<122x32xf32>
    %201 = arith.addf %196, %200 : vector<122x32xf32>
    %c126 = arith.constant 126 : index
    %c0_112 = arith.constant 0 : index
    %202 = vector.load %arg21[%c126, %c0_112] : memref<248x32xf32, #tpu.memory_space<vmem>>, vector<122x32xf32>
    %c2_113 = arith.constant 2 : index
    %c0_114 = arith.constant 0 : index
    %c0_115 = arith.constant 0 : index
    %203 = vector.load %arg5[%c2_113, %c0_114, %c0_115] : memref<3x32x32xf32, #tpu.memory_space<vmem>>, vector<1x32x32xf32>
    %204 = vector.shape_cast %203 : vector<1x32x32xf32> to vector<32x32xf32>
    %cst_116 = arith.constant dense<0.000000e+00> : vector<122x32xf32>
    %205 = tpu.matmul %202, %204, %cst_116 {dimension_numbers = #tpu.dot_dimension_numbers<[1], [0], [0], [1], [0, 0, 1, 1], [], []>} : vector<122x32xf32>, vector<32x32xf32>, vector<122x32xf32> -> vector<122x32xf32>
    %206 = arith.addf %201, %205 : vector<122x32xf32>
    %207 = vector.broadcast %166 : vector<1x32xf32> to vector<122x32xf32>
    %208 = arith.addf %206, %207 : vector<122x32xf32>
    %c122 = arith.constant 122 : index
    %c0_117 = arith.constant 0 : index
    %209 = vector.load %arg22[%c122, %c0_117] : memref<244x32xf32, #tpu.memory_space<vmem>>, vector<122x32xf32>
    tpu.vector_store %arg22[%c122, %c0_117], %208 {strides = array<i32>} : memref<244x32xf32, #tpu.memory_space<vmem>>, vector<122x32xf32>,
    %cst_118 = arith.constant dense<0.000000e+00> : vector<32xf32>
    %210 = vector.multi_reduction <add>, %208, %cst_118 [0] : vector<122x32xf32> to vector<32xf32>
    %211 = vector.shape_cast %210 : vector<32xf32> to vector<1x32xf32>
    %212 = arith.addf %188, %211 : vector<1x32xf32>
    %213 = arith.mulf %208, %208 : vector<122x32xf32>
    %cst_119 = arith.constant dense<0.000000e+00> : vector<32xf32>
    %214 = vector.multi_reduction <add>, %213, %cst_119 [0] : vector<122x32xf32> to vector<32xf32>
    %215 = vector.shape_cast %214 : vector<32xf32> to vector<1x32xf32>
    %216 = arith.addf %192, %215 : vector<1x32xf32>
    %cst_120 = arith.constant 0.00409836043 : f32
    %217 = vector.broadcast %cst_120 : f32 to vector<1x32xf32>
    %218 = arith.mulf %212, %217 : vector<1x32xf32>
    %cst_121 = arith.constant 0.00409836043 : f32
    %219 = vector.broadcast %cst_121 : f32 to vector<1x32xf32>
    %220 = arith.mulf %216, %219 : vector<1x32xf32>
    %221 = arith.mulf %218, %218 : vector<1x32xf32>
    %222 = arith.subf %220, %221 : vector<1x32xf32>
    %cst_122 = arith.constant 9.99999974E-6 : f32
    %223 = vector.broadcast %cst_122 : f32 to vector<1x32xf32>
    %224 = arith.addf %222, %223 : vector<1x32xf32>
    %225 = math.rsqrt %224 : vector<1x32xf32>
    %c0_123 = arith.constant 0 : index
    %c0_124 = arith.constant 0 : index
    %226 = vector.load %arg7[%c0_123, %c0_124] : memref<1x32xf32, #tpu.memory_space<vmem>>, vector<1x32xf32>
    %227 = arith.mulf %225, %226 : vector<1x32xf32>
    %c0_125 = arith.constant 0 : index
    %c0_126 = arith.constant 0 : index
    %228 = vector.load %arg8[%c0_125, %c0_126] : memref<1x32xf32, #tpu.memory_space<vmem>>, vector<1x32xf32>
    %229 = arith.mulf %218, %227 : vector<1x32xf32>
    %230 = arith.subf %228, %229 : vector<1x32xf32>
    %c0_127 = arith.constant 0 : index
    %c0_128 = arith.constant 0 : index
    %231 = tpu.strided_load %arg22[%c0_127, %c0_128] {strides = array<i32: 4, 1>} : memref<244x32xf32, #tpu.memory_space<vmem>>, vector<30x32xf32>
    %232 = vector.broadcast %227 : vector<1x32xf32> to vector<30x32xf32>
    %233 = arith.mulf %231, %232 : vector<30x32xf32>
    %234 = vector.broadcast %230 : vector<1x32xf32> to vector<30x32xf32>
    %235 = arith.addf %233, %234 : vector<30x32xf32>
    %c1_129 = arith.constant 1 : index
    %c0_130 = arith.constant 0 : index
    %236 = tpu.strided_load %arg22[%c1_129, %c0_130] {strides = array<i32: 4, 1>} : memref<244x32xf32, #tpu.memory_space<vmem>>, vector<30x32xf32>
    %237 = vector.broadcast %227 : vector<1x32xf32> to vector<30x32xf32>
    %238 = arith.mulf %236, %237 : vector<30x32xf32>
    %239 = vector.broadcast %230 : vector<1x32xf32> to vector<30x32xf32>
    %240 = arith.addf %238, %239 : vector<30x32xf32>
    %241 = arith.maximumf %235, %240 : vector<30x32xf32>
    %c2_131 = arith.constant 2 : index
    %c0_132 = arith.constant 0 : index
    %242 = tpu.strided_load %arg22[%c2_131, %c0_132] {strides = array<i32: 4, 1>} : memref<244x32xf32, #tpu.memory_space<vmem>>, vector<30x32xf32>
    %243 = vector.broadcast %227 : vector<1x32xf32> to vector<30x32xf32>
    %244 = arith.mulf %242, %243 : vector<30x32xf32>
    %245 = vector.broadcast %230 : vector<1x32xf32> to vector<30x32xf32>
    %246 = arith.addf %244, %245 : vector<30x32xf32>
    %247 = arith.maximumf %241, %246 : vector<30x32xf32>
    %c3_133 = arith.constant 3 : index
    %c0_134 = arith.constant 0 : index
    %248 = tpu.strided_load %arg22[%c3_133, %c0_134] {strides = array<i32: 4, 1>} : memref<244x32xf32, #tpu.memory_space<vmem>>, vector<30x32xf32>
    %249 = vector.broadcast %227 : vector<1x32xf32> to vector<30x32xf32>
    %250 = arith.mulf %248, %249 : vector<30x32xf32>
    %251 = vector.broadcast %230 : vector<1x32xf32> to vector<30x32xf32>
    %252 = arith.addf %250, %251 : vector<30x32xf32>
    %253 = arith.maximumf %247, %252 : vector<30x32xf32>
    %cst_135 = arith.constant 0.000000e+00 : f32
    %254 = vector.broadcast %cst_135 : f32 to vector<30x32xf32>
    %255 = arith.maximumf %253, %254 : vector<30x32xf32>
    %c0_136 = arith.constant 0 : index
    %c0_137 = arith.constant 0 : index
    %256 = vector.load %arg23[%c0_136, %c0_137] : memref<60x32xf32, #tpu.memory_space<vmem>>, vector<30x32xf32>
    tpu.vector_store %arg23[%c0_136, %c0_137], %255 {strides = array<i32>} : memref<60x32xf32, #tpu.memory_space<vmem>>, vector<30x32xf32>,
    %c122_138 = arith.constant 122 : index
    %c0_139 = arith.constant 0 : index
    %257 = tpu.strided_load %arg22[%c122_138, %c0_139] {strides = array<i32: 4, 1>} : memref<244x32xf32, #tpu.memory_space<vmem>>, vector<30x32xf32>
    %258 = vector.broadcast %227 : vector<1x32xf32> to vector<30x32xf32>
    %259 = arith.mulf %257, %258 : vector<30x32xf32>
    %260 = vector.broadcast %230 : vector<1x32xf32> to vector<30x32xf32>
    %261 = arith.addf %259, %260 : vector<30x32xf32>
    %c123 = arith.constant 123 : index
    %c0_140 = arith.constant 0 : index
    %262 = tpu.strided_load %arg22[%c123, %c0_140] {strides = array<i32: 4, 1>} : memref<244x32xf32, #tpu.memory_space<vmem>>, vector<30x32xf32>
    %263 = vector.broadcast %227 : vector<1x32xf32> to vector<30x32xf32>
    %264 = arith.mulf %262, %263 : vector<30x32xf32>
    %265 = vector.broadcast %230 : vector<1x32xf32> to vector<30x32xf32>
    %266 = arith.addf %264, %265 : vector<30x32xf32>
    %267 = arith.maximumf %261, %266 : vector<30x32xf32>
    %c124_141 = arith.constant 124 : index
    %c0_142 = arith.constant 0 : index
    %268 = tpu.strided_load %arg22[%c124_141, %c0_142] {strides = array<i32: 4, 1>} : memref<244x32xf32, #tpu.memory_space<vmem>>, vector<30x32xf32>
    %269 = vector.broadcast %227 : vector<1x32xf32> to vector<30x32xf32>
    %270 = arith.mulf %268, %269 : vector<30x32xf32>
    %271 = vector.broadcast %230 : vector<1x32xf32> to vector<30x32xf32>
    %272 = arith.addf %270, %271 : vector<30x32xf32>
    %273 = arith.maximumf %267, %272 : vector<30x32xf32>
    %c125_143 = arith.constant 125 : index
    %c0_144 = arith.constant 0 : index
    %274 = tpu.strided_load %arg22[%c125_143, %c0_144] {strides = array<i32: 4, 1>} : memref<244x32xf32, #tpu.memory_space<vmem>>, vector<30x32xf32>
    %275 = vector.broadcast %227 : vector<1x32xf32> to vector<30x32xf32>
    %276 = arith.mulf %274, %275 : vector<30x32xf32>
    %277 = vector.broadcast %230 : vector<1x32xf32> to vector<30x32xf32>
    %278 = arith.addf %276, %277 : vector<30x32xf32>
    %279 = arith.maximumf %273, %278 : vector<30x32xf32>
    %cst_145 = arith.constant 0.000000e+00 : f32
    %280 = vector.broadcast %cst_145 : f32 to vector<30x32xf32>
    %281 = arith.maximumf %279, %280 : vector<30x32xf32>
    %c30 = arith.constant 30 : index
    %c0_146 = arith.constant 0 : index
    %282 = vector.load %arg23[%c30, %c0_146] : memref<60x32xf32, #tpu.memory_space<vmem>>, vector<30x32xf32>
    tpu.vector_store %arg23[%c30, %c0_146], %281 {strides = array<i32>} : memref<60x32xf32, #tpu.memory_space<vmem>>, vector<30x32xf32>,
    %c0_147 = arith.constant 0 : index
    %c0_148 = arith.constant 0 : index
    %283 = vector.load %arg10[%c0_147, %c0_148] : memref<1x64xf32, #tpu.memory_space<vmem>>, vector<1x64xf32>
    %cst_149 = arith.constant 0.000000e+00 : f32
    %284 = vector.broadcast %cst_149 : f32 to vector<1x64xf32>
    %cst_150 = arith.constant 0.000000e+00 : f32
    %285 = vector.broadcast %cst_150 : f32 to vector<1x64xf32>
    %c0_151 = arith.constant 0 : index
    %c0_152 = arith.constant 0 : index
    %286 = vector.load %arg23[%c0_151, %c0_152] : memref<60x32xf32, #tpu.memory_space<vmem>>, vector<28x32xf32>
    %c0_153 = arith.constant 0 : index
    %c0_154 = arith.constant 0 : index
    %c0_155 = arith.constant 0 : index
    %287 = vector.load %arg9[%c0_153, %c0_154, %c0_155] : memref<3x32x64xf32, #tpu.memory_space<vmem>>, vector<1x32x64xf32>
    %288 = vector.shape_cast %287 : vector<1x32x64xf32> to vector<32x64xf32>
    %cst_156 = arith.constant dense<0.000000e+00> : vector<28x64xf32>
    %289 = tpu.matmul %286, %288, %cst_156 {dimension_numbers = #tpu.dot_dimension_numbers<[1], [0], [0], [1], [0, 0, 1, 1], [], []>} : vector<28x32xf32>, vector<32x64xf32>, vector<28x64xf32> -> vector<28x64xf32>
    %c1_157 = arith.constant 1 : index
    %c0_158 = arith.constant 0 : index
    %290 = vector.load %arg23[%c1_157, %c0_158] : memref<60x32xf32, #tpu.memory_space<vmem>>, vector<28x32xf32>
    %c1_159 = arith.constant 1 : index
    %c0_160 = arith.constant 0 : index
    %c0_161 = arith.constant 0 : index
    %291 = vector.load %arg9[%c1_159, %c0_160, %c0_161] : memref<3x32x64xf32, #tpu.memory_space<vmem>>, vector<1x32x64xf32>
    %292 = vector.shape_cast %291 : vector<1x32x64xf32> to vector<32x64xf32>
    %cst_162 = arith.constant dense<0.000000e+00> : vector<28x64xf32>
    %293 = tpu.matmul %290, %292, %cst_162 {dimension_numbers = #tpu.dot_dimension_numbers<[1], [0], [0], [1], [0, 0, 1, 1], [], []>} : vector<28x32xf32>, vector<32x64xf32>, vector<28x64xf32> -> vector<28x64xf32>
    %294 = arith.addf %289, %293 : vector<28x64xf32>
    %c2_163 = arith.constant 2 : index
    %c0_164 = arith.constant 0 : index
    %295 = vector.load %arg23[%c2_163, %c0_164] : memref<60x32xf32, #tpu.memory_space<vmem>>, vector<28x32xf32>
    %c2_165 = arith.constant 2 : index
    %c0_166 = arith.constant 0 : index
    %c0_167 = arith.constant 0 : index
    %296 = vector.load %arg9[%c2_165, %c0_166, %c0_167] : memref<3x32x64xf32, #tpu.memory_space<vmem>>, vector<1x32x64xf32>
    %297 = vector.shape_cast %296 : vector<1x32x64xf32> to vector<32x64xf32>
    %cst_168 = arith.constant dense<0.000000e+00> : vector<28x64xf32>
    %298 = tpu.matmul %295, %297, %cst_168 {dimension_numbers = #tpu.dot_dimension_numbers<[1], [0], [0], [1], [0, 0, 1, 1], [], []>} : vector<28x32xf32>, vector<32x64xf32>, vector<28x64xf32> -> vector<28x64xf32>
    %299 = arith.addf %294, %298 : vector<28x64xf32>
    %300 = vector.broadcast %283 : vector<1x64xf32> to vector<28x64xf32>
    %301 = arith.addf %299, %300 : vector<28x64xf32>
    %c0_169 = arith.constant 0 : index
    %c0_170 = arith.constant 0 : index
    %302 = vector.load %arg24[%c0_169, %c0_170] : memref<56x64xf32, #tpu.memory_space<vmem>>, vector<28x64xf32>
    tpu.vector_store %arg24[%c0_169, %c0_170], %301 {strides = array<i32>} : memref<56x64xf32, #tpu.memory_space<vmem>>, vector<28x64xf32>,
    %cst_171 = arith.constant dense<0.000000e+00> : vector<64xf32>
    %303 = vector.multi_reduction <add>, %301, %cst_171 [0] : vector<28x64xf32> to vector<64xf32>
    %304 = vector.shape_cast %303 : vector<64xf32> to vector<1x64xf32>
    %305 = arith.addf %284, %304 : vector<1x64xf32>
    %306 = arith.mulf %301, %301 : vector<28x64xf32>
    %cst_172 = arith.constant dense<0.000000e+00> : vector<64xf32>
    %307 = vector.multi_reduction <add>, %306, %cst_172 [0] : vector<28x64xf32> to vector<64xf32>
    %308 = vector.shape_cast %307 : vector<64xf32> to vector<1x64xf32>
    %309 = arith.addf %285, %308 : vector<1x64xf32>
    %c30_173 = arith.constant 30 : index
    %c0_174 = arith.constant 0 : index
    %310 = vector.load %arg23[%c30_173, %c0_174] : memref<60x32xf32, #tpu.memory_space<vmem>>, vector<28x32xf32>
    %c0_175 = arith.constant 0 : index
    %c0_176 = arith.constant 0 : index
    %c0_177 = arith.constant 0 : index
    %311 = vector.load %arg9[%c0_175, %c0_176, %c0_177] : memref<3x32x64xf32, #tpu.memory_space<vmem>>, vector<1x32x64xf32>
    %312 = vector.shape_cast %311 : vector<1x32x64xf32> to vector<32x64xf32>
    %cst_178 = arith.constant dense<0.000000e+00> : vector<28x64xf32>
    %313 = tpu.matmul %310, %312, %cst_178 {dimension_numbers = #tpu.dot_dimension_numbers<[1], [0], [0], [1], [0, 0, 1, 1], [], []>} : vector<28x32xf32>, vector<32x64xf32>, vector<28x64xf32> -> vector<28x64xf32>
    %c31 = arith.constant 31 : index
    %c0_179 = arith.constant 0 : index
    %314 = vector.load %arg23[%c31, %c0_179] : memref<60x32xf32, #tpu.memory_space<vmem>>, vector<28x32xf32>
    %c1_180 = arith.constant 1 : index
    %c0_181 = arith.constant 0 : index
    %c0_182 = arith.constant 0 : index
    %315 = vector.load %arg9[%c1_180, %c0_181, %c0_182] : memref<3x32x64xf32, #tpu.memory_space<vmem>>, vector<1x32x64xf32>
    %316 = vector.shape_cast %315 : vector<1x32x64xf32> to vector<32x64xf32>
    %cst_183 = arith.constant dense<0.000000e+00> : vector<28x64xf32>
    %317 = tpu.matmul %314, %316, %cst_183 {dimension_numbers = #tpu.dot_dimension_numbers<[1], [0], [0], [1], [0, 0, 1, 1], [], []>} : vector<28x32xf32>, vector<32x64xf32>, vector<28x64xf32> -> vector<28x64xf32>
    %318 = arith.addf %313, %317 : vector<28x64xf32>
    %c32 = arith.constant 32 : index
    %c0_184 = arith.constant 0 : index
    %319 = vector.load %arg23[%c32, %c0_184] : memref<60x32xf32, #tpu.memory_space<vmem>>, vector<28x32xf32>
    %c2_185 = arith.constant 2 : index
    %c0_186 = arith.constant 0 : index
    %c0_187 = arith.constant 0 : index
    %320 = vector.load %arg9[%c2_185, %c0_186, %c0_187] : memref<3x32x64xf32, #tpu.memory_space<vmem>>, vector<1x32x64xf32>
    %321 = vector.shape_cast %320 : vector<1x32x64xf32> to vector<32x64xf32>
    %cst_188 = arith.constant dense<0.000000e+00> : vector<28x64xf32>
    %322 = tpu.matmul %319, %321, %cst_188 {dimension_numbers = #tpu.dot_dimension_numbers<[1], [0], [0], [1], [0, 0, 1, 1], [], []>} : vector<28x32xf32>, vector<32x64xf32>, vector<28x64xf32> -> vector<28x64xf32>
    %323 = arith.addf %318, %322 : vector<28x64xf32>
    %324 = vector.broadcast %283 : vector<1x64xf32> to vector<28x64xf32>
    %325 = arith.addf %323, %324 : vector<28x64xf32>
    %c28 = arith.constant 28 : index
    %c0_189 = arith.constant 0 : index
    %326 = vector.load %arg24[%c28, %c0_189] : memref<56x64xf32, #tpu.memory_space<vmem>>, vector<28x64xf32>
    tpu.vector_store %arg24[%c28, %c0_189], %325 {strides = array<i32>} : memref<56x64xf32, #tpu.memory_space<vmem>>, vector<28x64xf32>,
    %cst_190 = arith.constant dense<0.000000e+00> : vector<64xf32>
    %327 = vector.multi_reduction <add>, %325, %cst_190 [0] : vector<28x64xf32> to vector<64xf32>
    %328 = vector.shape_cast %327 : vector<64xf32> to vector<1x64xf32>
    %329 = arith.addf %305, %328 : vector<1x64xf32>
    %330 = arith.mulf %325, %325 : vector<28x64xf32>
    %cst_191 = arith.constant dense<0.000000e+00> : vector<64xf32>
    %331 = vector.multi_reduction <add>, %330, %cst_191 [0] : vector<28x64xf32> to vector<64xf32>
    %332 = vector.shape_cast %331 : vector<64xf32> to vector<1x64xf32>
    %333 = arith.addf %309, %332 : vector<1x64xf32>
    %cst_192 = arith.constant 0.0178571437 : f32
    %334 = vector.broadcast %cst_192 : f32 to vector<1x64xf32>
    %335 = arith.mulf %329, %334 : vector<1x64xf32>
    %cst_193 = arith.constant 0.0178571437 : f32
    %336 = vector.broadcast %cst_193 : f32 to vector<1x64xf32>
    %337 = arith.mulf %333, %336 : vector<1x64xf32>
    %338 = arith.mulf %335, %335 : vector<1x64xf32>
    %339 = arith.subf %337, %338 : vector<1x64xf32>
    %cst_194 = arith.constant 9.99999974E-6 : f32
    %340 = vector.broadcast %cst_194 : f32 to vector<1x64xf32>
    %341 = arith.addf %339, %340 : vector<1x64xf32>
    %342 = math.rsqrt %341 : vector<1x64xf32>
    %c0_195 = arith.constant 0 : index
    %c0_196 = arith.constant 0 : index
    %343 = vector.load %arg11[%c0_195, %c0_196] : memref<1x64xf32, #tpu.memory_space<vmem>>, vector<1x64xf32>
    %344 = arith.mulf %342, %343 : vector<1x64xf32>
    %c0_197 = arith.constant 0 : index
    %c0_198 = arith.constant 0 : index
    %345 = vector.load %arg12[%c0_197, %c0_198] : memref<1x64xf32, #tpu.memory_space<vmem>>, vector<1x64xf32>
    %346 = arith.mulf %335, %344 : vector<1x64xf32>
    %347 = arith.subf %345, %346 : vector<1x64xf32>
    %c0_199 = arith.constant 0 : index
    %c0_200 = arith.constant 0 : index
    %348 = tpu.strided_load %arg24[%c0_199, %c0_200] {strides = array<i32: 4, 1>} : memref<56x64xf32, #tpu.memory_space<vmem>>, vector<7x64xf32>
    %349 = vector.broadcast %344 : vector<1x64xf32> to vector<7x64xf32>
    %350 = arith.mulf %348, %349 : vector<7x64xf32>
    %351 = vector.broadcast %347 : vector<1x64xf32> to vector<7x64xf32>
    %352 = arith.addf %350, %351 : vector<7x64xf32>
    %c1_201 = arith.constant 1 : index
    %c0_202 = arith.constant 0 : index
    %353 = tpu.strided_load %arg24[%c1_201, %c0_202] {strides = array<i32: 4, 1>} : memref<56x64xf32, #tpu.memory_space<vmem>>, vector<7x64xf32>
    %354 = vector.broadcast %344 : vector<1x64xf32> to vector<7x64xf32>
    %355 = arith.mulf %353, %354 : vector<7x64xf32>
    %356 = vector.broadcast %347 : vector<1x64xf32> to vector<7x64xf32>
    %357 = arith.addf %355, %356 : vector<7x64xf32>
    %358 = arith.maximumf %352, %357 : vector<7x64xf32>
    %c2_203 = arith.constant 2 : index
    %c0_204 = arith.constant 0 : index
    %359 = tpu.strided_load %arg24[%c2_203, %c0_204] {strides = array<i32: 4, 1>} : memref<56x64xf32, #tpu.memory_space<vmem>>, vector<7x64xf32>
    %360 = vector.broadcast %344 : vector<1x64xf32> to vector<7x64xf32>
    %361 = arith.mulf %359, %360 : vector<7x64xf32>
    %362 = vector.broadcast %347 : vector<1x64xf32> to vector<7x64xf32>
    %363 = arith.addf %361, %362 : vector<7x64xf32>
    %364 = arith.maximumf %358, %363 : vector<7x64xf32>
    %c3_205 = arith.constant 3 : index
    %c0_206 = arith.constant 0 : index
    %365 = tpu.strided_load %arg24[%c3_205, %c0_206] {strides = array<i32: 4, 1>} : memref<56x64xf32, #tpu.memory_space<vmem>>, vector<7x64xf32>
    %366 = vector.broadcast %344 : vector<1x64xf32> to vector<7x64xf32>
    %367 = arith.mulf %365, %366 : vector<7x64xf32>
    %368 = vector.broadcast %347 : vector<1x64xf32> to vector<7x64xf32>
    %369 = arith.addf %367, %368 : vector<7x64xf32>
    %370 = arith.maximumf %364, %369 : vector<7x64xf32>
    %cst_207 = arith.constant 0.000000e+00 : f32
    %371 = vector.broadcast %cst_207 : f32 to vector<7x64xf32>
    %372 = arith.maximumf %370, %371 : vector<7x64xf32>
    %c0_208 = arith.constant 0 : index
    %c0_209 = arith.constant 0 : index
    %373 = vector.load %arg25[%c0_208, %c0_209] : memref<14x64xf32, #tpu.memory_space<vmem>>, vector<7x64xf32>
    tpu.vector_store %arg25[%c0_208, %c0_209], %372 {strides = array<i32>} : memref<14x64xf32, #tpu.memory_space<vmem>>, vector<7x64xf32>,
    %c28_210 = arith.constant 28 : index
    %c0_211 = arith.constant 0 : index
    %374 = tpu.strided_load %arg24[%c28_210, %c0_211] {strides = array<i32: 4, 1>} : memref<56x64xf32, #tpu.memory_space<vmem>>, vector<7x64xf32>
    %375 = vector.broadcast %344 : vector<1x64xf32> to vector<7x64xf32>
    %376 = arith.mulf %374, %375 : vector<7x64xf32>
    %377 = vector.broadcast %347 : vector<1x64xf32> to vector<7x64xf32>
    %378 = arith.addf %376, %377 : vector<7x64xf32>
    %c29 = arith.constant 29 : index
    %c0_212 = arith.constant 0 : index
    %379 = tpu.strided_load %arg24[%c29, %c0_212] {strides = array<i32: 4, 1>} : memref<56x64xf32, #tpu.memory_space<vmem>>, vector<7x64xf32>
    %380 = vector.broadcast %344 : vector<1x64xf32> to vector<7x64xf32>
    %381 = arith.mulf %379, %380 : vector<7x64xf32>
    %382 = vector.broadcast %347 : vector<1x64xf32> to vector<7x64xf32>
    %383 = arith.addf %381, %382 : vector<7x64xf32>
    %384 = arith.maximumf %378, %383 : vector<7x64xf32>
    %c30_213 = arith.constant 30 : index
    %c0_214 = arith.constant 0 : index
    %385 = tpu.strided_load %arg24[%c30_213, %c0_214] {strides = array<i32: 4, 1>} : memref<56x64xf32, #tpu.memory_space<vmem>>, vector<7x64xf32>
    %386 = vector.broadcast %344 : vector<1x64xf32> to vector<7x64xf32>
    %387 = arith.mulf %385, %386 : vector<7x64xf32>
    %388 = vector.broadcast %347 : vector<1x64xf32> to vector<7x64xf32>
    %389 = arith.addf %387, %388 : vector<7x64xf32>
    %390 = arith.maximumf %384, %389 : vector<7x64xf32>
    %c31_215 = arith.constant 31 : index
    %c0_216 = arith.constant 0 : index
    %391 = tpu.strided_load %arg24[%c31_215, %c0_216] {strides = array<i32: 4, 1>} : memref<56x64xf32, #tpu.memory_space<vmem>>, vector<7x64xf32>
    %392 = vector.broadcast %344 : vector<1x64xf32> to vector<7x64xf32>
    %393 = arith.mulf %391, %392 : vector<7x64xf32>
    %394 = vector.broadcast %347 : vector<1x64xf32> to vector<7x64xf32>
    %395 = arith.addf %393, %394 : vector<7x64xf32>
    %396 = arith.maximumf %390, %395 : vector<7x64xf32>
    %cst_217 = arith.constant 0.000000e+00 : f32
    %397 = vector.broadcast %cst_217 : f32 to vector<7x64xf32>
    %398 = arith.maximumf %396, %397 : vector<7x64xf32>
    %c7 = arith.constant 7 : index
    %c0_218 = arith.constant 0 : index
    %399 = vector.load %arg25[%c7, %c0_218] : memref<14x64xf32, #tpu.memory_space<vmem>>, vector<7x64xf32>
    tpu.vector_store %arg25[%c7, %c0_218], %398 {strides = array<i32>} : memref<14x64xf32, #tpu.memory_space<vmem>>, vector<7x64xf32>,
    %c0_219 = arith.constant 0 : index
    %c0_220 = arith.constant 0 : index
    %400 = vector.load %arg14[%c0_219, %c0_220] : memref<1x64xf32, #tpu.memory_space<vmem>>, vector<1x64xf32>
    %cst_221 = arith.constant 0.000000e+00 : f32
    %401 = vector.broadcast %cst_221 : f32 to vector<1x64xf32>
    %cst_222 = arith.constant 0.000000e+00 : f32
    %402 = vector.broadcast %cst_222 : f32 to vector<1x64xf32>
    %c0_223 = arith.constant 0 : index
    %c0_224 = arith.constant 0 : index
    %403 = vector.load %arg25[%c0_223, %c0_224] : memref<14x64xf32, #tpu.memory_space<vmem>>, vector<5x64xf32>
    %c0_225 = arith.constant 0 : index
    %c0_226 = arith.constant 0 : index
    %c0_227 = arith.constant 0 : index
    %404 = vector.load %arg13[%c0_225, %c0_226, %c0_227] : memref<3x64x64xf32, #tpu.memory_space<vmem>>, vector<1x64x64xf32>
    %405 = vector.shape_cast %404 : vector<1x64x64xf32> to vector<64x64xf32>
    %cst_228 = arith.constant dense<0.000000e+00> : vector<5x64xf32>
    %406 = tpu.matmul %403, %405, %cst_228 {dimension_numbers = #tpu.dot_dimension_numbers<[1], [0], [0], [1], [0, 0, 1, 1], [], []>} : vector<5x64xf32>, vector<64x64xf32>, vector<5x64xf32> -> vector<5x64xf32>
    %c1_229 = arith.constant 1 : index
    %c0_230 = arith.constant 0 : index
    %407 = vector.load %arg25[%c1_229, %c0_230] : memref<14x64xf32, #tpu.memory_space<vmem>>, vector<5x64xf32>
    %c1_231 = arith.constant 1 : index
    %c0_232 = arith.constant 0 : index
    %c0_233 = arith.constant 0 : index
    %408 = vector.load %arg13[%c1_231, %c0_232, %c0_233] : memref<3x64x64xf32, #tpu.memory_space<vmem>>, vector<1x64x64xf32>
    %409 = vector.shape_cast %408 : vector<1x64x64xf32> to vector<64x64xf32>
    %cst_234 = arith.constant dense<0.000000e+00> : vector<5x64xf32>
    %410 = tpu.matmul %407, %409, %cst_234 {dimension_numbers = #tpu.dot_dimension_numbers<[1], [0], [0], [1], [0, 0, 1, 1], [], []>} : vector<5x64xf32>, vector<64x64xf32>, vector<5x64xf32> -> vector<5x64xf32>
    %411 = arith.addf %406, %410 : vector<5x64xf32>
    %c2_235 = arith.constant 2 : index
    %c0_236 = arith.constant 0 : index
    %412 = vector.load %arg25[%c2_235, %c0_236] : memref<14x64xf32, #tpu.memory_space<vmem>>, vector<5x64xf32>
    %c2_237 = arith.constant 2 : index
    %c0_238 = arith.constant 0 : index
    %c0_239 = arith.constant 0 : index
    %413 = vector.load %arg13[%c2_237, %c0_238, %c0_239] : memref<3x64x64xf32, #tpu.memory_space<vmem>>, vector<1x64x64xf32>
    %414 = vector.shape_cast %413 : vector<1x64x64xf32> to vector<64x64xf32>
    %cst_240 = arith.constant dense<0.000000e+00> : vector<5x64xf32>
    %415 = tpu.matmul %412, %414, %cst_240 {dimension_numbers = #tpu.dot_dimension_numbers<[1], [0], [0], [1], [0, 0, 1, 1], [], []>} : vector<5x64xf32>, vector<64x64xf32>, vector<5x64xf32> -> vector<5x64xf32>
    %416 = arith.addf %411, %415 : vector<5x64xf32>
    %417 = vector.broadcast %400 : vector<1x64xf32> to vector<5x64xf32>
    %418 = arith.addf %416, %417 : vector<5x64xf32>
    %c0_241 = arith.constant 0 : index
    %c0_242 = arith.constant 0 : index
    %419 = vector.load %arg26[%c0_241, %c0_242] : memref<10x64xf32, #tpu.memory_space<vmem>>, vector<5x64xf32>
    tpu.vector_store %arg26[%c0_241, %c0_242], %418 {strides = array<i32>} : memref<10x64xf32, #tpu.memory_space<vmem>>, vector<5x64xf32>,
    %cst_243 = arith.constant dense<0.000000e+00> : vector<64xf32>
    %420 = vector.multi_reduction <add>, %418, %cst_243 [0] : vector<5x64xf32> to vector<64xf32>
    %421 = vector.shape_cast %420 : vector<64xf32> to vector<1x64xf32>
    %422 = arith.addf %401, %421 : vector<1x64xf32>
    %423 = arith.mulf %418, %418 : vector<5x64xf32>
    %cst_244 = arith.constant dense<0.000000e+00> : vector<64xf32>
    %424 = vector.multi_reduction <add>, %423, %cst_244 [0] : vector<5x64xf32> to vector<64xf32>
    %425 = vector.shape_cast %424 : vector<64xf32> to vector<1x64xf32>
    %426 = arith.addf %402, %425 : vector<1x64xf32>
    %c7_245 = arith.constant 7 : index
    %c0_246 = arith.constant 0 : index
    %427 = vector.load %arg25[%c7_245, %c0_246] : memref<14x64xf32, #tpu.memory_space<vmem>>, vector<5x64xf32>
    %c0_247 = arith.constant 0 : index
    %c0_248 = arith.constant 0 : index
    %c0_249 = arith.constant 0 : index
    %428 = vector.load %arg13[%c0_247, %c0_248, %c0_249] : memref<3x64x64xf32, #tpu.memory_space<vmem>>, vector<1x64x64xf32>
    %429 = vector.shape_cast %428 : vector<1x64x64xf32> to vector<64x64xf32>
    %cst_250 = arith.constant dense<0.000000e+00> : vector<5x64xf32>
    %430 = tpu.matmul %427, %429, %cst_250 {dimension_numbers = #tpu.dot_dimension_numbers<[1], [0], [0], [1], [0, 0, 1, 1], [], []>} : vector<5x64xf32>, vector<64x64xf32>, vector<5x64xf32> -> vector<5x64xf32>
    %c8 = arith.constant 8 : index
    %c0_251 = arith.constant 0 : index
    %431 = vector.load %arg25[%c8, %c0_251] : memref<14x64xf32, #tpu.memory_space<vmem>>, vector<5x64xf32>
    %c1_252 = arith.constant 1 : index
    %c0_253 = arith.constant 0 : index
    %c0_254 = arith.constant 0 : index
    %432 = vector.load %arg13[%c1_252, %c0_253, %c0_254] : memref<3x64x64xf32, #tpu.memory_space<vmem>>, vector<1x64x64xf32>
    %433 = vector.shape_cast %432 : vector<1x64x64xf32> to vector<64x64xf32>
    %cst_255 = arith.constant dense<0.000000e+00> : vector<5x64xf32>
    %434 = tpu.matmul %431, %433, %cst_255 {dimension_numbers = #tpu.dot_dimension_numbers<[1], [0], [0], [1], [0, 0, 1, 1], [], []>} : vector<5x64xf32>, vector<64x64xf32>, vector<5x64xf32> -> vector<5x64xf32>
    %435 = arith.addf %430, %434 : vector<5x64xf32>
    %c9 = arith.constant 9 : index
    %c0_256 = arith.constant 0 : index
    %436 = vector.load %arg25[%c9, %c0_256] : memref<14x64xf32, #tpu.memory_space<vmem>>, vector<5x64xf32>
    %c2_257 = arith.constant 2 : index
    %c0_258 = arith.constant 0 : index
    %c0_259 = arith.constant 0 : index
    %437 = vector.load %arg13[%c2_257, %c0_258, %c0_259] : memref<3x64x64xf32, #tpu.memory_space<vmem>>, vector<1x64x64xf32>
    %438 = vector.shape_cast %437 : vector<1x64x64xf32> to vector<64x64xf32>
    %cst_260 = arith.constant dense<0.000000e+00> : vector<5x64xf32>
    %439 = tpu.matmul %436, %438, %cst_260 {dimension_numbers = #tpu.dot_dimension_numbers<[1], [0], [0], [1], [0, 0, 1, 1], [], []>} : vector<5x64xf32>, vector<64x64xf32>, vector<5x64xf32> -> vector<5x64xf32>
    %440 = arith.addf %435, %439 : vector<5x64xf32>
    %441 = vector.broadcast %400 : vector<1x64xf32> to vector<5x64xf32>
    %442 = arith.addf %440, %441 : vector<5x64xf32>
    %c5 = arith.constant 5 : index
    %c0_261 = arith.constant 0 : index
    %443 = vector.load %arg26[%c5, %c0_261] : memref<10x64xf32, #tpu.memory_space<vmem>>, vector<5x64xf32>
    tpu.vector_store %arg26[%c5, %c0_261], %442 {strides = array<i32>} : memref<10x64xf32, #tpu.memory_space<vmem>>, vector<5x64xf32>,
    %cst_262 = arith.constant dense<0.000000e+00> : vector<64xf32>
    %444 = vector.multi_reduction <add>, %442, %cst_262 [0] : vector<5x64xf32> to vector<64xf32>
    %445 = vector.shape_cast %444 : vector<64xf32> to vector<1x64xf32>
    %446 = arith.addf %422, %445 : vector<1x64xf32>
    %447 = arith.mulf %442, %442 : vector<5x64xf32>
    %cst_263 = arith.constant dense<0.000000e+00> : vector<64xf32>
    %448 = vector.multi_reduction <add>, %447, %cst_263 [0] : vector<5x64xf32> to vector<64xf32>
    %449 = vector.shape_cast %448 : vector<64xf32> to vector<1x64xf32>
    %450 = arith.addf %426, %449 : vector<1x64xf32>
    %cst_264 = arith.constant 1.000000e-01 : f32
    %451 = vector.broadcast %cst_264 : f32 to vector<1x64xf32>
    %452 = arith.mulf %446, %451 : vector<1x64xf32>
    %cst_265 = arith.constant 1.000000e-01 : f32
    %453 = vector.broadcast %cst_265 : f32 to vector<1x64xf32>
    %454 = arith.mulf %450, %453 : vector<1x64xf32>
    %455 = arith.mulf %452, %452 : vector<1x64xf32>
    %456 = arith.subf %454, %455 : vector<1x64xf32>
    %cst_266 = arith.constant 9.99999974E-6 : f32
    %457 = vector.broadcast %cst_266 : f32 to vector<1x64xf32>
    %458 = arith.addf %456, %457 : vector<1x64xf32>
    %459 = math.rsqrt %458 : vector<1x64xf32>
    %c0_267 = arith.constant 0 : index
    %c0_268 = arith.constant 0 : index
    %460 = vector.load %arg15[%c0_267, %c0_268] : memref<1x64xf32, #tpu.memory_space<vmem>>, vector<1x64xf32>
    %461 = arith.mulf %459, %460 : vector<1x64xf32>
    %c0_269 = arith.constant 0 : index
    %c0_270 = arith.constant 0 : index
    %462 = vector.load %arg16[%c0_269, %c0_270] : memref<1x64xf32, #tpu.memory_space<vmem>>, vector<1x64xf32>
    %463 = arith.mulf %452, %461 : vector<1x64xf32>
    %464 = arith.subf %462, %463 : vector<1x64xf32>
    %c0_271 = arith.constant 0 : index
    %c0_272 = arith.constant 0 : index
    %465 = tpu.strided_load %arg26[%c0_271, %c0_272] {strides = array<i32: 4, 1>} : memref<10x64xf32, #tpu.memory_space<vmem>>, vector<1x64xf32>
    %466 = arith.mulf %465, %461 : vector<1x64xf32>
    %467 = arith.addf %466, %464 : vector<1x64xf32>
    %c1_273 = arith.constant 1 : index
    %c0_274 = arith.constant 0 : index
    %468 = tpu.strided_load %arg26[%c1_273, %c0_274] {strides = array<i32: 4, 1>} : memref<10x64xf32, #tpu.memory_space<vmem>>, vector<1x64xf32>
    %469 = arith.mulf %468, %461 : vector<1x64xf32>
    %470 = arith.addf %469, %464 : vector<1x64xf32>
    %471 = arith.maximumf %467, %470 : vector<1x64xf32>
    %c2_275 = arith.constant 2 : index
    %c0_276 = arith.constant 0 : index
    %472 = tpu.strided_load %arg26[%c2_275, %c0_276] {strides = array<i32: 4, 1>} : memref<10x64xf32, #tpu.memory_space<vmem>>, vector<1x64xf32>
    %473 = arith.mulf %472, %461 : vector<1x64xf32>
    %474 = arith.addf %473, %464 : vector<1x64xf32>
    %475 = arith.maximumf %471, %474 : vector<1x64xf32>
    %c3_277 = arith.constant 3 : index
    %c0_278 = arith.constant 0 : index
    %476 = tpu.strided_load %arg26[%c3_277, %c0_278] {strides = array<i32: 4, 1>} : memref<10x64xf32, #tpu.memory_space<vmem>>, vector<1x64xf32>
    %477 = arith.mulf %476, %461 : vector<1x64xf32>
    %478 = arith.addf %477, %464 : vector<1x64xf32>
    %479 = arith.maximumf %475, %478 : vector<1x64xf32>
    %cst_279 = arith.constant 0.000000e+00 : f32
    %480 = vector.broadcast %cst_279 : f32 to vector<1x64xf32>
    %481 = arith.maximumf %479, %480 : vector<1x64xf32>
    %cst_280 = arith.constant dense<0.000000e+00> : vector<64xf32>
    %482 = vector.multi_reduction <add>, %481, %cst_280 [0] : vector<1x64xf32> to vector<64xf32>
    %483 = vector.shape_cast %482 : vector<64xf32> to vector<1x64xf32>
    %cst_281 = arith.constant 1.000000e+00 : f32
    %484 = vector.broadcast %cst_281 : f32 to vector<1x64xf32>
    %485 = arith.divf %483, %484 : vector<1x64xf32>
    %c0_282 = arith.constant 0 : index
    %c0_283 = arith.constant 0 : index
    %486 = vector.load %arg27[%c0_282, %c0_283] : memref<2x64xf32, #tpu.memory_space<vmem>>, vector<1x64xf32>
    tpu.vector_store %arg27[%c0_282, %c0_283], %485 {strides = array<i32>} : memref<2x64xf32, #tpu.memory_space<vmem>>, vector<1x64xf32>,
    %c5_284 = arith.constant 5 : index
    %c0_285 = arith.constant 0 : index
    %487 = tpu.strided_load %arg26[%c5_284, %c0_285] {strides = array<i32: 4, 1>} : memref<10x64xf32, #tpu.memory_space<vmem>>, vector<1x64xf32>
    %488 = arith.mulf %487, %461 : vector<1x64xf32>
    %489 = arith.addf %488, %464 : vector<1x64xf32>
    %c6 = arith.constant 6 : index
    %c0_286 = arith.constant 0 : index
    %490 = tpu.strided_load %arg26[%c6, %c0_286] {strides = array<i32: 4, 1>} : memref<10x64xf32, #tpu.memory_space<vmem>>, vector<1x64xf32>
    %491 = arith.mulf %490, %461 : vector<1x64xf32>
    %492 = arith.addf %491, %464 : vector<1x64xf32>
    %493 = arith.maximumf %489, %492 : vector<1x64xf32>
    %c7_287 = arith.constant 7 : index
    %c0_288 = arith.constant 0 : index
    %494 = tpu.strided_load %arg26[%c7_287, %c0_288] {strides = array<i32: 4, 1>} : memref<10x64xf32, #tpu.memory_space<vmem>>, vector<1x64xf32>
    %495 = arith.mulf %494, %461 : vector<1x64xf32>
    %496 = arith.addf %495, %464 : vector<1x64xf32>
    %497 = arith.maximumf %493, %496 : vector<1x64xf32>
    %c8_289 = arith.constant 8 : index
    %c0_290 = arith.constant 0 : index
    %498 = tpu.strided_load %arg26[%c8_289, %c0_290] {strides = array<i32: 4, 1>} : memref<10x64xf32, #tpu.memory_space<vmem>>, vector<1x64xf32>
    %499 = arith.mulf %498, %461 : vector<1x64xf32>
    %500 = arith.addf %499, %464 : vector<1x64xf32>
    %501 = arith.maximumf %497, %500 : vector<1x64xf32>
    %cst_291 = arith.constant 0.000000e+00 : f32
    %502 = vector.broadcast %cst_291 : f32 to vector<1x64xf32>
    %503 = arith.maximumf %501, %502 : vector<1x64xf32>
    %cst_292 = arith.constant dense<0.000000e+00> : vector<64xf32>
    %504 = vector.multi_reduction <add>, %503, %cst_292 [0] : vector<1x64xf32> to vector<64xf32>
    %505 = vector.shape_cast %504 : vector<64xf32> to vector<1x64xf32>
    %cst_293 = arith.constant 1.000000e+00 : f32
    %506 = vector.broadcast %cst_293 : f32 to vector<1x64xf32>
    %507 = arith.divf %505, %506 : vector<1x64xf32>
    %c1_294 = arith.constant 1 : index
    %c0_295 = arith.constant 0 : index
    %508 = vector.load %arg27[%c1_294, %c0_295] : memref<2x64xf32, #tpu.memory_space<vmem>>, vector<1x64xf32>
    tpu.vector_store %arg27[%c1_294, %c0_295], %507 {strides = array<i32>} : memref<2x64xf32, #tpu.memory_space<vmem>>, vector<1x64xf32>,
    %c0_296 = arith.constant 0 : index
    %c0_297 = arith.constant 0 : index
    %509 = vector.load %arg27[%c0_296, %c0_297] : memref<2x64xf32, #tpu.memory_space<vmem>>, vector<2x64xf32>
    %c0_298 = arith.constant 0 : index
    %c0_299 = arith.constant 0 : index
    %510 = vector.load %arg17[%c0_298, %c0_299] : memref<64x35xf32, #tpu.memory_space<vmem>>, vector<64x35xf32>
    %cst_300 = arith.constant dense<0.000000e+00> : vector<2x35xf32>
    %511 = tpu.matmul %509, %510, %cst_300 {dimension_numbers = #tpu.dot_dimension_numbers<[1], [0], [0], [1], [0, 0, 1, 1], [], []>} : vector<2x64xf32>, vector<64x35xf32>, vector<2x35xf32> -> vector<2x35xf32>
    %c0_301 = arith.constant 0 : index
    %c0_302 = arith.constant 0 : index
    %512 = vector.load %arg18[%c0_301, %c0_302] : memref<1x35xf32, #tpu.memory_space<vmem>>, vector<1x35xf32>
    %513 = vector.broadcast %512 : vector<1x35xf32> to vector<2x35xf32>
    %514 = arith.addf %511, %513 : vector<2x35xf32>
    %cst_303 = arith.constant dense<0xFF800000> : vector<2xf32>
    %515 = vector.multi_reduction <maximumf>, %514, %cst_303 [1] : vector<2x35xf32> to vector<2xf32>
    %516 = vector.shape_cast %515 : vector<2xf32> to vector<2x1xf32>
    %517 = vector.broadcast %516 : vector<2x1xf32> to vector<2x35xf32>
    %518 = arith.subf %514, %517 : vector<2x35xf32>
    %519 = math.exp %518 : vector<2x35xf32>
    %cst_304 = arith.constant dense<0.000000e+00> : vector<2xf32>
    %520 = vector.multi_reduction <add>, %519, %cst_304 [1] : vector<2x35xf32> to vector<2xf32>
    %521 = vector.shape_cast %520 : vector<2xf32> to vector<2x1xf32>
    %522 = math.log %521 : vector<2x1xf32>
    %523 = vector.broadcast %522 : vector<2x1xf32> to vector<2x35xf32>
    %524 = arith.subf %518, %523 : vector<2x35xf32>
    %c0_305 = arith.constant 0 : index
    %c0_306 = arith.constant 0 : index
    %525 = vector.load %arg19[%c0_305, %c0_306] : memref<2x35xf32, #tpu.memory_space<vmem>>, vector<2x35xf32>
    tpu.vector_store %arg19[%c0_305, %c0_306], %524 {strides = array<i32>} : memref<2x35xf32, #tpu.memory_space<vmem>>, vector<2x35xf32>,
    return
  }
}

</mosaic_0001>

<bundles_post_ra>
// kernel: squeeze.1
= control target key start
LH: loop header
LB: loop body
LE: loop exit
PB: predicated region body
PF: predicated region fallthrough
CT: control target
= control target key end

     0   :  { %vm570_vm0 = vcmask 1046531   ;;  %vm574_vm1 = vcmask 1047559   ;;  %s3090_s5 = smov 112   ;;  %vm855_vm2 = vcmask 1045507   ;;  %vm255_vm3 = vcmask 130048   ;;  %s3093_s11 = smov 64   ;;  %s5195_s0 = inlined_call_operand.vmem [shape: f32[2,8000], index: 0, kind: input, shape index: {}]   ;;  %s5196_s1 = inlined_call_operand.vmem [shape: f32[2,500,16], index: 1, kind: output, shape index: {}]  }
   0x1   :  { %v2689_v0 = vld [vmem:[%s5195_s0 + $0x6] sm:$0x3]  ;;  %v2690_v1 = vld [vmem:[%s5195_s0 + $0x4] sm:$0x3]  ;;  %v2691_v2 = vld [vmem:[%s5195_s0 + $0x2] sm:$0x3] }
   0x2   :  { %243 = vst [vmem:[#allocation0 + $0x18] sm:$0x3] %v2689_v0  ;;  %v252_v3 = vld [vmem:[%s5195_s0] sm:$0x3]  ;;  %v2685_v4 = vld [vmem:[%s5195_s0 + $0xe] sm:$0x3] }
   0x3   :  { %247 = vst [vmem:[#allocation0 + $0x10] sm:$0x3] %v2690_v1  ;;  %v2686_v5 = vld [vmem:[%s5195_s0 + $0xc] sm:$0x3]  ;;  %v2687_v6 = vld [vmem:[%s5195_s0 + $0xa] sm:$0x3] }
   0x4   :  { %251 = vst [vmem:[#allocation0 + $0x8] sm:$0x3] %v2691_v2  ;;  %v2688_v7 = vld [vmem:[%s5195_s0 + $0x8] sm:$0x3]  ;;  %v2681_v8 = vld [vmem:[%s5195_s0 + $0x16] sm:$0x3] }
   0x5   :  { %253 = vst [vmem:[#allocation0] sm:$0x3] %v252_v3  ;;  %v2682_v9 = vld [vmem:[%s5195_s0 + $0x14] sm:$0x3]  ;;  %v2683_v10 = vld [vmem:[%s5195_s0 + $0x12] sm:$0x3] }
   0x6   :  { %227 = vst [vmem:[#allocation0 + $0x38] sm:$0x3] %v2685_v4  ;;  %v2684_v11 = vld [vmem:[%s5195_s0 + $0x10] sm:$0x3]  ;;  %v2677_v13 = vld [vmem:[%s5195_s0 + $0x1e] sm:$0x3] }
   0x7   :  { %231 = vst [vmem:[#allocation0 + $0x30] sm:$0x3] %v2686_v5  ;;  %v2678_v18 = vld [vmem:[%s5195_s0 + $0x1c] sm:$0x3]  ;;  %v2679_v19 = vld [vmem:[%s5195_s0 + $0x1a] sm:$0x3] }
   0x8   :  { %235 = vst [vmem:[#allocation0 + $0x28] sm:$0x3] %v2687_v6  ;;  %v2680_v20 = vld [vmem:[%s5195_s0 + $0x18] sm:$0x3]  ;;  %v2665_v25 = vld [vmem:[%s5195_s0 + $0x36] sm:$0x3] }
   0x9   :  { %239 = vst [vmem:[#allocation0 + $0x20] sm:$0x3] %v2688_v7  ;;  %v573_v12 = vld [vmem:[#allocation0 + $0x11] sm:$0x80]   ;;  %v2666_v26 = vld [vmem:[%s5195_s0 + $0x34] sm:$0x3] }
   0xa   :  { %211 = vst [vmem:[#allocation0 + $0x58] sm:$0x3] %v2681_v8  ;;  %v2667_v27 = vld [vmem:[%s5195_s0 + $0x32] sm:$0x3]  ;;  %v2668_v30 = vld [vmem:[%s5195_s0 + $0x30] sm:$0x3] }
   0xb   :  { %215 = vst [vmem:[#allocation0 + $0x50] sm:$0x3] %v2682_v9  ;;  %v2661_v34 = vld [vmem:[%s5195_s0 + $0x3e] sm:$0x3]  ;;  %v2662_v36 = vld [vmem:[%s5195_s0 + $0x3c] sm:$0x3] }
   0xc   :  { %v567_v14 = vld [vmem:[#allocation0] ss:$8 sm:$0x7]   ;;  %v569_v15 = vld [vmem:[#allocation0 - $0x17] ss:$8 sm:$0x78]  }
   0xd   :  { %v571_v16 = vsel %vm570_vm0, %v569_v15, %v567_v14  ;;  %219 = vst [vmem:[#allocation0 + $0x48] sm:$0x3] %v2683_v10  ;;  %v592_v24 = vld [vmem:[#allocation0 + $0x31] sm:$0x80]   ;;  %v2663_v37 = vld [vmem:[%s5195_s0 + $0x3a] sm:$0x3] }
   0xe   :  { %v575_v17 = vsel %vm574_vm1, %v573_v12, %v571_v16  ;;  %223 = vst [vmem:[#allocation0 + $0x40] sm:$0x3] %v2684_v11  ;;  %v2664_v39 = vld [vmem:[%s5195_s0 + $0x38] sm:$0x3]  ;;  %v2653_v43 = vld [vmem:[%s5195_s0 + $0x4e] sm:$0x3] }
   0xf   :  { %576 = vrot.lane.b32.xlu0 %v575_v17, %s3090_s5  ;;  %195 = vst [vmem:[#allocation0 + $0x78] sm:$0x3] %v2677_v13  ;;  %v2654_v45 = vld [vmem:[%s5195_s0 + $0x4c] sm:$0x3]  ;;  %v2655_v46 = vld [vmem:[%s5195_s0 + $0x4a] sm:$0x3] }
  0x10   :  { %v586_v21 = vld [vmem:[#allocation0 + $0x20] ss:$8 sm:$0x7]   ;;  %v588_v22 = vld [vmem:[#allocation0 + $0x9] ss:$8 sm:$0x78]  }
  0x11   :  { %v590_v23 = vsel %vm570_vm0, %v588_v22, %v586_v21  ;;  %199 = vst [vmem:[#allocation0 + $0x70] sm:$0x3] %v2678_v18  ;;  %v611_v29 = vld [vmem:[#allocation0 + $0x51] sm:$0x80]   ;;  %v2656_v48 = vld [vmem:[%s5195_s0 + $0x48] sm:$0x3] }
  0x12   :  { %203 = vst [vmem:[#allocation0 + $0x68] sm:$0x3] %v2679_v19  ;;  %v594_v28 = vsel %vm574_vm1, %v592_v24, %v590_v23  ;;  %v2673_v52 = vld [vmem:[%s5195_s0 + $0x26] sm:$0x3]  ;;  %v2674_v54 = vld [vmem:[%s5195_s0 + $0x24] sm:$0x3] }
  0x13   :  { %207 = vst [vmem:[#allocation0 + $0x60] sm:$0x3] %v2680_v20  ;;  %v2675_v55 = vld [vmem:[%s5195_s0 + $0x22] sm:$0x3]  ;;  %v2676_v57 = vld [vmem:[%s5195_s0 + $0x20] sm:$0x3] }
  0x14   :  { %147 = vst [vmem:[#allocation0 + $0xd8] sm:$0x3] %v2665_v25  ;;  %v2649_v61 = vld [vmem:[%s5195_s0 + $0x56] sm:$0x3]  ;;  %v2650_v63 = vld [vmem:[%s5195_s0 + $0x54] sm:$0x3] }
  0x15   :  { %v605_v31 = vld [vmem:[#allocation0 + $0x40] ss:$8 sm:$0x7]   ;;  %v607_v32 = vld [vmem:[#allocation0 + $0x29] ss:$8 sm:$0x78]  }
  0x16   :  { %v609_v33 = vsel %vm570_vm0, %v607_v32, %v605_v31  ;;  %151 = vst [vmem:[#allocation0 + $0xd0] sm:$0x3] %v2666_v26  ;;  %v630_v38 = vld [vmem:[#allocation0 + $0x71] sm:$0x80]   ;;  %v2651_v0 = vld [vmem:[%s5195_s0 + $0x52] sm:$0x3] }
  0x17   :  { %595 = vrot.lane.b32.xlu0 %v594_v28, %s3090_s5  ;;  %v613_v35 = vsel %vm574_vm1, %v611_v29, %v609_v33  ;;  %155 = vst [vmem:[#allocation0 + $0xc8] sm:$0x3] %v2667_v27  ;;  %v2652_v2 = vld [vmem:[%s5195_s0 + $0x50] sm:$0x3]  ;;  %v2641_v6 = vld [vmem:[%s5195_s0 + $0x66] sm:$0x3] }
  0x18   :  { %614 = vrot.lane.b32.xlu1 %v613_v35, %s3090_s5  ;;  %159 = vst [vmem:[#allocation0 + $0xc0] sm:$0x3] %v2668_v30  ;;  %v2642_v8 = vld [vmem:[%s5195_s0 + $0x64] sm:$0x3]  ;;  %v2643_v9 = vld [vmem:[%s5195_s0 + $0x62] sm:$0x3] }
  0x19   :  { %131 = vst [vmem:[#allocation0 + $0xf8] sm:$0x3] %v2661_v34  ;;  %v2644_v11 = vld [vmem:[%s5195_s0 + $0x60] sm:$0x3]  ;;  %v2669_v15 = vld [vmem:[%s5195_s0 + $0x2e] sm:$0x3] }
  0x1a   :  { %v624_v40 = vld [vmem:[#allocation0 + $0x60] ss:$8 sm:$0x7]   ;;  %v626_v41 = vld [vmem:[#allocation0 + $0x49] ss:$8 sm:$0x78]  }
  0x1b   :  { %v628_v42 = vsel %vm570_vm0, %v626_v41, %v624_v40  ;;  %135 = vst [vmem:[#allocation0 + $0xf0] sm:$0x3] %v2662_v36  ;;  %v687_v47 = vld [vmem:[#allocation0 + $0xd1] sm:$0x80]   ;;  %v2670_v17 = vld [vmem:[%s5195_s0 + $0x2c] sm:$0x3] }
  0x1c   :  { %139 = vst [vmem:[#allocation0 + $0xe8] sm:$0x3] %v2663_v37  ;;  %v632_v44 = vsel %vm574_vm1, %v630_v38, %v628_v42  ;;  %v2671_v18 = vld [vmem:[%s5195_s0 + $0x2a] sm:$0x3]  ;;  %v2672_v20 = vld [vmem:[%s5195_s0 + $0x28] sm:$0x3] }
  0x1d   :  { %143 = vst [vmem:[#allocation0 + $0xe0] sm:$0x3] %v2664_v39  ;;  %v2637_v24 = vld [vmem:[%s5195_s0 + $0x6e] sm:$0x3]  ;;  %v2638_v26 = vld [vmem:[%s5195_s0 + $0x6c] sm:$0x3] }
  0x1e   :  { %99 = vst [vmem:[#allocation0 + $0x138] sm:$0x3] %v2653_v43  ;;  %v2639_v27 = vld [vmem:[%s5195_s0 + $0x6a] sm:$0x3]  ;;  %v2640_v29 = vld [vmem:[%s5195_s0 + $0x68] sm:$0x3] }
  0x1f   :  { %v681_v49 = vld [vmem:[#allocation0 + $0xc0] ss:$8 sm:$0x7]   ;;  %v683_v50 = vld [vmem:[#allocation0 + $0xa9] ss:$8 sm:$0x78]  }
  0x20   :  { %633 = vrot.lane.b32.xlu1 %v632_v44, %s3090_s5  ;;  %v685_v51 = vsel %vm570_vm0, %v683_v50, %v681_v49  ;;  %103 = vst [vmem:[#allocation0 + $0x130] sm:$0x3] %v2654_v45  ;;  %v706_v56 = vld [vmem:[#allocation0 + $0xf1] sm:$0x80]   ;;  %v2630_v33 = vld [vmem:[%s5195_s0 + $0x7c] sm:$0x3] }
  0x21   :  { %v689_v53 = vsel %vm574_vm1, %v687_v47, %v685_v51  ;;  %107 = vst [vmem:[#allocation0 + $0x128] sm:$0x3] %v2655_v46  ;;  %v2631_v35 = vld [vmem:[%s5195_s0 + $0x7a] sm:$0x3]  ;;  %v2632_v36 = vld [vmem:[%s5195_s0 + $0x78] sm:$0x3] }
  0x22   :  { %690 = vrot.lane.b32.xlu0 %v689_v53, %s3090_s5  ;;  %111 = vst [vmem:[#allocation0 + $0x120] sm:$0x3] %v2656_v48  ;;  %v2657_v38 = vld [vmem:[%s5195_s0 + $0x46] sm:$0x3]  ;;  %v2658_v42 = vld [vmem:[%s5195_s0 + $0x44] sm:$0x3] }
  0x23   :  { %179 = vst [vmem:[#allocation0 + $0x98] sm:$0x3] %v2673_v52  ;;  %v2659_v44 = vld [vmem:[%s5195_s0 + $0x42] sm:$0x3]  ;;  %v2660_v45 = vld [vmem:[%s5195_s0 + $0x40] sm:$0x3] }
  0x24   :  { %v700_v58 = vld [vmem:[#allocation0 + $0xe0] ss:$8 sm:$0x7]   ;;  %v702_v59 = vld [vmem:[#allocation0 + $0xc9] ss:$8 sm:$0x78]  }
  0x25   :  { %v704_v60 = vsel %vm570_vm0, %v702_v59, %v700_v58  ;;  %183 = vst [vmem:[#allocation0 + $0x90] sm:$0x3] %v2674_v54  ;;  %v744_v1 = vld [vmem:[#allocation0 + $0x131] sm:$0x80]   ;;  %v2645_v47 = vld [vmem:[%s5195_s0 + $0x5e] sm:$0x3] }
  0x26   :  { %v708_v62 = vsel %vm574_vm1, %v706_v56, %v704_v60  ;;  %187 = vst [vmem:[#allocation0 + $0x88] sm:$0x3] %v2675_v55  ;;  %v864_v50 = vld [vmem:[#allocation0] ss:$8 sm:$0x7]   ;;  %s3094_s29 = smov 48  }
  0x27   :  { %191 = vst [vmem:[#allocation0 + $0x80] sm:$0x3] %v2676_v57  ;;  %v866_v52 = vld [vmem:[#allocation0 - $0x17] ss:$8 sm:$0x78]   ;;  %s3095_s30 = smov 32  }
  0x28   :  { %709 = vrot.lane.b32.xlu1 %v708_v62, %s3090_s5  ;;  %83 = vst [vmem:[#allocation0 + $0x158] sm:$0x3] %v2649_v61  ;;  %v2646_v54 = vld [vmem:[%s5195_s0 + $0x5c] sm:$0x3]  ;;  %v2647_v57 = vld [vmem:[%s5195_s0 + $0x5a] sm:$0x3]  ;;  %v868_v62 = vsel %vm570_vm0, %v866_v52, %v864_v50 }
  0x29   :  { %v738_v3 = vld [vmem:[#allocation0 + $0x120] ss:$8 sm:$0x7]   ;;  %v740_v4 = vld [vmem:[#allocation0 + $0x109] ss:$8 sm:$0x78]  }
  0x2a   :  { %v742_v5 = vsel %vm570_vm0, %v740_v4, %v738_v3  ;;  %87 = vst [vmem:[#allocation0 + $0x150] sm:$0x3] %v2650_v63  ;;  %v649_v10 = vld [vmem:[#allocation0 + $0x91] sm:$0x80]   ;;  %v2635_v3 = vld [vmem:[%s5195_s0 + $0x72] sm:$0x3] }
  0x2b   :  { %v746_v7 = vsel %vm574_vm1, %v744_v1, %v742_v5  ;;  %91 = vst [vmem:[#allocation0 + $0x148] sm:$0x3] %v2651_v0  ;;  %v902_v55 = vld [vmem:[#allocation0 + $0x40] ss:$8 sm:$0x7]   ;;  %s3096_s23 = smov 16  }
  0x2c   :  { %747 = vrot.lane.b32.xlu0 %v746_v7, %s3090_s5  ;;  %95 = vst [vmem:[#allocation0 + $0x140] sm:$0x3] %v2652_v2  ;;  %v904_v56 = vld [vmem:[#allocation0 + $0x29] ss:$8 sm:$0x78]  }
  0x2d   :  { %51 = vst [vmem:[#allocation0 + $0x198] sm:$0x3] %v2641_v6  ;;  %v2648_v58 = vld [vmem:[%s5195_s0 + $0x58] sm:$0x3]  ;;  %v2633_v0 = vld [vmem:[%s5195_s0 + $0x76] sm:$0x3]  ;;  %v906_v6 = vsel %vm570_vm0, %v904_v56, %v902_v55 }
  0x2e   :  { %v643_v12 = vld [vmem:[#allocation0 + $0x80] ss:$8 sm:$0x7]   ;;  %v645_v13 = vld [vmem:[#allocation0 + $0x69] ss:$8 sm:$0x78]  }
  0x2f   :  { %v647_v14 = vsel %vm570_vm0, %v645_v13, %v643_v12  ;;  %55 = vst [vmem:[#allocation0 + $0x190] sm:$0x3] %v2642_v8  ;;  %v763_v19 = vld [vmem:[#allocation0 + $0x151] sm:$0x80]   ;;  %v2634_v2 = vld [vmem:[%s5195_s0 + $0x74] sm:$0x3] }
  0x30   :  { %v651_v16 = vsel %vm574_vm1, %v649_v10, %v647_v14  ;;  %59 = vst [vmem:[#allocation0 + $0x188] sm:$0x3] %v2643_v9  ;;  %v870_v63 = vld [vmem:[#allocation0 + $0x11] sm:$0x80]   ;;  %v2636_v8 = vld [vmem:[%s5195_s0 + $0x70] sm:$0x3] }
  0x31   :  { %652 = vrot.lane.b32.xlu2 %v651_v16, %s3090_s5  ;;  %63 = vst [vmem:[#allocation0 + $0x180] sm:$0x3] %v2644_v11  ;;  %v908_v1 = vld [vmem:[#allocation0 + $0x51] sm:$0x80]   ;;  %v872_v5 = vsel %vm574_vm1, %v870_v63, %v868_v62  ;;  %s3091_s0 = smov 96  }
  0x32   :  { %163 = vst [vmem:[#allocation0 + $0xb8] sm:$0x3] %v2669_v15  ;;  %v921_v7 = vld [vmem:[#allocation0 + $0x60] ss:$8 sm:$0x7]   ;;  %v910_v14 = vsel %vm574_vm1, %v908_v1, %v906_v6 }
  0x33   :  { %v757_v21 = vld [vmem:[#allocation0 + $0x140] ss:$8 sm:$0x7]   ;;  %v759_v22 = vld [vmem:[#allocation0 + $0x129] ss:$8 sm:$0x78]  }
  0x34   :  { %v761_v23 = vsel %vm570_vm0, %v759_v22, %v757_v21  ;;  %167 = vst [vmem:[#allocation0 + $0xb0] sm:$0x3] %v2670_v17  ;;  %v801_v28 = vld [vmem:[#allocation0 + $0x191] sm:$0x80]  }
  0x35   :  { %v765_v25 = vsel %vm574_vm1, %v763_v19, %v761_v23  ;;  %171 = vst [vmem:[#allocation0 + $0xa8] sm:$0x3] %v2671_v18  ;;  %v923_v12 = vld [vmem:[#allocation0 + $0x49] ss:$8 sm:$0x78]  }
  0x36   :  { %766 = vrot.lane.b32.xlu1 %v765_v25, %s3090_s5  ;;  %175 = vst [vmem:[#allocation0 + $0xa0] sm:$0x3] %v2672_v20  ;;  %v927_v15 = vld [vmem:[#allocation0 + $0x71] sm:$0x80]   ;;  %v925_v18 = vsel %vm570_vm0, %v923_v12, %v921_v7 }
  0x37   :  { %35 = vst [vmem:[#allocation0 + $0x1b8] sm:$0x3] %v2637_v24  ;;  %v929_v23 = vsel %vm574_vm1, %v927_v15, %v925_v18  ;;  %v889_v52 = vld [vmem:[#allocation0 + $0x31] sm:$0x80]  }
  0x38   :  { %v795_v30 = vld [vmem:[#allocation0 + $0x180] ss:$8 sm:$0x7]   ;;  %v797_v31 = vld [vmem:[#allocation0 + $0x169] ss:$8 sm:$0x78]  }
  0x39   :  { %v799_v32 = vsel %vm570_vm0, %v797_v31, %v795_v30  ;;  %39 = vst [vmem:[#allocation0 + $0x1b0] sm:$0x3] %v2638_v26  ;;  %v668_v37 = vld [vmem:[#allocation0 + $0xb1] sm:$0x80]  }
  0x3a   :  { %v803_v34 = vsel %vm574_vm1, %v801_v28, %v799_v32  ;;  %43 = vst [vmem:[#allocation0 + $0x1a8] sm:$0x3] %v2639_v27  ;;  %v965_v25 = vld [vmem:[#allocation0 + $0xb1] sm:$0x80]  }
  0x3b   :  { %804 = vrot.lane.b32.xlu0 %v803_v34, %s3090_s5  ;;  %47 = vst [vmem:[#allocation0 + $0x1a0] sm:$0x3] %v2640_v29  ;;  %v978_v27 = vld [vmem:[#allocation0 + $0xc0] ss:$8 sm:$0x7]  }
  0x3c   :  { %7 = vst [vmem:[#allocation0 + $0x1f0] sm:$0x3] %v2630_v33  ;;  %v980_v28 = vld [vmem:[#allocation0 + $0xa9] ss:$8 sm:$0x78]  }
  0x3d   :  { %v662_v39 = vld [vmem:[#allocation0 + $0xa0] ss:$8 sm:$0x7]   ;;  %v664_v40 = vld [vmem:[#allocation0 + $0x89] ss:$8 sm:$0x78]   ;;  %v982_v33 = vsel %vm570_vm0, %v980_v28, %v978_v27 }
  0x3e   :  { %v666_v41 = vsel %vm570_vm0, %v664_v40, %v662_v39  ;;  %11 = vst [vmem:[#allocation0 + $0x1e8] sm:$0x3] %v2631_v35  ;;  %v820_v46 = vld [vmem:[#allocation0 + $0x1b1] sm:$0x80]  }
  0x3f   :  { %v670_v43 = vsel %vm574_vm1, %v668_v37, %v666_v41  ;;  %15 = vst [vmem:[#allocation0 + $0x1e0] sm:$0x3] %v2632_v36  ;;  %v959_v16 = vld [vmem:[#allocation0 + $0xa0] ss:$8 sm:$0x7]  }
  0x40   :  { %671 = vrot.lane.b32.xlu2 %v670_v43, %s3090_s5  ;;  %115 = vst [vmem:[#allocation0 + $0x118] sm:$0x3] %v2657_v38  ;;  %v961_v19 = vld [vmem:[#allocation0 + $0x89] ss:$8 sm:$0x78]  }
  0x41   :  { %119 = vst [vmem:[#allocation0 + $0x110] sm:$0x3] %v2658_v42  ;;  %v963_v24 = vsel %vm570_vm0, %v961_v19, %v959_v16  ;;  %v984_v32 = vld [vmem:[#allocation0 + $0xd1] sm:$0x80]  }
  0x42   :  { %v814_v48 = vld [vmem:[#allocation0 + $0x1a0] ss:$8 sm:$0x7]   ;;  %v816_v49 = vld [vmem:[#allocation0 + $0x189] ss:$8 sm:$0x78]   ;;  %v967_v29 = vsel %vm574_vm1, %v965_v25, %v963_v24  ;;  %v986_v38 = vsel %vm574_vm1, %v984_v32, %v982_v33 }
  0x43   :  { %v818_v51 = vsel %vm570_vm0, %v816_v49, %v814_v48  ;;  %123 = vst [vmem:[#allocation0 + $0x108] sm:$0x3] %v2659_v44  ;;  %v1035_v42 = vld [vmem:[#allocation0 + $0x120] ss:$8 sm:$0x7]  }
  0x44   :  { %v822_v53 = vsel %vm574_vm1, %v820_v46, %v818_v51  ;;  %127 = vst [vmem:[#allocation0 + $0x100] sm:$0x3] %v2660_v45  ;;  %v1037_v43 = vld [vmem:[#allocation0 + $0x109] ss:$8 sm:$0x78]  }
  0x45   :  { %823 = vrot.lane.b32.xlu1 %v822_v53, %s3090_s5  ;;  %67 = vst [vmem:[#allocation0 + $0x178] sm:$0x3] %v2645_v47  ;;  %v883_v45 = vld [vmem:[#allocation0 + $0x20] ss:$8 sm:$0x7]   ;;  %v1039_v48 = vsel %vm570_vm0, %v1037_v43, %v1035_v42 }
  0x46   :  { %v852_v59 = vld [vmem:[#allocation0 + $0x1e0] ss:$8 sm:$0x7]   ;;  %v854_v60 = vld [vmem:[#allocation0 + $0x1c9] ss:$8 sm:$0x38]  }
  0x47   :  { %v856_v61 = vsel %vm855_vm2, %v854_v60, %v852_v59  ;;  %71 = vst [vmem:[#allocation0 + $0x170] sm:$0x3] %v2646_v54  ;;  %v725_v4 = vld [vmem:[#allocation0 + $0x111] sm:$0x80]  }
  0x48   :  { %857 = vrot.lane.b32.xlu0 %v856_v61, %s3090_s5  ;;  %75 = vst [vmem:[#allocation0 + $0x168] sm:$0x3] %v2647_v57  ;;  %v1022_v40 = vld [vmem:[#allocation0 + $0x111] sm:$0x80]  }
  0x49   :  { %79 = vst [vmem:[#allocation0 + $0x160] sm:$0x3] %v2648_v58  ;;  %v885_v46 = vld [vmem:[#allocation0 + $0x9] ss:$8 sm:$0x78]  }
  0x4a   :  { %19 = vst [vmem:[#allocation0 + $0x1d8] sm:$0x3] %v2633_v0  ;;  %v1041_v47 = vld [vmem:[#allocation0 + $0x131] sm:$0x80]   ;;  %v887_v51 = vsel %vm570_vm0, %v885_v46, %v883_v45 }
  0x4b   :  { %v719_v9 = vld [vmem:[#allocation0 + $0x100] ss:$8 sm:$0x7]   ;;  %v721_v10 = vld [vmem:[#allocation0 + $0xe9] ss:$8 sm:$0x78]   ;;  %v1043_v53 = vsel %vm574_vm1, %v1041_v47, %v1039_v48  ;;  %v891_v56 = vsel %vm574_vm1, %v889_v52, %v887_v51 }
  0x4c   :  { %v723_v11 = vsel %vm570_vm0, %v721_v10, %v719_v9  ;;  %23 = vst [vmem:[#allocation0 + $0x1d0] sm:$0x3] %v2634_v2  ;;  %v782_v17 = vld [vmem:[#allocation0 + $0x171] sm:$0x80]  }
  0x4d   :  { %v727_v13 = vsel %vm574_vm1, %v725_v4, %v723_v11  ;;  %873 = vrot.lane.b32.xlu1 %v872_v5, %s3091_s0  ;;  %27 = vst [vmem:[#allocation0 + $0x1c8] sm:$0x3] %v2635_v3  ;;  %v1016_v34 = vld [vmem:[#allocation0 + $0x100] ss:$8 sm:$0x7]  }
  0x4e   :  { %728 = vrot.lane.b32.xlu2 %v727_v13, %s3090_s5  ;;  %31 = vst [vmem:[#allocation0 + $0x1c0] sm:$0x3] %v2636_v8  ;;  %v1018_v35 = vld [vmem:[#allocation0 + $0xe9] ss:$8 sm:$0x78]  }
  0x4f   :  { %v1020_v39 = vsel %vm570_vm0, %v1018_v35, %v1016_v34  ;;  %v1079_v55 = vld [vmem:[#allocation0 + $0x171] sm:$0x80]   ;;  %v1092_v57 = vld [vmem:[#allocation0 + $0x180] ss:$8 sm:$0x7]  }
  0x50   :  { %911 = vrot.lane.b32.xlu0 %v910_v14, %s3091_s0  ;;  %v776_v20 = vld [vmem:[#allocation0 + $0x160] ss:$8 sm:$0x7]   ;;  %v778_v21 = vld [vmem:[#allocation0 + $0x149] ss:$8 sm:$0x78]   ;;  %v1024_v44 = vsel %vm574_vm1, %v1022_v40, %v1020_v39 }
  0x51   :  { %v780_v22 = vsel %vm570_vm0, %v778_v21, %v776_v20  ;;  %v839_v37 = vld [vmem:[#allocation0 + $0x1d1] sm:$0x80]   ;;  %v1073_v49 = vld [vmem:[#allocation0 + $0x160] ss:$8 sm:$0x7]  }
  0x52   :  { %v784_v26 = vsel %vm574_vm1, %v782_v17, %v780_v22  ;;  %v1075_v50 = vld [vmem:[#allocation0 + $0x149] ss:$8 sm:$0x78]   ;;  %v940_v60 = vld [vmem:[#allocation0 + $0x80] ss:$8 sm:$0x7]  }
  0x53   :  { %v1077_v54 = vsel %vm570_vm0, %v1075_v50, %v1073_v49  ;;  %v1094_v58 = vld [vmem:[#allocation0 + $0x169] ss:$8 sm:$0x78]   ;;  %v1098_v62 = vld [vmem:[#allocation0 + $0x191] sm:$0x80]  }
  0x54   :  { %v1081_v59 = vsel %vm574_vm1, %v1079_v55, %v1077_v54  ;;  %v942_v61 = vld [vmem:[#allocation0 + $0x69] ss:$8 sm:$0x78]   ;;  %v1096_v63 = vsel %vm570_vm0, %v1094_v58, %v1092_v57  ;;  %v946_v3 = vld [vmem:[#allocation0 + $0x91] sm:$0x80]  }
  0x55   :  { %930 = vrot.lane.b32.xlu1 %v929_v23, %s3091_s0  ;;  %v833_v30 = vld [vmem:[#allocation0 + $0x1c0] ss:$8 sm:$0x7]   ;;  %v835_v31 = vld [vmem:[#allocation0 + $0x1a9] ss:$8 sm:$0x78]   ;;  %v944_v2 = vsel %vm570_vm0, %v942_v61, %v940_v60  ;;  %v1100_v4 = vsel %vm574_vm1, %v1098_v62, %v1096_v63 }
  0x56   :  { %785 = vrot.lane.b32.xlu2 %v784_v26, %s3090_s5  ;;  %v837_v36 = vsel %vm570_vm0, %v835_v31, %v833_v30  ;;  %v1130_v0 = vld [vmem:[#allocation0 + $0x1c0] ss:$8 sm:$0x7]   ;;  %v1132_v1 = vld [vmem:[#allocation0 + $0x1a9] ss:$8 sm:$0x78]   ;;  %v948_v7 = vsel %vm574_vm1, %v946_v3, %v944_v2 }
  0x57   :  { %v841_v41 = vsel %vm574_vm1, %v839_v37, %v837_v36  ;;  %v1134_v5 = vsel %vm570_vm0, %v1132_v1, %v1130_v0  ;;  %v1136_v6 = vld [vmem:[#allocation0 + $0x1d1] sm:$0x80]   ;;  %v997_v9 = vld [vmem:[#allocation0 + $0xe0] ss:$8 sm:$0x7]  }
  0x58   :  { %968 = vrot.lane.b32.xlu0 %v967_v29, %s3091_s0  ;;  %v1138_v8 = vsel %vm574_vm1, %v1136_v6, %v1134_v5  ;;  %v999_v10 = vld [vmem:[#allocation0 + $0xc9] ss:$8 sm:$0x78]   ;;  %v1149_v11 = vld [vmem:[#allocation0 + $0x1e0] ss:$8 sm:$0x7]  }
  0x59   :  { %v1151_v12 = vld [vmem:[#allocation0 + $0x1c9] ss:$8 sm:$0x38]   ;;  %v1180_v13 = vld [vmem:[#allocation0 + $0x20] ss:$8 sm:$0x7]   ;;  %v1001_v15 = vsel %vm570_vm0, %v999_v10, %v997_v9 }
  0x5a   :  { %v1182_v14 = vld [vmem:[#allocation0 + $0x9] ss:$8 sm:$0x78]   ;;  %v1003_v16 = vld [vmem:[#allocation0 + $0xf1] sm:$0x80]   ;;  %v1153_v17 = vsel %vm855_vm2, %v1151_v12, %v1149_v11 }
  0x5b   :  { %v1184_v18 = vsel %vm570_vm0, %v1182_v14, %v1180_v13  ;;  %v1186_v19 = vld [vmem:[#allocation0 + $0x31] sm:$0x80]   ;;  %v1005_v20 = vsel %vm574_vm1, %v1003_v16, %v1001_v15  ;;  %v1199_v21 = vld [vmem:[#allocation0 + $0x40] ss:$8 sm:$0x7]  }
  0x5c   :  { %v1201_v22 = vld [vmem:[#allocation0 + $0x29] ss:$8 sm:$0x78]   ;;  %v1188_v23 = vsel %vm574_vm1, %v1186_v19, %v1184_v18  ;;  %v1054_v24 = vld [vmem:[#allocation0 + $0x140] ss:$8 sm:$0x7]  }
  0x5d   :  { %987 = vrot.lane.b32.xlu1 %v986_v38, %s3091_s0  ;;  %v1056_v25 = vld [vmem:[#allocation0 + $0x129] ss:$8 sm:$0x78]   ;;  %v1205_v26 = vld [vmem:[#allocation0 + $0x51] sm:$0x80]   ;;  %v1203_v27 = vsel %vm570_vm0, %v1201_v22, %v1199_v21 }
  0x5e   :  { %842 = vrot.lane.b32.xlu2 %v841_v41, %s3090_s5  ;;  %v1237_v28 = vld [vmem:[#allocation0 + $0x80] ss:$8 sm:$0x7]   ;;  %v1239_v29 = vld [vmem:[#allocation0 + $0x69] ss:$8 sm:$0x78]   ;;  %v1058_v30 = vsel %vm570_vm0, %v1056_v25, %v1054_v24  ;;  %v1207_v32 = vsel %vm574_vm1, %v1205_v26, %v1203_v27 }
  0x5f   :  { %s3092_s5 = smov 80   ;;  %v1060_v31 = vld [vmem:[#allocation0 + $0x151] sm:$0x80]   ;;  %v1241_v33 = vsel %vm570_vm0, %v1239_v29, %v1237_v28  ;;  %v1256_v36 = vld [vmem:[#allocation0 + $0xa0] ss:$8 sm:$0x7]  }
  0x60   :  { %1025 = vrot.lane.b32.xlu0 %v1024_v44, %s3091_s0  ;;  %v1243_v34 = vld [vmem:[#allocation0 + $0x91] sm:$0x80]   ;;  %v1062_v35 = vsel %vm574_vm1, %v1060_v31, %v1058_v30  ;;  %v1258_v37 = vld [vmem:[#allocation0 + $0x89] ss:$8 sm:$0x78]  }
  0x61   :  { %v1245_v38 = vsel %vm574_vm1, %v1243_v34, %v1241_v33  ;;  %v1111_v39 = vld [vmem:[#allocation0 + $0x1a0] ss:$8 sm:$0x7]   ;;  %v1113_v40 = vld [vmem:[#allocation0 + $0x189] ss:$8 sm:$0x78]   ;;  %v1260_v42 = vsel %vm570_vm0, %v1258_v37, %v1256_v36 }
  0x62   :  { %v1294_v41 = vld [vmem:[#allocation0 + $0xe0] ss:$8 sm:$0x7]   ;;  %v1262_v43 = vld [vmem:[#allocation0 + $0xb1] sm:$0x80]   ;;  %v1115_v45 = vsel %vm570_vm0, %v1113_v40, %v1111_v39 }
  0x63   :  { %v1296_v44 = vld [vmem:[#allocation0 + $0xc9] ss:$8 sm:$0x78]   ;;  %v1117_v46 = vld [vmem:[#allocation0 + $0x1b1] sm:$0x80]   ;;  %v1264_v48 = vsel %vm574_vm1, %v1262_v43, %v1260_v42 }
  0x64   :  { %v1298_v49 = vsel %vm570_vm0, %v1296_v44, %v1294_v41  ;;  %v1300_v50 = vld [vmem:[#allocation0 + $0xf1] sm:$0x80]   ;;  %v1119_v51 = vsel %vm574_vm1, %v1117_v46, %v1115_v45  ;;  %v1313_v52 = vld [vmem:[#allocation0 + $0x100] ss:$8 sm:$0x7]  }
  0x65   :  { %1044 = vrot.lane.b32.xlu1 %v1043_v53, %s3091_s0  ;;  %v1315_v53 = vld [vmem:[#allocation0 + $0xe9] ss:$8 sm:$0x78]   ;;  %v1302_v54 = vsel %vm574_vm1, %v1300_v50, %v1298_v49  ;;  %v1161_v55 = vld [vmem:[#allocation0] ss:$8 sm:$0x7]  }
  0x66   :  { %892 = vrot.lane.b32.xlu2 %v891_v56, %s3091_s0  ;;  %v1163_v56 = vld [vmem:[#allocation0 - $0x17] ss:$8 sm:$0x78]   ;;  %v1319_v57 = vld [vmem:[#allocation0 + $0x111] sm:$0x80]   ;;  %v1317_v58 = vsel %vm570_vm0, %v1315_v53, %v1313_v52 }
  0x67   :  { %v1353_v60 = vld [vmem:[#allocation0 + $0x129] ss:$8 sm:$0x78]   ;;  %v1165_v61 = vsel %vm570_vm0, %v1163_v56, %v1161_v55  ;;  %v1167_v62 = vld [vmem:[#allocation0 + $0x11] sm:$0x80]   ;;  %v1321_v0 = vsel %vm574_vm1, %v1319_v57, %v1317_v58 }
  0x68   :  { %1082 = vrot.lane.b32.xlu0 %v1081_v59, %s3091_s0  ;;  %v1351_v59 = vld [vmem:[#allocation0 + $0x140] ss:$8 sm:$0x7]   ;;  %v1357_v2 = vld [vmem:[#allocation0 + $0x151] sm:$0x80]  }
  0x69   :  { %v1355_v1 = vsel %vm570_vm0, %v1353_v60, %v1351_v59  ;;  %v1218_v5 = vld [vmem:[#allocation0 + $0x60] ss:$8 sm:$0x7]   ;;  %v1220_v6 = vld [vmem:[#allocation0 + $0x49] ss:$8 sm:$0x78]  }
  0x6a   :  { %v1372_v9 = vld [vmem:[#allocation0 + $0x149] ss:$8 sm:$0x78]   ;;  %v1359_v10 = vsel %vm574_vm1, %v1357_v2, %v1355_v1  ;;  %v1376_v11 = vld [vmem:[#allocation0 + $0x171] sm:$0x80]   ;;  %v1222_v15 = vsel %vm570_vm0, %v1220_v6, %v1218_v5 }
  0x6b   :  { %v1408_v12 = vld [vmem:[#allocation0 + $0x1a0] ss:$8 sm:$0x7]   ;;  %v1410_v14 = vld [vmem:[#allocation0 + $0x189] ss:$8 sm:$0x78]  }
  0x6c   :  { %v1224_v16 = vld [vmem:[#allocation0 + $0x71] sm:$0x80]   ;;  %v1412_v18 = vsel %vm570_vm0, %v1410_v14, %v1408_v12  ;;  %v1275_v22 = vld [vmem:[#allocation0 + $0xc0] ss:$8 sm:$0x7]  }
  0x6d   :  { %1101 = vrot.lane.b32.xlu1 %v1100_v4, %s3091_s0  ;;  %v1169_v4 = vsel %vm574_vm1, %v1167_v62, %v1165_v61  ;;  %v1414_v19 = vld [vmem:[#allocation0 + $0x1b1] sm:$0x80]   ;;  %v1226_v21 = vsel %vm574_vm1, %v1224_v16, %v1222_v15  ;;  %v1427_v24 = vld [vmem:[#allocation0 + $0x1c0] ss:$8 sm:$0x7]  }
  0x6e   :  { %949 = vrot.lane.b32.xlu2 %v948_v7, %s3091_s0  ;;  %v1370_v7 = vld [vmem:[#allocation0 + $0x160] ss:$8 sm:$0x7]   ;;  %v1429_v25 = vld [vmem:[#allocation0 + $0x1a9] ss:$8 sm:$0x78]   ;;  %v1416_v27 = vsel %vm574_vm1, %v1414_v19, %v1412_v18 }
  0x6f   :  { %v1374_v13 = vsel %vm570_vm0, %v1372_v9, %v1370_v7  ;;  %v1433_v28 = vld [vmem:[#allocation0 + $0x1d1] sm:$0x80]   ;;  %v1458_v29 = vld [vmem:[#allocation0] ss:$8 sm:$0x7]   ;;  %v1431_v31 = vsel %vm570_vm0, %v1429_v25, %v1427_v24 }
  0x70   :  { %1139 = vrot.lane.b32.xlu0 %v1138_v8, %s3091_s0  ;;  %v563_v30 = vld [vmem:[#allocation0 + $0x1f0] sm:$0x3]   ;;  %v1281_v34 = vld [vmem:[#allocation0 + $0xd1] sm:$0x80]  }
  0x71   :  { %2753 = vst.msk [vmem:[%s5196_s1 + $0x1f0] ss:$504 sm:$0x3] %vm255_vm3, %v563_v30   ;;  %v1464_v37 = vld [vmem:[#allocation0 + $0x11] sm:$0x80]  }
  0x72   :  { %v1332_v41 = vld [vmem:[#allocation0 + $0x120] ss:$8 sm:$0x7]   ;;  %v1334_v42 = vld [vmem:[#allocation0 + $0x109] ss:$8 sm:$0x78]  }
  0x73   :  { %v1477_v43 = vld [vmem:[#allocation0 + $0x20] ss:$8 sm:$0x7]   ;;  %v1479_v44 = vld [vmem:[#allocation0 + $0x9] ss:$8 sm:$0x78]  }
  0x74   :  { %v1483_v46 = vld [vmem:[#allocation0 + $0x31] sm:$0x80]   ;;  %v1481_v49 = vsel %vm570_vm0, %v1479_v44, %v1477_v43  ;;  %v1517_v50 = vld [vmem:[#allocation0 + $0x49] ss:$8 sm:$0x78]  }
  0x75   :  { %1154 = vrot.lane.b32.xlu1 %v1153_v17, %s3091_s0  ;;  %v1378_v17 = vsel %vm574_vm1, %v1376_v11, %v1374_v13  ;;  %v1338_v52 = vld [vmem:[#allocation0 + $0x131] sm:$0x80]   ;;  %v1485_v53 = vsel %vm574_vm1, %v1483_v46, %v1481_v49  ;;  %v1534_v57 = vld [vmem:[#allocation0 + $0x80] ss:$8 sm:$0x7]  }
  0x76   :  { %1006 = vrot.lane.b32.xlu2 %v1005_v20, %s3091_s0  ;;  %v1521_v55 = vld [vmem:[#allocation0 + $0x71] sm:$0x80]   ;;  %v1536_v58 = vld [vmem:[#allocation0 + $0x69] ss:$8 sm:$0x78]  }
  0x77   :  { %v1389_v60 = vld [vmem:[#allocation0 + $0x180] ss:$8 sm:$0x7]   ;;  %v1391_v61 = vld [vmem:[#allocation0 + $0x169] ss:$8 sm:$0x78]  }
  0x78   :  { %1189 = vrot.lane.b32.xlu0 %v1188_v23, %s3092_s5  ;;  %v1277_v23 = vld [vmem:[#allocation0 + $0xa9] ss:$8 sm:$0x78]   ;;  %v1540_v62 = vld [vmem:[#allocation0 + $0x91] sm:$0x80]  }
  0x79   :  { %v1279_v33 = vsel %vm570_vm0, %v1277_v23, %v1275_v22  ;;  %v1574_v1 = vld [vmem:[#allocation0 + $0xa9] ss:$8 sm:$0x78]   ;;  %v1597_v14 = vld [vmem:[#allocation0 + $0xf1] sm:$0x80]  }
  0x7a   :  { %v1283_v40 = vsel %vm574_vm1, %v1281_v34, %v1279_v33  ;;  %v1593_v11 = vld [vmem:[#allocation0 + $0xc9] ss:$8 sm:$0x78]   ;;  %v1446_v15 = vld [vmem:[#allocation0 + $0x1e0] ss:$8 sm:$0x7]  }
  0x7b   :  { %v1629_v16 = vld [vmem:[#allocation0 + $0x120] ss:$8 sm:$0x7]   ;;  %v1631_v18 = vld [vmem:[#allocation0 + $0x109] ss:$8 sm:$0x78]  }
  0x7c   :  { %v1633_v22 = vsel %vm570_vm0, %v1631_v18, %v1629_v16  ;;  %v1635_v23 = vld [vmem:[#allocation0 + $0x131] sm:$0x80]   ;;  %v1648_v25 = vld [vmem:[#allocation0 + $0x140] ss:$8 sm:$0x7]  }
  0x7d   :  { %1208 = vrot.lane.b32.xlu1 %v1207_v32, %s3092_s5  ;;  %v1460_v32 = vld [vmem:[#allocation0 - $0x17] ss:$8 sm:$0x78]   ;;  %v1654_v30 = vld [vmem:[#allocation0 + $0x151] sm:$0x80]  }
  0x7e   :  { %1063 = vrot.lane.b32.xlu2 %v1062_v35, %s3091_s0  ;;  %v1435_v35 = vsel %vm574_vm1, %v1433_v28, %v1431_v31  ;;  %v1462_v36 = vsel %vm570_vm0, %v1460_v32, %v1458_v29  ;;  %v1496_v28 = vld [vmem:[#allocation0 + $0x40] ss:$8 sm:$0x7]   ;;  %v1498_v29 = vld [vmem:[#allocation0 + $0x29] ss:$8 sm:$0x78]  }
  0x7f   :  { %v1466_v45 = vsel %vm574_vm1, %v1464_v37, %v1462_v36  ;;  %v1686_v33 = vld [vmem:[#allocation0 + $0x180] ss:$8 sm:$0x7]   ;;  %v1688_v34 = vld [vmem:[#allocation0 + $0x169] ss:$8 sm:$0x78]   ;;  %v1500_v36 = vsel %vm570_vm0, %v1498_v29, %v1496_v28 }
  0x80   :  { %1246 = vrot.lane.b32.xlu0 %v1245_v38, %s3092_s5  ;;  %v1502_v37 = vld [vmem:[#allocation0 + $0x51] sm:$0x80]   ;;  %v1553_v43 = vld [vmem:[#allocation0 + $0xa0] ss:$8 sm:$0x7]  }
  0x81   :  { %v577_v47 = vpop.permute.xlu0 %576   ;;  %v1705_v44 = vld [vmem:[#allocation0 + $0x1a0] ss:$8 sm:$0x7]   ;;  %v1814_v16 = vld [vmem:[#allocation0 + $0x71] sm:$0x80]  }
  0x82   :  { %2754 = vst.msk [vmem:[%s5196_s1 + $0x1] ss:$8 sm:$0x7] %vm255_vm3, %v577_v47   ;;  %v1724_v29 = vld [vmem:[#allocation0 + $0x1c0] ss:$8 sm:$0x7]  }
  0x83   :  { %2755 = vst.msk [vmem:[%s5196_s1 + $0x1e1] ss:$8 sm:$0x78] %vm255_vm3, %v577_v47  }
  0x84   :  { %2756 = vst.msk [vmem:[%s5196_s1 + $0x12] sm:$0x80] %vm255_vm3, %v577_v47   ;;  %v1515_v47 = vld [vmem:[#allocation0 + $0x60] ss:$8 sm:$0x7]  }
  0x85   :  { %1265 = vrot.lane.b32.xlu1 %v1264_v48, %s3092_s5 }
  0x86   :  { %1120 = vrot.lane.b32.xlu2 %v1119_v51, %s3091_s0  ;;  %v1336_v51 = vsel %vm570_vm0, %v1334_v42, %v1332_v41  ;;  %v1692_v41 = vld [vmem:[#allocation0 + $0x191] sm:$0x80]   ;;  %v1504_v42 = vsel %vm574_vm1, %v1502_v37, %v1500_v36 }
  0x87   :  { %v1340_v56 = vsel %vm574_vm1, %v1338_v52, %v1336_v51 }
  0x88   :  { %1303 = vrot.lane.b32.xlu0 %v1302_v54, %s3092_s5  ;;  %v1519_v54 = vsel %vm570_vm0, %v1517_v50, %v1515_v47  ;;  %v1555_v47 = vld [vmem:[#allocation0 + $0x89] ss:$8 sm:$0x78]   ;;  %v1711_v50 = vld [vmem:[#allocation0 + $0x1b1] sm:$0x80]  }
  0x89   :  { %v596_v63 = vpop.permute.xlu0 %595   ;;  %v1523_v59 = vsel %vm574_vm1, %v1521_v55, %v1519_v54  ;;  %v1557_v52 = vsel %vm570_vm0, %v1555_v47, %v1553_v43  ;;  %v1770_v47 = vld [vmem:[#allocation0 + $0x20] ss:$8 sm:$0x7]  }
  0x8a   :  { %2757 = vst.msk [vmem:[%s5196_s1 + $0x21] ss:$8 sm:$0x7] %vm255_vm3, %v596_v63   ;;  %v615_v3 = vpop.permute.xlu1 %614  }
  0x8b   :  { %2758 = vst.msk [vmem:[%s5196_s1 + $0x201] ss:$8 sm:$0x78] %vm255_vm3, %v596_v63   ;;  %v653_v8 = vpop.permute.xlu2 %652  }
  0x8c   :  { %2759 = vst.msk [vmem:[%s5196_s1 + $0x32] sm:$0x80] %vm255_vm3, %v596_v63   ;;  %v1538_v63 = vsel %vm570_vm0, %v1536_v58, %v1534_v57  ;;  %v3679_v57 = vld.sshfl [vmem:[#allocation0 + $0x1e0] sm:$0xff pattern:$0x99999180]  }
  0x8d   :  { %1322 = vrot.lane.b32.xlu1 %v1321_v0, %s3092_s5  ;;  %2760 = vst.msk [vmem:[%s5196_s1 + $0x41] ss:$8 sm:$0x7] %vm255_vm3, %v615_v3   ;;  %v1572_v0 = vld [vmem:[#allocation0 + $0xc0] ss:$8 sm:$0x7]   ;;  %v1542_v6 = vsel %vm574_vm1, %v1540_v62, %v1538_v63 }
  0x8e   :  { %1170 = vrot.lane.b32.xlu2 %v1169_v4, %s3092_s5  ;;  %2761 = vst.msk [vmem:[%s5196_s1 + $0x221] ss:$8 sm:$0x78] %vm255_vm3, %v615_v3   ;;  %v1395_v4 = vld [vmem:[#allocation0 + $0x191] sm:$0x80]   ;;  %v1576_v7 = vsel %vm570_vm0, %v1574_v1, %v1572_v0 }
  0x8f   :  { %2762 = vst.msk [vmem:[%s5196_s1 + $0x52] sm:$0x80] %vm255_vm3, %v615_v3   ;;  %v1393_v3 = vsel %vm570_vm0, %v1391_v61, %v1389_v60  ;;  %v1610_v58 = vld [vmem:[#allocation0 + $0x100] ss:$8 sm:$0x7]  }
  0x90   :  { %1360 = vrot.lane.b32.xlu0 %v1359_v10, %s3092_s5  ;;  %2766 = vst.msk [vmem:[%s5196_s1 + $0x81] ss:$8 sm:$0x7] %vm255_vm3, %v653_v8   ;;  %v1397_v9 = vsel %vm574_vm1, %v1395_v4, %v1393_v3  ;;  %v1591_v10 = vld [vmem:[#allocation0 + $0xe0] ss:$8 sm:$0x7]  }
  0x91   :  { %2767 = vst.msk [vmem:[%s5196_s1 + $0x261] ss:$8 sm:$0x78] %vm255_vm3, %v653_v8   ;;  %v1751_v60 = vld [vmem:[#allocation0] ss:$8 sm:$0x7]  }
  0x92   :  { %2768 = vst.msk [vmem:[%s5196_s1 + $0x92] sm:$0x80] %vm255_vm3, %v653_v8   ;;  %v634_v20 = vpop.permute.xlu1 %633   ;;  %v1578_v8 = vld [vmem:[#allocation0 + $0xd1] sm:$0x80]  }
  0x93   :  { %2763 = vst.msk [vmem:[%s5196_s1 + $0x61] ss:$8 sm:$0x7] %vm255_vm3, %v634_v20   ;;  %v1580_v12 = vsel %vm574_vm1, %v1578_v8, %v1576_v7  ;;  %v1753_v61 = vld [vmem:[#allocation0 - $0x17] ss:$8 sm:$0x78]  }
  0x94   :  { %2764 = vst.msk [vmem:[%s5196_s1 + $0x241] ss:$8 sm:$0x78] %vm255_vm3, %v634_v20   ;;  %v691_v26 = vpop.permute.xlu0 %690   ;;  %v1757_v62 = vld [vmem:[#allocation0 + $0x11] sm:$0x80]   ;;  %v1755_v1 = vsel %vm570_vm0, %v1753_v61, %v1751_v60 }
  0x95   :  { %1379 = vrot.lane.b32.xlu1 %v1378_v17, %s3092_s5  ;;  %2765 = vst.msk [vmem:[%s5196_s1 + $0x72] sm:$0x80] %vm255_vm3, %v634_v20   ;;  %v1595_v17 = vsel %vm570_vm0, %v1593_v11, %v1591_v10  ;;  %v1448_v20 = vld [vmem:[#allocation0 + $0x1c9] ss:$8 sm:$0x38]   ;;  %v1759_v7 = vsel %vm574_vm1, %v1757_v62, %v1755_v1 }
  0x96   :  { %1227 = vrot.lane.b32.xlu2 %v1226_v21, %s3092_s5  ;;  %2772 = vst.msk [vmem:[%s5196_s1 + $0xc1] ss:$8 sm:$0x7] %vm255_vm3, %v691_v26   ;;  %v1599_v21 = vsel %vm574_vm1, %v1597_v14, %v1595_v17  ;;  %v1450_v24 = vsel %vm855_vm2, %v1448_v20, %v1446_v15  ;;  %v1789_v63 = vld [vmem:[#allocation0 + $0x40] ss:$8 sm:$0x7]  }
  0x97   :  { %2773 = vst.msk [vmem:[%s5196_s1 + $0x2a1] ss:$8 sm:$0x78] %vm255_vm3, %v691_v26   ;;  %v1667_v11 = vld [vmem:[#allocation0 + $0x160] ss:$8 sm:$0x7]  }
  0x98   :  { %1417 = vrot.lane.b32.xlu0 %v1416_v27, %s3092_s5  ;;  %2774 = vst.msk [vmem:[%s5196_s1 + $0xd2] sm:$0x80] %vm255_vm3, %v691_v26   ;;  %v1650_v26 = vld [vmem:[#allocation0 + $0x129] ss:$8 sm:$0x78]   ;;  %v1637_v27 = vsel %vm574_vm1, %v1635_v23, %v1633_v22 }
  0x99   :  { %v1652_v32 = vsel %vm570_vm0, %v1650_v26, %v1648_v25  ;;  %v1810_v14 = vld [vmem:[#allocation0 + $0x49] ss:$8 sm:$0x78]   ;;  %v1846_v17 = vld [vmem:[#allocation0 + $0xa0] ss:$8 sm:$0x7]  }
  0x9a   :  { %v672_v38 = vpop.permute.xlu2 %671   ;;  %v710_v39 = vpop.permute.xlu1 %709   ;;  %v1848_v20 = vld [vmem:[#allocation0 + $0x89] ss:$8 sm:$0x78]   ;;  %v1673_v23 = vld [vmem:[#allocation0 + $0x171] sm:$0x80]  }
  0x9b   :  { %2769 = vst.msk [vmem:[%s5196_s1 + $0xa1] ss:$8 sm:$0x7] %vm255_vm3, %v672_v38   ;;  %v1850_v26 = vsel %vm570_vm0, %v1848_v20, %v1846_v17  ;;  %v1776_v60 = vld [vmem:[#allocation0 + $0x31] sm:$0x80]  }
  0x9c   :  { %2770 = vst.msk [vmem:[%s5196_s1 + $0x281] ss:$8 sm:$0x78] %vm255_vm3, %v672_v38   ;;  %v1884_v20 = vld [vmem:[#allocation0 + $0xe0] ss:$8 sm:$0x7]  }
  0x9d   :  { %1436 = vrot.lane.b32.xlu1 %v1435_v35, %s3092_s5  ;;  %2771 = vst.msk [vmem:[%s5196_s1 + $0xb2] sm:$0x80] %vm255_vm3, %v672_v38  }
  0x9e   :  { %1284 = vrot.lane.b32.xlu2 %v1283_v40, %s3092_s5  ;;  %2775 = vst.msk [vmem:[%s5196_s1 + $0xe1] ss:$8 sm:$0x7] %vm255_vm3, %v710_v39   ;;  %v748_v48 = vpop.permute.xlu0 %747   ;;  %v1690_v40 = vsel %vm570_vm0, %v1688_v34, %v1686_v33  ;;  %v1871_v34 = vld [vmem:[#allocation0 + $0xd1] sm:$0x80]  }
  0x9f   :  { %2776 = vst.msk [vmem:[%s5196_s1 + $0x2c1] ss:$8 sm:$0x78] %vm255_vm3, %v710_v39   ;;  %v1694_v46 = vsel %vm574_vm1, %v1692_v41, %v1690_v40  ;;  %v1730_v41 = vld [vmem:[#allocation0 + $0x1d1] sm:$0x80]  }
  0xa0   :  { %1467 = vrot.lane.b32.xlu0 %v1466_v45, %s3093_s11  ;;  %2777 = vst.msk [vmem:[%s5196_s1 + $0xf2] sm:$0x80] %vm255_vm3, %v710_v39   ;;  %v1656_v39 = vsel %vm574_vm1, %v1654_v30, %v1652_v32  ;;  %v1707_v45 = vld [vmem:[#allocation0 + $0x189] ss:$8 sm:$0x78]  }
  0xa1   :  { %2781 = vst.msk [vmem:[%s5196_s1 + $0x121] ss:$8 sm:$0x7] %vm255_vm3, %v748_v48   ;;  %v1709_v49 = vsel %vm570_vm0, %v1707_v45, %v1705_v44  ;;  %v1726_v30 = vld [vmem:[#allocation0 + $0x1a9] ss:$8 sm:$0x78]  }
  0xa2   :  { %2782 = vst.msk [vmem:[%s5196_s1 + $0x301] ss:$8 sm:$0x78] %vm255_vm3, %v748_v48   ;;  %v1713_v55 = vsel %vm574_vm1, %v1711_v50, %v1709_v49  ;;  %v1867_v32 = vld [vmem:[#allocation0 + $0xa9] ss:$8 sm:$0x78]   ;;  %v1728_v40 = vsel %vm570_vm0, %v1726_v30, %v1724_v29 }
  0xa3   :  { %2783 = vst.msk [vmem:[%s5196_s1 + $0x132] sm:$0x80] %vm255_vm3, %v748_v48   ;;  %v1909_v45 = vld [vmem:[#allocation0 + $0x111] sm:$0x80]  }
  0xa4   :  { %v1922_v49 = vld [vmem:[#allocation0 + $0x120] ss:$8 sm:$0x7]   ;;  %v1924_v50 = vld [vmem:[#allocation0 + $0x109] ss:$8 sm:$0x78]  }
  0xa5   :  { %1486 = vrot.lane.b32.xlu1 %v1485_v53, %s3093_s11  ;;  %v1559_v53 = vld [vmem:[#allocation0 + $0xb1] sm:$0x80]  }
  0xa6   :  { %1341 = vrot.lane.b32.xlu2 %v1340_v56, %s3092_s5  ;;  %v1561_v56 = vsel %vm574_vm1, %v1559_v53, %v1557_v52  ;;  %v1928_v52 = vld [vmem:[#allocation0 + $0x131] sm:$0x80]   ;;  %v1960_v53 = vld [vmem:[#allocation0 + $0x160] ss:$8 sm:$0x7]  }
  0xa8   :  { %1524 = vrot.lane.b32.xlu0 %v1523_v59, %s3093_s11  ;;  %v729_v2 = vpop.permute.xlu2 %728   ;;  %v767_v5 = vpop.permute.xlu1 %766   ;;  %v1612_v59 = vld [vmem:[#allocation0 + $0xe9] ss:$8 sm:$0x78]  }
  0xa9   :  { %2778 = vst.msk [vmem:[%s5196_s1 + $0x101] ss:$8 sm:$0x7] %vm255_vm3, %v729_v2   ;;  %v1614_v4 = vsel %vm570_vm0, %v1612_v59, %v1610_v58 }
  0xaa   :  { %2779 = vst.msk [vmem:[%s5196_s1 + $0x2e1] ss:$8 sm:$0x78] %vm255_vm3, %v729_v2  }
  0xab   :  { %2780 = vst.msk [vmem:[%s5196_s1 + $0x112] sm:$0x80] %vm255_vm3, %v729_v2   ;;  %v1791_v2 = vld [vmem:[#allocation0 + $0x29] ss:$8 sm:$0x78]  }
  0xac   :  { %2784 = vst.msk [vmem:[%s5196_s1 + $0x141] ss:$8 sm:$0x7] %vm255_vm3, %v767_v5   ;;  %v1793_v8 = vsel %vm570_vm0, %v1791_v2, %v1789_v63  ;;  %v1827_v2 = vld [vmem:[#allocation0 + $0x80] ss:$8 sm:$0x7]  }
  0xad   :  { %1543 = vrot.lane.b32.xlu1 %v1542_v6, %s3093_s11  ;;  %2785 = vst.msk [vmem:[%s5196_s1 + $0x321] ss:$8 sm:$0x78] %vm255_vm3, %v767_v5   ;;  %v805_v13 = vpop.permute.xlu0 %804  }
  0xae   :  { %1398 = vrot.lane.b32.xlu2 %v1397_v9, %s3092_s5  ;;  %2786 = vst.msk [vmem:[%s5196_s1 + $0x152] sm:$0x80] %vm255_vm3, %v767_v5   ;;  %v1616_v5 = vld [vmem:[#allocation0 + $0x111] sm:$0x80]  }
  0xaf   :  { %2790 = vst.msk [vmem:[%s5196_s1 + $0x181] ss:$8 sm:$0x7] %vm255_vm3, %v805_v13   ;;  %v1795_v9 = vld [vmem:[#allocation0 + $0x51] sm:$0x80]   ;;  %v1618_v10 = vsel %vm574_vm1, %v1616_v5, %v1614_v4 }
  0xb0   :  { %1581 = vrot.lane.b32.xlu0 %v1580_v12, %s3093_s11  ;;  %v786_v19 = vpop.permute.xlu2 %785   ;;  %2791 = vst.msk [vmem:[%s5196_s1 + $0x361] ss:$8 sm:$0x78] %vm255_vm3, %v805_v13   ;;  %v1669_v12 = vld [vmem:[#allocation0 + $0x149] ss:$8 sm:$0x78]   ;;  %v1797_v15 = vsel %vm574_vm1, %v1795_v9, %v1793_v8 }
  0xb1   :  { %2787 = vst.msk [vmem:[%s5196_s1 + $0x161] ss:$8 sm:$0x7] %vm255_vm3, %v786_v19   ;;  %v1671_v22 = vsel %vm570_vm0, %v1669_v12, %v1667_v11  ;;  %v1979_v4 = vld [vmem:[#allocation0 + $0x180] ss:$8 sm:$0x7]  }
  0xb2   :  { %2788 = vst.msk [vmem:[%s5196_s1 + $0x341] ss:$8 sm:$0x78] %vm255_vm3, %v786_v19   ;;  %v1675_v28 = vsel %vm574_vm1, %v1673_v23, %v1671_v22  ;;  %v1981_v5 = vld [vmem:[#allocation0 + $0x169] ss:$8 sm:$0x78]  }
  0xb3   :  { %2789 = vst.msk [vmem:[%s5196_s1 + $0x172] sm:$0x80] %vm255_vm3, %v786_v19   ;;  %v2017_v8 = vld [vmem:[#allocation0 + $0x1c0] ss:$8 sm:$0x7]  }
  0xb4   :  { %2792 = vst.msk [vmem:[%s5196_s1 + $0x192] sm:$0x80] %vm255_vm3, %v805_v13   ;;  %v1808_v13 = vld [vmem:[#allocation0 + $0x60] ss:$8 sm:$0x7]  }
  0xb5   :  { %1600 = vrot.lane.b32.xlu1 %v1599_v21, %s3093_s11  ;;  %v1812_v19 = vsel %vm570_vm0, %v1810_v14, %v1808_v13  ;;  %v2019_v11 = vld [vmem:[#allocation0 + $0x1a9] ss:$8 sm:$0x78]   ;;  %v1833_v14 = vld [vmem:[#allocation0 + $0x91] sm:$0x80]  }
  0xb6   :  { %1451 = vrot.lane.b32.xlu2 %v1450_v24, %s3092_s5  ;;  %v1816_v25 = vsel %vm574_vm1, %v1814_v16, %v1812_v19  ;;  %v2021_v17 = vsel %vm570_vm0, %v2019_v11, %v2017_v8  ;;  %v1886_v22 = vld [vmem:[#allocation0 + $0xc9] ss:$8 sm:$0x78]   ;;  %v2063_v23 = vld [vmem:[#allocation0 + $0x20] ss:$8 sm:$0x7]  }
  0xb7   :  { %v824_v31 = vpop.permute.xlu1 %823   ;;  %v2196_v8 = vld [vmem:[#allocation0 + $0x100] ss:$8 sm:$0x7]   ;;  %v2202_v11 = vld [vmem:[#allocation0 + $0x111] sm:$0x80]  }
  0xb8   :  { %1638 = vrot.lane.b32.xlu0 %v1637_v27, %s3093_s11  ;;  %2793 = vst.msk [vmem:[%s5196_s1 + $0x1a1] ss:$8 sm:$0x7] %vm255_vm3, %v824_v31   ;;  %v843_v35 = vpop.permute.xlu2 %842   ;;  %v1852_v27 = vld [vmem:[#allocation0 + $0xb1] sm:$0x80]  }
  0xb9   :  { %2794 = vst.msk [vmem:[%s5196_s1 + $0x381] ss:$8 sm:$0x78] %vm255_vm3, %v824_v31   ;;  %v1854_v33 = vsel %vm574_vm1, %v1852_v27, %v1850_v26  ;;  %v1888_v27 = vsel %vm570_vm0, %v1886_v22, %v1884_v20  ;;  %v2240_v22 = vld [vmem:[#allocation0 + $0x151] sm:$0x80]  }
  0xba   :  { %2795 = vst.msk [vmem:[%s5196_s1 + $0x1b2] sm:$0x80] %vm255_vm3, %v824_v31   ;;  %v858_v38 = vpop.permute.xlu0 %857   ;;  %v1865_v31 = vld [vmem:[#allocation0 + $0xc0] ss:$8 sm:$0x7]  }
  0xbb   :  { %2796 = vst.msk [vmem:[%s5196_s1 + $0x1c1] ss:$8 sm:$0x7] %vm255_vm3, %v843_v35   ;;  %v1869_v37 = vsel %vm570_vm0, %v1867_v32, %v1865_v31  ;;  %v2069_v31 = vld [vmem:[#allocation0 + $0x31] sm:$0x80]  }
  0xbc   :  { %2797 = vst.msk [vmem:[%s5196_s1 + $0x3a1] ss:$8 sm:$0x78] %vm255_vm3, %v843_v35   ;;  %v1873_v43 = vsel %vm574_vm1, %v1871_v34, %v1869_v37  ;;  %v1943_v34 = vld [vmem:[#allocation0 + $0x129] ss:$8 sm:$0x78]  }
  0xbd   :  { %2798 = vst.msk [vmem:[%s5196_s1 + $0x1d2] sm:$0x80] %vm255_vm3, %v843_v35   ;;  %1657 = vrot.lane.b32.xlu1 %v1656_v39, %s3093_s11  ;;  %v1903_v35 = vld [vmem:[#allocation0 + $0x100] ss:$8 sm:$0x7]  }
  0xbe   :  { %2799 = vst.msk [vmem:[%s5196_s1 + $0x1e1] ss:$8 sm:$0x7] %vm255_vm3, %v858_v38   ;;  %1505 = vrot.lane.b32.xlu2 %v1504_v42, %s3093_s11 }
  0xbf   :  { %2800 = vst.msk [vmem:[%s5196_s1 + $0x3c1] ss:$8 sm:$0x38] %vm255_vm3, %v858_v38   ;;  %v874_v48 = vpop.permute.xlu1 %873   ;;  %v1905_v38 = vld [vmem:[#allocation0 + $0xe9] ss:$8 sm:$0x78]  }
  0xc0   :  { %1695 = vrot.lane.b32.xlu0 %v1694_v46, %s3093_s11  ;;  %2801 = vst.msk [vmem:[%s5196_s1 + $0x2] ss:$8 sm:$0x7] %vm255_vm3, %v874_v48   ;;  %v893_v51 = vpop.permute.xlu2 %892   ;;  %v1907_v44 = vsel %vm570_vm0, %v1905_v38, %v1903_v35  ;;  %v1732_v46 = vsel %vm574_vm1, %v1730_v41, %v1728_v40  ;;  %v2082_v35 = vld [vmem:[#allocation0 + $0x40] ss:$8 sm:$0x7]  }
  0xc1   :  { %2802 = vst.msk [vmem:[%s5196_s1 + $0x1e2] ss:$8 sm:$0x78] %vm255_vm3, %v874_v48   ;;  %v2088_v38 = vld [vmem:[#allocation0 + $0x51] sm:$0x80]  }
  0xc2   :  { %2803 = vst.msk [vmem:[%s5196_s1 + $0x13] sm:$0x80] %vm255_vm3, %v874_v48   ;;  %v912_v54 = vpop.permute.xlu0 %911   ;;  %v1772_v48 = vld [vmem:[#allocation0 + $0x9] ss:$8 sm:$0x78]  }
  0xc3   :  { %2804 = vst.msk [vmem:[%s5196_s1 + $0x22] ss:$8 sm:$0x7] %vm255_vm3, %v893_v51   ;;  %v1774_v59 = vsel %vm570_vm0, %v1772_v48, %v1770_v47 }
  0xc4   :  { %2805 = vst.msk [vmem:[%s5196_s1 + $0x202] ss:$8 sm:$0x78] %vm255_vm3, %v893_v51   ;;  %v1778_v1 = vsel %vm574_vm1, %v1776_v60, %v1774_v59 }
  0xc5   :  { %2806 = vst.msk [vmem:[%s5196_s1 + $0x33] sm:$0x80] %vm255_vm3, %v893_v51   ;;  %1714 = vrot.lane.b32.xlu1 %v1713_v55, %s3093_s11  ;;  %v1911_v51 = vsel %vm574_vm1, %v1909_v45, %v1907_v44  ;;  %v1926_v55 = vsel %vm570_vm0, %v1924_v50, %v1922_v49  ;;  %v1947_v45 = vld [vmem:[#allocation0 + $0x151] sm:$0x80]  }
  0xc6   :  { %2807 = vst.msk [vmem:[%s5196_s1 + $0x42] ss:$8 sm:$0x7] %vm255_vm3, %v912_v54   ;;  %1562 = vrot.lane.b32.xlu2 %v1561_v56, %s3093_s11  ;;  %v1962_v56 = vld [vmem:[#allocation0 + $0x149] ss:$8 sm:$0x78]   ;;  %v1930_v62 = vsel %vm574_vm1, %v1928_v52, %v1926_v55 }
  0xc7   :  { %2808 = vst.msk [vmem:[%s5196_s1 + $0x222] ss:$8 sm:$0x78] %vm255_vm3, %v912_v54   ;;  %v931_v0 = vpop.permute.xlu1 %930   ;;  %v1964_v63 = vsel %vm570_vm0, %v1962_v56, %v1960_v53  ;;  %v2126_v49 = vld [vmem:[#allocation0 + $0x91] sm:$0x80]  }
  0xc8   :  { %2809 = vst.msk [vmem:[%s5196_s1 + $0x53] sm:$0x80] %vm255_vm3, %v912_v54   ;;  %1744 = vrot.lane.b32.xlu0 %v3679_v57, %s3093_s11  ;;  %v950_v3 = vpop.permute.xlu2 %949   ;;  %v2000_v52 = vld [vmem:[#allocation0 + $0x189] ss:$8 sm:$0x78]  }
  0xc9   :  { %2810 = vst.msk [vmem:[%s5196_s1 + $0x62] ss:$8 sm:$0x7] %vm255_vm3, %v931_v0   ;;  %v2139_v53 = vld [vmem:[#allocation0 + $0xa0] ss:$8 sm:$0x7]  }
  0xca   :  { %2811 = vst.msk [vmem:[%s5196_s1 + $0x242] ss:$8 sm:$0x78] %vm255_vm3, %v931_v0   ;;  %v969_v6 = vpop.permute.xlu0 %968   ;;  %v2145_v56 = vld [vmem:[#allocation0 + $0xb1] sm:$0x80]  }
  0xcb   :  { %2812 = vst.msk [vmem:[%s5196_s1 + $0x73] sm:$0x80] %vm255_vm3, %v931_v0   ;;  %v1966_v0 = vld [vmem:[#allocation0 + $0x171] sm:$0x80]  }
  0xcc   :  { %2813 = vst.msk [vmem:[%s5196_s1 + $0x82] ss:$8 sm:$0x7] %vm255_vm3, %v950_v3  }
  0xcd   :  { %2814 = vst.msk [vmem:[%s5196_s1 + $0x262] ss:$8 sm:$0x78] %vm255_vm3, %v950_v3   ;;  %1760 = vrot.lane.b32.xlu1 %v1759_v7, %s3094_s29  ;;  %v1985_v7 = vld [vmem:[#allocation0 + $0x191] sm:$0x80]  }
  0xce   :  { %2815 = vst.msk [vmem:[%s5196_s1 + $0x93] sm:$0x80] %vm255_vm3, %v950_v3   ;;  %1619 = vrot.lane.b32.xlu2 %v1618_v10, %s3093_s11  ;;  %v1829_v3 = vld [vmem:[#allocation0 + $0x69] ss:$8 sm:$0x78]   ;;  %v1983_v10 = vsel %vm570_vm0, %v1981_v5, %v1979_v4 }
  0xcf   :  { %2816 = vst.msk [vmem:[%s5196_s1 + $0xa2] ss:$8 sm:$0x7] %vm255_vm3, %v969_v6   ;;  %v988_v18 = vpop.permute.xlu1 %987   ;;  %v1831_v13 = vsel %vm570_vm0, %v1829_v3, %v1827_v2  ;;  %v1987_v16 = vsel %vm574_vm1, %v1985_v7, %v1983_v10  ;;  %v2183_v4 = vld [vmem:[#allocation0 + $0xf1] sm:$0x80]  }
  0xd0   :  { %2817 = vst.msk [vmem:[%s5196_s1 + $0x282] ss:$8 sm:$0x78] %vm255_vm3, %v969_v6   ;;  %1798 = vrot.lane.b32.xlu0 %v1797_v15, %s3094_s29  ;;  %v1007_v21 = vpop.permute.xlu2 %1006   ;;  %v1835_v19 = vsel %vm574_vm1, %v1833_v14, %v1831_v13  ;;  %v2046_v7 = vld [vmem:[#allocation0 - $0x17] ss:$8 sm:$0x78]  }
  0xd1   :  { %2818 = vst.msk [vmem:[%s5196_s1 + $0xb3] sm:$0x80] %vm255_vm3, %v969_v6   ;;  %v1968_v6 = vsel %vm574_vm1, %v1966_v0, %v1964_v63  ;;  %v2004_v0 = vld [vmem:[#allocation0 + $0x1b1] sm:$0x80]  }
  0xd2   :  { %2819 = vst.msk [vmem:[%s5196_s1 + $0xc2] ss:$8 sm:$0x7] %vm255_vm3, %v988_v18   ;;  %v1026_v24 = vpop.permute.xlu0 %1025  }
  0xd3   :  { %2820 = vst.msk [vmem:[%s5196_s1 + $0x2a2] ss:$8 sm:$0x78] %vm255_vm3, %v988_v18  }
  0xd4   :  { %2821 = vst.msk [vmem:[%s5196_s1 + $0xd3] sm:$0x80] %vm255_vm3, %v988_v18   ;;  %v2023_v18 = vld [vmem:[#allocation0 + $0x1d1] sm:$0x80]  }
  0xd5   :  { %2822 = vst.msk [vmem:[%s5196_s1 + $0xe2] ss:$8 sm:$0x7] %vm255_vm3, %v1007_v21   ;;  %1817 = vrot.lane.b32.xlu1 %v1816_v25, %s3094_s29  ;;  %v2065_v25 = vld [vmem:[#allocation0 + $0x9] ss:$8 sm:$0x78]  }
  0xd6   :  { %2823 = vst.msk [vmem:[%s5196_s1 + $0x2c2] ss:$8 sm:$0x78] %vm255_vm3, %v1007_v21   ;;  %1676 = vrot.lane.b32.xlu2 %v1675_v28, %s3093_s11  ;;  %v1890_v28 = vld [vmem:[#allocation0 + $0xf1] sm:$0x80]   ;;  %v2067_v30 = vsel %vm570_vm0, %v2065_v25, %v2063_v23 }
  0xd7   :  { %2824 = vst.msk [vmem:[%s5196_s1 + $0xf3] sm:$0x80] %vm255_vm3, %v1007_v21   ;;  %v1045_v36 = vpop.permute.xlu1 %1044   ;;  %v2025_v21 = vsel %vm574_vm1, %v2023_v18, %v2021_v17  ;;  %v1892_v32 = vsel %vm574_vm1, %v1890_v28, %v1888_v27  ;;  %v2071_v37 = vsel %vm574_vm1, %v2069_v31, %v2067_v30  ;;  %v2050_v18 = vld [vmem:[#allocation0 + $0x11] sm:$0x80]  }
  0xd8   :  { %2825 = vst.msk [vmem:[%s5196_s1 + $0x102] ss:$8 sm:$0x7] %vm255_vm3, %v1026_v24   ;;  %1855 = vrot.lane.b32.xlu0 %v1854_v33, %s3094_s29  ;;  %v1064_v39 = vpop.permute.xlu2 %1063   ;;  %v1941_v33 = vld [vmem:[#allocation0 + $0x140] ss:$8 sm:$0x7]  }
  0xd9   :  { %2826 = vst.msk [vmem:[%s5196_s1 + $0x2e2] ss:$8 sm:$0x78] %vm255_vm3, %v1026_v24   ;;  %v1945_v44 = vsel %vm570_vm0, %v1943_v34, %v1941_v33  ;;  %v2103_v25 = vld [vmem:[#allocation0 + $0x49] ss:$8 sm:$0x78]  }
  0xda   :  { %2827 = vst.msk [vmem:[%s5196_s1 + $0x113] sm:$0x80] %vm255_vm3, %v1026_v24   ;;  %v1083_v42 = vpop.permute.xlu0 %1082   ;;  %v1949_v50 = vsel %vm574_vm1, %v1947_v45, %v1945_v44  ;;  %v2255_v27 = vld [vmem:[#allocation0 + $0x149] ss:$8 sm:$0x78]  }
  0xdb   :  { %2828 = vst.msk [vmem:[%s5196_s1 + $0x122] ss:$8 sm:$0x7] %vm255_vm3, %v1045_v36   ;;  %v2291_v30 = vld [vmem:[#allocation0 + $0x1a0] ss:$8 sm:$0x7]  }
  0xdc   :  { %2829 = vst.msk [vmem:[%s5196_s1 + $0x302] ss:$8 sm:$0x78] %vm255_vm3, %v1045_v36   ;;  %v2293_v33 = vld [vmem:[#allocation0 + $0x189] ss:$8 sm:$0x78]  }
  0xdd   :  { %2830 = vst.msk [vmem:[%s5196_s1 + $0x133] sm:$0x80] %vm255_vm3, %v1045_v36   ;;  %1874 = vrot.lane.b32.xlu1 %v1873_v43, %s3094_s29  ;;  %v2084_v36 = vld [vmem:[#allocation0 + $0x29] ss:$8 sm:$0x78]  }
  0xde   :  { %2831 = vst.msk [vmem:[%s5196_s1 + $0x142] ss:$8 sm:$0x7] %vm255_vm3, %v1064_v39   ;;  %1733 = vrot.lane.b32.xlu2 %v1732_v46, %s3093_s11  ;;  %v2086_v41 = vsel %vm570_vm0, %v2084_v36, %v2082_v35  ;;  %v2107_v36 = vld [vmem:[#allocation0 + $0x71] sm:$0x80]  }
  0xdf   :  { %2832 = vst.msk [vmem:[%s5196_s1 + $0x322] ss:$8 sm:$0x78] %vm255_vm3, %v1064_v39   ;;  %v1102_v54 = vpop.permute.xlu1 %1101   ;;  %v2090_v47 = vsel %vm574_vm1, %v2088_v38, %v2086_v41  ;;  %v2310_v44 = vld [vmem:[#allocation0 + $0x1c0] ss:$8 sm:$0x7]  }
  0xe0   :  { %2833 = vst.msk [vmem:[%s5196_s1 + $0x153] sm:$0x80] %vm255_vm3, %v1064_v39   ;;  %1912 = vrot.lane.b32.xlu0 %v1911_v51, %s3094_s29  ;;  %v1121_v58 = vpop.permute.xlu2 %1120   ;;  %v2120_v39 = vld [vmem:[#allocation0 + $0x80] ss:$8 sm:$0x7]  }
  0xe1   :  { %2834 = vst.msk [vmem:[%s5196_s1 + $0x162] ss:$8 sm:$0x7] %vm255_vm3, %v1083_v42   ;;  %v1998_v51 = vld [vmem:[#allocation0 + $0x1a0] ss:$8 sm:$0x7]  }
  0xe2   :  { %2835 = vst.msk [vmem:[%s5196_s1 + $0x342] ss:$8 sm:$0x78] %vm255_vm3, %v1083_v42   ;;  %v1140_v61 = vpop.permute.xlu0 %1139   ;;  %v2002_v63 = vsel %vm570_vm0, %v2000_v52, %v1998_v51  ;;  %v2312_v45 = vld [vmem:[#allocation0 + $0x1a9] ss:$8 sm:$0x78]  }
  0xe3   :  { %2836 = vst.msk [vmem:[%s5196_s1 + $0x173] sm:$0x80] %vm255_vm3, %v1083_v42   ;;  %v2122_v42 = vld [vmem:[#allocation0 + $0x69] ss:$8 sm:$0x78]   ;;  %v2006_v5 = vsel %vm574_vm1, %v2004_v0, %v2002_v63 }
  0xe4   :  { %2837 = vst.msk [vmem:[%s5196_s1 + $0x182] ss:$8 sm:$0x7] %vm255_vm3, %v1102_v54   ;;  %v2124_v48 = vsel %vm570_vm0, %v2122_v42, %v2120_v39  ;;  %v2295_v39 = vsel %vm570_vm0, %v2293_v33, %v2291_v30  ;;  %v2158_v42 = vld [vmem:[#allocation0 + $0xc0] ss:$8 sm:$0x7]  }
  0xe5   :  { %2838 = vst.msk [vmem:[%s5196_s1 + $0x362] ss:$8 sm:$0x78] %vm255_vm3, %v1102_v54   ;;  %1931 = vrot.lane.b32.xlu1 %v1930_v62, %s3094_s29  ;;  %v2128_v55 = vsel %vm574_vm1, %v2126_v49, %v2124_v48  ;;  %v2337_v48 = vld [vmem:[#allocation0] ss:$8 sm:$0x7]  }
  0xe6   :  { %2839 = vst.msk [vmem:[%s5196_s1 + $0x193] sm:$0x80] %vm255_vm3, %v1102_v54   ;;  %1779 = vrot.lane.b32.xlu2 %v1778_v1, %s3094_s29  ;;  %v2141_v54 = vld [vmem:[#allocation0 + $0x89] ss:$8 sm:$0x78]  }
  0xe7   :  { %2840 = vst.msk [vmem:[%s5196_s1 + $0x1a2] ss:$8 sm:$0x7] %vm255_vm3, %v1121_v58   ;;  %v1155_v9 = vpop.permute.xlu1 %1154   ;;  %v2143_v60 = vsel %vm570_vm0, %v2141_v54, %v2139_v53  ;;  %v2339_v51 = vld [vmem:[#allocation0 - $0x17] ss:$8 sm:$0x78]  }
  0xe8   :  { %2841 = vst.msk [vmem:[%s5196_s1 + $0x382] ss:$8 sm:$0x78] %vm255_vm3, %v1121_v58   ;;  %1969 = vrot.lane.b32.xlu0 %v1968_v6, %s3094_s29  ;;  %v1171_v12 = vpop.permute.xlu2 %1170   ;;  %v2147_v2 = vsel %vm574_vm1, %v2145_v56, %v2143_v60  ;;  %v2044_v6 = vld [vmem:[#allocation0] ss:$8 sm:$0x7]  }
  0xe9   :  { %2842 = vst.msk [vmem:[%s5196_s1 + $0x1b3] sm:$0x80] %vm255_vm3, %v1121_v58   ;;  %v2177_v58 = vld [vmem:[#allocation0 + $0xe0] ss:$8 sm:$0x7]   ;;  %v2048_v17 = vsel %vm570_vm0, %v2046_v7, %v2044_v6 }
  0xea   :  { %2843 = vst.msk [vmem:[%s5196_s1 + $0x1c2] ss:$8 sm:$0x7] %vm255_vm3, %v1140_v61   ;;  %v1190_v15 = vpop.permute.xlu0 %1189   ;;  %v2052_v23 = vsel %vm574_vm1, %v2050_v18, %v2048_v17  ;;  %v2164_v54 = vld [vmem:[#allocation0 + $0xd1] sm:$0x80]  }
  0xeb   :  { %2844 = vst.msk [vmem:[%s5196_s1 + $0x3a2] ss:$8 sm:$0x78] %vm255_vm3, %v1140_v61   ;;  %v2356_v63 = vld [vmem:[#allocation0 + $0x20] ss:$8 sm:$0x7]  }
  0xec   :  { %2845 = vst.msk [vmem:[%s5196_s1 + $0x1d3] sm:$0x80] %vm255_vm3, %v1140_v61   ;;  %v2179_v61 = vld [vmem:[#allocation0 + $0xc9] ss:$8 sm:$0x78]  }
  0xed   :  { %2848 = vst.msk [vmem:[%s5196_s1 + $0x3] ss:$8 sm:$0x7] %vm255_vm3, %v1171_v12   ;;  %1988 = vrot.lane.b32.xlu1 %v1987_v16, %s3094_s29  ;;  %v2181_v3 = vsel %vm570_vm0, %v2179_v61, %v2177_v58  ;;  %v2341_v58 = vsel %vm570_vm0, %v2339_v51, %v2337_v48  ;;  %v2215_v61 = vld [vmem:[#allocation0 + $0x120] ss:$8 sm:$0x7]  }
  0xee   :  { %2849 = vst.msk [vmem:[%s5196_s1 + $0x1e3] ss:$8 sm:$0x78] %vm255_vm3, %v1171_v12   ;;  %1836 = vrot.lane.b32.xlu2 %v1835_v19, %s3094_s29  ;;  %v2185_v10 = vsel %vm574_vm1, %v2183_v4, %v2181_v3  ;;  %v2358_v0 = vld [vmem:[#allocation0 + $0x9] ss:$8 sm:$0x78]  }
  0xef   :  { %2850 = vst.msk [vmem:[%s5196_s1 + $0x14] sm:$0x80] %vm255_vm3, %v1171_v12   ;;  %v1209_v24 = vpop.permute.xlu1 %1208   ;;  %v2234_v12 = vld [vmem:[#allocation0 + $0x140] ss:$8 sm:$0x7]  }
  0xf0   :  { %2846 = vst.msk [vmem:[%s5196_s1 + $0x1e2] ss:$8 sm:$0x7] %vm255_vm3, %v1155_v9   ;;  %2026 = vrot.lane.b32.xlu0 %v2025_v21, %s3094_s29  ;;  %v1228_v26 = vpop.permute.xlu2 %1227   ;;  %v2394_v3 = vld [vmem:[#allocation0 + $0x60] ss:$8 sm:$0x7]  }
  0xf1   :  { %2847 = vst.msk [vmem:[%s5196_s1 + $0x3c2] ss:$8 sm:$0x38] %vm255_vm3, %v1155_v9   ;;  %v2198_v9 = vld [vmem:[#allocation0 + $0xe9] ss:$8 sm:$0x78]  }
  0xf2   :  { %2851 = vst.msk [vmem:[%s5196_s1 + $0x23] ss:$8 sm:$0x7] %vm255_vm3, %v1190_v15   ;;  %v1247_v29 = vpop.permute.xlu0 %1246   ;;  %v2200_v14 = vsel %vm570_vm0, %v2198_v9, %v2196_v8  ;;  %v2396_v6 = vld [vmem:[#allocation0 + $0x49] ss:$8 sm:$0x78]  }
  0xf3   :  { %2852 = vst.msk [vmem:[%s5196_s1 + $0x203] ss:$8 sm:$0x78] %vm255_vm3, %v1190_v15   ;;  %v2204_v20 = vsel %vm574_vm1, %v2202_v11, %v2200_v14  ;;  %v2221_v9 = vld [vmem:[#allocation0 + $0x131] sm:$0x80]  }
  0xf4   :  { %2853 = vst.msk [vmem:[%s5196_s1 + $0x34] sm:$0x80] %vm255_vm3, %v1190_v15   ;;  %v2236_v15 = vld [vmem:[#allocation0 + $0x129] ss:$8 sm:$0x78]  }
  0xf5   :  { %2857 = vst.msk [vmem:[%s5196_s1 + $0x63] ss:$8 sm:$0x7] %vm255_vm3, %v1228_v26   ;;  %2037 = vrot.lane.b32.xlu1 %v3679_v57, %s3094_s29  ;;  %v2238_v21 = vsel %vm570_vm0, %v2236_v15, %v2234_v12  ;;  %v2398_v12 = vsel %vm570_vm0, %v2396_v6, %v2394_v3  ;;  %v2272_v15 = vld [vmem:[#allocation0 + $0x180] ss:$8 sm:$0x7]  }
  0xf6   :  { %2858 = vst.msk [vmem:[%s5196_s1 + $0x243] ss:$8 sm:$0x78] %vm255_vm3, %v1228_v26   ;;  %1893 = vrot.lane.b32.xlu2 %v1892_v32, %s3094_s29  ;;  %v2242_v28 = vsel %vm574_vm1, %v2240_v22, %v2238_v21  ;;  %v2413_v17 = vld [vmem:[#allocation0 + $0x80] ss:$8 sm:$0x7]  }
  0xf7   :  { %2859 = vst.msk [vmem:[%s5196_s1 + $0x74] sm:$0x80] %vm255_vm3, %v1228_v26   ;;  %v1266_v40 = vpop.permute.xlu1 %1265   ;;  %v2253_v26 = vld [vmem:[#allocation0 + $0x160] ss:$8 sm:$0x7]  }
  0xf8   :  { %2854 = vst.msk [vmem:[%s5196_s1 + $0x43] ss:$8 sm:$0x7] %vm255_vm3, %v1209_v24   ;;  %2072 = vrot.lane.b32.xlu0 %v2071_v37, %s3095_s30  ;;  %v1285_v43 = vpop.permute.xlu2 %1284   ;;  %v2257_v32 = vsel %vm570_vm0, %v2255_v27, %v2253_v26  ;;  %v2415_v18 = vld [vmem:[#allocation0 + $0x69] ss:$8 sm:$0x78]  }
  0xf9   :  { %2855 = vst.msk [vmem:[%s5196_s1 + $0x223] ss:$8 sm:$0x78] %vm255_vm3, %v1209_v24   ;;  %v2451_v21 = vld [vmem:[#allocation0 + $0xc0] ss:$8 sm:$0x7]  }
  0xfa   :  { %2856 = vst.msk [vmem:[%s5196_s1 + $0x54] sm:$0x80] %vm255_vm3, %v1209_v24   ;;  %v1304_v46 = vpop.permute.xlu0 %1303   ;;  %v2101_v24 = vld [vmem:[#allocation0 + $0x60] ss:$8 sm:$0x7]  }
  0xfb   :  { %2860 = vst.msk [vmem:[%s5196_s1 + $0x83] ss:$8 sm:$0x7] %vm255_vm3, %v1247_v29   ;;  %v2105_v35 = vsel %vm570_vm0, %v2103_v25, %v2101_v24  ;;  %v2453_v24 = vld [vmem:[#allocation0 + $0xa9] ss:$8 sm:$0x78]  }
  0xfc   :  { %2861 = vst.msk [vmem:[%s5196_s1 + $0x263] ss:$8 sm:$0x78] %vm255_vm3, %v1247_v29   ;;  %v2109_v41 = vsel %vm574_vm1, %v2107_v36, %v2105_v35  ;;  %v2278_v27 = vld [vmem:[#allocation0 + $0x191] sm:$0x80]   ;;  %v2455_v30 = vsel %vm570_vm0, %v2453_v24, %v2451_v21 }
  0xfd   :  { %2862 = vst.msk [vmem:[%s5196_s1 + $0x94] sm:$0x80] %vm255_vm3, %v1247_v29   ;;  %2091 = vrot.lane.b32.xlu1 %v2090_v47, %s3095_s30  ;;  %v2259_v29 = vld [vmem:[#allocation0 + $0x171] sm:$0x80]  }
  0xfe   :  { %2866 = vst.msk [vmem:[%s5196_s1 + $0xc3] ss:$8 sm:$0x7] %vm255_vm3, %v1285_v43   ;;  %1950 = vrot.lane.b32.xlu2 %v1949_v50, %s3094_s29  ;;  %v2261_v38 = vsel %vm574_vm1, %v2259_v29, %v2257_v32  ;;  %v2316_v47 = vld [vmem:[#allocation0 + $0x1d1] sm:$0x80]   ;;  %v2314_v50 = vsel %vm570_vm0, %v2312_v45, %v2310_v44 }
  0xff   :  { %2867 = vst.msk [vmem:[%s5196_s1 + $0x2a3] ss:$8 sm:$0x78] %vm255_vm3, %v1285_v43   ;;  %v1323_v59 = vpop.permute.xlu1 %1322   ;;  %v2318_v56 = vsel %vm574_vm1, %v2316_v47, %v2314_v50  ;;  %v2470_v33 = vld [vmem:[#allocation0 + $0xe0] ss:$8 sm:$0x7]  }
 0x100   :  { %2868 = vst.msk [vmem:[%s5196_s1 + $0xd4] sm:$0x80] %vm255_vm3, %v1285_v43   ;;  %2129 = vrot.lane.b32.xlu0 %v2128_v55, %s3095_s30  ;;  %v1342_v62 = vpop.permute.xlu2 %1341   ;;  %v2160_v43 = vld [vmem:[#allocation0 + $0xa9] ss:$8 sm:$0x78]  }
 0x101   :  { %2863 = vst.msk [vmem:[%s5196_s1 + $0xa3] ss:$8 sm:$0x7] %vm255_vm3, %v1266_v40   ;;  %v2162_v53 = vsel %vm570_vm0, %v2160_v43, %v2158_v42  ;;  %v2476_v36 = vld [vmem:[#allocation0 + $0xf1] sm:$0x80]  }
 0x102   :  { %2864 = vst.msk [vmem:[%s5196_s1 + $0x283] ss:$8 sm:$0x78] %vm255_vm3, %v1266_v40   ;;  %v1361_v1 = vpop.permute.xlu0 %1360   ;;  %v2166_v60 = vsel %vm574_vm1, %v2164_v54, %v2162_v53  ;;  %v2514_v45 = vld [vmem:[#allocation0 + $0x131] sm:$0x80]  }
 0x103   :  { %2865 = vst.msk [vmem:[%s5196_s1 + $0xb4] sm:$0x80] %vm255_vm3, %v1266_v40   ;;  %v2297_v40 = vld [vmem:[#allocation0 + $0x1b1] sm:$0x80]  }
 0x104   :  { %2869 = vst.msk [vmem:[%s5196_s1 + $0xe3] ss:$8 sm:$0x7] %vm255_vm3, %v1304_v46   ;;  %v2377_v47 = vld [vmem:[#allocation0 + $0x29] ss:$8 sm:$0x78]  }
 0x105   :  { %2870 = vst.msk [vmem:[%s5196_s1 + $0x2c3] ss:$8 sm:$0x78] %vm255_vm3, %v1304_v46   ;;  %2148 = vrot.lane.b32.xlu1 %v2147_v2, %s3095_s30  ;;  %v2362_v2 = vld [vmem:[#allocation0 + $0x31] sm:$0x80]  }
 0x106   :  { %2871 = vst.msk [vmem:[%s5196_s1 + $0xf4] sm:$0x80] %vm255_vm3, %v1304_v46   ;;  %2007 = vrot.lane.b32.xlu2 %v2006_v5, %s3094_s29  ;;  %v2299_v46 = vsel %vm574_vm1, %v2297_v40, %v2295_v39  ;;  %v2360_v5 = vsel %vm570_vm0, %v2358_v0, %v2356_v63  ;;  %v2510_v40 = vld [vmem:[#allocation0 + $0x109] ss:$8 sm:$0x78]  }
 0x107   :  { %2875 = vst.msk [vmem:[%s5196_s1 + $0x123] ss:$8 sm:$0x7] %vm255_vm3, %v1342_v62   ;;  %v1380_v13 = vpop.permute.xlu1 %1379   ;;  %v2364_v11 = vsel %vm574_vm1, %v2362_v2, %v2360_v5  ;;  %v2527_v48 = vld [vmem:[#allocation0 + $0x140] ss:$8 sm:$0x7]  }
 0x108   :  { %2876 = vst.msk [vmem:[%s5196_s1 + $0x303] ss:$8 sm:$0x78] %vm255_vm3, %v1342_v62   ;;  %2186 = vrot.lane.b32.xlu0 %v2185_v10, %s3095_s30  ;;  %v1399_v16 = vpop.permute.xlu2 %1398   ;;  %v2533_v51 = vld [vmem:[#allocation0 + $0x151] sm:$0x80]  }
 0x109   :  { %2877 = vst.msk [vmem:[%s5196_s1 + $0x134] sm:$0x80] %vm255_vm3, %v1342_v62   ;;  %v2217_v62 = vld [vmem:[#allocation0 + $0x109] ss:$8 sm:$0x78]  }
 0x10a   :  { %2872 = vst.msk [vmem:[%s5196_s1 + $0x103] ss:$8 sm:$0x7] %vm255_vm3, %v1323_v59   ;;  %v1418_v19 = vpop.permute.xlu0 %1417   ;;  %v2219_v8 = vsel %vm570_vm0, %v2217_v62, %v2215_v61  ;;  %v2571_v63 = vld [vmem:[#allocation0 + $0x191] sm:$0x80]  }
 0x10b   :  { %2873 = vst.msk [vmem:[%s5196_s1 + $0x2e3] ss:$8 sm:$0x78] %vm255_vm3, %v1323_v59   ;;  %v2223_v14 = vsel %vm574_vm1, %v2221_v9, %v2219_v8  ;;  %v2584_v2 = vld [vmem:[#allocation0 + $0x1a0] ss:$8 sm:$0x7]  }
 0x10c   :  { %2874 = vst.msk [vmem:[%s5196_s1 + $0x114] sm:$0x80] %vm255_vm3, %v1323_v59   ;;  %v2343_v59 = vld [vmem:[#allocation0 + $0x11] sm:$0x80]  }
 0x10d   :  { %2878 = vst.msk [vmem:[%s5196_s1 + $0x143] ss:$8 sm:$0x7] %vm255_vm3, %v1361_v1   ;;  %2205 = vrot.lane.b32.xlu1 %v2204_v20, %s3095_s30  ;;  %v2419_v20 = vld [vmem:[#allocation0 + $0x91] sm:$0x80]  }
 0x10e   :  { %2879 = vst.msk [vmem:[%s5196_s1 + $0x323] ss:$8 sm:$0x78] %vm255_vm3, %v1361_v1   ;;  %2053 = vrot.lane.b32.xlu2 %v2052_v23, %s3095_s30  ;;  %v2417_v23 = vsel %vm570_vm0, %v2415_v18, %v2413_v17  ;;  %v2586_v3 = vld [vmem:[#allocation0 + $0x189] ss:$8 sm:$0x78]  }
 0x10f   :  { %2880 = vst.msk [vmem:[%s5196_s1 + $0x154] sm:$0x80] %vm255_vm3, %v1361_v1   ;;  %v1437_v31 = vpop.permute.xlu1 %1436   ;;  %v2345_v1 = vsel %vm574_vm1, %v2343_v59, %v2341_v58  ;;  %v2421_v29 = vsel %vm574_vm1, %v2419_v20, %v2417_v23  ;;  %v2381_v59 = vld [vmem:[#allocation0 + $0x51] sm:$0x80]  }
 0x110   :  { %2884 = vst.msk [vmem:[%s5196_s1 + $0x183] ss:$8 sm:$0x7] %vm255_vm3, %v1399_v16   ;;  %2243 = vrot.lane.b32.xlu0 %v2242_v28, %s3095_s30  ;;  %v1452_v34 = vpop.permute.xlu2 %1451   ;;  %v2434_v5 = vld [vmem:[#allocation0 + $0x89] ss:$8 sm:$0x78]  }
 0x111   :  { %2885 = vst.msk [vmem:[%s5196_s1 + $0x363] ss:$8 sm:$0x78] %vm255_vm3, %v1399_v16   ;;  %v2590_v8 = vld [vmem:[#allocation0 + $0x1b1] sm:$0x80]  }
 0x112   :  { %2886 = vst.msk [vmem:[%s5196_s1 + $0x194] sm:$0x80] %vm255_vm3, %v1399_v16   ;;  %v1468_v37 = vpop.permute.xlu0 %1467   ;;  %v2274_v16 = vld [vmem:[#allocation0 + $0x169] ss:$8 sm:$0x78]  }
 0x113   :  { %2881 = vst.msk [vmem:[%s5196_s1 + $0x163] ss:$8 sm:$0x7] %vm255_vm3, %v1380_v13   ;;  %v2276_v26 = vsel %vm570_vm0, %v2274_v16, %v2272_v15  ;;  %v2489_v15 = vld [vmem:[#allocation0 + $0x100] ss:$8 sm:$0x7]  }
 0x114   :  { %2882 = vst.msk [vmem:[%s5196_s1 + $0x343] ss:$8 sm:$0x78] %vm255_vm3, %v1380_v13   ;;  %v2280_v32 = vsel %vm574_vm1, %v2278_v27, %v2276_v26  ;;  %v2491_v16 = vld [vmem:[#allocation0 + $0xe9] ss:$8 sm:$0x78]  }
 0x115   :  { %2883 = vst.msk [vmem:[%s5196_s1 + $0x174] sm:$0x80] %vm255_vm3, %v1380_v13   ;;  %2262 = vrot.lane.b32.xlu1 %v2261_v38, %s3095_s30  ;;  %v2400_v13 = vld [vmem:[#allocation0 + $0x71] sm:$0x80]   ;;  %v2493_v18 = vsel %vm570_vm0, %v2491_v16, %v2489_v15  ;;  %v273_v15 = vld [vmem:[#allocation0 + $0x20] sm:$0x3]  }
 0x116   :  { %2887 = vst.msk [vmem:[%s5196_s1 + $0x1a3] ss:$8 sm:$0x7] %vm255_vm3, %v1418_v19   ;;  %2110 = vrot.lane.b32.xlu2 %v2109_v41, %s3095_s30  ;;  %v2548_v23 = vld [vmem:[#allocation0 + $0x149] ss:$8 sm:$0x78]  }
 0x117   :  { %2888 = vst.msk [vmem:[%s5196_s1 + $0x383] ss:$8 sm:$0x78] %vm255_vm3, %v1418_v19   ;;  %v1487_v49 = vpop.permute.xlu1 %1486   ;;  %v2552_v27 = vld [vmem:[#allocation0 + $0x171] sm:$0x80]  }
 0x118   :  { %2889 = vst.msk [vmem:[%s5196_s1 + $0x1b4] sm:$0x80] %vm255_vm3, %v1418_v19   ;;  %2300 = vrot.lane.b32.xlu0 %v2299_v46, %s3095_s30  ;;  %v1506_v52 = vpop.permute.xlu2 %1505   ;;  %v2402_v19 = vsel %vm574_vm1, %v2400_v13, %v2398_v12  ;;  %v2375_v46 = vld [vmem:[#allocation0 + $0x40] ss:$8 sm:$0x7]  }
 0x119   :  { %2893 = vst.msk [vmem:[%s5196_s1 + $0x1e3] ss:$8 sm:$0x7] %vm255_vm3, %v1452_v34   ;;  %v2379_v58 = vsel %vm570_vm0, %v2377_v47, %v2375_v46  ;;  %v278_v16 = vld [vmem:[#allocation0 + $0x28] sm:$0x3]  }
 0x11a   :  { %2894 = vst.msk [vmem:[%s5196_s1 + $0x3c3] ss:$8 sm:$0x38] %vm255_vm3, %v1452_v34   ;;  %v1525_v55 = vpop.permute.xlu0 %1524   ;;  %v2472_v34 = vld [vmem:[#allocation0 + $0xc9] ss:$8 sm:$0x78]   ;;  %v2383_v0 = vsel %vm574_vm1, %v2381_v59, %v2379_v58 }
 0x11b   :  { %2890 = vst.msk [vmem:[%s5196_s1 + $0x1c3] ss:$8 sm:$0x7] %vm255_vm3, %v1437_v31   ;;  %v2474_v39 = vsel %vm570_vm0, %v2472_v34, %v2470_v33 }
 0x11c   :  { %2891 = vst.msk [vmem:[%s5196_s1 + $0x3a3] ss:$8 sm:$0x78] %vm255_vm3, %v1437_v31   ;;  %v2478_v43 = vsel %vm574_vm1, %v2476_v36, %v2474_v39 }
 0x11d   :  { %2892 = vst.msk [vmem:[%s5196_s1 + $0x1d4] sm:$0x80] %vm255_vm3, %v1437_v31   ;;  %2319 = vrot.lane.b32.xlu1 %v2318_v56, %s3095_s30  ;;  %v2457_v31 = vld [vmem:[#allocation0 + $0xd1] sm:$0x80]  }
 0x11e   :  { %2895 = vst.msk [vmem:[%s5196_s1 + $0x4] ss:$8 sm:$0x7] %vm255_vm3, %v1468_v37   ;;  %2167 = vrot.lane.b32.xlu2 %v2166_v60, %s3095_s30  ;;  %v2459_v35 = vsel %vm574_vm1, %v2457_v31, %v2455_v30  ;;  %v2603_v30 = vld [vmem:[#allocation0 + $0x1c0] ss:$8 sm:$0x7]  }
 0x11f   :  { %2896 = vst.msk [vmem:[%s5196_s1 + $0x1e4] ss:$8 sm:$0x78] %vm255_vm3, %v1468_v37   ;;  %v1544_v4 = vpop.permute.xlu1 %1543   ;;  %v2605_v31 = vld [vmem:[#allocation0 + $0x1a9] ss:$8 sm:$0x78]  }
 0x120   :  { %2897 = vst.msk [vmem:[%s5196_s1 + $0x15] sm:$0x80] %vm255_vm3, %v1468_v37   ;;  %2346 = vrot.lane.b32.xlu0 %v2345_v1, %s3096_s23  ;;  %v1563_v7 = vpop.permute.xlu2 %1562   ;;  %v2508_v37 = vld [vmem:[#allocation0 + $0x120] ss:$8 sm:$0x7]   ;;  %v2607_v34 = vsel %vm570_vm0, %v2605_v31, %v2603_v30 }
 0x121   :  { %2901 = vst.msk [vmem:[%s5196_s1 + $0x44] ss:$8 sm:$0x7] %vm255_vm3, %v1506_v52   ;;  %v2512_v44 = vsel %vm570_vm0, %v2510_v40, %v2508_v37  ;;  %v2432_v1 = vld [vmem:[#allocation0 + $0xa0] ss:$8 sm:$0x7]  }
 0x122   :  { %2902 = vst.msk [vmem:[%s5196_s1 + $0x224] ss:$8 sm:$0x78] %vm255_vm3, %v1506_v52   ;;  %v1582_v10 = vpop.permute.xlu0 %1581   ;;  %v2516_v50 = vsel %vm574_vm1, %v2514_v45, %v2512_v44  ;;  %v353_v30 = vld [vmem:[#allocation0 + $0xa0] sm:$0x3]  }
 0x123   :  { %2903 = vst.msk [vmem:[%s5196_s1 + $0x55] sm:$0x80] %vm255_vm3, %v1506_v52   ;;  %v2565_v52 = vld [vmem:[#allocation0 + $0x180] ss:$8 sm:$0x7]  }
 0x124   :  { %2898 = vst.msk [vmem:[%s5196_s1 + $0x24] ss:$8 sm:$0x7] %vm255_vm3, %v1487_v49   ;;  %v358_v31 = vld [vmem:[#allocation0 + $0xa8] sm:$0x3]  }
 0x125   :  { %2899 = vst.msk [vmem:[%s5196_s1 + $0x204] ss:$8 sm:$0x78] %vm255_vm3, %v1487_v49   ;;  %2365 = vrot.lane.b32.xlu1 %v2364_v11, %s3096_s23  ;;  %v2438_v11 = vld [vmem:[#allocation0 + $0xb1] sm:$0x80]  }
 0x126   :  { %2900 = vst.msk [vmem:[%s5196_s1 + $0x35] sm:$0x80] %vm255_vm3, %v1487_v49   ;;  %2224 = vrot.lane.b32.xlu2 %v2223_v14, %s3095_s30  ;;  %v2529_v49 = vld [vmem:[#allocation0 + $0x129] ss:$8 sm:$0x78]  }
 0x127   :  { %2904 = vst.msk [vmem:[%s5196_s1 + $0x64] ss:$8 sm:$0x7] %vm255_vm3, %v1525_v55   ;;  %v1601_v22 = vpop.permute.xlu1 %1600   ;;  %v2531_v54 = vsel %vm570_vm0, %v2529_v49, %v2527_v48 }
 0x128   :  { %2905 = vst.msk [vmem:[%s5196_s1 + $0x244] ss:$8 sm:$0x78] %vm255_vm3, %v1525_v55   ;;  %2403 = vrot.lane.b32.xlu0 %v2402_v19, %s3096_s23  ;;  %v1620_v25 = vpop.permute.xlu2 %1619   ;;  %v2535_v61 = vsel %vm574_vm1, %v2533_v51, %v2531_v54  ;;  %v2495_v19 = vld [vmem:[#allocation0 + $0x111] sm:$0x80]  }
 0x129   :  { %2906 = vst.msk [vmem:[%s5196_s1 + $0x75] sm:$0x80] %vm255_vm3, %v1525_v55   ;;  %v2567_v55 = vld [vmem:[#allocation0 + $0x169] ss:$8 sm:$0x78]   ;;  %v2497_v21 = vsel %vm574_vm1, %v2495_v19, %v2493_v18 }
 0x12a   :  { %2910 = vst.msk [vmem:[%s5196_s1 + $0xa4] ss:$8 sm:$0x7] %vm255_vm3, %v1563_v7   ;;  %v1639_v28 = vpop.permute.xlu0 %1638   ;;  %v2569_v62 = vsel %vm570_vm0, %v2567_v55, %v2565_v52  ;;  %v293_v18 = vld [vmem:[#allocation0 + $0x40] sm:$0x3]  }
 0x12b   :  { %2911 = vst.msk [vmem:[%s5196_s1 + $0x284] ss:$8 sm:$0x78] %vm255_vm3, %v1563_v7   ;;  %v298_v19 = vld [vmem:[#allocation0 + $0x48] sm:$0x3]  }
 0x12c   :  { %2912 = vst.msk [vmem:[%s5196_s1 + $0xb5] sm:$0x80] %vm255_vm3, %v1563_v7   ;;  %v2588_v7 = vsel %vm570_vm0, %v2586_v3, %v2584_v2 }
 0x12d   :  { %2907 = vst.msk [vmem:[%s5196_s1 + $0x84] ss:$8 sm:$0x7] %vm255_vm3, %v1544_v4   ;;  %2422 = vrot.lane.b32.xlu1 %v2421_v29, %s3096_s23  ;;  %v2592_v13 = vsel %vm574_vm1, %v2590_v8, %v2588_v7 }
 0x12e   :  { %2908 = vst.msk [vmem:[%s5196_s1 + $0x264] ss:$8 sm:$0x78] %vm255_vm3, %v1544_v4   ;;  %2281 = vrot.lane.b32.xlu2 %v2280_v32, %s3095_s30 }
 0x12f   :  { %2909 = vst.msk [vmem:[%s5196_s1 + $0x95] sm:$0x80] %vm255_vm3, %v1544_v4   ;;  %v1658_v38 = vpop.permute.xlu1 %1657   ;;  %v2573_v4 = vsel %vm574_vm1, %v2571_v63, %v2569_v62 }
 0x130   :  { %2913 = vst.msk [vmem:[%s5196_s1 + $0xc4] ss:$8 sm:$0x7] %vm255_vm3, %v1582_v10   ;;  %2460 = vrot.lane.b32.xlu0 %v2459_v35, %s3096_s23  ;;  %v1677_v41 = vpop.permute.xlu2 %1676   ;;  %v2609_v35 = vld [vmem:[#allocation0 + $0x1d1] sm:$0x80]  }
 0x131   :  { %2914 = vst.msk [vmem:[%s5196_s1 + $0x2a4] ss:$8 sm:$0x78] %vm255_vm3, %v1582_v10   ;;  %v2611_v37 = vsel %vm574_vm1, %v2609_v35, %v2607_v34  ;;  %v373_v34 = vld [vmem:[#allocation0 + $0xc0] sm:$0x3]  }
 0x132   :  { %2915 = vst.msk [vmem:[%s5196_s1 + $0xd5] sm:$0x80] %vm255_vm3, %v1582_v10   ;;  %v1696_v42 = vpop.permute.xlu0 %1695   ;;  %v2436_v10 = vsel %vm570_vm0, %v2434_v5, %v2432_v1  ;;  %v378_v35 = vld [vmem:[#allocation0 + $0xc8] sm:$0x3]  }
 0x133   :  { %2919 = vst.msk [vmem:[%s5196_s1 + $0x104] ss:$8 sm:$0x7] %vm255_vm3, %v1620_v25   ;;  %v2440_v14 = vsel %vm574_vm1, %v2438_v11, %v2436_v10  ;;  %v254_v11 = vld [vmem:[#allocation0] sm:$0x3]  }
 0x134   :  { %2920 = vst.msk [vmem:[%s5196_s1 + $0x2e4] ss:$8 sm:$0x78] %vm255_vm3, %v1620_v25  }
 0x135   :  { %2921 = vst.msk [vmem:[%s5196_s1 + $0x115] sm:$0x80] %vm255_vm3, %v1620_v25   ;;  %2479 = vrot.lane.b32.xlu1 %v2478_v43, %s3096_s23 }
 0x136   :  { %2916 = vst.msk [vmem:[%s5196_s1 + $0xe4] ss:$8 sm:$0x7] %vm255_vm3, %v1601_v22   ;;  %2330 = vrot.lane.b32.xlu2 %v3679_v57, %s3095_s30 }
 0x137   :  { %2917 = vst.msk [vmem:[%s5196_s1 + $0x2c4] ss:$8 sm:$0x78] %vm255_vm3, %v1601_v22   ;;  %v1715_v53 = vpop.permute.xlu1 %1714  }
 0x138   :  { %2918 = vst.msk [vmem:[%s5196_s1 + $0xf5] sm:$0x80] %vm255_vm3, %v1601_v22   ;;  %2517 = vrot.lane.b32.xlu0 %v2516_v50, %s3096_s23  ;;  %v1734_v56 = vpop.permute.xlu2 %1733   ;;  %v2546_v22 = vld [vmem:[#allocation0 + $0x160] ss:$8 sm:$0x7]  }
 0x139   :  { %2922 = vst.msk [vmem:[%s5196_s1 + $0x124] ss:$8 sm:$0x7] %vm255_vm3, %v1639_v28   ;;  %v2550_v26 = vsel %vm570_vm0, %v2548_v23, %v2546_v22  ;;  %v313_v22 = vld [vmem:[#allocation0 + $0x60] sm:$0x3]  }
 0x13a   :  { %2923 = vst.msk [vmem:[%s5196_s1 + $0x304] ss:$8 sm:$0x78] %vm255_vm3, %v1639_v28   ;;  %v1745_v60 = vpop.permute.xlu0 %1744   ;;  %v2554_v29 = vsel %vm574_vm1, %v2552_v27, %v2550_v26  ;;  %v318_v23 = vld [vmem:[#allocation0 + $0x68] sm:$0x3]  }
 0x13b   :  { %2924 = vst.msk [vmem:[%s5196_s1 + $0x135] sm:$0x80] %vm255_vm3, %v1639_v28   ;;  %v333_v26 = vld [vmem:[#allocation0 + $0x80] sm:$0x3]   ;;  %v338_v27 = vld [vmem:[#allocation0 + $0x88] sm:$0x3]  }
 0x13c   :  { %2928 = vst.msk [vmem:[%s5196_s1 + $0x164] ss:$8 sm:$0x7] %vm255_vm3, %v1677_v41  }
 0x13d   :  { %2929 = vst.msk [vmem:[%s5196_s1 + $0x344] ss:$8 sm:$0x78] %vm255_vm3, %v1677_v41   ;;  %2536 = vrot.lane.b32.xlu1 %v2535_v61, %s3096_s23 }
 0x13e   :  { %2930 = vst.msk [vmem:[%s5196_s1 + $0x175] sm:$0x80] %vm255_vm3, %v1677_v41   ;;  %2384 = vrot.lane.b32.xlu2 %v2383_v0, %s3096_s23 }
 0x13f   :  { %2925 = vst.msk [vmem:[%s5196_s1 + $0x144] ss:$8 sm:$0x7] %vm255_vm3, %v1658_v38   ;;  %v1761_v6 = vpop.permute.xlu1 %1760  }
 0x140   :  { %2926 = vst.msk [vmem:[%s5196_s1 + $0x324] ss:$8 sm:$0x78] %vm255_vm3, %v1658_v38   ;;  %2574 = vrot.lane.b32.xlu0 %v2573_v4, %s3096_s23  ;;  %v1780_v9 = vpop.permute.xlu2 %1779  }
 0x141   :  { %2927 = vst.msk [vmem:[%s5196_s1 + $0x155] sm:$0x80] %vm255_vm3, %v1658_v38  }
 0x142   :  { %2931 = vst.msk [vmem:[%s5196_s1 + $0x184] ss:$8 sm:$0x7] %vm255_vm3, %v1696_v42   ;;  %v1799_v12 = vpop.permute.xlu0 %1798  }
 0x143   :  { %2932 = vst.msk [vmem:[%s5196_s1 + $0x364] ss:$8 sm:$0x78] %vm255_vm3, %v1696_v42  }
 0x144   :  { %2933 = vst.msk [vmem:[%s5196_s1 + $0x195] sm:$0x80] %vm255_vm3, %v1696_v42  }
 0x145   :  { %2937 = vst.msk [vmem:[%s5196_s1 + $0x1c4] ss:$8 sm:$0x7] %vm255_vm3, %v1734_v56   ;;  %2593 = vrot.lane.b32.xlu1 %v2592_v13, %s3096_s23  ;;  %v263_v13 = vld [vmem:[#allocation0 + $0x10] sm:$0x3]  }
 0x146   :  { %2938 = vst.msk [vmem:[%s5196_s1 + $0x3a4] ss:$8 sm:$0x78] %vm255_vm3, %v1734_v56   ;;  %2441 = vrot.lane.b32.xlu2 %v2440_v14, %s3096_s23  ;;  %v268_v14 = vld [vmem:[#allocation0 + $0x18] sm:$0x3]  }
 0x147   :  { %2939 = vst.msk [vmem:[%s5196_s1 + $0x1d5] sm:$0x80] %vm255_vm3, %v1734_v56   ;;  %v1818_v17 = vpop.permute.xlu1 %1817  }
 0x148   :  { %2934 = vst.msk [vmem:[%s5196_s1 + $0x1a4] ss:$8 sm:$0x7] %vm255_vm3, %v1715_v53   ;;  %2623 = vrot.lane.b32.xlu0 %v3679_v57, %s3096_s23  ;;  %v1837_v57 = vpop.permute.xlu2 %1836  }
 0x149   :  { %2935 = vst.msk [vmem:[%s5196_s1 + $0x384] ss:$8 sm:$0x78] %vm255_vm3, %v1715_v53  }
 0x14a   :  { %2936 = vst.msk [vmem:[%s5196_s1 + $0x1b5] sm:$0x80] %vm255_vm3, %v1715_v53   ;;  %v1856_v20 = vpop.permute.xlu0 %1855  }
 0x14b   :  { %2940 = vst.msk [vmem:[%s5196_s1 + $0x1e4] ss:$8 sm:$0x3] %vm255_vm3, %v1745_v60  }
 0x14c   :  { %2941 = vst.msk [vmem:[%s5196_s1 + $0x3cc] ss:$8 sm:$0xc] %vm255_vm3, %v1745_v60  }
 0x14d   :  { %2945 = vst.msk [vmem:[%s5196_s1 + $0x25] ss:$8 sm:$0x7] %vm255_vm3, %v1780_v9  }
 0x14e   :  { %2946 = vst.msk [vmem:[%s5196_s1 + $0x205] ss:$8 sm:$0x78] %vm255_vm3, %v1780_v9   ;;  %2498 = vrot.lane.b32.xlu2 %v2497_v21, %s3096_s23  ;;  %v308_v21 = vld [vmem:[#allocation0 + $0x58] sm:$0x3]  }
 0x14f   :  { %2947 = vst.msk [vmem:[%s5196_s1 + $0x36] sm:$0x80] %vm255_vm3, %v1780_v9   ;;  %v1875_v24 = vpop.permute.xlu1 %1874  }
 0x150   :  { %2942 = vst.msk [vmem:[%s5196_s1 + $0x5] ss:$8 sm:$0x7] %vm255_vm3, %v1761_v6   ;;  %v1894_v25 = vpop.permute.xlu2 %1893  }
 0x151   :  { %2943 = vst.msk [vmem:[%s5196_s1 + $0x1e5] ss:$8 sm:$0x78] %vm255_vm3, %v1761_v6  }
 0x152   :  { %2944 = vst.msk [vmem:[%s5196_s1 + $0x16] sm:$0x80] %vm255_vm3, %v1761_v6   ;;  %v1913_v28 = vpop.permute.xlu0 %1912  }
 0x153   :  { %2948 = vst.msk [vmem:[%s5196_s1 + $0x45] ss:$8 sm:$0x7] %vm255_vm3, %v1799_v12  }
 0x154   :  { %2949 = vst.msk [vmem:[%s5196_s1 + $0x225] ss:$8 sm:$0x78] %vm255_vm3, %v1799_v12  }
 0x155   :  { %2950 = vst.msk [vmem:[%s5196_s1 + $0x56] sm:$0x80] %vm255_vm3, %v1799_v12   ;;  %v258_v12 = vld [vmem:[#allocation0 + $0x8] sm:$0x3]  }
 0x156   :  { %2954 = vst.msk [vmem:[%s5196_s1 + $0x85] ss:$8 sm:$0x7] %vm255_vm3, %v1837_v57   ;;  %2555 = vrot.lane.b32.xlu2 %v2554_v29, %s3096_s23  ;;  %v348_v29 = vld [vmem:[#allocation0 + $0x98] sm:$0x3]  }
 0x157   :  { %2955 = vst.msk [vmem:[%s5196_s1 + $0x265] ss:$8 sm:$0x78] %vm255_vm3, %v1837_v57   ;;  %v1932_v32 = vpop.permute.xlu1 %1931  }
 0x158   :  { %2956 = vst.msk [vmem:[%s5196_s1 + $0x96] sm:$0x80] %vm255_vm3, %v1837_v57   ;;  %v1951_v33 = vpop.permute.xlu2 %1950   ;;  %v288_v57 = vld [vmem:[#allocation0 + $0x38] sm:$0x3]  }
 0x159   :  { %2951 = vst.msk [vmem:[%s5196_s1 + $0x65] ss:$8 sm:$0x7] %vm255_vm3, %v1818_v17  }
 0x15a   :  { %2952 = vst.msk [vmem:[%s5196_s1 + $0x245] ss:$8 sm:$0x78] %vm255_vm3, %v1818_v17   ;;  %v1970_v36 = vpop.permute.xlu0 %1969  }
 0x15b   :  { %2953 = vst.msk [vmem:[%s5196_s1 + $0x76] sm:$0x80] %vm255_vm3, %v1818_v17   ;;  %v283_v17 = vld [vmem:[#allocation0 + $0x30] sm:$0x3]  }
 0x15c   :  { %2957 = vst.msk [vmem:[%s5196_s1 + $0xa5] ss:$8 sm:$0x7] %vm255_vm3, %v1856_v20  }
 0x15d   :  { %2958 = vst.msk [vmem:[%s5196_s1 + $0x285] ss:$8 sm:$0x78] %vm255_vm3, %v1856_v20  }
 0x15e   :  { %2959 = vst.msk [vmem:[%s5196_s1 + $0xb6] sm:$0x80] %vm255_vm3, %v1856_v20   ;;  %2612 = vrot.lane.b32.xlu2 %v2611_v37, %s3096_s23  ;;  %v303_v20 = vld [vmem:[#allocation0 + $0x50] sm:$0x3]   ;;  %v388_v37 = vld [vmem:[#allocation0 + $0xd8] sm:$0x3]  }
 0x15f   :  { %2963 = vst.msk [vmem:[%s5196_s1 + $0xe5] ss:$8 sm:$0x7] %vm255_vm3, %v1894_v25   ;;  %v1989_v38 = vpop.permute.xlu1 %1988  }
 0x160   :  { %2964 = vst.msk [vmem:[%s5196_s1 + $0x2c5] ss:$8 sm:$0x78] %vm255_vm3, %v1894_v25   ;;  %v2008_v39 = vpop.permute.xlu2 %2007  }
 0x161   :  { %2965 = vst.msk [vmem:[%s5196_s1 + $0xf6] sm:$0x80] %vm255_vm3, %v1894_v25   ;;  %v328_v25 = vld [vmem:[#allocation0 + $0x78] sm:$0x3]  }
 0x162   :  { %2960 = vst.msk [vmem:[%s5196_s1 + $0xc5] ss:$8 sm:$0x7] %vm255_vm3, %v1875_v24   ;;  %v2027_v40 = vpop.permute.xlu0 %2026  }
 0x163   :  { %2961 = vst.msk [vmem:[%s5196_s1 + $0x2a5] ss:$8 sm:$0x78] %vm255_vm3, %v1875_v24  }
 0x164   :  { %2962 = vst.msk [vmem:[%s5196_s1 + $0xd6] sm:$0x80] %vm255_vm3, %v1875_v24   ;;  %v323_v24 = vld [vmem:[#allocation0 + $0x70] sm:$0x3]  }
 0x165   :  { %2966 = vst.msk [vmem:[%s5196_s1 + $0x105] ss:$8 sm:$0x7] %vm255_vm3, %v1913_v28  }
 0x166   :  { %2967 = vst.msk [vmem:[%s5196_s1 + $0x2e5] ss:$8 sm:$0x78] %vm255_vm3, %v1913_v28  }
 0x167   :  { %2968 = vst.msk [vmem:[%s5196_s1 + $0x116] sm:$0x80] %vm255_vm3, %v1913_v28   ;;  %v2038_v41 = vpop.permute.xlu1 %2037   ;;  %v343_v28 = vld [vmem:[#allocation0 + $0x90] sm:$0x3]  }
 0x168   :  { %2972 = vst.msk [vmem:[%s5196_s1 + $0x145] ss:$8 sm:$0x7] %vm255_vm3, %v1951_v33   ;;  %v2054_v42 = vpop.permute.xlu2 %2053  }
 0x169   :  { %2973 = vst.msk [vmem:[%s5196_s1 + $0x325] ss:$8 sm:$0x78] %vm255_vm3, %v1951_v33  }
 0x16a   :  { %2974 = vst.msk [vmem:[%s5196_s1 + $0x156] sm:$0x80] %vm255_vm3, %v1951_v33   ;;  %v2073_v43 = vpop.permute.xlu0 %2072   ;;  %v368_v33 = vld [vmem:[#allocation0 + $0xb8] sm:$0x3]  }
 0x16b   :  { %2969 = vst.msk [vmem:[%s5196_s1 + $0x125] ss:$8 sm:$0x7] %vm255_vm3, %v1932_v32  }
 0x16c   :  { %2970 = vst.msk [vmem:[%s5196_s1 + $0x305] ss:$8 sm:$0x78] %vm255_vm3, %v1932_v32  }
 0x16d   :  { %2971 = vst.msk [vmem:[%s5196_s1 + $0x136] sm:$0x80] %vm255_vm3, %v1932_v32   ;;  %v363_v32 = vld [vmem:[#allocation0 + $0xb0] sm:$0x3]  }
 0x16e   :  { %2975 = vst.msk [vmem:[%s5196_s1 + $0x165] ss:$8 sm:$0x7] %vm255_vm3, %v1970_v36  }
 0x16f   :  { %2976 = vst.msk [vmem:[%s5196_s1 + $0x345] ss:$8 sm:$0x78] %vm255_vm3, %v1970_v36   ;;  %v2092_v44 = vpop.permute.xlu1 %2091  }
 0x170   :  { %2977 = vst.msk [vmem:[%s5196_s1 + $0x176] sm:$0x80] %vm255_vm3, %v1970_v36   ;;  %v2111_v45 = vpop.permute.xlu2 %2110   ;;  %v383_v36 = vld [vmem:[#allocation0 + $0xd0] sm:$0x3]  }
 0x171   :  { %2981 = vst.msk [vmem:[%s5196_s1 + $0x1a5] ss:$8 sm:$0x7] %vm255_vm3, %v2008_v39  }
 0x172   :  { %2982 = vst.msk [vmem:[%s5196_s1 + $0x385] ss:$8 sm:$0x78] %vm255_vm3, %v2008_v39   ;;  %v2130_v46 = vpop.permute.xlu0 %2129  }
 0x173   :  { %2983 = vst.msk [vmem:[%s5196_s1 + $0x1b6] sm:$0x80] %vm255_vm3, %v2008_v39   ;;  %v398_v39 = vld [vmem:[#allocation0 + $0xe8] sm:$0x3]  }
 0x174   :  { %2978 = vst.msk [vmem:[%s5196_s1 + $0x185] ss:$8 sm:$0x7] %vm255_vm3, %v1989_v38  }
 0x175   :  { %2979 = vst.msk [vmem:[%s5196_s1 + $0x365] ss:$8 sm:$0x78] %vm255_vm3, %v1989_v38  }
 0x176   :  { %2980 = vst.msk [vmem:[%s5196_s1 + $0x196] sm:$0x80] %vm255_vm3, %v1989_v38   ;;  %v393_v38 = vld [vmem:[#allocation0 + $0xe0] sm:$0x3]  }
 0x177   :  { %2984 = vst.msk [vmem:[%s5196_s1 + $0x1c5] ss:$8 sm:$0x7] %vm255_vm3, %v2027_v40   ;;  %v2149_v47 = vpop.permute.xlu1 %2148  }
 0x178   :  { %2985 = vst.msk [vmem:[%s5196_s1 + $0x3a5] ss:$8 sm:$0x78] %vm255_vm3, %v2027_v40   ;;  %v2168_v48 = vpop.permute.xlu2 %2167  }
 0x179   :  { %2986 = vst.msk [vmem:[%s5196_s1 + $0x1d6] sm:$0x80] %vm255_vm3, %v2027_v40   ;;  %v403_v40 = vld [vmem:[#allocation0 + $0xf0] sm:$0x3]  }
 0x17a   :  { %2989 = vst.msk [vmem:[%s5196_s1 + $0x6] ss:$8 sm:$0x7] %vm255_vm3, %v2054_v42   ;;  %v2187_v49 = vpop.permute.xlu0 %2186  }
 0x17b   :  { %2990 = vst.msk [vmem:[%s5196_s1 + $0x1e6] ss:$8 sm:$0x78] %vm255_vm3, %v2054_v42  }
 0x17c   :  { %2991 = vst.msk [vmem:[%s5196_s1 + $0x17] sm:$0x80] %vm255_vm3, %v2054_v42   ;;  %v413_v42 = vld [vmem:[#allocation0 + $0x100] sm:$0x3]  }
 0x17d   :  { %2987 = vst.msk [vmem:[%s5196_s1 + $0x1e5] ss:$8 sm:$0x3] %vm255_vm3, %v2038_v41  }
 0x17e   :  { %2988 = vst.msk [vmem:[%s5196_s1 + $0x3cd] ss:$8 sm:$0xc] %vm255_vm3, %v2038_v41   ;;  %v408_v41 = vld [vmem:[#allocation0 + $0xf8] sm:$0x3]  }
 0x17f   :  { %2992 = vst.msk [vmem:[%s5196_s1 + $0x26] ss:$8 sm:$0x7] %vm255_vm3, %v2073_v43   ;;  %v2206_v50 = vpop.permute.xlu1 %2205  }
 0x180   :  { %2993 = vst.msk [vmem:[%s5196_s1 + $0x206] ss:$8 sm:$0x78] %vm255_vm3, %v2073_v43   ;;  %v2225_v51 = vpop.permute.xlu2 %2224  }
 0x181   :  { %2994 = vst.msk [vmem:[%s5196_s1 + $0x37] sm:$0x80] %vm255_vm3, %v2073_v43   ;;  %v418_v43 = vld [vmem:[#allocation0 + $0x108] sm:$0x3]  }
 0x182   :  { %2998 = vst.msk [vmem:[%s5196_s1 + $0x66] ss:$8 sm:$0x7] %vm255_vm3, %v2111_v45   ;;  %v2244_v52 = vpop.permute.xlu0 %2243  }
 0x183   :  { %2999 = vst.msk [vmem:[%s5196_s1 + $0x246] ss:$8 sm:$0x78] %vm255_vm3, %v2111_v45  }
 0x184   :  { %3000 = vst.msk [vmem:[%s5196_s1 + $0x77] sm:$0x80] %vm255_vm3, %v2111_v45   ;;  %v428_v45 = vld [vmem:[#allocation0 + $0x118] sm:$0x3]  }
 0x185   :  { %2995 = vst.msk [vmem:[%s5196_s1 + $0x46] ss:$8 sm:$0x7] %vm255_vm3, %v2092_v44  }
 0x186   :  { %2996 = vst.msk [vmem:[%s5196_s1 + $0x226] ss:$8 sm:$0x78] %vm255_vm3, %v2092_v44  }
 0x187   :  { %2997 = vst.msk [vmem:[%s5196_s1 + $0x57] sm:$0x80] %vm255_vm3, %v2092_v44   ;;  %v2263_v53 = vpop.permute.xlu1 %2262   ;;  %v423_v44 = vld [vmem:[#allocation0 + $0x110] sm:$0x3]  }
 0x188   :  { %3001 = vst.msk [vmem:[%s5196_s1 + $0x86] ss:$8 sm:$0x7] %vm255_vm3, %v2130_v46   ;;  %v2282_v54 = vpop.permute.xlu2 %2281  }
 0x189   :  { %3002 = vst.msk [vmem:[%s5196_s1 + $0x266] ss:$8 sm:$0x78] %vm255_vm3, %v2130_v46  }
 0x18a   :  { %3003 = vst.msk [vmem:[%s5196_s1 + $0x97] sm:$0x80] %vm255_vm3, %v2130_v46   ;;  %v2301_v55 = vpop.permute.xlu0 %2300   ;;  %v433_v46 = vld [vmem:[#allocation0 + $0x120] sm:$0x3]  }
 0x18b   :  { %3007 = vst.msk [vmem:[%s5196_s1 + $0xc6] ss:$8 sm:$0x7] %vm255_vm3, %v2168_v48  }
 0x18c   :  { %3008 = vst.msk [vmem:[%s5196_s1 + $0x2a6] ss:$8 sm:$0x78] %vm255_vm3, %v2168_v48  }
 0x18d   :  { %3009 = vst.msk [vmem:[%s5196_s1 + $0xd7] sm:$0x80] %vm255_vm3, %v2168_v48   ;;  %v443_v48 = vld [vmem:[#allocation0 + $0x130] sm:$0x3]  }
 0x18e   :  { %3004 = vst.msk [vmem:[%s5196_s1 + $0xa6] ss:$8 sm:$0x7] %vm255_vm3, %v2149_v47  }
 0x18f   :  { %3005 = vst.msk [vmem:[%s5196_s1 + $0x286] ss:$8 sm:$0x78] %vm255_vm3, %v2149_v47   ;;  %v2320_v56 = vpop.permute.xlu1 %2319  }
 0x190   :  { %3006 = vst.msk [vmem:[%s5196_s1 + $0xb7] sm:$0x80] %vm255_vm3, %v2149_v47   ;;  %v2331_v58 = vpop.permute.xlu2 %2330   ;;  %v438_v47 = vld [vmem:[#allocation0 + $0x128] sm:$0x3]  }
 0x191   :  { %3010 = vst.msk [vmem:[%s5196_s1 + $0xe6] ss:$8 sm:$0x7] %vm255_vm3, %v2187_v49  }
 0x192   :  { %3011 = vst.msk [vmem:[%s5196_s1 + $0x2c6] ss:$8 sm:$0x78] %vm255_vm3, %v2187_v49   ;;  %v2347_v59 = vpop.permute.xlu0 %2346  }
 0x193   :  { %3012 = vst.msk [vmem:[%s5196_s1 + $0xf7] sm:$0x80] %vm255_vm3, %v2187_v49   ;;  %v448_v49 = vld [vmem:[#allocation0 + $0x138] sm:$0x3]  }
 0x194   :  { %3016 = vst.msk [vmem:[%s5196_s1 + $0x126] ss:$8 sm:$0x7] %vm255_vm3, %v2225_v51  }
 0x195   :  { %3017 = vst.msk [vmem:[%s5196_s1 + $0x306] ss:$8 sm:$0x78] %vm255_vm3, %v2225_v51  }
 0x196   :  { %3018 = vst.msk [vmem:[%s5196_s1 + $0x137] sm:$0x80] %vm255_vm3, %v2225_v51   ;;  %v458_v51 = vld [vmem:[#allocation0 + $0x148] sm:$0x3]  }
 0x197   :  { %3013 = vst.msk [vmem:[%s5196_s1 + $0x106] ss:$8 sm:$0x7] %vm255_vm3, %v2206_v50   ;;  %v2366_v60 = vpop.permute.xlu1 %2365  }
 0x198   :  { %3014 = vst.msk [vmem:[%s5196_s1 + $0x2e6] ss:$8 sm:$0x78] %vm255_vm3, %v2206_v50   ;;  %v2385_v61 = vpop.permute.xlu2 %2384  }
 0x199   :  { %3015 = vst.msk [vmem:[%s5196_s1 + $0x117] sm:$0x80] %vm255_vm3, %v2206_v50   ;;  %v453_v50 = vld [vmem:[#allocation0 + $0x140] sm:$0x3]  }
 0x19a   :  { %3019 = vst.msk [vmem:[%s5196_s1 + $0x146] ss:$8 sm:$0x7] %vm255_vm3, %v2244_v52   ;;  %v2404_v62 = vpop.permute.xlu0 %2403  }
 0x19b   :  { %3020 = vst.msk [vmem:[%s5196_s1 + $0x326] ss:$8 sm:$0x78] %vm255_vm3, %v2244_v52  }
 0x19c   :  { %3021 = vst.msk [vmem:[%s5196_s1 + $0x157] sm:$0x80] %vm255_vm3, %v2244_v52   ;;  %v463_v52 = vld [vmem:[#allocation0 + $0x150] sm:$0x3]  }
 0x19d   :  { %3025 = vst.msk [vmem:[%s5196_s1 + $0x186] ss:$8 sm:$0x7] %vm255_vm3, %v2282_v54  }
 0x19e   :  { %3026 = vst.msk [vmem:[%s5196_s1 + $0x366] ss:$8 sm:$0x78] %vm255_vm3, %v2282_v54  }
 0x19f   :  { %3027 = vst.msk [vmem:[%s5196_s1 + $0x197] sm:$0x80] %vm255_vm3, %v2282_v54   ;;  %v2423_v63 = vpop.permute.xlu1 %2422   ;;  %v473_v54 = vld [vmem:[#allocation0 + $0x160] sm:$0x3]  }
 0x1a0   :  { %3022 = vst.msk [vmem:[%s5196_s1 + $0x166] ss:$8 sm:$0x7] %vm255_vm3, %v2263_v53   ;;  %v2442_v0 = vpop.permute.xlu2 %2441  }
 0x1a1   :  { %3023 = vst.msk [vmem:[%s5196_s1 + $0x346] ss:$8 sm:$0x78] %vm255_vm3, %v2263_v53  }
 0x1a2   :  { %3024 = vst.msk [vmem:[%s5196_s1 + $0x177] sm:$0x80] %vm255_vm3, %v2263_v53   ;;  %v2461_v1 = vpop.permute.xlu0 %2460   ;;  %v468_v53 = vld [vmem:[#allocation0 + $0x158] sm:$0x3]  }
 0x1a3   :  { %3028 = vst.msk [vmem:[%s5196_s1 + $0x1a6] ss:$8 sm:$0x7] %vm255_vm3, %v2301_v55  }
 0x1a4   :  { %3029 = vst.msk [vmem:[%s5196_s1 + $0x386] ss:$8 sm:$0x78] %vm255_vm3, %v2301_v55  }
 0x1a5   :  { %3030 = vst.msk [vmem:[%s5196_s1 + $0x1b7] sm:$0x80] %vm255_vm3, %v2301_v55   ;;  %v478_v55 = vld [vmem:[#allocation0 + $0x168] sm:$0x3]  }
 0x1a6   :  { %3034 = vst.msk [vmem:[%s5196_s1 + $0x1e6] ss:$8 sm:$0x3] %vm255_vm3, %v2331_v58  }
 0x1a7   :  { %3035 = vst.msk [vmem:[%s5196_s1 + $0x3ce] ss:$8 sm:$0xc] %vm255_vm3, %v2331_v58   ;;  %v2480_v2 = vpop.permute.xlu1 %2479   ;;  %v488_v58 = vld [vmem:[#allocation0 + $0x178] sm:$0x3]  }
 0x1a8   :  { %3031 = vst.msk [vmem:[%s5196_s1 + $0x1c6] ss:$8 sm:$0x7] %vm255_vm3, %v2320_v56   ;;  %v2499_v3 = vpop.permute.xlu2 %2498  }
 0x1a9   :  { %3032 = vst.msk [vmem:[%s5196_s1 + $0x3a6] ss:$8 sm:$0x78] %vm255_vm3, %v2320_v56  }
 0x1aa   :  { %3033 = vst.msk [vmem:[%s5196_s1 + $0x1d7] sm:$0x80] %vm255_vm3, %v2320_v56   ;;  %v2518_v4 = vpop.permute.xlu0 %2517   ;;  %v483_v56 = vld [vmem:[#allocation0 + $0x170] sm:$0x3]  }
 0x1ab   :  { %3036 = vst.msk [vmem:[%s5196_s1 + $0x7] ss:$8 sm:$0x7] %vm255_vm3, %v2347_v59  }
 0x1ac   :  { %3037 = vst.msk [vmem:[%s5196_s1 + $0x1e7] ss:$8 sm:$0x78] %vm255_vm3, %v2347_v59  }
 0x1ad   :  { %3038 = vst.msk [vmem:[%s5196_s1 + $0x18] sm:$0x80] %vm255_vm3, %v2347_v59   ;;  %v493_v59 = vld [vmem:[#allocation0 + $0x180] sm:$0x3]  }
 0x1ae   :  { %3042 = vst.msk [vmem:[%s5196_s1 + $0x47] ss:$8 sm:$0x7] %vm255_vm3, %v2385_v61  }
 0x1af   :  { %3043 = vst.msk [vmem:[%s5196_s1 + $0x227] ss:$8 sm:$0x78] %vm255_vm3, %v2385_v61   ;;  %v2537_v5 = vpop.permute.xlu1 %2536  }
 0x1b0   :  { %3044 = vst.msk [vmem:[%s5196_s1 + $0x58] sm:$0x80] %vm255_vm3, %v2385_v61   ;;  %v2556_v6 = vpop.permute.xlu2 %2555   ;;  %v503_v61 = vld [vmem:[#allocation0 + $0x190] sm:$0x3]  }
 0x1b1   :  { %3039 = vst.msk [vmem:[%s5196_s1 + $0x27] ss:$8 sm:$0x7] %vm255_vm3, %v2366_v60  }
 0x1b2   :  { %3040 = vst.msk [vmem:[%s5196_s1 + $0x207] ss:$8 sm:$0x78] %vm255_vm3, %v2366_v60   ;;  %v2575_v7 = vpop.permute.xlu0 %2574  }
 0x1b3   :  { %3041 = vst.msk [vmem:[%s5196_s1 + $0x38] sm:$0x80] %vm255_vm3, %v2366_v60   ;;  %v498_v60 = vld [vmem:[#allocation0 + $0x188] sm:$0x3]  }
 0x1b4   :  { %3045 = vst.msk [vmem:[%s5196_s1 + $0x67] ss:$8 sm:$0x7] %vm255_vm3, %v2404_v62  }
 0x1b5   :  { %3046 = vst.msk [vmem:[%s5196_s1 + $0x247] ss:$8 sm:$0x78] %vm255_vm3, %v2404_v62  }
 0x1b6   :  { %3047 = vst.msk [vmem:[%s5196_s1 + $0x78] sm:$0x80] %vm255_vm3, %v2404_v62   ;;  %v508_v62 = vld [vmem:[#allocation0 + $0x198] sm:$0x3]  }
 0x1b7   :  { %3051 = vst.msk [vmem:[%s5196_s1 + $0xa7] ss:$8 sm:$0x7] %vm255_vm3, %v2442_v0   ;;  %v2594_v8 = vpop.permute.xlu1 %2593  }
 0x1b8   :  { %3052 = vst.msk [vmem:[%s5196_s1 + $0x287] ss:$8 sm:$0x78] %vm255_vm3, %v2442_v0   ;;  %v2613_v9 = vpop.permute.xlu2 %2612  }
 0x1b9   :  { %3053 = vst.msk [vmem:[%s5196_s1 + $0xb8] sm:$0x80] %vm255_vm3, %v2442_v0   ;;  %v518_v0 = vld [vmem:[#allocation0 + $0x1a8] sm:$0x3]  }
 0x1ba   :  { %3048 = vst.msk [vmem:[%s5196_s1 + $0x87] ss:$8 sm:$0x7] %vm255_vm3, %v2423_v63   ;;  %v2624_v10 = vpop.permute.xlu0 %2623  }
 0x1bb   :  { %3049 = vst.msk [vmem:[%s5196_s1 + $0x267] ss:$8 sm:$0x78] %vm255_vm3, %v2423_v63  }
 0x1bc   :  { %3050 = vst.msk [vmem:[%s5196_s1 + $0x98] sm:$0x80] %vm255_vm3, %v2423_v63   ;;  %v513_v63 = vld [vmem:[#allocation0 + $0x1a0] sm:$0x3]  }
 0x1bd   :  { %3054 = vst.msk [vmem:[%s5196_s1 + $0xc7] ss:$8 sm:$0x7] %vm255_vm3, %v2461_v1  }
 0x1be   :  { %3055 = vst.msk [vmem:[%s5196_s1 + $0x2a7] ss:$8 sm:$0x78] %vm255_vm3, %v2461_v1  }
 0x1bf   :  { %3056 = vst.msk [vmem:[%s5196_s1 + $0xd8] sm:$0x80] %vm255_vm3, %v2461_v1   ;;  %v523_v1 = vld [vmem:[#allocation0 + $0x1b0] sm:$0x3]  }
 0x1c0   :  { %3060 = vst.msk [vmem:[%s5196_s1 + $0x107] ss:$8 sm:$0x7] %vm255_vm3, %v2499_v3  }
 0x1c1   :  { %3061 = vst.msk [vmem:[%s5196_s1 + $0x2e7] ss:$8 sm:$0x78] %vm255_vm3, %v2499_v3  }
 0x1c2   :  { %3062 = vst.msk [vmem:[%s5196_s1 + $0x118] sm:$0x80] %vm255_vm3, %v2499_v3   ;;  %v533_v3 = vld [vmem:[#allocation0 + $0x1c0] sm:$0x3]  }
 0x1c3   :  { %3057 = vst.msk [vmem:[%s5196_s1 + $0xe7] ss:$8 sm:$0x7] %vm255_vm3, %v2480_v2  }
 0x1c4   :  { %3058 = vst.msk [vmem:[%s5196_s1 + $0x2c7] ss:$8 sm:$0x78] %vm255_vm3, %v2480_v2  }
 0x1c5   :  { %3059 = vst.msk [vmem:[%s5196_s1 + $0xf8] sm:$0x80] %vm255_vm3, %v2480_v2   ;;  %v528_v2 = vld [vmem:[#allocation0 + $0x1b8] sm:$0x3]  }
 0x1c6   :  { %3063 = vst.msk [vmem:[%s5196_s1 + $0x127] ss:$8 sm:$0x7] %vm255_vm3, %v2518_v4  }
 0x1c7   :  { %3064 = vst.msk [vmem:[%s5196_s1 + $0x307] ss:$8 sm:$0x78] %vm255_vm3, %v2518_v4  }
 0x1c8   :  { %3065 = vst.msk [vmem:[%s5196_s1 + $0x138] sm:$0x80] %vm255_vm3, %v2518_v4   ;;  %v538_v4 = vld [vmem:[#allocation0 + $0x1c8] sm:$0x3]  }
 0x1c9   :  { %3069 = vst.msk [vmem:[%s5196_s1 + $0x167] ss:$8 sm:$0x7] %vm255_vm3, %v2556_v6  }
 0x1ca   :  { %3070 = vst.msk [vmem:[%s5196_s1 + $0x347] ss:$8 sm:$0x78] %vm255_vm3, %v2556_v6  }
 0x1cb   :  { %3071 = vst.msk [vmem:[%s5196_s1 + $0x178] sm:$0x80] %vm255_vm3, %v2556_v6   ;;  %v548_v6 = vld [vmem:[#allocation0 + $0x1d8] sm:$0x3]  }
 0x1cc   :  { %3066 = vst.msk [vmem:[%s5196_s1 + $0x147] ss:$8 sm:$0x7] %vm255_vm3, %v2537_v5  }
 0x1cd   :  { %3067 = vst.msk [vmem:[%s5196_s1 + $0x327] ss:$8 sm:$0x78] %vm255_vm3, %v2537_v5  }
 0x1ce   :  { %3068 = vst.msk [vmem:[%s5196_s1 + $0x158] sm:$0x80] %vm255_vm3, %v2537_v5   ;;  %v543_v5 = vld [vmem:[#allocation0 + $0x1d0] sm:$0x3]  }
 0x1cf   :  { %3072 = vst.msk [vmem:[%s5196_s1 + $0x187] ss:$8 sm:$0x7] %vm255_vm3, %v2575_v7  }
 0x1d0   :  { %3073 = vst.msk [vmem:[%s5196_s1 + $0x367] ss:$8 sm:$0x78] %vm255_vm3, %v2575_v7  }
 0x1d1   :  { %3074 = vst.msk [vmem:[%s5196_s1 + $0x198] sm:$0x80] %vm255_vm3, %v2575_v7   ;;  %v553_v7 = vld [vmem:[#allocation0 + $0x1e0] sm:$0x3]  }
 0x1d2   :  { %3078 = vst.msk [vmem:[%s5196_s1 + $0x1c7] ss:$8 sm:$0x7] %vm255_vm3, %v2613_v9  }
 0x1d3   :  { %3079 = vst.msk [vmem:[%s5196_s1 + $0x3a7] ss:$8 sm:$0x78] %vm255_vm3, %v2613_v9  }
 0x1d4   :  { %3080 = vst.msk [vmem:[%s5196_s1 + $0x1d8] sm:$0x80] %vm255_vm3, %v2613_v9  }
 0x1d5   :  { %3075 = vst.msk [vmem:[%s5196_s1 + $0x1a7] ss:$8 sm:$0x7] %vm255_vm3, %v2594_v8  }
 0x1d6   :  { %3076 = vst.msk [vmem:[%s5196_s1 + $0x387] ss:$8 sm:$0x78] %vm255_vm3, %v2594_v8  }
 0x1d7   :  { %3077 = vst.msk [vmem:[%s5196_s1 + $0x1b8] sm:$0x80] %vm255_vm3, %v2594_v8   ;;  %v558_v8 = vld [vmem:[#allocation0 + $0x1e8] sm:$0x3]  }
 0x1d8   :  { %3081 = vst.msk [vmem:[%s5196_s1 + $0x1e7] ss:$8 sm:$0x3] %vm255_vm3, %v2624_v10  }
 0x1d9   :  { %3082 = vst.msk [vmem:[%s5196_s1 + $0x3cf] ss:$8 sm:$0xc] %vm255_vm3, %v2624_v10  }
 0x1da   :  { %256 = vst.msk [vmem:[%s5196_s1] ss:$504 sm:$0x3] %vm255_vm3, %v254_v11  }
 0x1db   :  { %2692 = vst.msk [vmem:[%s5196_s1 + $0x8] ss:$504 sm:$0x3] %vm255_vm3, %v258_v12  }
 0x1dc   :  { %2693 = vst.msk [vmem:[%s5196_s1 + $0x10] ss:$504 sm:$0x3] %vm255_vm3, %v263_v13  }
 0x1dd   :  { %2694 = vst.msk [vmem:[%s5196_s1 + $0x18] ss:$504 sm:$0x3] %vm255_vm3, %v268_v14  }
 0x1de   :  { %2695 = vst.msk [vmem:[%s5196_s1 + $0x20] ss:$504 sm:$0x3] %vm255_vm3, %v273_v15  }
 0x1df   :  { %2696 = vst.msk [vmem:[%s5196_s1 + $0x28] ss:$504 sm:$0x3] %vm255_vm3, %v278_v16  }
 0x1e0   :  { %2697 = vst.msk [vmem:[%s5196_s1 + $0x30] ss:$504 sm:$0x3] %vm255_vm3, %v283_v17  }
 0x1e1   :  { %2698 = vst.msk [vmem:[%s5196_s1 + $0x38] ss:$504 sm:$0x3] %vm255_vm3, %v288_v57  }
 0x1e2   :  { %2699 = vst.msk [vmem:[%s5196_s1 + $0x40] ss:$504 sm:$0x3] %vm255_vm3, %v293_v18  }
 0x1e3   :  { %2700 = vst.msk [vmem:[%s5196_s1 + $0x48] ss:$504 sm:$0x3] %vm255_vm3, %v298_v19  }
 0x1e4   :  { %2701 = vst.msk [vmem:[%s5196_s1 + $0x50] ss:$504 sm:$0x3] %vm255_vm3, %v303_v20  }
 0x1e5   :  { %2702 = vst.msk [vmem:[%s5196_s1 + $0x58] ss:$504 sm:$0x3] %vm255_vm3, %v308_v21  }
 0x1e6   :  { %2703 = vst.msk [vmem:[%s5196_s1 + $0x60] ss:$504 sm:$0x3] %vm255_vm3, %v313_v22  }
 0x1e7   :  { %2704 = vst.msk [vmem:[%s5196_s1 + $0x68] ss:$504 sm:$0x3] %vm255_vm3, %v318_v23  }
 0x1e8   :  { %2705 = vst.msk [vmem:[%s5196_s1 + $0x70] ss:$504 sm:$0x3] %vm255_vm3, %v323_v24  }
 0x1e9   :  { %2706 = vst.msk [vmem:[%s5196_s1 + $0x78] ss:$504 sm:$0x3] %vm255_vm3, %v328_v25  }
 0x1ea   :  { %2707 = vst.msk [vmem:[%s5196_s1 + $0x80] ss:$504 sm:$0x3] %vm255_vm3, %v333_v26  }
 0x1eb   :  { %2708 = vst.msk [vmem:[%s5196_s1 + $0x88] ss:$504 sm:$0x3] %vm255_vm3, %v338_v27  }
 0x1ec   :  { %2709 = vst.msk [vmem:[%s5196_s1 + $0x90] ss:$504 sm:$0x3] %vm255_vm3, %v343_v28  }
 0x1ed   :  { %2710 = vst.msk [vmem:[%s5196_s1 + $0x98] ss:$504 sm:$0x3] %vm255_vm3, %v348_v29  }
 0x1ee   :  { %2711 = vst.msk [vmem:[%s5196_s1 + $0xa0] ss:$504 sm:$0x3] %vm255_vm3, %v353_v30  }
 0x1ef   :  { %2712 = vst.msk [vmem:[%s5196_s1 + $0xa8] ss:$504 sm:$0x3] %vm255_vm3, %v358_v31  }
 0x1f0   :  { %2713 = vst.msk [vmem:[%s5196_s1 + $0xb0] ss:$504 sm:$0x3] %vm255_vm3, %v363_v32  }
 0x1f1   :  { %2714 = vst.msk [vmem:[%s5196_s1 + $0xb8] ss:$504 sm:$0x3] %vm255_vm3, %v368_v33  }
 0x1f2   :  { %2715 = vst.msk [vmem:[%s5196_s1 + $0xc0] ss:$504 sm:$0x3] %vm255_vm3, %v373_v34  }
 0x1f3   :  { %2716 = vst.msk [vmem:[%s5196_s1 + $0xc8] ss:$504 sm:$0x3] %vm255_vm3, %v378_v35  }
 0x1f4   :  { %2717 = vst.msk [vmem:[%s5196_s1 + $0xd0] ss:$504 sm:$0x3] %vm255_vm3, %v383_v36  }
 0x1f5   :  { %2718 = vst.msk [vmem:[%s5196_s1 + $0xd8] ss:$504 sm:$0x3] %vm255_vm3, %v388_v37  }
 0x1f6   :  { %2719 = vst.msk [vmem:[%s5196_s1 + $0xe0] ss:$504 sm:$0x3] %vm255_vm3, %v393_v38  }
 0x1f7   :  { %2720 = vst.msk [vmem:[%s5196_s1 + $0xe8] ss:$504 sm:$0x3] %vm255_vm3, %v398_v39  }
 0x1f8   :  { %2721 = vst.msk [vmem:[%s5196_s1 + $0xf0] ss:$504 sm:$0x3] %vm255_vm3, %v403_v40  }
 0x1f9   :  { %2722 = vst.msk [vmem:[%s5196_s1 + $0xf8] ss:$504 sm:$0x3] %vm255_vm3, %v408_v41  }
 0x1fa   :  { %2723 = vst.msk [vmem:[%s5196_s1 + $0x100] ss:$504 sm:$0x3] %vm255_vm3, %v413_v42  }
 0x1fb   :  { %2724 = vst.msk [vmem:[%s5196_s1 + $0x108] ss:$504 sm:$0x3] %vm255_vm3, %v418_v43  }
 0x1fc   :  { %2725 = vst.msk [vmem:[%s5196_s1 + $0x110] ss:$504 sm:$0x3] %vm255_vm3, %v423_v44  }
 0x1fd   :  { %2726 = vst.msk [vmem:[%s5196_s1 + $0x118] ss:$504 sm:$0x3] %vm255_vm3, %v428_v45  }
 0x1fe   :  { %2727 = vst.msk [vmem:[%s5196_s1 + $0x120] ss:$504 sm:$0x3] %vm255_vm3, %v433_v46  }
 0x1ff   :  { %2728 = vst.msk [vmem:[%s5196_s1 + $0x128] ss:$504 sm:$0x3] %vm255_vm3, %v438_v47  }
 0x200   :  { %2729 = vst.msk [vmem:[%s5196_s1 + $0x130] ss:$504 sm:$0x3] %vm255_vm3, %v443_v48  }
 0x201   :  { %2730 = vst.msk [vmem:[%s5196_s1 + $0x138] ss:$504 sm:$0x3] %vm255_vm3, %v448_v49  }
 0x202   :  { %2731 = vst.msk [vmem:[%s5196_s1 + $0x140] ss:$504 sm:$0x3] %vm255_vm3, %v453_v50  }
 0x203   :  { %2732 = vst.msk [vmem:[%s5196_s1 + $0x148] ss:$504 sm:$0x3] %vm255_vm3, %v458_v51  }
 0x204   :  { %2733 = vst.msk [vmem:[%s5196_s1 + $0x150] ss:$504 sm:$0x3] %vm255_vm3, %v463_v52  }
 0x205   :  { %2734 = vst.msk [vmem:[%s5196_s1 + $0x158] ss:$504 sm:$0x3] %vm255_vm3, %v468_v53  }
 0x206   :  { %2735 = vst.msk [vmem:[%s5196_s1 + $0x160] ss:$504 sm:$0x3] %vm255_vm3, %v473_v54  }
 0x207   :  { %2736 = vst.msk [vmem:[%s5196_s1 + $0x168] ss:$504 sm:$0x3] %vm255_vm3, %v478_v55  }
 0x208   :  { %2737 = vst.msk [vmem:[%s5196_s1 + $0x170] ss:$504 sm:$0x3] %vm255_vm3, %v483_v56  }
 0x209   :  { %2738 = vst.msk [vmem:[%s5196_s1 + $0x178] ss:$504 sm:$0x3] %vm255_vm3, %v488_v58  }
 0x20a   :  { %2739 = vst.msk [vmem:[%s5196_s1 + $0x180] ss:$504 sm:$0x3] %vm255_vm3, %v493_v59  }
 0x20b   :  { %2740 = vst.msk [vmem:[%s5196_s1 + $0x188] ss:$504 sm:$0x3] %vm255_vm3, %v498_v60  }
 0x20c   :  { %2741 = vst.msk [vmem:[%s5196_s1 + $0x190] ss:$504 sm:$0x3] %vm255_vm3, %v503_v61  }
 0x20d   :  { %2742 = vst.msk [vmem:[%s5196_s1 + $0x198] ss:$504 sm:$0x3] %vm255_vm3, %v508_v62  }
 0x20e   :  { %2743 = vst.msk [vmem:[%s5196_s1 + $0x1a0] ss:$504 sm:$0x3] %vm255_vm3, %v513_v63  }
 0x20f   :  { %2744 = vst.msk [vmem:[%s5196_s1 + $0x1a8] ss:$504 sm:$0x3] %vm255_vm3, %v518_v0  }
 0x210   :  { %2745 = vst.msk [vmem:[%s5196_s1 + $0x1b0] ss:$504 sm:$0x3] %vm255_vm3, %v523_v1  }
 0x211   :  { %2746 = vst.msk [vmem:[%s5196_s1 + $0x1b8] ss:$504 sm:$0x3] %vm255_vm3, %v528_v2  }
 0x212   :  { %2747 = vst.msk [vmem:[%s5196_s1 + $0x1c0] ss:$504 sm:$0x3] %vm255_vm3, %v533_v3  }
 0x213   :  { %2748 = vst.msk [vmem:[%s5196_s1 + $0x1c8] ss:$504 sm:$0x3] %vm255_vm3, %v538_v4  }
 0x214   :  { %2749 = vst.msk [vmem:[%s5196_s1 + $0x1d0] ss:$504 sm:$0x3] %vm255_vm3, %v543_v5  }
 0x215   :  { %2750 = vst.msk [vmem:[%s5196_s1 + $0x1d8] ss:$504 sm:$0x3] %vm255_vm3, %v548_v6  }
 0x216   :  { %2751 = vst.msk [vmem:[%s5196_s1 + $0x1e0] ss:$504 sm:$0x3] %vm255_vm3, %v553_v7  }
 0x217   :  { %2752 = vst.msk [vmem:[%s5196_s1 + $0x1e8] ss:$504 sm:$0x3] %vm255_vm3, %v558_v8  }

// kernel: m5_forward.1
= control target key start
LH: loop header
LB: loop body
LE: loop exit
PB: predicated region body
PF: predicated region fallthrough
CT: control target
= control target key end

     0   :  { %s7879_s0 = inlined_call_operand.vmem [shape: f32[992,80], index: 0, kind: input, shape index: {}]   ;;  %s7880_s1 = inlined_call_operand.vmem [shape: f32[80,32], index: 1, kind: input, shape index: {}]   ;;  %s7881_s2 = inlined_call_operand.vmem [shape: f32[1,32], index: 2, kind: input, shape index: {}]   ;;  %s7882_s3 = inlined_call_operand.vmem [shape: f32[1,32], index: 3, kind: input, shape index: {}]   ;;  %s7883_s4 = inlined_call_operand.vmem [shape: f32[1,32], index: 4, kind: input, shape index: {}]   ;;  %s7884_s5 = inlined_call_operand.vmem [shape: f32[3,32,32], index: 5, kind: input, shape index: {}]   ;;  %s7885_s6 = inlined_call_operand.vmem [shape: f32[1,32], index: 6, kind: input, shape index: {}]   ;;  %s7886_s7 = inlined_call_operand.vmem [shape: f32[1,32], index: 7, kind: input, shape index: {}]   ;;  %s7887_s8 = inlined_call_operand.vmem [shape: f32[1,32], index: 8, kind: input, shape index: {}]   ;;  %s7888_s9 = inlined_call_operand.vmem [shape: f32[3,32,64], index: 9, kind: input, shape index: {}]   ;;  %s7889_s10 = inlined_call_operand.vmem [shape: f32[1,64], index: 10, kind: input, shape index: {}]   ;;  %s7890_s11 = inlined_call_operand.vmem [shape: f32[1,64], index: 11, kind: input, shape index: {}]   ;;  %s7891_s12 = inlined_call_operand.vmem [shape: f32[1,64], index: 12, kind: input, shape index: {}]   ;;  %s7892_s13 = inlined_call_operand.vmem [shape: f32[3,64,64], index: 13, kind: input, shape index: {}]   ;;  %s7893_s14 = inlined_call_operand.vmem [shape: f32[1,64], index: 14, kind: input, shape index: {}]   ;;  %s7894_s15 = inlined_call_operand.vmem [shape: f32[1,64], index: 15, kind: input, shape index: {}]   ;;  %s7895_s16 = inlined_call_operand.vmem [shape: f32[1,64], index: 16, kind: input, shape index: {}]   ;;  %s7896_s17 = inlined_call_operand.vmem [shape: f32[64,35], index: 17, kind: input, shape index: {}]   ;;  %s7897_s18 = inlined_call_operand.vmem [shape: f32[1,35], index: 18, kind: input, shape index: {}]   ;;  %s7898_s19 = inlined_call_operand.hbm [shape: f32[2,35], index: 19, kind: output, shape index: {}]  }
   0x1   :  { %7902 = sst [smem:[#allocation107_spill]] %s7879_s0 }
   0x2   :  { %7903 = sst [smem:[#allocation108_spill]] %s7880_s1 }
   0x3   :  { %7904 = sst [smem:[#allocation109_spill]] %s7881_s2 }
   0x4   :  { %7905 = sst [smem:[#allocation110_spill]] %s7882_s3 }
   0x5   :  { %s7906_s20 = sld [smem:[#allocation108_spill]] }
   0xb   :  { %v72_v0 = vld [vmem:[%s7906_s20 + $0x48] sm:$0xff]  ;;  %v5172_v1 = vld [vmem:[%s7906_s20 + $0x40] sm:$0xff]  ;;  %v5177_v2 = vld [vmem:[%s7906_s20 + $0x38] sm:$0xff] }
   0xc   :  { %148 = vmatpush.msra.mxu0 %v72_v0  ;;  %386 = vmatpush.msra.mxu1 %v72_v0  ;;  %v5186_v3 = vld [vmem:[%s7906_s20 + $0x30] sm:$0xff]  ;;  %v5195_v4 = vld [vmem:[%s7906_s20 + $0x28] sm:$0xff]  ;;  %v5202_v5 = vld [vmem:[%s7906_s20 + $0x20] sm:$0xff] }
   0xd   :  { %623 = vmatpush.msra.mxu2 %v72_v0  ;;  %860 = vmatpush.msra.mxu3 %v72_v0 }
   0xe   :  { %149 = vmatpush.msra.mxu0 %v5172_v1  ;;  %387 = vmatpush.msra.mxu1 %v5172_v1 }
   0xf   :  { %624 = vmatpush.msra.mxu2 %v5172_v1  ;;  %861 = vmatpush.msra.mxu3 %v5172_v1 }
  0x10   :  { %150 = vmatpush.msra.mxu0 %v5177_v2  ;;  %388 = vmatpush.msra.mxu1 %v5177_v2 }
  0x11   :  { %625 = vmatpush.msra.mxu2 %v5177_v2  ;;  %862 = vmatpush.msra.mxu3 %v5177_v2 }
  0x12   :  { %151 = vmatpush.msra.mxu0 %v5186_v3  ;;  %389 = vmatpush.msra.mxu1 %v5186_v3 }
  0x13   :  { %626 = vmatpush.msra.mxu2 %v5186_v3  ;;  %863 = vmatpush.msra.mxu3 %v5186_v3 }
  0x14   :  { %152 = vmatpush.msra.mxu0 %v5195_v4  ;;  %390 = vmatpush.msra.mxu1 %v5195_v4 }
  0x15   :  { %24 = vsyncpa [#allocation11], 0  ;;  %627 = vmatpush.msra.mxu2 %v5195_v4  ;;  %864 = vmatpush.msra.mxu3 %v5195_v4  ;;  %v5213_v6 = vld [vmem:[%s7906_s20 + $0x18] sm:$0xff]  ;;  %v5222_v7 = vld [vmem:[%s7906_s20 + $0x10] sm:$0xff]  ;;  %s7907_s25 = sld [smem:[#allocation107_spill]]  ;;  %vm93_vm0 = vcmask 654336  }
  0x16   :  { %153 = vmatpush.msra.mxu0 %v5202_v5  ;;  %391 = vmatpush.msra.mxu1 %v5202_v5  ;;  %v5231_v8 = vld [vmem:[%s7906_s20 + $0x8] sm:$0xff]  ;;  %v5240_v9 = vld [vmem:[%s7906_s20] sm:$0xff]  ;;  %s7908_s20 = sld [smem:[#allocation109_spill]]  ;;  %vm207_vm1 = vcmask 261120   ;;  %vm3049_vm5 = vcmask 254976   ;;  %vm3788_vm9 = vcmask 259072  }
  0x17   :  { %628 = vmatpush.msra.mxu2 %v5202_v5  ;;  %865 = vmatpush.msra.mxu3 %v5202_v5  ;;  %s7909_s27 = sld [smem:[#allocation110_spill]]  ;;  %vm4035_vm10 = vcmask 523264   ;;  %vm4039_vm11 = vcmask 519168   ;;  %vm4307_vm15 = vcmask 522240  }
  0x18   :  { %154 = vmatpush.msra.mxu0 %v5213_v6  ;;  %392 = vmatpush.msra.mxu1 %v5213_v6 }
  0x19   :  { %629 = vmatpush.msra.mxu2 %v5213_v6  ;;  %866 = vmatpush.msra.mxu3 %v5213_v6 }
  0x1a   :  { %155 = vmatpush.msra.mxu0 %v5222_v7  ;;  %393 = vmatpush.msra.mxu1 %v5222_v7 }
  0x1b   :  { %630 = vmatpush.msra.mxu2 %v5222_v7  ;;  %867 = vmatpush.msra.mxu3 %v5222_v7  ;;  %v74_v10 = vld [vmem:[%s7907_s25] sm:$0xff]  ;;  %v75_v14 = vld [vmem:[%s7907_s25 + $0x8] sm:$0xff]  ;;  %v76_v18 = vld [vmem:[%s7907_s25 + $0x10] sm:$0xff] }
  0x1c   :  { %156 = vmatpush.msra.mxu0 %v5231_v8  ;;  %394 = vmatpush.msra.mxu1 %v5231_v8  ;;  %v316_v11 = vld [vmem:[%s7907_s25 + $0x80] sm:$0xff]  ;;  %v317_v15 = vld [vmem:[%s7907_s25 + $0x88] sm:$0xff]  ;;  %v318_v19 = vld [vmem:[%s7907_s25 + $0x90] sm:$0xff] }
  0x1d   :  { %631 = vmatpush.msra.mxu2 %v5231_v8  ;;  %868 = vmatpush.msra.mxu3 %v5231_v8  ;;  %v553_v12 = vld [vmem:[%s7907_s25 + $0x100] sm:$0xff]  ;;  %v554_v16 = vld [vmem:[%s7907_s25 + $0x108] sm:$0xff]  ;;  %v555_v20 = vld [vmem:[%s7907_s25 + $0x110] sm:$0xff] }
  0x1e   :  { %157 = vmatpush.msra.mxu0 %v5240_v9  ;;  %395 = vmatpush.msra.mxu1 %v5240_v9  ;;  %v790_v13 = vld [vmem:[%s7907_s25 + $0x180] sm:$0xff]  ;;  %v791_v17 = vld [vmem:[%s7907_s25 + $0x188] sm:$0xff]  ;;  %v792_v21 = vld [vmem:[%s7907_s25 + $0x190] sm:$0xff] }
  0x1f   :  { %632 = vmatpush.msra.mxu2 %v5240_v9  ;;  %869 = vmatpush.msra.mxu3 %v5240_v9  ;;  %v77_v22 = vld [vmem:[%s7907_s25 + $0x18] sm:$0xff]  ;;  %v78_v26 = vld [vmem:[%s7907_s25 + $0x20] sm:$0xff]  ;;  %v79_v30 = vld [vmem:[%s7907_s25 + $0x28] sm:$0xff] }
  0x20   :  { %4699 = vmatmul.msk.f32.vlgmr.msra.gmra.mxu0 %vm93_vm0, %v74_v10  ;;  %4715 = vmatmul.msk.f32.vlgmr.msra.gmra.mxu1 %vm93_vm0, %v316_v11  ;;  %v319_v23 = vld [vmem:[%s7907_s25 + $0x98] sm:$0xff]  ;;  %v320_v27 = vld [vmem:[%s7907_s25 + $0xa0] sm:$0xff]  ;;  %v321_v31 = vld [vmem:[%s7907_s25 + $0xa8] sm:$0xff] }
  0x21   :  { %4731 = vmatmul.msk.f32.vlgmr.msra.gmra.mxu2 %vm93_vm0, %v553_v12  ;;  %4747 = vmatmul.msk.f32.vlgmr.msra.gmra.mxu3 %vm93_vm0, %v790_v13  ;;  %v556_v24 = vld [vmem:[%s7907_s25 + $0x118] sm:$0xff]  ;;  %v557_v28 = vld [vmem:[%s7907_s25 + $0x120] sm:$0xff]  ;;  %v558_v32 = vld [vmem:[%s7907_s25 + $0x128] sm:$0xff] }
  0x22   :  { %1571 = vmatpush.msrb.mxu2 %v72_v0  ;;  %1097 = vmatpush.msrb.mxu0 %v72_v0  ;;  %v793_v25 = vld [vmem:[%s7907_s25 + $0x198] sm:$0xff]  ;;  %v794_v29 = vld [vmem:[%s7907_s25 + $0x1a0] sm:$0xff]  ;;  %v795_v33 = vld [vmem:[%s7907_s25 + $0x1a8] sm:$0xff] }
  0x23   :  { %1334 = vmatpush.msrb.mxu1 %v72_v0  ;;  %1792 = vmatpush.msrb.mxu3 %v72_v0  ;;  %v80_v34 = vld [vmem:[%s7907_s25 + $0x30] sm:$0xff]  ;;  %v81_v38 = vld [vmem:[%s7907_s25 + $0x38] sm:$0xff]  ;;  %v82_v42 = vld [vmem:[%s7907_s25 + $0x40] sm:$0xff] }
  0x24   :  { %1572 = vmatpush.msrb.mxu2 %v5172_v1  ;;  %1098 = vmatpush.msrb.mxu0 %v5172_v1  ;;  %v322_v35 = vld [vmem:[%s7907_s25 + $0xb0] sm:$0xff]  ;;  %v323_v39 = vld [vmem:[%s7907_s25 + $0xb8] sm:$0xff]  ;;  %v324_v43 = vld [vmem:[%s7907_s25 + $0xc0] sm:$0xff] }
  0x25   :  { %1335 = vmatpush.msrb.mxu1 %v5172_v1  ;;  %1793 = vmatpush.msrb.mxu3 %v5172_v1  ;;  %v559_v36 = vld [vmem:[%s7907_s25 + $0x130] sm:$0xff]  ;;  %v560_v40 = vld [vmem:[%s7907_s25 + $0x138] sm:$0xff]  ;;  %v561_v44 = vld [vmem:[%s7907_s25 + $0x140] sm:$0xff] }
  0x26   :  { %1573 = vmatpush.msrb.mxu2 %v5177_v2  ;;  %1099 = vmatpush.msrb.mxu0 %v5177_v2  ;;  %v796_v37 = vld [vmem:[%s7907_s25 + $0x1b0] sm:$0xff]  ;;  %v797_v41 = vld [vmem:[%s7907_s25 + $0x1b8] sm:$0xff]  ;;  %v798_v45 = vld [vmem:[%s7907_s25 + $0x1c0] sm:$0xff] }
  0x27   :  { %1336 = vmatpush.msrb.mxu1 %v5177_v2  ;;  %1794 = vmatpush.msrb.mxu3 %v5177_v2  ;;  %v83_v46 = vld [vmem:[%s7907_s25 + $0x48] sm:$0xff]  ;;  %v84_v50 = vld [vmem:[%s7907_s25 + $0x50] sm:$0xff]  ;;  %v85_v54 = vld [vmem:[%s7907_s25 + $0x58] sm:$0xff] }
  0x28   :  { %4700 = vmatmul.msk.f32.gmra.mxu0 %vm93_vm0, %v75_v14  ;;  %4716 = vmatmul.msk.f32.gmra.mxu1 %vm93_vm0, %v317_v15  ;;  %v325_v47 = vld [vmem:[%s7907_s25 + $0xc8] sm:$0xff]  ;;  %v326_v51 = vld [vmem:[%s7907_s25 + $0xd0] sm:$0xff]  ;;  %v327_v55 = vld [vmem:[%s7907_s25 + $0xd8] sm:$0xff] }
  0x29   :  { %4732 = vmatmul.msk.f32.gmra.mxu2 %vm93_vm0, %v554_v16  ;;  %4748 = vmatmul.msk.f32.gmra.mxu3 %vm93_vm0, %v791_v17  ;;  %v562_v48 = vld [vmem:[%s7907_s25 + $0x148] sm:$0xff]  ;;  %v563_v52 = vld [vmem:[%s7907_s25 + $0x150] sm:$0xff]  ;;  %v564_v56 = vld [vmem:[%s7907_s25 + $0x158] sm:$0xff] }
  0x2a   :  { %1574 = vmatpush.msrb.mxu2 %v5186_v3  ;;  %1100 = vmatpush.msrb.mxu0 %v5186_v3  ;;  %v799_v49 = vld [vmem:[%s7907_s25 + $0x1c8] sm:$0xff]  ;;  %v800_v53 = vld [vmem:[%s7907_s25 + $0x1d0] sm:$0xff]  ;;  %v801_v57 = vld [vmem:[%s7907_s25 + $0x1d8] sm:$0xff] }
  0x2b   :  { %1337 = vmatpush.msrb.mxu1 %v5186_v3  ;;  %1795 = vmatpush.msrb.mxu3 %v5186_v3  ;;  %v86_v58 = vld [vmem:[%s7907_s25 + $0x60] sm:$0xff]  ;;  %v87_v62 = vld [vmem:[%s7907_s25 + $0x68] sm:$0xff]  ;;  %v88_v2 = vld [vmem:[%s7907_s25 + $0x70] sm:$0xff] }
  0x2c   :  { %1575 = vmatpush.msrb.mxu2 %v5195_v4  ;;  %1101 = vmatpush.msrb.mxu0 %v5195_v4  ;;  %v328_v59 = vld [vmem:[%s7907_s25 + $0xe0] sm:$0xff]  ;;  %v329_v63 = vld [vmem:[%s7907_s25 + $0xe8] sm:$0xff]  ;;  %v330_v3 = vld [vmem:[%s7907_s25 + $0xf0] sm:$0xff] }
  0x2d   :  { %1338 = vmatpush.msrb.mxu1 %v5195_v4  ;;  %1796 = vmatpush.msrb.mxu3 %v5195_v4  ;;  %v565_v60 = vld [vmem:[%s7907_s25 + $0x160] sm:$0xff]  ;;  %v566_v0 = vld [vmem:[%s7907_s25 + $0x168] sm:$0xff]  ;;  %v567_v4 = vld [vmem:[%s7907_s25 + $0x170] sm:$0xff] }
  0x2e   :  { %1576 = vmatpush.msrb.mxu2 %v5202_v5  ;;  %1102 = vmatpush.msrb.mxu0 %v5202_v5  ;;  %v802_v61 = vld [vmem:[%s7907_s25 + $0x1e0] sm:$0xff]  ;;  %v803_v1 = vld [vmem:[%s7907_s25 + $0x1e8] sm:$0xff] }
  0x2f   :  { %1339 = vmatpush.msrb.mxu1 %v5202_v5  ;;  %1797 = vmatpush.msrb.mxu3 %v5202_v5  ;;  %v804_v5 = vld [vmem:[%s7907_s25 + $0x1f0] sm:$0xff]  ;;  %v5545_v10 = vld [vmem:[%s7908_s20] ss:$0 sm:$0xff] }
  0x30   :  { %4701 = vmatmul.msk.f32.gmra.mxu0 %vm93_vm0, %v76_v18  ;;  %4717 = vmatmul.msk.f32.gmra.mxu1 %vm93_vm0, %v318_v19  ;;  %v1027_v13 = vld [vmem:[%s7907_s25 + $0x200] sm:$0xff] }
  0x31   :  { %4733 = vmatmul.msk.f32.gmra.mxu2 %vm93_vm0, %v555_v20  ;;  %4749 = vmatmul.msk.f32.gmra.mxu3 %vm93_vm0, %v792_v21  ;;  %v1264_v14 = vld [vmem:[%s7907_s25 + $0x280] sm:$0xff] }
  0x32   :  { %1577 = vmatpush.msrb.mxu2 %v5213_v6  ;;  %1103 = vmatpush.msrb.mxu0 %v5213_v6  ;;  %v1501_v17 = vld [vmem:[%s7907_s25 + $0x300] sm:$0xff] }
  0x33   :  { %1340 = vmatpush.msrb.mxu1 %v5213_v6  ;;  %1798 = vmatpush.msrb.mxu3 %v5213_v6  ;;  %v89_v6 = vld [vmem:[%s7907_s25 + $0x78] sm:$0xff]  ;;  %v1738_v18 = vld [vmem:[%s7907_s25 + $0x380] sm:$0xff] }
  0x34   :  { %1578 = vmatpush.msrb.mxu2 %v5222_v7  ;;  %1104 = vmatpush.msrb.mxu0 %v5222_v7 }
  0x35   :  { %1341 = vmatpush.msrb.mxu1 %v5222_v7  ;;  %1799 = vmatpush.msrb.mxu3 %v5222_v7  ;;  %v331_v7 = vld [vmem:[%s7907_s25 + $0xf8] sm:$0xff] }
  0x36   :  { %1579 = vmatpush.msrb.mxu2 %v5231_v8  ;;  %1105 = vmatpush.msrb.mxu0 %v5231_v8 }
  0x37   :  { %1342 = vmatpush.msrb.mxu1 %v5231_v8  ;;  %1800 = vmatpush.msrb.mxu3 %v5231_v8  ;;  %v568_v8 = vld [vmem:[%s7907_s25 + $0x178] sm:$0xff] }
  0x38   :  { %4702 = vmatmul.msk.f32.gmra.mxu0 %vm93_vm0, %v77_v22  ;;  %4718 = vmatmul.msk.f32.gmra.mxu1 %vm93_vm0, %v319_v23 }
  0x39   :  { %4734 = vmatmul.msk.f32.gmra.mxu2 %vm93_vm0, %v556_v24  ;;  %4750 = vmatmul.msk.f32.gmra.mxu3 %vm93_vm0, %v793_v25 }
  0x3a   :  { %1580 = vmatpush.msrb.mxu2 %v5240_v9  ;;  %1106 = vmatpush.msrb.mxu0 %v5240_v9 }
  0x3b   :  { %1343 = vmatpush.msrb.mxu1 %v5240_v9  ;;  %1801 = vmatpush.msrb.mxu3 %v5240_v9  ;;  %v805_v9 = vld [vmem:[%s7907_s25 + $0x1f8] sm:$0xff] }
  0x40   :  { %4703 = vmatmul.msk.f32.gmra.mxu0 %vm93_vm0, %v78_v26  ;;  %4719 = vmatmul.msk.f32.gmra.mxu1 %vm93_vm0, %v320_v27  ;;  %v1028_v27 = vld [vmem:[%s7907_s25 + $0x208] sm:$0xff] }
  0x41   :  { %4735 = vmatmul.msk.f32.gmra.mxu2 %vm93_vm0, %v557_v28  ;;  %4751 = vmatmul.msk.f32.gmra.mxu3 %vm93_vm0, %v794_v29  ;;  %v1265_v28 = vld [vmem:[%s7907_s25 + $0x288] sm:$0xff] }
  0x48   :  { %4704 = vmatmul.msk.f32.gmra.mxu0 %vm93_vm0, %v79_v30  ;;  %4720 = vmatmul.msk.f32.gmra.mxu1 %vm93_vm0, %v321_v31  ;;  %v1502_v31 = vld [vmem:[%s7907_s25 + $0x308] sm:$0xff] }
  0x49   :  { %4736 = vmatmul.msk.f32.gmra.mxu2 %vm93_vm0, %v558_v32  ;;  %4752 = vmatmul.msk.f32.gmra.mxu3 %vm93_vm0, %v795_v33  ;;  %v1739_v32 = vld [vmem:[%s7907_s25 + $0x388] sm:$0xff] }
  0x50   :  { %4705 = vmatmul.msk.f32.gmra.mxu0 %vm93_vm0, %v80_v34  ;;  %4721 = vmatmul.msk.f32.gmra.mxu1 %vm93_vm0, %v322_v35 }
  0x51   :  { %4737 = vmatmul.msk.f32.gmra.mxu2 %vm93_vm0, %v559_v36  ;;  %4753 = vmatmul.msk.f32.gmra.mxu3 %vm93_vm0, %v796_v37 }
  0x58   :  { %4706 = vmatmul.msk.f32.gmra.mxu0 %vm93_vm0, %v81_v38  ;;  %4722 = vmatmul.msk.f32.gmra.mxu1 %vm93_vm0, %v323_v39 }
  0x59   :  { %4738 = vmatmul.msk.f32.gmra.mxu2 %vm93_vm0, %v560_v40  ;;  %4754 = vmatmul.msk.f32.gmra.mxu3 %vm93_vm0, %v797_v41 }
  0x60   :  { %4707 = vmatmul.msk.f32.gmra.mxu0 %vm93_vm0, %v82_v42  ;;  %4723 = vmatmul.msk.f32.gmra.mxu1 %vm93_vm0, %v324_v43 }
  0x61   :  { %4739 = vmatmul.msk.f32.gmra.mxu2 %vm93_vm0, %v561_v44  ;;  %4755 = vmatmul.msk.f32.gmra.mxu3 %vm93_vm0, %v798_v45 }
  0x68   :  { %4708 = vmatmul.msk.f32.gmra.mxu0 %vm93_vm0, %v83_v46  ;;  %4724 = vmatmul.msk.f32.gmra.mxu1 %vm93_vm0, %v325_v47 }
  0x69   :  { %4740 = vmatmul.msk.f32.gmra.mxu2 %vm93_vm0, %v562_v48  ;;  %4756 = vmatmul.msk.f32.gmra.mxu3 %vm93_vm0, %v799_v49 }
  0x70   :  { %4709 = vmatmul.msk.f32.gmra.mxu0 %vm93_vm0, %v84_v50  ;;  %4725 = vmatmul.msk.f32.gmra.mxu1 %vm93_vm0, %v326_v51 }
  0x71   :  { %4741 = vmatmul.msk.f32.gmra.mxu2 %vm93_vm0, %v563_v52  ;;  %4757 = vmatmul.msk.f32.gmra.mxu3 %vm93_vm0, %v800_v53 }
  0x78   :  { %4710 = vmatmul.msk.f32.gmra.mxu0 %vm93_vm0, %v85_v54  ;;  %4726 = vmatmul.msk.f32.gmra.mxu1 %vm93_vm0, %v327_v55 }
  0x79   :  { %4742 = vmatmul.msk.f32.gmra.mxu2 %vm93_vm0, %v564_v56  ;;  %4758 = vmatmul.msk.f32.gmra.mxu3 %vm93_vm0, %v801_v57  ;;  %v1029_v57 = vld [vmem:[%s7907_s25 + $0x210] sm:$0xff] }
  0x80   :  { %4711 = vmatmul.msk.f32.gmra.mxu0 %vm93_vm0, %v86_v58  ;;  %4727 = vmatmul.msk.f32.gmra.mxu1 %vm93_vm0, %v328_v59 }
  0x81   :  { %4743 = vmatmul.msk.f32.gmra.mxu2 %vm93_vm0, %v565_v60  ;;  %4759 = vmatmul.msk.f32.gmra.mxu3 %vm93_vm0, %v802_v61 }
  0x88   :  { %4712 = vmatmul.msk.f32.gmra.mxu0 %vm93_vm0, %v87_v62  ;;  %4728 = vmatmul.msk.f32.gmra.mxu1 %vm93_vm0, %v329_v63  ;;  %v1266_v62 = vld [vmem:[%s7907_s25 + $0x290] sm:$0xff] }
  0x89   :  { %4744 = vmatmul.msk.f32.gmra.mxu2 %vm93_vm0, %v566_v0  ;;  %4760 = vmatmul.msk.f32.gmra.mxu3 %vm93_vm0, %v803_v1  ;;  %v1503_v63 = vld [vmem:[%s7907_s25 + $0x310] sm:$0xff] }
  0x90   :  { %4713 = vmatmul.msk.f32.gmra.mxu0 %vm93_vm0, %v88_v2  ;;  %4729 = vmatmul.msk.f32.gmra.mxu1 %vm93_vm0, %v330_v3 }
  0x91   :  { %4745 = vmatmul.msk.f32.gmra.mxu2 %vm93_vm0, %v567_v4  ;;  %4761 = vmatmul.msk.f32.gmra.mxu3 %vm93_vm0, %v804_v5  ;;  %v1740_v4 = vld [vmem:[%s7907_s25 + $0x390] sm:$0xff] }
  0x98   :  { %4714 = vmatmul.msk.f32.gmra.mxu0 %vm93_vm0, %v89_v6  ;;  %4730 = vmatmul.msk.f32.gmra.mxu1 %vm93_vm0, %v331_v7 }
  0x99   :  { %4746 = vmatmul.msk.f32.gmra.mxu2 %vm93_vm0, %v568_v8  ;;  %4762 = vmatmul.msk.f32.gmra.mxu3 %vm93_vm0, %v805_v9 }
  0x9d   :  { %v159_v11 = vpop.f32.mrf.mxu0  ;;  %v397_v12 = vpop.f32.mrf.mxu1 }
  0x9e   :  { %v160_v15 = vadd.f32 %v5545_v10, %v159_v11  ;;  %v398_v16 = vadd.f32 %v5545_v10, %v397_v12 }
  0xa0   :  { %208 = vst.msk [vmem:[#allocation2] sm:$0xff] %vm207_vm1, %v160_v15  ;;  %4763 = vmatmul.msk.f32.vlgmr.msrb.gmra.mxu0 %vm93_vm0, %v1027_v13  ;;  %4779 = vmatmul.msk.f32.vlgmr.msrb.gmra.mxu1 %vm93_vm0, %v1264_v14  ;;  %v262_v21 = vmul.f32 %v160_v15, %v160_v15  ;;  %v499_v22 = vmul.f32 %v398_v16, %v398_v16  ;;  %v224_v33 = vsel %vm207_vm1, %v160_v15, 0.0  ;;  %v461_v34 = vsel %vm207_vm1, %v398_v16, 0.0 }
  0xa1   :  { %445 = vst.msk [vmem:[#allocation2 + $0x80] sm:$0xff] %vm207_vm1, %v398_v16  ;;  %4795 = vmatmul.msk.f32.vlgmr.msrb.gmra.mxu2 %vm93_vm0, %v1501_v17  ;;  %4811 = vmatmul.msk.f32.vlgmr.msrb.gmra.mxu3 %vm93_vm0, %v1738_v18 }
  0xa2   :  { %v278_v39 = vsel %vm207_vm1, %v262_v21, 0.0  ;;  %v515_v40 = vsel %vm207_vm1, %v499_v22, 0.0 }
  0xa4   :  { %v634_v19 = vpop.f32.mrf.mxu2  ;;  %v871_v20 = vpop.f32.mrf.mxu3 }
  0xa5   :  { %v635_v23 = vadd.f32 %v5545_v10, %v634_v19  ;;  %v872_v24 = vadd.f32 %v5545_v10, %v871_v20  ;;  %v162_v25 = vpop.f32.mrf.mxu0  ;;  %v400_v26 = vpop.f32.mrf.mxu1 }
  0xa6   :  { %v163_v29 = vadd.f32 %v5545_v10, %v162_v25  ;;  %v401_v30 = vadd.f32 %v5545_v10, %v400_v26 }
  0xa7   :  { %682 = vst.msk [vmem:[#allocation2 + $0x100] sm:$0xff] %vm207_vm1, %v635_v23  ;;  %v736_v43 = vmul.f32 %v635_v23, %v635_v23  ;;  %v973_v44 = vmul.f32 %v872_v24, %v872_v24  ;;  %v698_v51 = vsel %vm207_vm1, %v635_v23, 0.0  ;;  %v935_v52 = vsel %vm207_vm1, %v872_v24, 0.0 }
  0xa8   :  { %919 = vst.msk [vmem:[#allocation2 + $0x180] sm:$0xff] %vm207_vm1, %v872_v24  ;;  %v225_v35 = vsel %vm207_vm1, %v163_v29, 0.0  ;;  %v263_v36 = vmul.f32 %v163_v29, %v163_v29  ;;  %v462_v37 = vsel %vm207_vm1, %v401_v30, 0.0  ;;  %v500_v38 = vmul.f32 %v401_v30, %v401_v30  ;;  %4764 = vmatmul.msk.f32.gmra.mxu0 %vm93_vm0, %v1028_v27  ;;  %4780 = vmatmul.msk.f32.gmra.mxu1 %vm93_vm0, %v1265_v28  ;;  %v1030_v27 = vld [vmem:[%s7907_s25 + $0x218] sm:$0xff] }
  0xa9   :  { %209 = vst.msk [vmem:[#allocation2 + $0x8] sm:$0xff] %vm207_vm1, %v163_v29  ;;  %v226_v41 = vadd.f32 %v225_v35, %v224_v33  ;;  %v463_v42 = vadd.f32 %v462_v37, %v461_v34  ;;  %4796 = vmatmul.msk.f32.gmra.mxu2 %vm93_vm0, %v1502_v31  ;;  %4812 = vmatmul.msk.f32.gmra.mxu3 %vm93_vm0, %v1739_v32  ;;  %v752_v58 = vsel %vm207_vm1, %v736_v43, 0.0  ;;  %v989_v59 = vsel %vm207_vm1, %v973_v44, 0.0  ;;  %v1267_v31 = vld [vmem:[%s7907_s25 + $0x298] sm:$0xff] }
  0xaa   :  { %v279_v45 = vsel %vm207_vm1, %v263_v36, 0.0  ;;  %446 = vst.msk [vmem:[#allocation2 + $0x88] sm:$0xff] %vm207_vm1, %v401_v30  ;;  %v516_v46 = vsel %vm207_vm1, %v500_v38, 0.0  ;;  %v1504_v32 = vld [vmem:[%s7907_s25 + $0x318] sm:$0xff] }
  0xab   :  { %v280_v47 = vadd.f32 %v279_v45, %v278_v39  ;;  %v517_v48 = vadd.f32 %v516_v46, %v515_v40  ;;  %v1741_v37 = vld [vmem:[%s7907_s25 + $0x398] sm:$0xff] }
  0xac   :  { %v637_v49 = vpop.f32.mrf.mxu2  ;;  %v874_v50 = vpop.f32.mrf.mxu3 }
  0xad   :  { %v638_v53 = vadd.f32 %v5545_v10, %v637_v49  ;;  %v875_v54 = vadd.f32 %v5545_v10, %v874_v50  ;;  %v165_v55 = vpop.f32.mrf.mxu0  ;;  %v403_v56 = vpop.f32.mrf.mxu1 }
  0xae   :  { %v166_v60 = vadd.f32 %v5545_v10, %v165_v55  ;;  %v404_v61 = vadd.f32 %v5545_v10, %v403_v56 }
  0xaf   :  { %683 = vst.msk [vmem:[#allocation2 + $0x108] sm:$0xff] %vm207_vm1, %v638_v53  ;;  %v699_v0 = vsel %vm207_vm1, %v638_v53, 0.0  ;;  %v737_v1 = vmul.f32 %v638_v53, %v638_v53  ;;  %v936_v2 = vsel %vm207_vm1, %v875_v54, 0.0  ;;  %v974_v3 = vmul.f32 %v875_v54, %v875_v54 }
  0xb0   :  { %v700_v5 = vadd.f32 %v699_v0, %v698_v51  ;;  %920 = vst.msk [vmem:[#allocation2 + $0x188] sm:$0xff] %vm207_vm1, %v875_v54  ;;  %v937_v6 = vadd.f32 %v936_v2, %v935_v52  ;;  %v227_v7 = vsel %vm207_vm1, %v166_v60, 0.0  ;;  %v264_v8 = vmul.f32 %v166_v60, %v166_v60  ;;  %4765 = vmatmul.msk.f32.gmra.mxu0 %vm93_vm0, %v1029_v57  ;;  %v1505_v0 = vld [vmem:[%s7907_s25 + $0x320] sm:$0xff] }
  0xb1   :  { %v753_v9 = vsel %vm207_vm1, %v737_v1, 0.0  ;;  %v990_v11 = vsel %vm207_vm1, %v974_v3, 0.0  ;;  %210 = vst.msk [vmem:[#allocation2 + $0x10] sm:$0xff] %vm207_vm1, %v166_v60  ;;  %v228_v12 = vadd.f32 %v227_v7, %v226_v41  ;;  %v464_v13 = vsel %vm207_vm1, %v404_v61, 0.0  ;;  %4781 = vmatmul.msk.f32.gmra.mxu1 %vm93_vm0, %v1266_v62  ;;  %4797 = vmatmul.msk.f32.gmra.mxu2 %vm93_vm0, %v1503_v63  ;;  %v1268_v63 = vld [vmem:[%s7907_s25 + $0x2a0] sm:$0xff] }
  0xb2   :  { %v754_v14 = vadd.f32 %v753_v9, %v752_v58  ;;  %v991_v15 = vadd.f32 %v990_v11, %v989_v59  ;;  %v281_v16 = vsel %vm207_vm1, %v264_v8, 0.0  ;;  %447 = vst.msk [vmem:[#allocation2 + $0x90] sm:$0xff] %vm207_vm1, %v404_v61  ;;  %v465_v17 = vadd.f32 %v464_v13, %v463_v42  ;;  %4813 = vmatmul.msk.f32.gmra.mxu3 %vm93_vm0, %v1740_v4  ;;  %v1031_v59 = vld [vmem:[%s7907_s25 + $0x220] sm:$0xff] }
  0xb3   :  { %v282_v18 = vadd.f32 %v281_v16, %v280_v47  ;;  %v501_v19 = vmul.f32 %v404_v61, %v404_v61 }
  0xb4   :  { %v640_v20 = vpop.f32.mrf.mxu2  ;;  %v877_v21 = vpop.f32.mrf.mxu3 }
  0xb5   :  { %v518_v22 = vsel %vm207_vm1, %v501_v19, 0.0  ;;  %v641_v23 = vadd.f32 %v5545_v10, %v640_v20  ;;  %v878_v24 = vadd.f32 %v5545_v10, %v877_v21  ;;  %v168_v25 = vpop.f32.mrf.mxu0  ;;  %v406_v26 = vpop.f32.mrf.mxu1 }
  0xb6   :  { %v519_v28 = vadd.f32 %v518_v22, %v517_v48  ;;  %v169_v29 = vadd.f32 %v5545_v10, %v168_v25  ;;  %v407_v30 = vadd.f32 %v5545_v10, %v406_v26 }
  0xb7   :  { %684 = vst.msk [vmem:[#allocation2 + $0x110] sm:$0xff] %vm207_vm1, %v641_v23  ;;  %v701_v33 = vsel %vm207_vm1, %v641_v23, 0.0  ;;  %v738_v34 = vmul.f32 %v641_v23, %v641_v23  ;;  %v938_v35 = vsel %vm207_vm1, %v878_v24, 0.0  ;;  %v975_v36 = vmul.f32 %v878_v24, %v878_v24 }
  0xb8   :  { %v702_v38 = vadd.f32 %v701_v33, %v700_v5  ;;  %921 = vst.msk [vmem:[#allocation2 + $0x190] sm:$0xff] %vm207_vm1, %v878_v24  ;;  %v939_v39 = vadd.f32 %v938_v35, %v937_v6  ;;  %v229_v40 = vsel %vm207_vm1, %v169_v29, 0.0  ;;  %v265_v41 = vmul.f32 %v169_v29, %v169_v29  ;;  %4766 = vmatmul.msk.f32.gmra.mxu0 %vm93_vm0, %v1030_v27  ;;  %v1742_v5 = vld [vmem:[%s7907_s25 + $0x3a0] sm:$0xff]  ;;  %v1506_v33 = vld [vmem:[%s7907_s25 + $0x328] sm:$0xff] }
  0xb9   :  { %v755_v42 = vsel %vm207_vm1, %v738_v34, 0.0  ;;  %v992_v43 = vsel %vm207_vm1, %v975_v36, 0.0  ;;  %211 = vst.msk [vmem:[#allocation2 + $0x18] sm:$0xff] %vm207_vm1, %v169_v29  ;;  %v230_v44 = vadd.f32 %v229_v40, %v228_v12  ;;  %v466_v45 = vsel %vm207_vm1, %v407_v30, 0.0  ;;  %4782 = vmatmul.msk.f32.gmra.mxu1 %vm93_vm0, %v1267_v31  ;;  %4798 = vmatmul.msk.f32.gmra.mxu2 %vm93_vm0, %v1504_v32  ;;  %v1269_v32 = vld [vmem:[%s7907_s25 + $0x2a8] sm:$0xff] }
  0xba   :  { %v756_v46 = vadd.f32 %v755_v42, %v754_v14  ;;  %v993_v47 = vadd.f32 %v992_v43, %v991_v15  ;;  %v283_v48 = vsel %vm207_vm1, %v265_v41, 0.0  ;;  %448 = vst.msk [vmem:[#allocation2 + $0x98] sm:$0xff] %vm207_vm1, %v407_v30  ;;  %v467_v49 = vadd.f32 %v466_v45, %v465_v17  ;;  %4814 = vmatmul.msk.f32.gmra.mxu3 %vm93_vm0, %v1741_v37 }
  0xbb   :  { %v284_v50 = vadd.f32 %v283_v48, %v282_v18  ;;  %v502_v51 = vmul.f32 %v407_v30, %v407_v30 }
  0xbc   :  { %v643_v52 = vpop.f32.mrf.mxu2  ;;  %v880_v53 = vpop.f32.mrf.mxu3 }
  0xbd   :  { %v520_v54 = vsel %vm207_vm1, %v502_v51, 0.0  ;;  %v644_v55 = vadd.f32 %v5545_v10, %v643_v52  ;;  %v881_v56 = vadd.f32 %v5545_v10, %v880_v53  ;;  %v171_v57 = vpop.f32.mrf.mxu0  ;;  %v409_v58 = vpop.f32.mrf.mxu1 }
  0xbe   :  { %v521_v60 = vadd.f32 %v520_v54, %v519_v28  ;;  %v172_v61 = vadd.f32 %v5545_v10, %v171_v57  ;;  %v410_v62 = vadd.f32 %v5545_v10, %v409_v58  ;;  %v1032_v28 = vld [vmem:[%s7907_s25 + $0x228] sm:$0xff] }
  0xbf   :  { %685 = vst.msk [vmem:[#allocation2 + $0x118] sm:$0xff] %vm207_vm1, %v644_v55  ;;  %v703_v1 = vsel %vm207_vm1, %v644_v55, 0.0  ;;  %v739_v2 = vmul.f32 %v644_v55, %v644_v55  ;;  %v940_v3 = vsel %vm207_vm1, %v881_v56, 0.0  ;;  %v976_v4 = vmul.f32 %v881_v56, %v881_v56 }
  0xc0   :  { %v704_v6 = vadd.f32 %v703_v1, %v702_v38  ;;  %v941_v7 = vadd.f32 %v940_v3, %v939_v39  ;;  %v266_v8 = vmul.f32 %v172_v61, %v172_v61  ;;  %4767 = vmatmul.msk.f32.gmra.mxu0 %vm93_vm0, %v1031_v59  ;;  %v503_v9 = vmul.f32 %v410_v62, %v410_v62  ;;  %v1743_v38 = vld [vmem:[%s7907_s25 + $0x3a8] sm:$0xff]  ;;  %v1507_v1 = vld [vmem:[%s7907_s25 + $0x330] sm:$0xff] }
  0xc1   :  { %4783 = vmatmul.msk.f32.gmra.mxu1 %vm93_vm0, %v1268_v63  ;;  %4799 = vmatmul.msk.f32.gmra.mxu2 %vm93_vm0, %v1505_v0  ;;  %v757_v11 = vsel %vm207_vm1, %v739_v2, 0.0  ;;  %922 = vst.msk [vmem:[#allocation2 + $0x198] sm:$0xff] %vm207_vm1, %v881_v56  ;;  %v994_v13 = vsel %vm207_vm1, %v976_v4, 0.0  ;;  %v231_v14 = vsel %vm207_vm1, %v172_v61, 0.0  ;;  %v468_v19 = vsel %vm207_vm1, %v410_v62, 0.0  ;;  %v1270_v0 = vld [vmem:[%s7907_s25 + $0x2b0] sm:$0xff] }
  0xc2   :  { %4815 = vmatmul.msk.f32.gmra.mxu3 %vm93_vm0, %v1742_v5  ;;  %v758_v12 = vadd.f32 %v757_v11, %v756_v46  ;;  %212 = vst.msk [vmem:[#allocation2 + $0x20] sm:$0xff] %vm207_vm1, %v172_v61  ;;  %v285_v15 = vsel %vm207_vm1, %v266_v8, 0.0  ;;  %v995_v16 = vadd.f32 %v994_v13, %v993_v47  ;;  %v232_v17 = vadd.f32 %v231_v14, %v230_v44  ;;  %v1033_v61 = vld [vmem:[%s7907_s25 + $0x230] sm:$0xff] }
  0xc3   :  { %v286_v18 = vadd.f32 %v285_v15, %v284_v50  ;;  %449 = vst.msk [vmem:[#allocation2 + $0xa0] sm:$0xff] %vm207_vm1, %v410_v62  ;;  %v469_v22 = vadd.f32 %v468_v19, %v467_v49  ;;  %v522_v23 = vsel %vm207_vm1, %v503_v9, 0.0 }
  0xc4   :  { %v646_v20 = vpop.f32.mrf.mxu2  ;;  %v883_v21 = vpop.f32.mrf.mxu3  ;;  %v523_v29 = vadd.f32 %v522_v23, %v521_v60 }
  0xc5   :  { %v647_v24 = vadd.f32 %v5545_v10, %v646_v20  ;;  %v884_v25 = vadd.f32 %v5545_v10, %v883_v21  ;;  %v174_v26 = vpop.f32.mrf.mxu0  ;;  %v412_v27 = vpop.f32.mrf.mxu1 }
  0xc6   :  { %v175_v30 = vadd.f32 %v5545_v10, %v174_v26  ;;  %v413_v31 = vadd.f32 %v5545_v10, %v412_v27 }
  0xc7   :  { %686 = vst.msk [vmem:[#allocation2 + $0x120] sm:$0xff] %vm207_vm1, %v647_v24  ;;  %v705_v34 = vsel %vm207_vm1, %v647_v24, 0.0  ;;  %v740_v35 = vmul.f32 %v647_v24, %v647_v24  ;;  %v942_v36 = vsel %vm207_vm1, %v884_v25, 0.0  ;;  %v977_v37 = vmul.f32 %v884_v25, %v884_v25 }
  0xc8   :  { %v706_v39 = vadd.f32 %v705_v34, %v704_v6  ;;  %923 = vst.msk [vmem:[#allocation2 + $0x1a0] sm:$0xff] %vm207_vm1, %v884_v25  ;;  %v943_v40 = vadd.f32 %v942_v36, %v941_v7  ;;  %v233_v41 = vsel %vm207_vm1, %v175_v30, 0.0  ;;  %v267_v42 = vmul.f32 %v175_v30, %v175_v30  ;;  %4768 = vmatmul.msk.f32.gmra.mxu0 %vm93_vm0, %v1032_v28  ;;  %v1744_v6 = vld [vmem:[%s7907_s25 + $0x3b0] sm:$0xff]  ;;  %v1508_v34 = vld [vmem:[%s7907_s25 + $0x338] sm:$0xff] }
  0xc9   :  { %v234_v43 = vadd.f32 %v233_v41, %v232_v17  ;;  %v504_v44 = vmul.f32 %v413_v31, %v413_v31  ;;  %4784 = vmatmul.msk.f32.gmra.mxu1 %vm93_vm0, %v1269_v32  ;;  %4800 = vmatmul.msk.f32.gmra.mxu2 %vm93_vm0, %v1506_v33  ;;  %v759_v45 = vsel %vm207_vm1, %v740_v35, 0.0  ;;  %v996_v46 = vsel %vm207_vm1, %v977_v37, 0.0  ;;  %213 = vst.msk [vmem:[#allocation2 + $0x28] sm:$0xff] %vm207_vm1, %v175_v30  ;;  %v1271_v33 = vld [vmem:[%s7907_s25 + $0x2b8] sm:$0xff] }
  0xca   :  { %v287_v47 = vsel %vm207_vm1, %v267_v42, 0.0  ;;  %4816 = vmatmul.msk.f32.gmra.mxu3 %vm93_vm0, %v1743_v38  ;;  %v760_v48 = vadd.f32 %v759_v45, %v758_v12  ;;  %v997_v49 = vadd.f32 %v996_v46, %v995_v16  ;;  %450 = vst.msk [vmem:[#allocation2 + $0xa8] sm:$0xff] %vm207_vm1, %v413_v31  ;;  %v470_v51 = vsel %vm207_vm1, %v413_v31, 0.0 }
  0xcb   :  { %v288_v50 = vadd.f32 %v287_v47, %v286_v18  ;;  %v471_v52 = vadd.f32 %v470_v51, %v469_v22  ;;  %v524_v53 = vsel %vm207_vm1, %v504_v44, 0.0 }
  0xcc   :  { %v649_v54 = vpop.f32.mrf.mxu2  ;;  %v886_v55 = vpop.f32.mrf.mxu3  ;;  %v525_v56 = vadd.f32 %v524_v53, %v523_v29  ;;  %v1034_v29 = vld [vmem:[%s7907_s25 + $0x238] sm:$0xff] }
  0xcd   :  { %v650_v57 = vadd.f32 %v5545_v10, %v649_v54  ;;  %v887_v58 = vadd.f32 %v5545_v10, %v886_v55  ;;  %v177_v59 = vpop.f32.mrf.mxu0  ;;  %v415_v60 = vpop.f32.mrf.mxu1 }
  0xce   :  { %v178_v62 = vadd.f32 %v5545_v10, %v177_v59  ;;  %v416_v63 = vadd.f32 %v5545_v10, %v415_v60 }
  0xcf   :  { %687 = vst.msk [vmem:[#allocation2 + $0x128] sm:$0xff] %vm207_vm1, %v650_v57  ;;  %v707_v2 = vsel %vm207_vm1, %v650_v57, 0.0  ;;  %v741_v3 = vmul.f32 %v650_v57, %v650_v57  ;;  %v944_v4 = vsel %vm207_vm1, %v887_v58, 0.0  ;;  %v978_v5 = vmul.f32 %v887_v58, %v887_v58 }
  0xd0   :  { %v708_v7 = vadd.f32 %v707_v2, %v706_v39  ;;  %924 = vst.msk [vmem:[#allocation2 + $0x1a8] sm:$0xff] %vm207_vm1, %v887_v58  ;;  %v945_v8 = vadd.f32 %v944_v4, %v943_v40  ;;  %v235_v9 = vsel %vm207_vm1, %v178_v62, 0.0  ;;  %v268_v11 = vmul.f32 %v178_v62, %v178_v62  ;;  %4769 = vmatmul.msk.f32.gmra.mxu0 %vm93_vm0, %v1033_v61  ;;  %v1745_v39 = vld [vmem:[%s7907_s25 + $0x3b8] sm:$0xff]  ;;  %v1035_v61 = vld [vmem:[%s7907_s25 + $0x240] sm:$0xff] }
  0xd1   :  { %v761_v12 = vsel %vm207_vm1, %v741_v3, 0.0  ;;  %v998_v13 = vsel %vm207_vm1, %v978_v5, 0.0  ;;  %214 = vst.msk [vmem:[#allocation2 + $0x30] sm:$0xff] %vm207_vm1, %v178_v62  ;;  %v236_v14 = vadd.f32 %v235_v9, %v234_v43  ;;  %v472_v15 = vsel %vm207_vm1, %v416_v63, 0.0  ;;  %4785 = vmatmul.msk.f32.gmra.mxu1 %vm93_vm0, %v1270_v0  ;;  %4801 = vmatmul.msk.f32.gmra.mxu2 %vm93_vm0, %v1507_v1  ;;  %v1272_v1 = vld [vmem:[%s7907_s25 + $0x2c0] sm:$0xff] }
  0xd2   :  { %v762_v16 = vadd.f32 %v761_v12, %v760_v48  ;;  %v999_v17 = vadd.f32 %v998_v13, %v997_v49  ;;  %v289_v18 = vsel %vm207_vm1, %v268_v11, 0.0  ;;  %451 = vst.msk [vmem:[#allocation2 + $0xb0] sm:$0xff] %vm207_vm1, %v416_v63  ;;  %v473_v19 = vadd.f32 %v472_v15, %v471_v52  ;;  %4817 = vmatmul.msk.f32.gmra.mxu3 %vm93_vm0, %v1744_v6  ;;  %v1509_v2 = vld [vmem:[%s7907_s25 + $0x340] sm:$0xff] }
  0xd3   :  { %v290_v20 = vadd.f32 %v289_v18, %v288_v50  ;;  %v505_v21 = vmul.f32 %v416_v63, %v416_v63 }
  0xd4   :  { %v652_v22 = vpop.f32.mrf.mxu2  ;;  %v889_v23 = vpop.f32.mrf.mxu3 }
  0xd5   :  { %v526_v24 = vsel %vm207_vm1, %v505_v21, 0.0  ;;  %v653_v25 = vadd.f32 %v5545_v10, %v652_v22  ;;  %v890_v26 = vadd.f32 %v5545_v10, %v889_v23  ;;  %v180_v27 = vpop.f32.mrf.mxu0  ;;  %v418_v28 = vpop.f32.mrf.mxu1 }
  0xd6   :  { %v527_v30 = vadd.f32 %v526_v24, %v525_v56  ;;  %v181_v31 = vadd.f32 %v5545_v10, %v180_v27  ;;  %v419_v32 = vadd.f32 %v5545_v10, %v418_v28 }
  0xd7   :  { %688 = vst.msk [vmem:[#allocation2 + $0x130] sm:$0xff] %vm207_vm1, %v653_v25  ;;  %v709_v35 = vsel %vm207_vm1, %v653_v25, 0.0  ;;  %v742_v36 = vmul.f32 %v653_v25, %v653_v25  ;;  %v946_v37 = vsel %vm207_vm1, %v890_v26, 0.0  ;;  %v979_v38 = vmul.f32 %v890_v26, %v890_v26 }
  0xd8   :  { %v710_v40 = vadd.f32 %v709_v35, %v708_v7  ;;  %925 = vst.msk [vmem:[#allocation2 + $0x1b0] sm:$0xff] %vm207_vm1, %v890_v26  ;;  %v947_v41 = vadd.f32 %v946_v37, %v945_v8  ;;  %v237_v42 = vsel %vm207_vm1, %v181_v31, 0.0  ;;  %v269_v43 = vmul.f32 %v181_v31, %v181_v31  ;;  %4770 = vmatmul.msk.f32.gmra.mxu0 %vm93_vm0, %v1034_v29  ;;  %v1746_v7 = vld [vmem:[%s7907_s25 + $0x3c0] sm:$0xff]  ;;  %v1510_v35 = vld [vmem:[%s7907_s25 + $0x348] sm:$0xff] }
  0xd9   :  { %v763_v44 = vsel %vm207_vm1, %v742_v36, 0.0  ;;  %v1000_v45 = vsel %vm207_vm1, %v979_v38, 0.0  ;;  %215 = vst.msk [vmem:[#allocation2 + $0x38] sm:$0xff] %vm207_vm1, %v181_v31  ;;  %v238_v46 = vadd.f32 %v237_v42, %v236_v14  ;;  %v474_v47 = vsel %vm207_vm1, %v419_v32, 0.0  ;;  %4786 = vmatmul.msk.f32.gmra.mxu1 %vm93_vm0, %v1271_v33  ;;  %4802 = vmatmul.msk.f32.gmra.mxu2 %vm93_vm0, %v1508_v34  ;;  %v1273_v34 = vld [vmem:[%s7907_s25 + $0x2c8] sm:$0xff] }
  0xda   :  { %v764_v48 = vadd.f32 %v763_v44, %v762_v16  ;;  %v1001_v49 = vadd.f32 %v1000_v45, %v999_v17  ;;  %v291_v50 = vsel %vm207_vm1, %v269_v43, 0.0  ;;  %452 = vst.msk [vmem:[#allocation2 + $0xb8] sm:$0xff] %vm207_vm1, %v419_v32  ;;  %v475_v51 = vadd.f32 %v474_v47, %v473_v19  ;;  %4818 = vmatmul.msk.f32.gmra.mxu3 %vm93_vm0, %v1745_v39 }
  0xdb   :  { %v292_v52 = vadd.f32 %v291_v50, %v290_v20  ;;  %v506_v53 = vmul.f32 %v419_v32, %v419_v32 }
  0xdc   :  { %v655_v54 = vpop.f32.mrf.mxu2  ;;  %v892_v55 = vpop.f32.mrf.mxu3 }
  0xdd   :  { %v528_v56 = vsel %vm207_vm1, %v506_v53, 0.0  ;;  %v656_v57 = vadd.f32 %v5545_v10, %v655_v54  ;;  %v893_v58 = vadd.f32 %v5545_v10, %v892_v55  ;;  %v183_v59 = vpop.f32.mrf.mxu0  ;;  %v421_v60 = vpop.f32.mrf.mxu1 }
  0xde   :  { %v529_v62 = vadd.f32 %v528_v56, %v527_v30  ;;  %v184_v63 = vadd.f32 %v5545_v10, %v183_v59  ;;  %v422_v0 = vadd.f32 %v5545_v10, %v421_v60  ;;  %v1036_v30 = vld [vmem:[%s7907_s25 + $0x248] sm:$0xff] }
  0xdf   :  { %689 = vst.msk [vmem:[#allocation2 + $0x138] sm:$0xff] %vm207_vm1, %v656_v57  ;;  %v711_v3 = vsel %vm207_vm1, %v656_v57, 0.0  ;;  %v743_v4 = vmul.f32 %v656_v57, %v656_v57  ;;  %v948_v5 = vsel %vm207_vm1, %v893_v58, 0.0  ;;  %v980_v6 = vmul.f32 %v893_v58, %v893_v58 }
  0xe0   :  { %v712_v8 = vadd.f32 %v711_v3, %v710_v40  ;;  %v949_v9 = vadd.f32 %v948_v5, %v947_v41  ;;  %v270_v11 = vmul.f32 %v184_v63, %v184_v63  ;;  %4771 = vmatmul.msk.f32.gmra.mxu0 %vm93_vm0, %v1035_v61  ;;  %v507_v12 = vmul.f32 %v422_v0, %v422_v0  ;;  %v1747_v40 = vld [vmem:[%s7907_s25 + $0x3c8] sm:$0xff]  ;;  %v1511_v3 = vld [vmem:[%s7907_s25 + $0x350] sm:$0xff] }
  0xe1   :  { %4787 = vmatmul.msk.f32.gmra.mxu1 %vm93_vm0, %v1272_v1  ;;  %4803 = vmatmul.msk.f32.gmra.mxu2 %vm93_vm0, %v1509_v2  ;;  %v765_v13 = vsel %vm207_vm1, %v743_v4, 0.0  ;;  %926 = vst.msk [vmem:[#allocation2 + $0x1b8] sm:$0xff] %vm207_vm1, %v893_v58  ;;  %v1002_v15 = vsel %vm207_vm1, %v980_v6, 0.0  ;;  %v239_v16 = vsel %vm207_vm1, %v184_v63, 0.0  ;;  %v476_v21 = vsel %vm207_vm1, %v422_v0, 0.0  ;;  %v1274_v2 = vld [vmem:[%s7907_s25 + $0x2d0] sm:$0xff] }
  0xe2   :  { %4819 = vmatmul.msk.f32.gmra.mxu3 %vm93_vm0, %v1746_v7  ;;  %v766_v14 = vadd.f32 %v765_v13, %v764_v48  ;;  %216 = vst.msk [vmem:[#allocation2 + $0x40] sm:$0xff] %vm207_vm1, %v184_v63  ;;  %v293_v17 = vsel %vm207_vm1, %v270_v11, 0.0  ;;  %v1003_v18 = vadd.f32 %v1002_v15, %v1001_v49  ;;  %v240_v19 = vadd.f32 %v239_v16, %v238_v46  ;;  %v1037_v63 = vld [vmem:[%s7907_s25 + $0x250] sm:$0xff] }
  0xe3   :  { %v294_v20 = vadd.f32 %v293_v17, %v292_v52  ;;  %453 = vst.msk [vmem:[#allocation2 + $0xc0] sm:$0xff] %vm207_vm1, %v422_v0  ;;  %v477_v24 = vadd.f32 %v476_v21, %v475_v51  ;;  %v530_v25 = vsel %vm207_vm1, %v507_v12, 0.0 }
  0xe4   :  { %v658_v22 = vpop.f32.mrf.mxu2  ;;  %v895_v23 = vpop.f32.mrf.mxu3  ;;  %v531_v31 = vadd.f32 %v530_v25, %v529_v62 }
  0xe5   :  { %v659_v26 = vadd.f32 %v5545_v10, %v658_v22  ;;  %v896_v27 = vadd.f32 %v5545_v10, %v895_v23  ;;  %v186_v28 = vpop.f32.mrf.mxu0  ;;  %v424_v29 = vpop.f32.mrf.mxu1 }
  0xe6   :  { %v187_v32 = vadd.f32 %v5545_v10, %v186_v28  ;;  %v425_v33 = vadd.f32 %v5545_v10, %v424_v29 }
  0xe7   :  { %690 = vst.msk [vmem:[#allocation2 + $0x140] sm:$0xff] %vm207_vm1, %v659_v26  ;;  %v713_v36 = vsel %vm207_vm1, %v659_v26, 0.0  ;;  %v744_v37 = vmul.f32 %v659_v26, %v659_v26  ;;  %v950_v38 = vsel %vm207_vm1, %v896_v27, 0.0  ;;  %v981_v39 = vmul.f32 %v896_v27, %v896_v27 }
  0xe8   :  { %v714_v41 = vadd.f32 %v713_v36, %v712_v8  ;;  %927 = vst.msk [vmem:[#allocation2 + $0x1c0] sm:$0xff] %vm207_vm1, %v896_v27  ;;  %v951_v42 = vadd.f32 %v950_v38, %v949_v9  ;;  %v241_v43 = vsel %vm207_vm1, %v187_v32, 0.0  ;;  %v271_v44 = vmul.f32 %v187_v32, %v187_v32  ;;  %4772 = vmatmul.msk.f32.gmra.mxu0 %vm93_vm0, %v1036_v30  ;;  %v1748_v8 = vld [vmem:[%s7907_s25 + $0x3d0] sm:$0xff]  ;;  %v1512_v36 = vld [vmem:[%s7907_s25 + $0x358] sm:$0xff] }
  0xe9   :  { %v242_v45 = vadd.f32 %v241_v43, %v240_v19  ;;  %v508_v46 = vmul.f32 %v425_v33, %v425_v33  ;;  %4788 = vmatmul.msk.f32.gmra.mxu1 %vm93_vm0, %v1273_v34  ;;  %4804 = vmatmul.msk.f32.gmra.mxu2 %vm93_vm0, %v1510_v35  ;;  %v767_v47 = vsel %vm207_vm1, %v744_v37, 0.0  ;;  %v1004_v48 = vsel %vm207_vm1, %v981_v39, 0.0  ;;  %217 = vst.msk [vmem:[#allocation2 + $0x48] sm:$0xff] %vm207_vm1, %v187_v32  ;;  %v1275_v35 = vld [vmem:[%s7907_s25 + $0x2d8] sm:$0xff] }
  0xea   :  { %v295_v49 = vsel %vm207_vm1, %v271_v44, 0.0  ;;  %4820 = vmatmul.msk.f32.gmra.mxu3 %vm93_vm0, %v1747_v40  ;;  %v768_v50 = vadd.f32 %v767_v47, %v766_v14  ;;  %v1005_v51 = vadd.f32 %v1004_v48, %v1003_v18  ;;  %454 = vst.msk [vmem:[#allocation2 + $0xc8] sm:$0xff] %vm207_vm1, %v425_v33  ;;  %v478_v53 = vsel %vm207_vm1, %v425_v33, 0.0 }
  0xeb   :  { %v296_v52 = vadd.f32 %v295_v49, %v294_v20  ;;  %v479_v54 = vadd.f32 %v478_v53, %v477_v24  ;;  %v532_v55 = vsel %vm207_vm1, %v508_v46, 0.0 }
  0xec   :  { %v661_v56 = vpop.f32.mrf.mxu2  ;;  %v898_v57 = vpop.f32.mrf.mxu3  ;;  %v533_v58 = vadd.f32 %v532_v55, %v531_v31  ;;  %v1038_v31 = vld [vmem:[%s7907_s25 + $0x258] sm:$0xff] }
  0xed   :  { %v662_v59 = vadd.f32 %v5545_v10, %v661_v56  ;;  %v899_v60 = vadd.f32 %v5545_v10, %v898_v57  ;;  %v189_v61 = vpop.f32.mrf.mxu0  ;;  %v427_v62 = vpop.f32.mrf.mxu1 }
  0xee   :  { %v190_v0 = vadd.f32 %v5545_v10, %v189_v61  ;;  %v428_v1 = vadd.f32 %v5545_v10, %v427_v62 }
  0xef   :  { %691 = vst.msk [vmem:[#allocation2 + $0x148] sm:$0xff] %vm207_vm1, %v662_v59  ;;  %v715_v4 = vsel %vm207_vm1, %v662_v59, 0.0  ;;  %v745_v5 = vmul.f32 %v662_v59, %v662_v59  ;;  %v952_v6 = vsel %vm207_vm1, %v899_v60, 0.0  ;;  %v982_v7 = vmul.f32 %v899_v60, %v899_v60 }
  0xf0   :  { %v716_v9 = vadd.f32 %v715_v4, %v714_v41  ;;  %928 = vst.msk [vmem:[#allocation2 + $0x1c8] sm:$0xff] %vm207_vm1, %v899_v60  ;;  %v953_v11 = vadd.f32 %v952_v6, %v951_v42  ;;  %v243_v12 = vsel %vm207_vm1, %v190_v0, 0.0  ;;  %v272_v13 = vmul.f32 %v190_v0, %v190_v0  ;;  %4773 = vmatmul.msk.f32.gmra.mxu0 %vm93_vm0, %v1037_v63  ;;  %v1749_v41 = vld [vmem:[%s7907_s25 + $0x3d8] sm:$0xff]  ;;  %v1039_v63 = vld [vmem:[%s7907_s25 + $0x260] sm:$0xff] }
  0xf1   :  { %v769_v14 = vsel %vm207_vm1, %v745_v5, 0.0  ;;  %v1006_v15 = vsel %vm207_vm1, %v982_v7, 0.0  ;;  %218 = vst.msk [vmem:[#allocation2 + $0x50] sm:$0xff] %vm207_vm1, %v190_v0  ;;  %v244_v16 = vadd.f32 %v243_v12, %v242_v45  ;;  %v480_v17 = vsel %vm207_vm1, %v428_v1, 0.0  ;;  %4789 = vmatmul.msk.f32.gmra.mxu1 %vm93_vm0, %v1274_v2  ;;  %4805 = vmatmul.msk.f32.gmra.mxu2 %vm93_vm0, %v1511_v3  ;;  %v1276_v3 = vld [vmem:[%s7907_s25 + $0x2e0] sm:$0xff] }
  0xf2   :  { %v770_v18 = vadd.f32 %v769_v14, %v768_v50  ;;  %v1007_v19 = vadd.f32 %v1006_v15, %v1005_v51  ;;  %v297_v20 = vsel %vm207_vm1, %v272_v13, 0.0  ;;  %455 = vst.msk [vmem:[#allocation2 + $0xd0] sm:$0xff] %vm207_vm1, %v428_v1  ;;  %v481_v21 = vadd.f32 %v480_v17, %v479_v54  ;;  %4821 = vmatmul.msk.f32.gmra.mxu3 %vm93_vm0, %v1748_v8  ;;  %v1513_v4 = vld [vmem:[%s7907_s25 + $0x360] sm:$0xff] }
  0xf3   :  { %v298_v22 = vadd.f32 %v297_v20, %v296_v52  ;;  %v509_v23 = vmul.f32 %v428_v1, %v428_v1 }
  0xf4   :  { %v664_v24 = vpop.f32.mrf.mxu2  ;;  %v901_v25 = vpop.f32.mrf.mxu3 }
  0xf5   :  { %v534_v26 = vsel %vm207_vm1, %v509_v23, 0.0  ;;  %v665_v27 = vadd.f32 %v5545_v10, %v664_v24  ;;  %v902_v28 = vadd.f32 %v5545_v10, %v901_v25  ;;  %v192_v29 = vpop.f32.mrf.mxu0  ;;  %v430_v30 = vpop.f32.mrf.mxu1 }
  0xf6   :  { %v535_v32 = vadd.f32 %v534_v26, %v533_v58  ;;  %v193_v33 = vadd.f32 %v5545_v10, %v192_v29  ;;  %v431_v34 = vadd.f32 %v5545_v10, %v430_v30 }
  0xf7   :  { %692 = vst.msk [vmem:[#allocation2 + $0x150] sm:$0xff] %vm207_vm1, %v665_v27  ;;  %v717_v37 = vsel %vm207_vm1, %v665_v27, 0.0  ;;  %v746_v38 = vmul.f32 %v665_v27, %v665_v27  ;;  %v954_v39 = vsel %vm207_vm1, %v902_v28, 0.0  ;;  %v983_v40 = vmul.f32 %v902_v28, %v902_v28 }
  0xf8   :  { %v718_v42 = vadd.f32 %v717_v37, %v716_v9  ;;  %929 = vst.msk [vmem:[#allocation2 + $0x1d0] sm:$0xff] %vm207_vm1, %v902_v28  ;;  %v955_v43 = vadd.f32 %v954_v39, %v953_v11  ;;  %v245_v44 = vsel %vm207_vm1, %v193_v33, 0.0  ;;  %v273_v45 = vmul.f32 %v193_v33, %v193_v33  ;;  %4774 = vmatmul.msk.f32.gmra.mxu0 %vm93_vm0, %v1038_v31  ;;  %v1040_v31 = vld [vmem:[%s7907_s25 + $0x268] sm:$0xff] }
  0xf9   :  { %v771_v46 = vsel %vm207_vm1, %v746_v38, 0.0  ;;  %v1008_v47 = vsel %vm207_vm1, %v983_v40, 0.0  ;;  %219 = vst.msk [vmem:[#allocation2 + $0x58] sm:$0xff] %vm207_vm1, %v193_v33  ;;  %v246_v48 = vadd.f32 %v245_v44, %v244_v16  ;;  %v482_v49 = vsel %vm207_vm1, %v431_v34, 0.0  ;;  %4790 = vmatmul.msk.f32.gmra.mxu1 %vm93_vm0, %v1275_v35  ;;  %4806 = vmatmul.msk.f32.gmra.mxu2 %vm93_vm0, %v1512_v36  ;;  %v1277_v35 = vld [vmem:[%s7907_s25 + $0x2e8] sm:$0xff] }
  0xfa   :  { %v772_v50 = vadd.f32 %v771_v46, %v770_v18  ;;  %v1009_v51 = vadd.f32 %v1008_v47, %v1007_v19  ;;  %v299_v52 = vsel %vm207_vm1, %v273_v45, 0.0  ;;  %456 = vst.msk [vmem:[#allocation2 + $0xd8] sm:$0xff] %vm207_vm1, %v431_v34  ;;  %v483_v53 = vadd.f32 %v482_v49, %v481_v21  ;;  %4822 = vmatmul.msk.f32.gmra.mxu3 %vm93_vm0, %v1749_v41  ;;  %v1514_v36 = vld [vmem:[%s7907_s25 + $0x368] sm:$0xff] }
  0xfb   :  { %v300_v54 = vadd.f32 %v299_v52, %v298_v22  ;;  %v510_v55 = vmul.f32 %v431_v34, %v431_v34 }
  0xfc   :  { %v667_v56 = vpop.f32.mrf.mxu2  ;;  %v904_v57 = vpop.f32.mrf.mxu3 }
  0xfd   :  { %v536_v58 = vsel %vm207_vm1, %v510_v55, 0.0  ;;  %v668_v59 = vadd.f32 %v5545_v10, %v667_v56  ;;  %v905_v60 = vadd.f32 %v5545_v10, %v904_v57  ;;  %v195_v61 = vpop.f32.mrf.mxu0  ;;  %v433_v62 = vpop.f32.mrf.mxu1 }
  0xfe   :  { %v537_v0 = vadd.f32 %v536_v58, %v535_v32  ;;  %v196_v1 = vadd.f32 %v5545_v10, %v195_v61  ;;  %v434_v2 = vadd.f32 %v5545_v10, %v433_v62  ;;  %v5982_v58 = vld [vmem:[%s7908_s20] ss:$0 sm:$0xff] }
  0xff   :  { %693 = vst.msk [vmem:[#allocation2 + $0x158] sm:$0xff] %vm207_vm1, %v668_v59  ;;  %v719_v5 = vsel %vm207_vm1, %v668_v59, 0.0  ;;  %v747_v6 = vmul.f32 %v668_v59, %v668_v59  ;;  %v956_v7 = vsel %vm207_vm1, %v905_v60, 0.0  ;;  %v984_v8 = vmul.f32 %v905_v60, %v905_v60 }
 0x100   :  { %v720_v9 = vadd.f32 %v719_v5, %v718_v42  ;;  %v957_v11 = vadd.f32 %v956_v7, %v955_v43  ;;  %v274_v12 = vmul.f32 %v196_v1, %v196_v1  ;;  %4775 = vmatmul.msk.f32.gmra.mxu0 %vm93_vm0, %v1039_v63  ;;  %v511_v13 = vmul.f32 %v434_v2, %v434_v2  ;;  %v1041_v63 = vld [vmem:[%s7907_s25 + $0x270] sm:$0xff] }
 0x101   :  { %4791 = vmatmul.msk.f32.gmra.mxu1 %vm93_vm0, %v1276_v3  ;;  %4807 = vmatmul.msk.f32.gmra.mxu2 %vm93_vm0, %v1513_v4  ;;  %v773_v14 = vsel %vm207_vm1, %v747_v6, 0.0  ;;  %930 = vst.msk [vmem:[#allocation2 + $0x1d8] sm:$0xff] %vm207_vm1, %v905_v60  ;;  %v1010_v16 = vsel %vm207_vm1, %v984_v8, 0.0  ;;  %v247_v17 = vsel %vm207_vm1, %v196_v1, 0.0  ;;  %v484_v22 = vsel %vm207_vm1, %v434_v2, 0.0  ;;  %v1515_v3 = vld [vmem:[%s7907_s25 + $0x370] sm:$0xff] }
 0x102   :  { %v774_v15 = vadd.f32 %v773_v14, %v772_v50  ;;  %220 = vst.msk [vmem:[#allocation2 + $0x60] sm:$0xff] %vm207_vm1, %v196_v1  ;;  %v301_v18 = vsel %vm207_vm1, %v274_v12, 0.0  ;;  %v1011_v19 = vadd.f32 %v1010_v16, %v1009_v51  ;;  %v248_v20 = vadd.f32 %v247_v17, %v246_v48 }
 0x103   :  { %v302_v21 = vadd.f32 %v301_v18, %v300_v54  ;;  %457 = vst.msk [vmem:[#allocation2 + $0xe0] sm:$0xff] %vm207_vm1, %v434_v2  ;;  %v485_v25 = vadd.f32 %v484_v22, %v483_v53  ;;  %v538_v26 = vsel %vm207_vm1, %v511_v13, 0.0  ;;  %v1278_v2 = vld [vmem:[%s7907_s25 + $0x2f0] sm:$0xff] }
 0x104   :  { %v670_v23 = vpop.f32.mrf.mxu2  ;;  %v907_v24 = vpop.f32.mrf.mxu3  ;;  %v539_v32 = vadd.f32 %v538_v26, %v537_v0 }
 0x105   :  { %v671_v27 = vadd.f32 %v5545_v10, %v670_v23  ;;  %v908_v28 = vadd.f32 %v5545_v10, %v907_v24  ;;  %v198_v29 = vpop.f32.mrf.mxu0  ;;  %v436_v30 = vpop.f32.mrf.mxu1 }
 0x106   :  { %v199_v33 = vadd.f32 %v5545_v10, %v198_v29  ;;  %v437_v34 = vadd.f32 %v5545_v10, %v436_v30  ;;  %v1042_v30 = vld [vmem:[%s7907_s25 + $0x278] sm:$0xff] }
 0x107   :  { %694 = vst.msk [vmem:[#allocation2 + $0x160] sm:$0xff] %vm207_vm1, %v671_v27  ;;  %v721_v37 = vsel %vm207_vm1, %v671_v27, 0.0  ;;  %v748_v38 = vmul.f32 %v671_v27, %v671_v27  ;;  %v958_v39 = vsel %vm207_vm1, %v908_v28, 0.0  ;;  %v985_v40 = vmul.f32 %v908_v28, %v908_v28 }
 0x108   :  { %v722_v41 = vadd.f32 %v721_v37, %v720_v9  ;;  %931 = vst.msk [vmem:[#allocation2 + $0x1e0] sm:$0xff] %vm207_vm1, %v908_v28  ;;  %v959_v10 = vadd.f32 %v958_v39, %v957_v11  ;;  %v249_v42 = vsel %vm207_vm1, %v199_v33, 0.0  ;;  %v275_v43 = vmul.f32 %v199_v33, %v199_v33  ;;  %4776 = vmatmul.msk.f32.gmra.mxu0 %vm93_vm0, %v1040_v31 }
 0x109   :  { %v250_v44 = vadd.f32 %v249_v42, %v248_v20  ;;  %v512_v45 = vmul.f32 %v437_v34, %v437_v34  ;;  %4792 = vmatmul.msk.f32.gmra.mxu1 %vm93_vm0, %v1277_v35  ;;  %4808 = vmatmul.msk.f32.gmra.mxu2 %vm93_vm0, %v1514_v36  ;;  %v775_v46 = vsel %vm207_vm1, %v748_v38, 0.0  ;;  %v1012_v47 = vsel %vm207_vm1, %v985_v40, 0.0  ;;  %221 = vst.msk [vmem:[#allocation2 + $0x68] sm:$0xff] %vm207_vm1, %v199_v33  ;;  %v1516_v35 = vld [vmem:[%s7907_s25 + $0x378] sm:$0xff] }
 0x10a   :  { %v303_v48 = vsel %vm207_vm1, %v275_v43, 0.0  ;;  %v776_v49 = vadd.f32 %v775_v46, %v774_v15  ;;  %v1013_v50 = vadd.f32 %v1012_v47, %v1011_v19  ;;  %458 = vst.msk [vmem:[#allocation2 + $0xe8] sm:$0xff] %vm207_vm1, %v437_v34  ;;  %v486_v52 = vsel %vm207_vm1, %v437_v34, 0.0  ;;  %v1279_v34 = vld [vmem:[%s7907_s25 + $0x2f8] sm:$0xff] }
 0x10b   :  { %v304_v51 = vadd.f32 %v303_v48, %v302_v21  ;;  %v487_v53 = vadd.f32 %v486_v52, %v485_v25  ;;  %v540_v54 = vsel %vm207_vm1, %v512_v45, 0.0 }
 0x10c   :  { %v673_v55 = vpop.f32.mrf.mxu2  ;;  %v910_v56 = vpop.f32.mrf.mxu3  ;;  %v541_v57 = vadd.f32 %v540_v54, %v539_v32 }
 0x10d   :  { %v674_v59 = vadd.f32 %v5982_v58, %v673_v55  ;;  %v911_v60 = vadd.f32 %v5982_v58, %v910_v56  ;;  %v201_v61 = vpop.f32.mrf.mxu0  ;;  %v439_v62 = vpop.f32.mrf.mxu1 }
 0x10e   :  { %v202_v0 = vadd.f32 %v5982_v58, %v201_v61  ;;  %v440_v1 = vadd.f32 %v5982_v58, %v439_v62 }
 0x10f   :  { %695 = vst.msk [vmem:[#allocation2 + $0x168] sm:$0xff] %vm207_vm1, %v674_v59  ;;  %v723_v4 = vsel %vm207_vm1, %v674_v59, 0.0  ;;  %v749_v5 = vmul.f32 %v674_v59, %v674_v59  ;;  %v960_v6 = vsel %vm207_vm1, %v911_v60, 0.0  ;;  %v986_v7 = vmul.f32 %v911_v60, %v911_v60 }
 0x110   :  { %v724_v8 = vadd.f32 %v723_v4, %v722_v41  ;;  %932 = vst.msk [vmem:[#allocation2 + $0x1e8] sm:$0xff] %vm207_vm1, %v911_v60  ;;  %v961_v9 = vadd.f32 %v960_v6, %v959_v10  ;;  %v251_v11 = vsel %vm207_vm1, %v202_v0, 0.0  ;;  %v276_v12 = vmul.f32 %v202_v0, %v202_v0  ;;  %4777 = vmatmul.msk.f32.gmra.mxu0 %vm93_vm0, %v1041_v63 }
 0x111   :  { %v777_v13 = vsel %vm207_vm1, %v749_v5, 0.0  ;;  %v1014_v14 = vsel %vm207_vm1, %v986_v7, 0.0  ;;  %222 = vst.msk [vmem:[#allocation2 + $0x70] sm:$0xff] %vm207_vm1, %v202_v0  ;;  %v252_v15 = vadd.f32 %v251_v11, %v250_v44  ;;  %v488_v16 = vsel %vm207_vm1, %v440_v1, 0.0  ;;  %4793 = vmatmul.msk.f32.gmra.mxu1 %vm93_vm0, %v1278_v2  ;;  %4809 = vmatmul.msk.f32.gmra.mxu2 %vm93_vm0, %v1515_v3 }
 0x112   :  { %v778_v17 = vadd.f32 %v777_v13, %v776_v49  ;;  %v1015_v18 = vadd.f32 %v1014_v14, %v1013_v50  ;;  %v305_v19 = vsel %vm207_vm1, %v276_v12, 0.0  ;;  %459 = vst.msk [vmem:[#allocation2 + $0xf0] sm:$0xff] %vm207_vm1, %v440_v1  ;;  %v489_v20 = vadd.f32 %v488_v16, %v487_v53 }
 0x113   :  { %v306_v21 = vadd.f32 %v305_v19, %v304_v51  ;;  %v513_v22 = vmul.f32 %v440_v1, %v440_v1 }
 0x114   :  { %v676_v23 = vpop.f32.mrf.mxu2  ;;  %v913_v24 = vpop.f32.mrf.mxu3 }
 0x115   :  { %v542_v25 = vsel %vm207_vm1, %v513_v22, 0.0  ;;  %v677_v26 = vadd.f32 %v5982_v58, %v676_v23  ;;  %v914_v27 = vadd.f32 %v5982_v58, %v913_v24  ;;  %v204_v28 = vpop.f32.mrf.mxu0  ;;  %v442_v29 = vpop.f32.mrf.mxu1 }
 0x116   :  { %v543_v31 = vadd.f32 %v542_v25, %v541_v57  ;;  %v205_v32 = vadd.f32 %v5982_v58, %v204_v28  ;;  %v443_v33 = vadd.f32 %v5982_v58, %v442_v29 }
 0x117   :  { %696 = vst.msk [vmem:[#allocation2 + $0x170] sm:$0xff] %vm207_vm1, %v677_v26  ;;  %v725_v36 = vsel %vm207_vm1, %v677_v26, 0.0  ;;  %v750_v37 = vmul.f32 %v677_v26, %v677_v26  ;;  %v962_v38 = vsel %vm207_vm1, %v914_v27, 0.0  ;;  %v987_v39 = vmul.f32 %v914_v27, %v914_v27 }
 0x118   :  { %v726_v40 = vadd.f32 %v725_v36, %v724_v8  ;;  %933 = vst.msk [vmem:[#allocation2 + $0x1f0] sm:$0xff] %vm207_vm1, %v914_v27  ;;  %v6029_v41 = vadd.f32 %v962_v38, %v961_v9  ;;  %v253_v10 = vsel %vm207_vm1, %v205_v32, 0.0  ;;  %v277_v42 = vmul.f32 %v205_v32, %v205_v32  ;;  %4778 = vmatmul.msk.f32.gmra.mxu0 %vm93_vm0, %v1042_v30 }
 0x119   :  { %v779_v43 = vsel %vm207_vm1, %v750_v37, 0.0  ;;  %v1016_v44 = vsel %vm207_vm1, %v987_v39, 0.0  ;;  %223 = vst.msk [vmem:[#allocation2 + $0x78] sm:$0xff] %vm207_vm1, %v205_v32  ;;  %v254_v45 = vadd.f32 %v253_v10, %v252_v15  ;;  %v490_v46 = vsel %vm207_vm1, %v443_v33, 0.0  ;;  %4794 = vmatmul.msk.f32.gmra.mxu1 %vm93_vm0, %v1279_v34  ;;  %4810 = vmatmul.msk.f32.gmra.mxu2 %vm93_vm0, %v1516_v35 }
 0x11a   :  { %v780_v47 = vadd.f32 %v779_v43, %v778_v17  ;;  %v1017_v48 = vadd.f32 %v1016_v44, %v1015_v18  ;;  %v307_v49 = vsel %vm207_vm1, %v277_v42, 0.0  ;;  %460 = vst.msk [vmem:[#allocation2 + $0xf8] sm:$0xff] %vm207_vm1, %v443_v33  ;;  %v491_v50 = vadd.f32 %v490_v46, %v489_v20 }
 0x11b   :  { %v255_v51 = vrot.slane %v254_v45, 4  ;;  %v308_v52 = vadd.f32 %v307_v49, %v306_v21  ;;  %v514_v53 = vmul.f32 %v443_v33, %v443_v33  ;;  %vm4434_vm0 = vcmask 520192  }
 0x11c   :  { %v492_v54 = vrot.slane %v491_v50, 4  ;;  %v679_v55 = vpop.f32.mrf.mxu2  ;;  %v916_v56 = vpop.f32.mrf.mxu3 }
 0x11d   :  { %v256_v57 = vadd.f32 %v255_v51, %v254_v45  ;;  %v309_v59 = vrot.slane %v308_v52, 4  ;;  %v544_v60 = vsel %vm207_vm1, %v514_v53, 0.0  ;;  %v680_v61 = vadd.f32 %v5982_v58, %v679_v55  ;;  %v1108_v62 = vpop.f32.mrf.mxu0  ;;  %v1345_v63 = vpop.f32.mrf.mxu1 }
 0x11e   :  { %v493_v0 = vadd.f32 %v492_v54, %v491_v50  ;;  %v545_v1 = vadd.f32 %v544_v60, %v543_v31  ;;  %v917_v2 = vadd.f32 %v5982_v58, %v916_v56  ;;  %v1109_v3 = vadd.f32 %v5982_v58, %v1108_v62 }
 0x11f   :  { %v257_v4 = vrot.slane %v256_v57, 2  ;;  %v310_v5 = vadd.f32 %v309_v59, %v308_v52  ;;  %697 = vst.msk [vmem:[#allocation2 + $0x178] sm:$0xff] %vm207_vm1, %v680_v61  ;;  %v727_v6 = vsel %vm207_vm1, %v680_v61, 0.0  ;;  %v751_v8 = vmul.f32 %v680_v61, %v680_v61 }
 0x120   :  { %v728_v7 = vadd.f32 %v727_v6, %v726_v40  ;;  %v988_v9 = vmul.f32 %v917_v2, %v917_v2  ;;  %v1346_v11 = vadd.f32 %v5982_v58, %v1345_v63  ;;  %v494_v14 = vrot.slane %v493_v0, 2  ;;  %934 = vst.msk [vmem:[#allocation2 + $0x1f8] sm:$0xff] %vm207_vm1, %v917_v2 }
 0x121   :  { %v258_v12 = vadd.f32 %v257_v4, %v256_v57  ;;  %v311_v13 = vrot.slane %v310_v5, 2  ;;  %v546_v15 = vrot.slane %v545_v1, 4  ;;  %v1210_v16 = vmul.f32 %v1109_v3, %v1109_v3  ;;  %1156 = vst.msk [vmem:[#allocation2 + $0x200] sm:$0xff] %vm207_vm1, %v1109_v3 }
 0x122   :  { %v1447_v17 = vmul.f32 %v1346_v11, %v1346_v11  ;;  %v495_v20 = vadd.f32 %v494_v14, %v493_v0  ;;  %v729_v22 = vrot.slane %v728_v7, 4  ;;  %v781_v23 = vsel %vm207_vm1, %v751_v8, 0.0  ;;  %1393 = vst.msk [vmem:[#allocation2 + $0x280] sm:$0xff] %vm207_vm1, %v1346_v11 }
 0x123   :  { %v259_v18 = vrot.slane %v258_v12, 1  ;;  %v312_v19 = vadd.f32 %v311_v13, %v310_v5  ;;  %v547_v21 = vadd.f32 %v546_v15, %v545_v1  ;;  %v964_v24 = vsel %vm207_vm1, %v917_v2, 0.0 }
 0x124   :  { %v1018_v25 = vsel %vm207_vm1, %v988_v9, 0.0  ;;  %v1582_v26 = vpop.f32.mrf.mxu2  ;;  %v1803_v27 = vpop.f32.mrf.mxu3  ;;  %v496_v30 = vrot.slane %v495_v20, 1  ;;  %v730_v34 = vadd.f32 %v729_v22, %v728_v7  ;;  %v782_v35 = vadd.f32 %v781_v23, %v780_v47 }
 0x125   :  { %v260_v28 = vadd.f32 %v259_v18, %v258_v12  ;;  %v313_v29 = vrot.slane %v312_v19, 1  ;;  %v548_v31 = vrot.slane %v547_v21, 2  ;;  %v1111_v32 = vpop.f32.mrf.mxu0  ;;  %v1348_v33 = vpop.f32.mrf.mxu1  ;;  %v965_v36 = vadd.f32 %v964_v24, %v6029_v41 }
 0x126   :  { %v1019_v37 = vadd.f32 %v1018_v25, %v1017_v48  ;;  %v497_v39 = vadd.f32 %v496_v30, %v495_v20  ;;  %v1172_v10 = vsel %vm207_vm1, %v1109_v3, 0.0  ;;  %v731_v42 = vrot.slane %v730_v34, 2 }
 0x127   :  { %v314_v38 = vadd.f32 %v313_v29, %v312_v19  ;;  %v549_v40 = vadd.f32 %v548_v31, %v547_v21  ;;  %v783_v43 = vrot.slane %v782_v35, 4  ;;  %v966_v44 = vrot.slane %v965_v36, 4 }
 0x128   :  { %v1020_v45 = vrot.slane %v1019_v37, 4  ;;  %v498_v46 = vadd.f32 %v497_v39, %v260_v28  ;;  %v1226_v50 = vsel %vm207_vm1, %v1210_v16, 0.0  ;;  %v1583_v51 = vadd.f32 %v5982_v58, %v1582_v26 }
 0x129   :  { %v550_v49 = vrot.slane %v549_v40, 1  ;;  %v732_v52 = vadd.f32 %v731_v42, %v730_v34  ;;  %v784_v47 = vadd.f32 %v783_v43, %v782_v35  ;;  %v967_v53 = vadd.f32 %v966_v44, %v965_v36 }
 0x12a   :  { %v1021_v41 = vadd.f32 %v1020_v45, %v1019_v37  ;;  %v1409_v54 = vsel %vm207_vm1, %v1346_v11, 0.0  ;;  %v1463_v55 = vsel %vm207_vm1, %v1447_v17, 0.0  ;;  %1630 = vst.msk [vmem:[#allocation2 + $0x300] sm:$0xff] %vm207_vm1, %v1583_v51  ;;  %v1646_v56 = vsel %vm207_vm1, %v1583_v51, 0.0 }
 0x12b   :  { %v551_v48 = vadd.f32 %v550_v49, %v549_v40  ;;  %v733_v57 = vrot.slane %v732_v52, 1  ;;  %v785_v59 = vrot.slane %v784_v47, 2  ;;  %v968_v60 = vrot.slane %v967_v53, 2 }
 0x12c   :  { %v1022_v61 = vrot.slane %v1021_v41, 2  ;;  %v1585_v62 = vpop.f32.mrf.mxu2  ;;  %v1806_v63 = vpop.f32.mrf.mxu3  ;;  %v1684_v1 = vmul.f32 %v1583_v51, %v1583_v51  ;;  %v1804_v2 = vadd.f32 %v5982_v58, %v1803_v27  ;;  %v1112_v3 = vadd.f32 %v5982_v58, %v1111_v32 }
 0x12d   :  { %v552_v0 = vadd.f32 %v551_v48, %v314_v38  ;;  %v1114_v4 = vpop.f32.mrf.mxu0  ;;  %v734_v5 = vadd.f32 %v733_v57, %v732_v52  ;;  %v786_v6 = vadd.f32 %v785_v59, %v784_v47  ;;  %v969_v7 = vadd.f32 %v968_v60, %v967_v53 }
 0x12e   :  { %v1023_v8 = vadd.f32 %v1022_v61, %v1021_v41  ;;  %v1351_v9 = vpop.f32.mrf.mxu1  ;;  %v1700_v11 = vsel %vm207_vm1, %v1684_v1, 0.0  ;;  %1839 = vst.msk [vmem:[#allocation2 + $0x380] sm:$0xff] %vm207_vm1, %v1804_v2  ;;  %v1851_v12 = vsel %vm207_vm1, %v1804_v2, 0.0  ;;  %v1881_v13 = vmul.f32 %v1804_v2, %v1804_v2 }
 0x12f   :  { %v1173_v14 = vsel %vm207_vm1, %v1112_v3, 0.0  ;;  %v735_v15 = vadd.f32 %v734_v5, %v498_v46  ;;  %v787_v16 = vrot.slane %v786_v6, 1  ;;  %v970_v17 = vrot.slane %v969_v7, 1  ;;  %1157 = vst.msk [vmem:[#allocation2 + $0x208] sm:$0xff] %vm207_vm1, %v1112_v3 }
 0x130   :  { %v1024_v18 = vrot.slane %v1023_v8, 1  ;;  %v1893_v19 = vsel %vm207_vm1, %v1881_v13, 0.0  ;;  %v1174_v20 = vadd.f32 %v1173_v14, %v1172_v10  ;;  %v1211_v21 = vmul.f32 %v1112_v3, %v1112_v3 }
 0x131   :  { %v1349_v22 = vadd.f32 %v5982_v58, %v1348_v33  ;;  %v788_v23 = vadd.f32 %v787_v16, %v786_v6  ;;  %v971_v24 = vadd.f32 %v970_v17, %v969_v7  ;;  %v1586_v26 = vadd.f32 %v5982_v58, %v1585_v62 }
 0x132   :  { %v1025_v25 = vadd.f32 %v1024_v18, %v1023_v8  ;;  %v1227_v27 = vsel %vm207_vm1, %v1211_v21, 0.0  ;;  %v1807_v30 = vadd.f32 %v5982_v58, %v1806_v63  ;;  %v1115_v51 = vadd.f32 %v5982_v58, %v1114_v4 }
 0x133   :  { %1394 = vst.msk [vmem:[#allocation2 + $0x288] sm:$0xff] %vm207_vm1, %v1349_v22  ;;  %v1410_v28 = vsel %vm207_vm1, %v1349_v22, 0.0  ;;  %v1448_v29 = vmul.f32 %v1349_v22, %v1349_v22  ;;  %v789_v31 = vadd.f32 %v788_v23, %v552_v0  ;;  %v6076_v32 = vadd.f32 %v971_v24, %v735_v15 }
 0x134   :  { %v1228_v34 = vadd.f32 %v1227_v27, %v1226_v50  ;;  %v1411_v35 = vadd.f32 %v1410_v28, %v1409_v54  ;;  %1631 = vst.msk [vmem:[#allocation2 + $0x308] sm:$0xff] %vm207_vm1, %v1586_v26  ;;  %v1588_v33 = vpop.f32.mrf.mxu2  ;;  %v1647_v37 = vsel %vm207_vm1, %v1586_v26, 0.0  ;;  %v1685_v38 = vmul.f32 %v1586_v26, %v1586_v26 }
 0x135   :  { %v1464_v36 = vsel %vm207_vm1, %v1448_v29, 0.0  ;;  %1840 = vst.msk [vmem:[#allocation2 + $0x388] sm:$0xff] %vm207_vm1, %v1807_v30  ;;  %v1852_v39 = vsel %vm207_vm1, %v1807_v30, 0.0  ;;  %v1809_v40 = vpop.f32.mrf.mxu3  ;;  %v1117_v10 = vpop.f32.mrf.mxu0  ;;  %v6083_v42 = vadd.f32 %v1025_v25, %v789_v31  ;;  %v1648_v44 = vadd.f32 %v1647_v37, %v1646_v56 }
 0x136   :  { %v1465_v43 = vadd.f32 %v1464_v36, %v1463_v55  ;;  %v1853_v45 = vadd.f32 %v1852_v39, %v1851_v12  ;;  %v1354_v46 = vpop.f32.mrf.mxu1  ;;  %v1701_v49 = vsel %vm207_vm1, %v1685_v38, 0.0  ;;  %v1882_v50 = vmul.f32 %v1807_v30, %v1807_v30  ;;  %1158 = vst.msk [vmem:[#allocation2 + $0x210] sm:$0xff] %vm207_vm1, %v1115_v51 }
 0x137   :  { %v1352_v52 = vadd.f32 %v5982_v58, %v1351_v9  ;;  %v1702_v47 = vadd.f32 %v1701_v49, %v1700_v11  ;;  %v1589_v53 = vadd.f32 %v5982_v58, %v1588_v33  ;;  %v1810_v41 = vadd.f32 %v5982_v58, %v1809_v40 }
 0x138   :  { %v1118_v48 = vadd.f32 %v5982_v58, %v1117_v10  ;;  %v1894_v54 = vsel %vm207_vm1, %v1882_v50, 0.0  ;;  %v1175_v55 = vsel %vm207_vm1, %v1115_v51, 0.0  ;;  %v1212_v56 = vmul.f32 %v1115_v51, %v1115_v51 }
 0x139   :  { %v1412_v57 = vsel %vm207_vm1, %v1352_v52, 0.0  ;;  %v1895_v59 = vadd.f32 %v1894_v54, %v1893_v19  ;;  %v1176_v60 = vadd.f32 %v1175_v55, %v1174_v20  ;;  %1395 = vst.msk [vmem:[#allocation2 + $0x290] sm:$0xff] %vm207_vm1, %v1352_v52  ;;  %v1449_v62 = vmul.f32 %v1352_v52, %v1352_v52 }
 0x13a   :  { %v1413_v61 = vadd.f32 %v1412_v57, %v1411_v35  ;;  %v1229_v63 = vsel %vm207_vm1, %v1212_v56, 0.0  ;;  %1632 = vst.msk [vmem:[#allocation2 + $0x310] sm:$0xff] %vm207_vm1, %v1589_v53  ;;  %v1649_v0 = vsel %vm207_vm1, %v1589_v53, 0.0  ;;  %v1686_v1 = vmul.f32 %v1589_v53, %v1589_v53 }
 0x13b   :  { %v1854_v2 = vsel %vm207_vm1, %v1810_v41, 0.0  ;;  %v1230_v3 = vadd.f32 %v1229_v63, %v1228_v34  ;;  %v1466_v4 = vsel %vm207_vm1, %v1449_v62, 0.0  ;;  %v1650_v5 = vadd.f32 %v1649_v0, %v1648_v44  ;;  %1841 = vst.msk [vmem:[#allocation2 + $0x390] sm:$0xff] %vm207_vm1, %v1810_v41 }
 0x13c   :  { %v1855_v6 = vadd.f32 %v1854_v2, %v1853_v45  ;;  %v1591_v7 = vpop.f32.mrf.mxu2  ;;  %v1467_v8 = vadd.f32 %v1466_v4, %v1465_v43  ;;  %v1703_v9 = vsel %vm207_vm1, %v1686_v1, 0.0  ;;  %v1883_v11 = vmul.f32 %v1810_v41, %v1810_v41  ;;  %1159 = vst.msk [vmem:[#allocation2 + $0x218] sm:$0xff] %vm207_vm1, %v1118_v48 }
 0x13d   :  { %v1177_v12 = vsel %vm207_vm1, %v1118_v48, 0.0  ;;  %v1812_v13 = vpop.f32.mrf.mxu3  ;;  %v1120_v14 = vpop.f32.mrf.mxu0  ;;  %v1704_v15 = vadd.f32 %v1703_v9, %v1702_v47  ;;  %v1213_v17 = vmul.f32 %v1118_v48, %v1118_v48  ;;  %v1355_v18 = vadd.f32 %v5982_v58, %v1354_v46 }
 0x13e   :  { %v1178_v16 = vadd.f32 %v1177_v12, %v1176_v60  ;;  %v1357_v19 = vpop.f32.mrf.mxu1  ;;  %v1896_v20 = vsel %vm207_vm1, %v1883_v11, 0.0  ;;  %v1592_v21 = vadd.f32 %v5982_v58, %v1591_v7  ;;  %v1813_v22 = vadd.f32 %v5982_v58, %v1812_v13 }
 0x13f   :  { %v1121_v23 = vadd.f32 %v5982_v58, %v1120_v14  ;;  %v1897_v24 = vadd.f32 %v1896_v20, %v1895_v59  ;;  %v1231_v25 = vsel %vm207_vm1, %v1213_v17, 0.0  ;;  %1396 = vst.msk [vmem:[#allocation2 + $0x298] sm:$0xff] %vm207_vm1, %v1355_v18  ;;  %v1414_v26 = vsel %vm207_vm1, %v1355_v18, 0.0 }
 0x140   :  { %v1450_v27 = vmul.f32 %v1355_v18, %v1355_v18  ;;  %v1232_v28 = vadd.f32 %v1231_v25, %v1230_v3  ;;  %v1415_v29 = vadd.f32 %v1414_v26, %v1413_v61  ;;  %1633 = vst.msk [vmem:[#allocation2 + $0x318] sm:$0xff] %vm207_vm1, %v1592_v21  ;;  %v1651_v30 = vsel %vm207_vm1, %v1592_v21, 0.0 }
 0x141   :  { %v1687_v31 = vmul.f32 %v1592_v21, %v1592_v21  ;;  %v1652_v35 = vadd.f32 %v1651_v30, %v1650_v5  ;;  %1842 = vst.msk [vmem:[#allocation2 + $0x398] sm:$0xff] %vm207_vm1, %v1813_v22  ;;  %v1856_v33 = vsel %vm207_vm1, %v1813_v22, 0.0  ;;  %v1884_v36 = vmul.f32 %v1813_v22, %v1813_v22 }
 0x142   :  { %v1468_v34 = vsel %vm207_vm1, %v1450_v27, 0.0  ;;  %v1857_v39 = vadd.f32 %v1856_v33, %v1855_v6  ;;  %1160 = vst.msk [vmem:[#allocation2 + $0x220] sm:$0xff] %vm207_vm1, %v1121_v23  ;;  %v1179_v40 = vsel %vm207_vm1, %v1121_v23, 0.0  ;;  %v1214_v44 = vmul.f32 %v1121_v23, %v1121_v23 }
 0x143   :  { %v1469_v37 = vadd.f32 %v1468_v34, %v1467_v8  ;;  %v1705_v38 = vsel %vm207_vm1, %v1687_v31, 0.0  ;;  %v1180_v43 = vadd.f32 %v1179_v40, %v1178_v16  ;;  %v1358_v45 = vadd.f32 %v5982_v58, %v1357_v19 }
 0x144   :  { %v1706_v10 = vadd.f32 %v1705_v38, %v1704_v15  ;;  %v1594_v46 = vpop.f32.mrf.mxu2  ;;  %v1898_v49 = vsel %vm207_vm1, %v1884_v36, 0.0  ;;  %v1233_v53 = vsel %vm207_vm1, %v1214_v44, 0.0 }
 0x145   :  { %v1595_v50 = vadd.f32 %v5982_v58, %v1594_v46  ;;  %v1815_v51 = vpop.f32.mrf.mxu3  ;;  %v1123_v52 = vpop.f32.mrf.mxu0  ;;  %v1899_v47 = vadd.f32 %v1898_v49, %v1897_v24  ;;  %1397 = vst.msk [vmem:[#allocation2 + $0x2a0] sm:$0xff] %vm207_vm1, %v1358_v45  ;;  %v1416_v41 = vsel %vm207_vm1, %v1358_v45, 0.0  ;;  %v1451_v48 = vmul.f32 %v1358_v45, %v1358_v45 }
 0x146   :  { %v1360_v54 = vpop.f32.mrf.mxu1  ;;  %v1234_v55 = vadd.f32 %v1233_v53, %v1232_v28  ;;  %v1417_v56 = vadd.f32 %v1416_v41, %v1415_v29  ;;  %v1816_v59 = vadd.f32 %v5982_v58, %v1815_v51  ;;  %v1124_v60 = vadd.f32 %v5982_v58, %v1123_v52 }
 0x147   :  { %v1688_v57 = vmul.f32 %v1595_v50, %v1595_v50  ;;  %v1361_v61 = vadd.f32 %v5982_v58, %v1360_v54  ;;  %v1470_v1 = vsel %vm207_vm1, %v1451_v48, 0.0  ;;  %1634 = vst.msk [vmem:[#allocation2 + $0x320] sm:$0xff] %vm207_vm1, %v1595_v50  ;;  %v1653_v2 = vsel %vm207_vm1, %v1595_v50, 0.0 }
 0x148   :  { %v1885_v62 = vmul.f32 %v1816_v59, %v1816_v59  ;;  %v1215_v63 = vmul.f32 %v1124_v60, %v1124_v60  ;;  %v1858_v4 = vsel %vm207_vm1, %v1816_v59, 0.0  ;;  %v1471_v5 = vadd.f32 %v1470_v1, %v1469_v37  ;;  %1843 = vst.msk [vmem:[#allocation2 + $0x3a0] sm:$0xff] %vm207_vm1, %v1816_v59 }
 0x149   :  { %v1452_v0 = vmul.f32 %v1361_v61, %v1361_v61  ;;  %v1707_v3 = vsel %vm207_vm1, %v1688_v57, 0.0  ;;  %v1654_v6 = vadd.f32 %v1653_v2, %v1652_v35  ;;  %v1859_v8 = vadd.f32 %v1858_v4, %v1857_v39  ;;  %1161 = vst.msk [vmem:[#allocation2 + $0x228] sm:$0xff] %vm207_vm1, %v1124_v60 }
 0x14a   :  { %v1708_v7 = vadd.f32 %v1707_v3, %v1706_v10  ;;  %v1900_v11 = vsel %vm207_vm1, %v1885_v62, 0.0  ;;  %v1181_v12 = vsel %vm207_vm1, %v1124_v60, 0.0  ;;  %v1235_v13 = vsel %vm207_vm1, %v1215_v63, 0.0  ;;  %1398 = vst.msk [vmem:[#allocation2 + $0x2a8] sm:$0xff] %vm207_vm1, %v1361_v61 }
 0x14b   :  { %v1418_v14 = vsel %vm207_vm1, %v1361_v61, 0.0  ;;  %v1901_v17 = vadd.f32 %v1900_v11, %v1899_v47  ;;  %v1182_v18 = vadd.f32 %v1181_v12, %v1180_v43  ;;  %v1236_v19 = vadd.f32 %v1235_v13, %v1234_v55 }
 0x14c   :  { %v1597_v9 = vpop.f32.mrf.mxu2  ;;  %v1419_v20 = vadd.f32 %v1418_v14, %v1417_v56  ;;  %v1472_v22 = vsel %vm207_vm1, %v1452_v0, 0.0 }
 0x14d   :  { %v1818_v15 = vpop.f32.mrf.mxu3  ;;  %v1126_v16 = vpop.f32.mrf.mxu0  ;;  %v1598_v23 = vadd.f32 %v5982_v58, %v1597_v9  ;;  %v1473_v26 = vadd.f32 %v1472_v22, %v1471_v5 }
 0x14e   :  { %v1363_v21 = vpop.f32.mrf.mxu1  ;;  %v1819_v24 = vadd.f32 %v5982_v58, %v1818_v15  ;;  %v1127_v25 = vadd.f32 %v5982_v58, %v1126_v16 }
 0x14f   :  { %v1364_v27 = vadd.f32 %v5982_v58, %v1363_v21  ;;  %1635 = vst.msk [vmem:[#allocation2 + $0x328] sm:$0xff] %vm207_vm1, %v1598_v23  ;;  %v1655_v28 = vsel %vm207_vm1, %v1598_v23, 0.0  ;;  %v1689_v29 = vmul.f32 %v1598_v23, %v1598_v23 }
 0x150   :  { %v1860_v30 = vsel %vm207_vm1, %v1819_v24, 0.0  ;;  %v1886_v31 = vmul.f32 %v1819_v24, %v1819_v24  ;;  %v1656_v34 = vadd.f32 %v1655_v28, %v1654_v6  ;;  %1844 = vst.msk [vmem:[#allocation2 + $0x3a8] sm:$0xff] %vm207_vm1, %v1819_v24  ;;  %v1183_v33 = vsel %vm207_vm1, %v1127_v25, 0.0 }
 0x151   :  { %v1861_v35 = vadd.f32 %v1860_v30, %v1859_v8  ;;  %v1216_v36 = vmul.f32 %v1127_v25, %v1127_v25  ;;  %v1709_v37 = vsel %vm207_vm1, %v1689_v29, 0.0  ;;  %1162 = vst.msk [vmem:[#allocation2 + $0x230] sm:$0xff] %vm207_vm1, %v1127_v25  ;;  %v1184_v39 = vadd.f32 %v1183_v33, %v1182_v18  ;;  %v2617_v33 = vld [vmem:[%s7884_s5 + $0x18] sm:$0xff] }
 0x152   :  { %v1902_v38 = vsel %vm207_vm1, %v1886_v31, 0.0  ;;  %v1420_v40 = vsel %vm207_vm1, %v1364_v27, 0.0  ;;  %v1710_v10 = vadd.f32 %v1709_v37, %v1708_v7  ;;  %1399 = vst.msk [vmem:[#allocation2 + $0x2b0] sm:$0xff] %vm207_vm1, %v1364_v27  ;;  %v1453_v50 = vmul.f32 %v1364_v27, %v1364_v27  ;;  %2812 = vmatpush.msra.mxu0 %v2617_v33  ;;  %5014 = vmatpush.msra.mxu1 %v2617_v33 }
 0x153   :  { %v1903_v43 = vadd.f32 %v1902_v38, %v1901_v17  ;;  %v1237_v44 = vsel %vm207_vm1, %v1216_v36, 0.0  ;;  %v1421_v45 = vadd.f32 %v1420_v40, %v1419_v20 }
 0x154   :  { %v1600_v46 = vpop.f32.mrf.mxu2  ;;  %v1238_v49 = vadd.f32 %v1237_v44, %v1236_v19  ;;  %v1474_v54 = vsel %vm207_vm1, %v1453_v50, 0.0 }
 0x155   :  { %v1601_v51 = vadd.f32 %v5982_v58, %v1600_v46  ;;  %v1821_v52 = vpop.f32.mrf.mxu3  ;;  %v1129_v47 = vpop.f32.mrf.mxu0  ;;  %v1475_v59 = vadd.f32 %v1474_v54, %v1473_v26 }
 0x156   :  { %v1822_v53 = vadd.f32 %v5982_v58, %v1821_v52  ;;  %v1130_v41 = vadd.f32 %v5982_v58, %v1129_v47  ;;  %v1366_v48 = vpop.f32.mrf.mxu1 }
 0x157   :  { %1636 = vst.msk [vmem:[#allocation2 + $0x330] sm:$0xff] %vm207_vm1, %v1601_v51  ;;  %v1657_v55 = vsel %vm207_vm1, %v1601_v51, 0.0  ;;  %v1690_v56 = vmul.f32 %v1601_v51, %v1601_v51  ;;  %v1367_v57 = vadd.f32 %v5982_v58, %v1366_v48 }
 0x158   :  { %v1658_v60 = vadd.f32 %v1657_v55, %v1656_v34  ;;  %1845 = vst.msk [vmem:[#allocation2 + $0x3b0] sm:$0xff] %vm207_vm1, %v1822_v53  ;;  %v1862_v61 = vsel %vm207_vm1, %v1822_v53, 0.0  ;;  %v1887_v62 = vmul.f32 %v1822_v53, %v1822_v53  ;;  %v1185_v1 = vsel %vm207_vm1, %v1130_v41, 0.0 }
 0x159   :  { %v1711_v63 = vsel %vm207_vm1, %v1690_v56, 0.0  ;;  %v1863_v0 = vadd.f32 %v1862_v61, %v1861_v35  ;;  %1163 = vst.msk [vmem:[#allocation2 + $0x238] sm:$0xff] %vm207_vm1, %v1130_v41  ;;  %v1217_v2 = vmul.f32 %v1130_v41, %v1130_v41  ;;  %v1186_v5 = vadd.f32 %v1185_v1, %v1184_v39 }
 0x15a   :  { %v1712_v3 = vadd.f32 %v1711_v63, %v1710_v10  ;;  %v1904_v4 = vsel %vm207_vm1, %v1887_v62, 0.0  ;;  %1400 = vst.msk [vmem:[#allocation2 + $0x2b8] sm:$0xff] %vm207_vm1, %v1367_v57  ;;  %v1422_v6 = vsel %vm207_vm1, %v1367_v57, 0.0  ;;  %v1454_v11 = vmul.f32 %v1367_v57, %v1367_v57 }
 0x15b   :  { %v1905_v7 = vadd.f32 %v1904_v4, %v1903_v43  ;;  %v1239_v8 = vsel %vm207_vm1, %v1217_v2, 0.0  ;;  %v1423_v9 = vadd.f32 %v1422_v6, %v1421_v45 }
 0x15c   :  { %v1240_v12 = vadd.f32 %v1239_v8, %v1238_v49  ;;  %v1603_v13 = vpop.f32.mrf.mxu2  ;;  %v1476_v14 = vsel %vm207_vm1, %v1454_v11, 0.0 }
 0x15d   :  { %v1604_v15 = vadd.f32 %v5982_v58, %v1603_v13  ;;  %v1824_v16 = vpop.f32.mrf.mxu3  ;;  %v1132_v17 = vpop.f32.mrf.mxu0  ;;  %v1477_v18 = vadd.f32 %v1476_v14, %v1475_v59 }
 0x15e   :  { %v1825_v19 = vadd.f32 %v5982_v58, %v1824_v16  ;;  %v1133_v20 = vadd.f32 %v5982_v58, %v1132_v17  ;;  %v1369_v21 = vpop.f32.mrf.mxu1 }
 0x15f   :  { %1637 = vst.msk [vmem:[#allocation2 + $0x338] sm:$0xff] %vm207_vm1, %v1604_v15  ;;  %v1659_v22 = vsel %vm207_vm1, %v1604_v15, 0.0  ;;  %v1691_v23 = vmul.f32 %v1604_v15, %v1604_v15  ;;  %v1370_v24 = vadd.f32 %v5982_v58, %v1369_v21 }
 0x160   :  { %v1660_v25 = vadd.f32 %v1659_v22, %v1658_v60  ;;  %v1888_v26 = vmul.f32 %v1825_v19, %v1825_v19  ;;  %v1218_v27 = vmul.f32 %v1133_v20, %v1133_v20  ;;  %1846 = vst.msk [vmem:[#allocation2 + $0x3b8] sm:$0xff] %vm207_vm1, %v1825_v19  ;;  %v1864_v31 = vsel %vm207_vm1, %v1825_v19, 0.0 }
 0x161   :  { %v1455_v28 = vmul.f32 %v1370_v24, %v1370_v24  ;;  %v1713_v29 = vsel %vm207_vm1, %v1691_v23, 0.0  ;;  %1164 = vst.msk [vmem:[#allocation2 + $0x240] sm:$0xff] %vm207_vm1, %v1133_v20  ;;  %v1187_v35 = vsel %vm207_vm1, %v1133_v20, 0.0  ;;  %v1865_v36 = vadd.f32 %v1864_v31, %v1863_v0 }
 0x162   :  { %v1714_v30 = vadd.f32 %v1713_v29, %v1712_v3  ;;  %v1906_v34 = vsel %vm207_vm1, %v1888_v26, 0.0  ;;  %v1188_v38 = vadd.f32 %v1187_v35, %v1186_v5  ;;  %v1241_v39 = vsel %vm207_vm1, %v1218_v27, 0.0  ;;  %1401 = vst.msk [vmem:[#allocation2 + $0x2c0] sm:$0xff] %vm207_vm1, %v1370_v24  ;;  %v4826_v29 = vld [vmem:[%s7884_s5 + $0x38] sm:$0xff] }
 0x163   :  { %v1907_v37 = vadd.f32 %v1906_v34, %v1905_v7  ;;  %v1242_v10 = vadd.f32 %v1241_v39, %v1240_v12  ;;  %v1424_v43 = vsel %vm207_vm1, %v1370_v24, 0.0  ;;  %v1478_v44 = vsel %vm207_vm1, %v1455_v28, 0.0  ;;  %2699 = vmatpush.msra.mxu3 %v4826_v29  ;;  %3243 = vmatpush.msra.mxu2 %v4826_v29 }
 0x164   :  { %v1606_v40 = vpop.f32.mrf.mxu2  ;;  %v1425_v50 = vadd.f32 %v1424_v43, %v1423_v9  ;;  %v1479_v51 = vadd.f32 %v1478_v44, %v1477_v18 }
 0x165   :  { %v1607_v45 = vadd.f32 %v5982_v58, %v1606_v40  ;;  %v1827_v46 = vpop.f32.mrf.mxu3  ;;  %v1135_v49 = vpop.f32.mrf.mxu0 }
 0x166   :  { %v1828_v52 = vadd.f32 %v5982_v58, %v1827_v46  ;;  %v1136_v47 = vadd.f32 %v5982_v58, %v1135_v49  ;;  %v1372_v53 = vpop.f32.mrf.mxu1 }
 0x167   :  { %1638 = vst.msk [vmem:[#allocation2 + $0x340] sm:$0xff] %vm207_vm1, %v1607_v45  ;;  %v1661_v41 = vsel %vm207_vm1, %v1607_v45, 0.0  ;;  %v1692_v48 = vmul.f32 %v1607_v45, %v1607_v45  ;;  %v1373_v54 = vadd.f32 %v5982_v58, %v1372_v53 }
 0x168   :  { %v1662_v55 = vadd.f32 %v1661_v41, %v1660_v25  ;;  %1847 = vst.msk [vmem:[#allocation2 + $0x3c0] sm:$0xff] %vm207_vm1, %v1828_v52  ;;  %v1866_v56 = vsel %vm207_vm1, %v1828_v52, 0.0  ;;  %v1889_v57 = vmul.f32 %v1828_v52, %v1828_v52  ;;  %v1189_v59 = vsel %vm207_vm1, %v1136_v47, 0.0 }
 0x169   :  { %v1867_v60 = vadd.f32 %v1866_v56, %v1865_v36  ;;  %v1190_v61 = vadd.f32 %v1189_v59, %v1188_v38  ;;  %v1219_v62 = vmul.f32 %v1136_v47, %v1136_v47  ;;  %v1456_v63 = vmul.f32 %v1373_v54, %v1373_v54  ;;  %1165 = vst.msk [vmem:[#allocation2 + $0x248] sm:$0xff] %vm207_vm1, %v1136_v47 }
 0x16a   :  { %v1715_v0 = vsel %vm207_vm1, %v1692_v48, 0.0  ;;  %v1908_v1 = vsel %vm207_vm1, %v1889_v57, 0.0  ;;  %v1426_v2 = vsel %vm207_vm1, %v1373_v54, 0.0  ;;  %1402 = vst.msk [vmem:[#allocation2 + $0x2c8] sm:$0xff] %vm207_vm1, %v1373_v54 }
 0x16b   :  { %v1716_v3 = vadd.f32 %v1715_v0, %v1714_v30  ;;  %v1909_v4 = vadd.f32 %v1908_v1, %v1907_v37  ;;  %v1243_v5 = vsel %vm207_vm1, %v1219_v62, 0.0  ;;  %v1427_v6 = vadd.f32 %v1426_v2, %v1425_v50 }
 0x16c   :  { %v1244_v7 = vadd.f32 %v1243_v5, %v1242_v10  ;;  %v1480_v8 = vsel %vm207_vm1, %v1456_v63, 0.0  ;;  %v1609_v9 = vpop.f32.mrf.mxu2 }
 0x16d   :  { %v1481_v11 = vadd.f32 %v1480_v8, %v1479_v51  ;;  %v1610_v12 = vadd.f32 %v5982_v58, %v1609_v9  ;;  %v1830_v13 = vpop.f32.mrf.mxu3  ;;  %v1138_v14 = vpop.f32.mrf.mxu0 }
 0x16e   :  { %v1831_v15 = vadd.f32 %v5982_v58, %v1830_v13  ;;  %v1139_v16 = vadd.f32 %v5982_v58, %v1138_v14  ;;  %v1375_v17 = vpop.f32.mrf.mxu1 }
 0x16f   :  { %1639 = vst.msk [vmem:[#allocation2 + $0x348] sm:$0xff] %vm207_vm1, %v1610_v12  ;;  %v1663_v18 = vsel %vm207_vm1, %v1610_v12, 0.0  ;;  %v1693_v19 = vmul.f32 %v1610_v12, %v1610_v12  ;;  %v1376_v20 = vadd.f32 %v5982_v58, %v1375_v17 }
 0x170   :  { %v1664_v21 = vadd.f32 %v1663_v18, %v1662_v55  ;;  %1848 = vst.msk [vmem:[#allocation2 + $0x3c8] sm:$0xff] %vm207_vm1, %v1831_v15  ;;  %v1868_v22 = vsel %vm207_vm1, %v1831_v15, 0.0  ;;  %v1890_v23 = vmul.f32 %v1831_v15, %v1831_v15  ;;  %v1191_v24 = vsel %vm207_vm1, %v1139_v16, 0.0 }
 0x171   :  { %v1717_v25 = vsel %vm207_vm1, %v1693_v19, 0.0  ;;  %v1869_v26 = vadd.f32 %v1868_v22, %v1867_v60  ;;  %1166 = vst.msk [vmem:[#allocation2 + $0x250] sm:$0xff] %vm207_vm1, %v1139_v16  ;;  %v1192_v27 = vadd.f32 %v1191_v24, %v1190_v61  ;;  %v1220_v28 = vmul.f32 %v1139_v16, %v1139_v16 }
 0x172   :  { %v1718_v30 = vadd.f32 %v1717_v25, %v1716_v3  ;;  %v1910_v31 = vsel %vm207_vm1, %v1890_v23, 0.0  ;;  %1403 = vst.msk [vmem:[#allocation2 + $0x2d0] sm:$0xff] %vm207_vm1, %v1376_v20  ;;  %v1428_v34 = vsel %vm207_vm1, %v1376_v20, 0.0  ;;  %v1457_v35 = vmul.f32 %v1376_v20, %v1376_v20 }
 0x173   :  { %v1911_v33 = vadd.f32 %v1910_v31, %v1909_v4  ;;  %v1245_v36 = vsel %vm207_vm1, %v1220_v28, 0.0  ;;  %v1429_v37 = vadd.f32 %v1428_v34, %v1427_v6 }
 0x174   :  { %v1246_v38 = vadd.f32 %v1245_v36, %v1244_v7  ;;  %v1482_v39 = vsel %vm207_vm1, %v1457_v35, 0.0  ;;  %v1612_v40 = vpop.f32.mrf.mxu2 }
 0x175   :  { %v1483_v10 = vadd.f32 %v1482_v39, %v1481_v11  ;;  %v1613_v43 = vadd.f32 %v5982_v58, %v1612_v40  ;;  %v1833_v44 = vpop.f32.mrf.mxu3  ;;  %v1141_v45 = vpop.f32.mrf.mxu0  ;;  %v6249_v11 = vld [vmem:[%s7908_s20] ss:$0 sm:$0xff] }
 0x176   :  { %v1834_v46 = vadd.f32 %v5982_v58, %v1833_v44  ;;  %v1142_v49 = vadd.f32 %v5982_v58, %v1141_v45  ;;  %v1378_v50 = vpop.f32.mrf.mxu1 }
 0x177   :  { %1640 = vst.msk [vmem:[#allocation2 + $0x350] sm:$0xff] %vm207_vm1, %v1613_v43  ;;  %v1665_v51 = vsel %vm207_vm1, %v1613_v43, 0.0  ;;  %v1694_v52 = vmul.f32 %v1613_v43, %v1613_v43  ;;  %v1379_v47 = vadd.f32 %v5982_v58, %v1378_v50 }
 0x178   :  { %v1666_v53 = vadd.f32 %v1665_v51, %v1664_v21  ;;  %1849 = vst.msk [vmem:[#allocation2 + $0x3d0] sm:$0xff] %vm207_vm1, %v1834_v46  ;;  %v1870_v41 = vsel %vm207_vm1, %v1834_v46, 0.0  ;;  %v1891_v48 = vmul.f32 %v1834_v46, %v1834_v46  ;;  %v1193_v54 = vsel %vm207_vm1, %v1142_v49, 0.0 }
 0x179   :  { %v1719_v55 = vsel %vm207_vm1, %v1694_v52, 0.0  ;;  %v1871_v56 = vadd.f32 %v1870_v41, %v1869_v26  ;;  %1167 = vst.msk [vmem:[#allocation2 + $0x258] sm:$0xff] %vm207_vm1, %v1142_v49  ;;  %v1194_v57 = vadd.f32 %v1193_v54, %v1192_v27  ;;  %v1221_v59 = vmul.f32 %v1142_v49, %v1142_v49  ;;  %v6288_v54 = vld [vmem:[%s7884_s5 + $0x10] sm:$0xff] }
 0x17a   :  { %v1720_v60 = vadd.f32 %v1719_v55, %v1718_v30  ;;  %v1912_v61 = vsel %vm207_vm1, %v1891_v48, 0.0  ;;  %1404 = vst.msk [vmem:[#allocation2 + $0x2d8] sm:$0xff] %vm207_vm1, %v1379_v47  ;;  %v1430_v62 = vsel %vm207_vm1, %v1379_v47, 0.0  ;;  %v1458_v63 = vmul.f32 %v1379_v47, %v1379_v47  ;;  %2813 = vmatpush.msra.mxu0 %v6288_v54  ;;  %5015 = vmatpush.msra.mxu1 %v6288_v54 }
 0x17b   :  { %v1913_v0 = vadd.f32 %v1912_v61, %v1911_v33  ;;  %v1247_v1 = vsel %vm207_vm1, %v1221_v59, 0.0  ;;  %v1431_v2 = vadd.f32 %v1430_v62, %v1429_v37 }
 0x17c   :  { %v1248_v3 = vadd.f32 %v1247_v1, %v1246_v38  ;;  %v1484_v4 = vsel %vm207_vm1, %v1458_v63, 0.0  ;;  %v1615_v5 = vpop.f32.mrf.mxu2 }
 0x17d   :  { %v1485_v6 = vadd.f32 %v1484_v4, %v1483_v10  ;;  %v1616_v7 = vadd.f32 %v5982_v58, %v1615_v5  ;;  %v1836_v8 = vpop.f32.mrf.mxu3  ;;  %v1144_v9 = vpop.f32.mrf.mxu0 }
 0x17e   :  { %v1837_v12 = vadd.f32 %v6249_v11, %v1836_v8  ;;  %v1145_v13 = vadd.f32 %v6249_v11, %v1144_v9  ;;  %v1381_v14 = vpop.f32.mrf.mxu1 }
 0x17f   :  { %1641 = vst.msk [vmem:[#allocation2 + $0x358] sm:$0xff] %vm207_vm1, %v1616_v7  ;;  %v1667_v15 = vsel %vm207_vm1, %v1616_v7, 0.0  ;;  %v1695_v16 = vmul.f32 %v1616_v7, %v1616_v7  ;;  %v1382_v17 = vadd.f32 %v6249_v11, %v1381_v14 }
 0x180   :  { %v1668_v58 = vadd.f32 %v1667_v15, %v1666_v53  ;;  %v1892_v18 = vmul.f32 %v1837_v12, %v1837_v12  ;;  %v1222_v19 = vmul.f32 %v1145_v13, %v1145_v13  ;;  %1850 = vst.msk [vmem:[#allocation2 + $0x3d8] sm:$0xff] %vm207_vm1, %v1837_v12  ;;  %v1872_v23 = vsel %vm207_vm1, %v1837_v12, 0.0 }
 0x181   :  { %v1459_v20 = vmul.f32 %v1382_v17, %v1382_v17  ;;  %v1721_v21 = vsel %vm207_vm1, %v1695_v16, 0.0  ;;  %1168 = vst.msk [vmem:[#allocation2 + $0x260] sm:$0xff] %vm207_vm1, %v1145_v13  ;;  %v1195_v25 = vsel %vm207_vm1, %v1145_v13, 0.0  ;;  %v6262_v26 = vadd.f32 %v1872_v23, %v1871_v56 }
 0x182   :  { %v1722_v22 = vadd.f32 %v1721_v21, %v1720_v60  ;;  %v1914_v24 = vsel %vm207_vm1, %v1892_v18, 0.0  ;;  %v1196_v28 = vadd.f32 %v1195_v25, %v1194_v57  ;;  %v1249_v29 = vsel %vm207_vm1, %v1222_v19, 0.0  ;;  %1405 = vst.msk [vmem:[#allocation2 + $0x2e0] sm:$0xff] %vm207_vm1, %v1382_v17 }
 0x183   :  { %v6264_v27 = vadd.f32 %v1914_v24, %v1913_v0  ;;  %v1250_v31 = vadd.f32 %v1249_v29, %v1248_v3  ;;  %v1432_v34 = vsel %vm207_vm1, %v1382_v17, 0.0  ;;  %v1486_v35 = vsel %vm207_vm1, %v1459_v20, 0.0 }
 0x184   :  { %v1618_v30 = vpop.f32.mrf.mxu2  ;;  %v1433_v37 = vadd.f32 %v1432_v34, %v1431_v2  ;;  %v1487_v38 = vadd.f32 %v1486_v35, %v1485_v6  ;;  %v1874_v9 = vrot.slane %v6262_v26, 4 }
 0x185   :  { %v1619_v33 = vadd.f32 %v6249_v11, %v1618_v30  ;;  %v1147_v36 = vpop.f32.mrf.mxu0  ;;  %v1916_v12 = vrot.slane %v6264_v27, 4 }
 0x186   :  { %v1148_v39 = vadd.f32 %v6249_v11, %v1147_v36  ;;  %v1384_v40 = vpop.f32.mrf.mxu1  ;;  %v1875_v29 = vadd.f32 %v1874_v9, %v6262_v26 }
 0x187   :  { %1642 = vst.msk [vmem:[#allocation2 + $0x360] sm:$0xff] %vm207_vm1, %v1619_v33  ;;  %v1669_v10 = vsel %vm207_vm1, %v1619_v33, 0.0  ;;  %v1696_v43 = vmul.f32 %v1619_v33, %v1619_v33  ;;  %v1385_v49 = vadd.f32 %v6249_v11, %v1384_v40 }
 0x188   :  { %v6274_v44 = vadd.f32 %v1669_v10, %v1668_v58  ;;  %1169 = vst.msk [vmem:[#allocation2 + $0x268] sm:$0xff] %vm207_vm1, %v1148_v39  ;;  %v1197_v45 = vsel %vm207_vm1, %v1148_v39, 0.0  ;;  %v1223_v46 = vmul.f32 %v1148_v39, %v1148_v39 }
 0x189   :  { %v1198_v50 = vadd.f32 %v1197_v45, %v1196_v28  ;;  %v1723_v51 = vsel %vm207_vm1, %v1696_v43, 0.0  ;;  %1406 = vst.msk [vmem:[#allocation2 + $0x2e8] sm:$0xff] %vm207_vm1, %v1385_v49  ;;  %v1434_v47 = vsel %vm207_vm1, %v1385_v49, 0.0  ;;  %v1460_v53 = vmul.f32 %v1385_v49, %v1385_v49 }
 0x18a   :  { %v1251_v52 = vsel %vm207_vm1, %v1223_v46, 0.0  ;;  %v6283_v41 = vadd.f32 %v1723_v51, %v1722_v22  ;;  %v1435_v55 = vadd.f32 %v1434_v47, %v1433_v37 }
 0x18b   :  { %v1252_v48 = vadd.f32 %v1251_v52, %v1250_v31  ;;  %v1488_v56 = vsel %vm207_vm1, %v1460_v53, 0.0 }
 0x18c   :  { %v1621_v57 = vpop.f32.mrf.mxu2  ;;  %v1489_v59 = vadd.f32 %v1488_v56, %v1487_v38 }
 0x18d   :  { %v1622_v60 = vadd.f32 %v6249_v11, %v1621_v57  ;;  %v1150_v61 = vpop.f32.mrf.mxu0 }
 0x18e   :  { %v1151_v62 = vadd.f32 %v6249_v11, %v1150_v61  ;;  %v1387_v63 = vpop.f32.mrf.mxu1 }
 0x18f   :  { %1643 = vst.msk [vmem:[#allocation2 + $0x368] sm:$0xff] %vm207_vm1, %v1622_v60  ;;  %v1388_v0 = vadd.f32 %v6249_v11, %v1387_v63  ;;  %v1671_v13 = vsel %vm207_vm1, %v1622_v60, 0.0  ;;  %v1697_v16 = vmul.f32 %v1622_v60, %v1622_v60  ;;  %v1876_v63 = vrot.slane %v1875_v29, 2 }
 0x190   :  { %1170 = vst.msk [vmem:[#allocation2 + $0x270] sm:$0xff] %vm207_vm1, %v1151_v62  ;;  %v1224_v1 = vmul.f32 %v1151_v62, %v1151_v62  ;;  %v1199_v3 = vsel %vm207_vm1, %v1151_v62, 0.0  ;;  %v1672_v38 = vadd.f32 %v1671_v13, %v6274_v44 }
 0x191   :  { %1407 = vst.msk [vmem:[#allocation2 + $0x2f0] sm:$0xff] %vm207_vm1, %v1388_v0  ;;  %v1461_v2 = vmul.f32 %v1388_v0, %v1388_v0  ;;  %v1436_v6 = vsel %vm207_vm1, %v1388_v0, 0.0  ;;  %v1200_v17 = vadd.f32 %v1199_v3, %v1198_v50  ;;  %v1725_v35 = vsel %vm207_vm1, %v1697_v16, 0.0 }
 0x192   :  { %v1253_v5 = vsel %vm207_vm1, %v1224_v1, 0.0  ;;  %v1437_v20 = vadd.f32 %v1436_v6, %v1435_v55  ;;  %v1917_v50 = vadd.f32 %v1916_v12, %v6264_v27  ;;  %v1726_v51 = vadd.f32 %v1725_v35, %v6283_v41 }
 0x193   :  { %v1490_v58 = vsel %vm207_vm1, %v1461_v2, 0.0  ;;  %v1254_v19 = vadd.f32 %v1253_v5, %v1252_v48 }
 0x194   :  { %v1624_v4 = vpop.f32.mrf.mxu2  ;;  %v1491_v30 = vadd.f32 %v1490_v58, %v1489_v59  ;;  %v1918_v5 = vrot.slane %v1917_v50, 2 }
 0x195   :  { %v1625_v7 = vadd.f32 %v6249_v11, %v1624_v4  ;;  %v1153_v8 = vpop.f32.mrf.mxu0 }
 0x196   :  { %v1154_v14 = vadd.f32 %v6249_v11, %v1153_v8  ;;  %v1390_v15 = vpop.f32.mrf.mxu1 }
 0x197   :  { %1644 = vst.msk [vmem:[#allocation2 + $0x370] sm:$0xff] %vm207_vm1, %v1625_v7  ;;  %v1391_v18 = vadd.f32 %v6249_v11, %v1390_v15  ;;  %v1698_v23 = vmul.f32 %v1625_v7, %v1625_v7  ;;  %v1673_v39 = vsel %vm207_vm1, %v1625_v7, 0.0 }
 0x198   :  { %1171 = vst.msk [vmem:[#allocation2 + $0x278] sm:$0xff] %vm207_vm1, %v1154_v14  ;;  %v1201_v21 = vsel %vm207_vm1, %v1154_v14, 0.0  ;;  %v1225_v22 = vmul.f32 %v1154_v14, %v1154_v14  ;;  %v1674_v53 = vadd.f32 %v1673_v39, %v1672_v38  ;;  %v1877_v14 = vadd.f32 %v1876_v63, %v1875_v29  ;;  %v1959_v63 = vld [vmem:[#allocation2 + $0x100] ss:$4 sm:$0xff] }
 0x199   :  { %v1202_v24 = vadd.f32 %v1201_v21, %v1200_v17  ;;  %1408 = vst.msk [vmem:[#allocation2 + $0x2f8] sm:$0xff] %vm207_vm1, %v1391_v18  ;;  %v1438_v25 = vsel %vm207_vm1, %v1391_v18, 0.0  ;;  %v1462_v28 = vmul.f32 %v1391_v18, %v1391_v18  ;;  %v1727_v45 = vsel %vm207_vm1, %v1698_v23, 0.0 }
 0x19a   :  { %v1255_v31 = vsel %vm207_vm1, %v1225_v22, 0.0  ;;  %v1439_v34 = vadd.f32 %v1438_v25, %v1437_v20  ;;  %v1728_v56 = vadd.f32 %v1727_v45, %v1726_v51  ;;  %v1919_v20 = vadd.f32 %v1918_v5, %v1917_v50 }
 0x19b   :  { %v1203_v33 = vrot.slane %v1202_v24, 4  ;;  %v1256_v36 = vadd.f32 %v1255_v31, %v1254_v19  ;;  %v1492_v37 = vsel %vm207_vm1, %v1462_v28, 0.0 }
 0x19c   :  { %v1440_v40 = vrot.slane %v1439_v34, 4  ;;  %v1493_v10 = vadd.f32 %v1492_v37, %v1491_v30  ;;  %v1627_v43 = vpop.f32.mrf.mxu2  ;;  %v1878_v30 = vrot.slane %v1877_v14, 1  ;;  %v1920_v35 = vrot.slane %v1919_v20, 1 }
 0x19d   :  { %v1204_v26 = vadd.f32 %v1203_v33, %v1202_v24  ;;  %v1257_v46 = vrot.slane %v1256_v36, 4  ;;  %v1628_v49 = vadd.f32 %v6249_v11, %v1627_v43 }
 0x19e   :  { %v1441_v52 = vadd.f32 %v1440_v40, %v1439_v34  ;;  %v1494_v47 = vrot.slane %v1493_v10, 4  ;;  %v1879_v37 = vadd.f32 %v1878_v30, %v1877_v14  ;;  %v1921_v38 = vadd.f32 %v1920_v35, %v1919_v20  ;;  %v2011_v20 = vld [vmem:[#allocation2 + $0x1] ss:$4 sm:$0xff]  ;;  %v1965_v35 = vld [vmem:[#allocation2 + $0x160] ss:$4 sm:$0xff] }
 0x19f   :  { %v1205_v48 = vrot.slane %v1204_v26, 2  ;;  %v1258_v44 = vadd.f32 %v1257_v46, %v1256_v36  ;;  %1645 = vst.msk [vmem:[#allocation2 + $0x378] sm:$0xff] %vm207_vm1, %v1628_v49  ;;  %v1699_v55 = vmul.f32 %v1628_v49, %v1628_v49  ;;  %v1675_v60 = vsel %vm207_vm1, %v1628_v49, 0.0  ;;  %v2019_v30 = vld [vmem:[#allocation2 + $0x81] ss:$4 sm:$0xff] }
 0x1a0   :  { %v1442_v57 = vrot.slane %v1441_v52, 2  ;;  %v1495_v59 = vadd.f32 %v1494_v47, %v1493_v10  ;;  %v1676_v11 = vadd.f32 %v1675_v60, %v1674_v53 }
 0x1a1   :  { %v1206_v61 = vadd.f32 %v1205_v48, %v1204_v26  ;;  %v1259_v62 = vrot.slane %v1258_v44, 2  ;;  %v1729_v27 = vsel %vm207_vm1, %v1699_v55, 0.0  ;;  %v1938_v48 = vld [vmem:[%s7909_s27] sm:$0x1] }
 0x1a2   :  { %v1443_v41 = vadd.f32 %v1442_v57, %v1441_v52  ;;  %v1496_v0 = vrot.slane %v1495_v59, 2  ;;  %v1730_v1 = vadd.f32 %v1729_v27, %v1728_v56  ;;  %v1677_v4 = vrot.slane %v1676_v11, 4  ;;  %v1940_v56 = vld [vmem:[%s7883_s4] sm:$0x1] }
 0x1a3   :  { %v1207_v2 = vrot.slane %v1206_v61, 1  ;;  %v1260_v3 = vadd.f32 %v1259_v62, %v1258_v44  ;;  %v1943_v57 = vld [vmem:[#allocation2] ss:$4 sm:$0xff] }
 0x1a4   :  { %v1444_v6 = vrot.slane %v1443_v41, 1  ;;  %v1497_v7 = vadd.f32 %v1496_v0, %v1495_v59  ;;  %v1731_v8 = vrot.slane %v1730_v1, 4  ;;  %v1678_v13 = vadd.f32 %v1677_v4, %v1676_v11  ;;  %v1947_v0 = vld [vmem:[#allocation2 + $0x40] ss:$4 sm:$0xff] }
 0x1a5   :  { %v1208_v9 = vadd.f32 %v1207_v2, %v1206_v61  ;;  %v1261_v12 = vrot.slane %v1260_v3, 1  ;;  %v1951_v61 = vld [vmem:[#allocation2 + $0x80] ss:$4 sm:$0xff] }
 0x1a6   :  { %v1498_v15 = vrot.slane %v1497_v7, 1  ;;  %v1732_v16 = vadd.f32 %v1731_v8, %v1730_v1  ;;  %v1445_v18 = vadd.f32 %v1444_v6, %v1443_v41  ;;  %v1679_v19 = vrot.slane %v1678_v13, 2  ;;  %v2305_v62 = vld [vmem:[#allocation2 + $0x360] ss:$4 sm:$0xff]  ;;  %v2365_v11 = vld [vmem:[#allocation2 + $0x361] ss:$4 sm:$0xff] }
 0x1a7   :  { %v1209_v17 = vadd.f32 %v1208_v9, %v6076_v32  ;;  %v1262_v58 = vadd.f32 %v1261_v12, %v1260_v3  ;;  %v2440_v27 = vld [vmem:[#allocation2 + $0x362] ss:$4 sm:$0xff]  ;;  %v1945_v41 = vld [vmem:[#allocation2 + $0x20] ss:$4 sm:$0xff]  ;;  %v2515_v5 = vld [vmem:[#allocation2 + $0x363] ss:$4 sm:$0xff] }
 0x1a8   :  { %v1733_v21 = vrot.slane %v1732_v16, 2  ;;  %v1499_v24 = vadd.f32 %v1498_v15, %v1497_v7  ;;  %v1680_v25 = vadd.f32 %v1679_v19, %v1678_v13  ;;  %v1953_v6 = vld [vmem:[#allocation2 + $0xa0] ss:$4 sm:$0xff] }
 0x1a9   :  { %v1263_v22 = vadd.f32 %v1262_v58, %v6083_v42  ;;  %v1446_v23 = vadd.f32 %v1445_v18, %v1209_v17  ;;  %v1961_v7 = vld [vmem:[#allocation2 + $0x120] ss:$4 sm:$0xff] }
 0x1aa   :  { %v1734_v28 = vadd.f32 %v1733_v21, %v1732_v16  ;;  %v1681_v34 = vrot.slane %v1680_v25, 1  ;;  %v1949_v8 = vld [vmem:[#allocation2 + $0x60] ss:$4 sm:$0xff] }
 0x1ab   :  { %v1500_v31 = vadd.f32 %v1499_v24, %v1263_v22  ;;  %v1955_v15 = vld [vmem:[#allocation2 + $0xc0] ss:$4 sm:$0xff] }
 0x1ac   :  { %v1735_v29 = vrot.slane %v1734_v28, 1  ;;  %v1682_v33 = vadd.f32 %v1681_v34, %v1680_v25  ;;  %v1957_v16 = vld [vmem:[#allocation2 + $0xe0] ss:$4 sm:$0xff] }
 0x1ad   :  { %v1967_v21 = vld [vmem:[#allocation2 + $0x180] ss:$4 sm:$0xff] }
 0x1ae   :  { %v1736_v36 = vadd.f32 %v1735_v29, %v1734_v28  ;;  %v1683_v32 = vadd.f32 %v1682_v33, %v1446_v23  ;;  %v1963_v22 = vld [vmem:[#allocation2 + $0x140] ss:$4 sm:$0xff] }
 0x1af   :  { %v1971_v34 = vld [vmem:[#allocation2 + $0x1c0] ss:$4 sm:$0xff] }
 0x1b0   :  { %v1737_v39 = vadd.f32 %v1736_v36, %v1500_v31  ;;  %v1880_v40 = vadd.f32 %v1879_v37, %v1683_v32  ;;  %v1969_v31 = vld [vmem:[#allocation2 + $0x1a0] ss:$4 sm:$0xff]  ;;  %v2027_v32 = vld [vmem:[#allocation2 + $0x101] ss:$4 sm:$0xff] }
 0x1b2   :  { %v1922_v10 = vadd.f32 %v1921_v38, %v1737_v39  ;;  %v1923_v43 = vmul.f32 0.0010080645, %v1880_v40  ;;  %v2013_v38 = vld [vmem:[#allocation2 + $0x21] ss:$4 sm:$0xff]  ;;  %v1973_v40 = vld [vmem:[#allocation2 + $0x1e0] ss:$4 sm:$0xff] }
 0x1b3   :  { %v2015_v39 = vld [vmem:[#allocation2 + $0x41] ss:$4 sm:$0xff] }
 0x1b4   :  { %v1924_v45 = vmul.f32 0.0010080645, %v1922_v10  ;;  %v1925_v42 = vmul.f32 %v1923_v43, %v1923_v43 }
 0x1b6   :  { %v1926_v26 = vsub.f32 %v1924_v45, %v1925_v42 }
 0x1b8   :  { %v1927_v46 = vadd.f32 1e-05, %v1926_v26  ;;  %v2035_v26 = vld [vmem:[#allocation2 + $0x181] ss:$4 sm:$0xff] }
 0x1ba   :  { %5024 = vrsqrt.f32 %v1927_v46  ;;  %vm1934_vm3 = vweird.f32 %v1927_v46 }
 0x1c0   :  { %v5025_v49 = vpop.eup %5024 }
 0x1c1   :  { %v1929_v50 = vmul.f32 %v5025_v49, %v1927_v46  ;;  %vm1935_vm2 = vweird.f32 %v5025_v49  ;;  %v2021_v46 = vld [vmem:[#allocation2 + $0xa1] ss:$4 sm:$0xff] }
 0x1c2   :  { %vm1936_vm4 = vmor %vm1934_vm3, %vm1935_vm2 }
 0x1c3   :  { %v1930_v51 = vmul.f32 %v5025_v49, %v1929_v50  ;;  %v2017_v50 = vld [vmem:[#allocation2 + $0x61] ss:$4 sm:$0xff] }
 0x1c5   :  { %v1931_v52 = vmul.f32 0.5, %v1930_v51 }
 0x1c7   :  { %v1932_v47 = vsub.f32 1.5, %v1931_v52 }
 0x1c9   :  { %v1933_v53 = vmul.f32 %v5025_v49, %v1932_v47 }
 0x1cb   :  { %v1937_v44 = vsel %vm1936_vm4, %v5025_v49, %v1933_v53  ;;  %v2023_v49 = vld [vmem:[#allocation2 + $0xc1] ss:$4 sm:$0xff]  ;;  %vm4609_vm4 = vcmask 516096  }
 0x1cc   :  { %v1939_v55 = vmul.f32 %v1938_v48, %v1937_v44  ;;  %v2091_v48 = vld [vmem:[#allocation2 + $0x2] ss:$4 sm:$0xff]  ;;  %v2029_v44 = vld [vmem:[#allocation2 + $0x121] ss:$4 sm:$0xff] }
 0x1ce   :  { %v1941_v59 = vmul.f32 %v1939_v55, %v1923_v43  ;;  %v6335_v60 = vperm.slane %v1939_v55, 0  ;;  %v2031_v55 = vld [vmem:[#allocation2 + $0x141] ss:$4 sm:$0xff] }
 0x1d0   :  { %v1942_v1 = vsub.f32 %v1940_v56, %v1941_v59  ;;  %v2323_v2 = vmul.f32 %v2305_v62, %v6335_v60  ;;  %v2383_v3 = vmul.f32 %v2365_v11, %v6335_v60  ;;  %v2458_v4 = vmul.f32 %v2440_v27, %v6335_v60  ;;  %v2025_v56 = vld [vmem:[#allocation2 + $0xe1] ss:$4 sm:$0xff]  ;;  %v2099_v11 = vld [vmem:[#allocation2 + $0x82] ss:$4 sm:$0xff] }
 0x1d1   :  { %v6341_v9 = vmul.f32 %v2515_v5, %v6335_v60  ;;  %v6344_v12 = vmul.f32 %v6335_v60, %v1943_v57  ;;  %v6347_v13 = vmul.f32 %v6335_v60, %v1945_v41  ;;  %v6350_v14 = vmul.f32 %v6335_v60, %v1947_v0  ;;  %v2037_v27 = vld [vmem:[#allocation2 + $0x1a1] ss:$4 sm:$0xff]  ;;  %v2093_v5 = vld [vmem:[#allocation2 + $0x22] ss:$4 sm:$0xff] }
 0x1d2   :  { %v6352_v17 = vperm.slane %v1942_v1, 0  ;;  %v6355_v58 = vmul.f32 %v6335_v60, %v1949_v8  ;;  %v6358_v18 = vmul.f32 %v6335_v60, %v1951_v61  ;;  %v6361_v19 = vmul.f32 %v6335_v60, %v1953_v6  ;;  %v2033_v41 = vld [vmem:[#allocation2 + $0x161] ss:$4 sm:$0xff]  ;;  %v2095_v6 = vld [vmem:[#allocation2 + $0x42] ss:$4 sm:$0xff] }
 0x1d3   :  { %7910 = vst [vmem:[#allocation13_spill] sm:$0xff] %v6341_v9  ;;  %v6364_v23 = vmul.f32 %v6335_v60, %v1955_v15  ;;  %v6367_v24 = vmul.f32 %v6335_v60, %v1957_v16  ;;  %v6370_v25 = vmul.f32 %v6335_v60, %v1959_v63  ;;  %v6373_v28 = vmul.f32 %v6335_v60, %v1961_v7  ;;  %v2039_v63 = vld [vmem:[#allocation2 + $0x1c1] ss:$4 sm:$0xff]  ;;  %v2121_v9 = vld [vmem:[#allocation2 + $0x1e2] ss:$4 sm:$0xff] }
 0x1d4   :  { %v6376_v29 = vadd.f32 %v2323_v2, %v6352_v17  ;;  %v6379_v33 = vadd.f32 %v2383_v3, %v6352_v17  ;;  %v6382_v36 = vadd.f32 %v2458_v4, %v6352_v17  ;;  %v6385_v37 = vmul.f32 %v6335_v60, %v1963_v22  ;;  %v2107_v4 = vld [vmem:[#allocation2 + $0x102] ss:$4 sm:$0xff]  ;;  %v2041_v7 = vld [vmem:[#allocation2 + $0x1e1] ss:$4 sm:$0xff] }
 0x1d5   :  { %v6388_v10 = vmul.f32 %v6335_v60, %v1965_v35  ;;  %v6391_v43 = vmul.f32 %v6335_v60, %v1967_v21  ;;  %v6394_v45 = vmul.f32 %v6335_v60, %v1969_v31  ;;  %v6397_v42 = vmul.f32 %v6335_v60, %v1971_v34  ;;  %v2115_v21 = vld [vmem:[#allocation2 + $0x182] ss:$4 sm:$0xff] }
 0x1d6   :  { %7911 = vst [vmem:[#allocation14_spill] sm:$0xff] %v6376_v29  ;;  %v6400_v51 = vmul.f32 %v6335_v60, %v1973_v40  ;;  %v6403_v52 = vmul.f32 %v2011_v20, %v6335_v60  ;;  %v6406_v47 = vmul.f32 %v2013_v38, %v6335_v60  ;;  %v6409_v53 = vmul.f32 %v2015_v39, %v6335_v60  ;;  %v2101_v22 = vld [vmem:[#allocation2 + $0xa2] ss:$4 sm:$0xff]  ;;  %v2171_v39 = vld [vmem:[#allocation2 + $0x3] ss:$4 sm:$0xff] }
 0x1d7   :  { %7912 = vst [vmem:[#allocation15_spill] sm:$0xff] %v6379_v33  ;;  %v6412_v57 = vmul.f32 %v2017_v50, %v6335_v60  ;;  %v6415_v59 = vmul.f32 %v2019_v30, %v6335_v60  ;;  %v6418_v61 = vmul.f32 %v2021_v46, %v6335_v60  ;;  %v6421_v62 = vmul.f32 %v2023_v49, %v6335_v60  ;;  %v2103_v30 = vld [vmem:[#allocation2 + $0xc2] ss:$4 sm:$0xff]  ;;  %v2173_v40 = vld [vmem:[#allocation2 + $0x23] ss:$4 sm:$0xff] }
 0x1d8   :  { %7913 = vst [vmem:[#allocation16_spill] sm:$0xff] %v6382_v36  ;;  %v6424_v0 = vmul.f32 %v2025_v56, %v6335_v60  ;;  %v6427_v1 = vmul.f32 %v2027_v32, %v6335_v60  ;;  %v6430_v2 = vmul.f32 %v2029_v44, %v6335_v60  ;;  %v6433_v3 = vmul.f32 %v2031_v55, %v6335_v60  ;;  %v2097_v31 = vld [vmem:[#allocation2 + $0x62] ss:$4 sm:$0xff]  ;;  %v2179_v56 = vld [vmem:[#allocation2 + $0x83] ss:$4 sm:$0xff] }
 0x1d9   :  { %v6436_v8 = vmul.f32 %v2033_v41, %v6335_v60  ;;  %v6439_v15 = vmul.f32 %v2035_v26, %v6335_v60  ;;  %v6442_v16 = vmul.f32 %v2037_v27, %v6335_v60  ;;  %v6445_v20 = vmul.f32 %v2039_v63, %v6335_v60  ;;  %v2109_v26 = vld [vmem:[#allocation2 + $0x122] ss:$4 sm:$0xff]  ;;  %v2181_v27 = vld [vmem:[#allocation2 + $0xa3] ss:$4 sm:$0xff] }
 0x1da   :  { %v6448_v34 = vmul.f32 %v2041_v7, %v6335_v60  ;;  %v6451_v35 = vmul.f32 %v2091_v48, %v6335_v60  ;;  %v6454_v32 = vmul.f32 %v2093_v5, %v6335_v60  ;;  %v6457_v38 = vmul.f32 %v2095_v6, %v6335_v60  ;;  %v2111_v46 = vld [vmem:[#allocation2 + $0x142] ss:$4 sm:$0xff]  ;;  %v2175_v36 = vld [vmem:[#allocation2 + $0x43] ss:$4 sm:$0xff] }
 0x1db   :  { %v2105_v49 = vld [vmem:[#allocation2 + $0xe2] ss:$4 sm:$0xff]  ;;  %v6460_v50 = vmul.f32 %v2097_v31, %v6335_v60  ;;  %v6463_v44 = vmul.f32 %v2099_v11, %v6335_v60  ;;  %v6466_v48 = vmul.f32 %v2101_v22, %v6335_v60  ;;  %v6469_v55 = vmul.f32 %v2103_v30, %v6335_v60  ;;  %v2187_v31 = vld [vmem:[#allocation2 + $0x103] ss:$4 sm:$0xff] }
 0x1dc   :  { %v2117_v63 = vld [vmem:[#allocation2 + $0x1a2] ss:$4 sm:$0xff]  ;;  %v6472_v6 = vmul.f32 %v2105_v49, %v6335_v60  ;;  %v6475_v7 = vmul.f32 %v2107_v4, %v6335_v60  ;;  %v6478_v11 = vmul.f32 %v2109_v26, %v6335_v60  ;;  %v6481_v22 = vmul.f32 %v2111_v46, %v6335_v60  ;;  %v2189_v30 = vld [vmem:[#allocation2 + $0x123] ss:$4 sm:$0xff] }
 0x1dd   :  { %7914 = vst [vmem:[#allocation17_spill] sm:$0xff] %v6466_v48  ;;  %v2119_v41 = vld [vmem:[#allocation2 + $0x1c2] ss:$4 sm:$0xff]  ;;  %v6487_v33 = vmul.f32 %v2115_v21, %v6335_v60  ;;  %v6490_v49 = vmul.f32 %v2117_v63, %v6335_v60  ;;  %v2195_v26 = vld [vmem:[#allocation2 + $0x183] ss:$4 sm:$0xff]  ;;  %v6502_v21 = vmul.f32 %v2173_v40, %v6335_v60  ;;  %v6505_v63 = vmul.f32 %v2175_v36, %v6335_v60 }
 0x1de   :  { %7915 = vst [vmem:[#allocation18_spill] sm:$0xff] %v6469_v55  ;;  %v2113_v5 = vld [vmem:[#allocation2 + $0x162] ss:$4 sm:$0xff]  ;;  %v6493_v4 = vmul.f32 %v2119_v41, %v6335_v60  ;;  %v2183_v46 = vld [vmem:[#allocation2 + $0xc3] ss:$4 sm:$0xff] }
 0x1df   :  { %7916 = vst [vmem:[#allocation19_spill] sm:$0xff] %v6472_v6  ;;  %v6484_v29 = vmul.f32 %v2113_v5, %v6335_v60  ;;  %v6496_v6 = vmul.f32 %v2121_v9, %v6335_v60  ;;  %v6499_v5 = vmul.f32 %v2171_v39, %v6335_v60  ;;  %v2185_v41 = vld [vmem:[#allocation2 + $0xe3] ss:$4 sm:$0xff]  ;;  %v6514_v9 = vmul.f32 %v2181_v27, %v6335_v60  ;;  %v2299_v27 = vld [vmem:[#allocation2 + $0x300] ss:$4 sm:$0xff] }
 0x1e0   :  { %7917 = vst [vmem:[#allocation20_spill] sm:$0xff] %v6475_v7  ;;  %v2177_v7 = vld [vmem:[#allocation2 + $0x63] ss:$4 sm:$0xff]  ;;  %v6517_v39 = vmul.f32 %v2183_v46, %v6335_v60  ;;  %v6520_v36 = vmul.f32 %v2185_v41, %v6335_v60 }
 0x1e1   :  { %7918 = vst [vmem:[#allocation21_spill] sm:$0xff] %v6478_v11  ;;  %v2197_v11 = vld [vmem:[#allocation2 + $0x1a3] ss:$4 sm:$0xff] }
 0x1e2   :  { %7919 = vst [vmem:[#allocation22_spill] sm:$0xff] %v6481_v22  ;;  %v2191_v22 = vld [vmem:[#allocation2 + $0x143] ss:$4 sm:$0xff]  ;;  %v6538_v41 = vmul.f32 %v2197_v11, %v6335_v60 }
 0x1e3   :  { %7920 = vst [vmem:[#allocation23_spill] sm:$0xff] %v6484_v29  ;;  %v6511_v29 = vmul.f32 %v2179_v56, %v6335_v60  ;;  %v2201_v40 = vld [vmem:[#allocation2 + $0x1e3] ss:$4 sm:$0xff]  ;;  %v6529_v56 = vmul.f32 %v2191_v22, %v6335_v60  ;;  %v2295_v22 = vld [vmem:[#allocation2 + $0x2c0] ss:$4 sm:$0xff] }
 0x1e4   :  { %7921 = vst [vmem:[#allocation24_spill] sm:$0xff] %v6487_v33  ;;  %v6508_v33 = vmul.f32 %v2177_v7, %v6335_v60  ;;  %v6526_v7 = vmul.f32 %v2189_v30, %v6335_v60  ;;  %v2343_v30 = vld [vmem:[#allocation2 + $0x201] ss:$4 sm:$0xff] }
 0x1e5   :  { %7922 = vst [vmem:[#allocation25_spill] sm:$0xff] %v6490_v49  ;;  %v2199_v49 = vld [vmem:[#allocation2 + $0x1c3] ss:$4 sm:$0xff] }
 0x1e6   :  { %7923 = vst [vmem:[#allocation26_spill] sm:$0xff] %v6493_v4  ;;  %v2193_v4 = vld [vmem:[#allocation2 + $0x163] ss:$4 sm:$0xff] }
 0x1e7   :  { %7924 = vst [vmem:[#allocation27_spill] sm:$0xff] %v6496_v6  ;;  %v6532_v46 = vmul.f32 %v2193_v4, %v6335_v60 }
 0x1e8   :  { %7925 = vst [vmem:[#allocation28_spill] sm:$0xff] %v6499_v5  ;;  %v2291_v5 = vld [vmem:[#allocation2 + $0x280] ss:$4 sm:$0xff] }
 0x1e9   :  { %7926 = vst [vmem:[#allocation29_spill] sm:$0xff] %v6502_v21  ;;  %v2283_v21 = vld [vmem:[#allocation2 + $0x200] ss:$4 sm:$0xff] }
 0x1ea   :  { %7927 = vst [vmem:[#allocation30_spill] sm:$0xff] %v6505_v63  ;;  %v6523_v63 = vmul.f32 %v2187_v31, %v6335_v60  ;;  %v6541_v31 = vmul.f32 %v2199_v49, %v6335_v60  ;;  %v6547_v4 = vmul.f32 %v2283_v21, %v6335_v60  ;;  %v2301_v49 = vld [vmem:[#allocation2 + $0x320] ss:$4 sm:$0xff]  ;;  %v6565_v21 = vmul.f32 %v2295_v22, %v6335_v60  ;;  %v2347_v22 = vld [vmem:[#allocation2 + $0x241] ss:$4 sm:$0xff] }
 0x1eb   :  { %7928 = vst [vmem:[#allocation31_spill] sm:$0xff] %v6508_v33  ;;  %v6559_v33 = vmul.f32 %v2291_v5, %v6335_v60 }
 0x1ec   :  { %7929 = vst [vmem:[#allocation32_spill] sm:$0xff] %v6511_v29  ;;  %v2287_v29 = vld [vmem:[#allocation2 + $0x240] ss:$4 sm:$0xff] }
 0x1ed   :  { %7930 = vst [vmem:[#allocation33_spill] sm:$0xff] %v6514_v9  ;;  %v2285_v9 = vld [vmem:[#allocation2 + $0x220] ss:$4 sm:$0xff]  ;;  %v6553_v11 = vmul.f32 %v2287_v29, %v6335_v60 }
 0x1ee   :  { %7931 = vst [vmem:[#allocation34_spill] sm:$0xff] %v6517_v39  ;;  %v6535_v39 = vmul.f32 %v2195_v26, %v6335_v60  ;;  %v6550_v26 = vmul.f32 %v2285_v9, %v6335_v60  ;;  %v2359_v9 = vld [vmem:[#allocation2 + $0x301] ss:$4 sm:$0xff]  ;;  %v2309_v29 = vld [vmem:[#allocation2 + $0x3a0] ss:$4 sm:$0xff] }
 0x1ef   :  { %7932 = vst [vmem:[#allocation35_spill] sm:$0xff] %v6520_v36  ;;  %v6544_v36 = vmul.f32 %v2201_v40, %v6335_v60 }
 0x1f0   :  { %7933 = vst [vmem:[#allocation36_spill] sm:$0xff] %v6523_v63  ;;  %v2293_v63 = vld [vmem:[#allocation2 + $0x2a0] ss:$4 sm:$0xff] }
 0x1f1   :  { %7934 = vst [vmem:[#allocation37_spill] sm:$0xff] %v6526_v7  ;;  %v2307_v7 = vld [vmem:[#allocation2 + $0x380] ss:$4 sm:$0xff]  ;;  %v6562_v40 = vmul.f32 %v2293_v63, %v6335_v60  ;;  %v2367_v63 = vld [vmem:[#allocation2 + $0x381] ss:$4 sm:$0xff] }
 0x1f2   :  { %7935 = vst [vmem:[#allocation38_spill] sm:$0xff] %v6529_v56  ;;  %v2289_v56 = vld [vmem:[#allocation2 + $0x260] ss:$4 sm:$0xff] }
 0x1f3   :  { %7936 = vst [vmem:[#allocation39_spill] sm:$0xff] %v6532_v46  ;;  %v6556_v46 = vmul.f32 %v2289_v56, %v6335_v60  ;;  %v6574_v56 = vmul.f32 %v2301_v49, %v6335_v60  ;;  %v2418_v49 = vld [vmem:[#allocation2 + $0x202] ss:$4 sm:$0xff] }
 0x1f4   :  { %7937 = vst [vmem:[#allocation40_spill] sm:$0xff] %v6535_v39  ;;  %v2297_v39 = vld [vmem:[#allocation2 + $0x2e0] ss:$4 sm:$0xff] }
 0x1f5   :  { %7938 = vst [vmem:[#allocation41_spill] sm:$0xff] %v6538_v41  ;;  %v2351_v41 = vld [vmem:[#allocation2 + $0x281] ss:$4 sm:$0xff] }
 0x1f6   :  { %7939 = vst [vmem:[#allocation42_spill] sm:$0xff] %v6541_v31  ;;  %v2303_v31 = vld [vmem:[#allocation2 + $0x340] ss:$4 sm:$0xff] }
 0x1f7   :  { %7940 = vst [vmem:[#allocation43_spill] sm:$0xff] %v6544_v36  ;;  %v6571_v36 = vmul.f32 %v2299_v27, %v6335_v60  ;;  %v6577_v5 = vmul.f32 %v2303_v31, %v6335_v60  ;;  %v6589_v27 = vmul.f32 %v2343_v30, %v6335_v60  ;;  %v2361_v31 = vld [vmem:[#allocation2 + $0x321] ss:$4 sm:$0xff]  ;;  %v2428_v30 = vld [vmem:[#allocation2 + $0x2a2] ss:$4 sm:$0xff] }
 0x1f8   :  { %7941 = vst [vmem:[#allocation44_spill] sm:$0xff] %v6547_v4  ;;  %v6568_v4 = vmul.f32 %v2297_v39, %v6335_v60  ;;  %v6616_v55 = vmul.f32 %v2361_v31, %v6335_v60 }
 0x1f9   :  { %7942 = vst [vmem:[#allocation45_spill] sm:$0xff] %v6550_v26  ;;  %v2345_v26 = vld [vmem:[#allocation2 + $0x221] ss:$4 sm:$0xff] }
 0x1fa   :  { %7943 = vst [vmem:[#allocation46_spill] sm:$0xff] %v6553_v11  ;;  %v2311_v11 = vld [vmem:[#allocation2 + $0x3c0] ss:$4 sm:$0xff] }
 0x1fb   :  { %7944 = vst [vmem:[#allocation47_spill] sm:$0xff] %v6556_v46  ;;  %v6583_v46 = vmul.f32 %v2309_v29, %v6335_v60  ;;  %v6586_v39 = vmul.f32 %v2311_v11, %v6335_v60  ;;  %v6601_v11 = vmul.f32 %v2351_v41, %v6335_v60  ;;  %v2436_v41 = vld [vmem:[#allocation2 + $0x322] ss:$4 sm:$0xff] }
 0x1fc   :  { %7945 = vst [vmem:[#allocation48_spill] sm:$0xff] %v6559_v33  ;;  %v6580_v33 = vmul.f32 %v2307_v7, %v6335_v60  ;;  %v6595_v7 = vmul.f32 %v2347_v22, %v6335_v60 }
 0x1fd   :  { %7946 = vst [vmem:[#allocation49_spill] sm:$0xff] %v6562_v40  ;;  %v2353_v40 = vld [vmem:[#allocation2 + $0x2a1] ss:$4 sm:$0xff] }
 0x1fe   :  { %7947 = vst [vmem:[#allocation50_spill] sm:$0xff] %v6565_v21  ;;  %v2349_v21 = vld [vmem:[#allocation2 + $0x261] ss:$4 sm:$0xff]  ;;  %v6604_v6 = vmul.f32 %v2353_v40, %v6335_v60 }
 0x1ff   :  { %7948 = vst [vmem:[#allocation51_spill] sm:$0xff] %v6568_v4  ;;  %v6592_v4 = vmul.f32 %v2345_v26, %v6335_v60  ;;  %v6598_v29 = vmul.f32 %v2349_v21, %v6335_v60  ;;  %v6613_v21 = vmul.f32 %v2359_v9, %v6335_v60  ;;  %v2442_v9 = vld [vmem:[#allocation2 + $0x382] ss:$4 sm:$0xff] }
 0x200   :  { %7949 = vst [vmem:[#allocation52_spill] sm:$0xff] %v6571_v36  ;;  %v2357_v36 = vld [vmem:[#allocation2 + $0x2e1] ss:$4 sm:$0xff] }
 0x201   :  { %7950 = vst [vmem:[#allocation53_spill] sm:$0xff] %v6574_v56  ;;  %v2420_v56 = vld [vmem:[#allocation2 + $0x222] ss:$4 sm:$0xff]  ;;  %v6610_v22 = vmul.f32 %v2357_v36, %v6335_v60 }
 0x202   :  { %7951 = vst [vmem:[#allocation54_spill] sm:$0xff] %v6577_v5  ;;  %v2355_v5 = vld [vmem:[#allocation2 + $0x2c1] ss:$4 sm:$0xff]  ;;  %v6634_v31 = vmul.f32 %v2420_v56, %v6335_v60  ;;  %v2432_v56 = vld [vmem:[#allocation2 + $0x2e2] ss:$4 sm:$0xff] }
 0x203   :  { %7952 = vst [vmem:[#allocation55_spill] sm:$0xff] %v6580_v33  ;;  %v2363_v33 = vld [vmem:[#allocation2 + $0x341] ss:$4 sm:$0xff]  ;;  %v6607_v26 = vmul.f32 %v2355_v5, %v6335_v60  ;;  %v6622_v5 = vmul.f32 %v2367_v63, %v6335_v60 }
 0x204   :  { %7953 = vst [vmem:[#allocation56_spill] sm:$0xff] %v6583_v46  ;;  %v2422_v46 = vld [vmem:[#allocation2 + $0x242] ss:$4 sm:$0xff]  ;;  %v6619_v40 = vmul.f32 %v2363_v33, %v6335_v60 }
 0x205   :  { %7954 = vst [vmem:[#allocation57_spill] sm:$0xff] %v6586_v39  ;;  %v2426_v39 = vld [vmem:[#allocation2 + $0x282] ss:$4 sm:$0xff]  ;;  %v6637_v33 = vmul.f32 %v2422_v46, %v6335_v60 }
 0x206   :  { %7955 = vst [vmem:[#allocation58_spill] sm:$0xff] %v6589_v27  ;;  %v2369_v27 = vld [vmem:[#allocation2 + $0x3a1] ss:$4 sm:$0xff]  ;;  %v6654_v46 = vmul.f32 %v2426_v39, %v6335_v60 }
 0x207   :  { %7956 = vst [vmem:[#allocation59_spill] sm:$0xff] %v6592_v4  ;;  %v2424_v4 = vld [vmem:[#allocation2 + $0x262] ss:$4 sm:$0xff]  ;;  %v6625_v36 = vmul.f32 %v2369_v27, %v6335_v60 }
 0x208   :  { %7957 = vst [vmem:[#allocation60_spill] sm:$0xff] %v6595_v7  ;;  %v2371_v7 = vld [vmem:[#allocation2 + $0x3c1] ss:$4 sm:$0xff] }
 0x209   :  { %7958 = vst [vmem:[#allocation61_spill] sm:$0xff] %v6598_v29  ;;  %v2434_v29 = vld [vmem:[#allocation2 + $0x302] ss:$4 sm:$0xff] }
 0x20a   :  { %7959 = vst [vmem:[#allocation62_spill] sm:$0xff] %v6601_v11  ;;  %v2430_v11 = vld [vmem:[#allocation2 + $0x2c2] ss:$4 sm:$0xff]  ;;  %v6671_v39 = vmul.f32 %v2434_v29, %v6335_v60 }
 0x20b   :  { %7960 = vst [vmem:[#allocation63_spill] sm:$0xff] %v6604_v6  ;;  %v4825_v63 = vld [vmem:[%s7884_s5 + $0x30] sm:$0xff]  ;;  %v4824_v27 = vld [vmem:[%s7884_s5 + $0x28] sm:$0xff] }
 0x20c   :  { %7961 = vst [vmem:[#allocation64_spill] sm:$0xff] %v6607_v26  ;;  %v6631_v26 = vmul.f32 %v2418_v49, %v6335_v60  ;;  %v2501_v49 = vld [vmem:[#allocation2 + $0x283] ss:$4 sm:$0xff]  ;;  %2700 = vmatpush.msra.mxu3 %v4825_v63  ;;  %3244 = vmatpush.msra.mxu2 %v4825_v63  ;;  %v2059_v63 = vadd.f32 %v6406_v47, %v6352_v17 }
 0x20d   :  { %7962 = vst [vmem:[#allocation65_spill] sm:$0xff] %v6610_v22  ;;  %v2493_v22 = vld [vmem:[#allocation2 + $0x203] ss:$4 sm:$0xff]  ;;  %v6824_v47 = vadd.f32 %v6421_v62, %v6352_v17  ;;  %v6845_v62 = vadd.f32 %v6436_v8, %v6352_v17 }
 0x20e   :  { %7963 = vst [vmem:[#allocation66_spill] sm:$0xff] %v6613_v21  ;;  %v6628_v21 = vmul.f32 %v2371_v7, %v6335_v60  ;;  %v6648_v7 = vld [vmem:[%s7884_s5 + $0x8] sm:$0xff]  ;;  %2701 = vmatpush.msra.mxu3 %v4824_v27  ;;  %3245 = vmatpush.msra.mxu2 %v4824_v27  ;;  %v6884_v27 = vadd.f32 %v6463_v44, %v6352_v17 }
 0x20f   :  { %7964 = vst [vmem:[#allocation67_spill] sm:$0xff] %v6616_v55  ;;  %v2446_v55 = vld [vmem:[#allocation2 + $0x3c2] ss:$4 sm:$0xff]  ;;  %2814 = vmatpush.msra.mxu0 %v6648_v7  ;;  %5016 = vmatpush.msra.mxu1 %v6648_v7 }
 0x210   :  { %7965 = vst [vmem:[#allocation68_spill] sm:$0xff] %v6619_v40  ;;  %v2444_v40 = vld [vmem:[#allocation2 + $0x3a2] ss:$4 sm:$0xff] }
 0x211   :  { %7966 = vst [vmem:[#allocation69_spill] sm:$0xff] %v6622_v5  ;;  %v2509_v5 = vld [vmem:[#allocation2 + $0x303] ss:$4 sm:$0xff]  ;;  %v6687_v29 = vmul.f32 %v2444_v40, %v6335_v60  ;;  %v6705_v40 = vmul.f32 %v2501_v49, %v6335_v60 }
 0x212   :  { %7967 = vst [vmem:[#allocation70_spill] sm:$0xff] %v6625_v36  ;;  %v6665_v36 = vld [vmem:[%s7884_s5] sm:$0xff] }
 0x213   :  { %7968 = vst [vmem:[#allocation71_spill] sm:$0xff] %v6628_v21  ;;  %v6660_v21 = vmul.f32 %v2430_v11, %v6335_v60  ;;  %2815 = vmatpush.msra.mxu0 %v6665_v36  ;;  %v2521_v49 = vld [vmem:[#allocation2 + $0x3c3] ss:$4 sm:$0xff]  ;;  %5017 = vmatpush.msra.mxu1 %v6665_v36 }
 0x214   :  { %7969 = vst [vmem:[#allocation72_spill] sm:$0xff] %v6631_v26  ;;  %v2438_v26 = vld [vmem:[#allocation2 + $0x342] ss:$4 sm:$0xff] }
 0x215   :  { %7970 = vst [vmem:[#allocation73_spill] sm:$0xff] %v6634_v31  ;;  %v6651_v31 = vmul.f32 %v2424_v4, %v6335_v60  ;;  %v6668_v4 = vmul.f32 %v2432_v56, %v6335_v60  ;;  %v6677_v11 = vmul.f32 %v2438_v26, %v6335_v60  ;;  %v2499_v56 = vld [vmem:[#allocation2 + $0x263] ss:$4 sm:$0xff]  ;;  %v6693_v26 = vmul.f32 %v2493_v22, %v6335_v60 }
 0x216   :  { %7971 = vst [vmem:[#allocation74_spill] sm:$0xff] %v6637_v33  ;;  %v6657_v33 = vmul.f32 %v2428_v30, %v6335_v60  ;;  %v6674_v30 = vmul.f32 %v2436_v41, %v6335_v60  ;;  %v6690_v41 = vmul.f32 %v2446_v55, %v6335_v60  ;;  %v2511_v55 = vld [vmem:[#allocation2 + $0x323] ss:$4 sm:$0xff] }
 0x217   :  { %7972 = vst [vmem:[#allocation75_spill] sm:$0xff] %v6651_v31  ;;  %v2497_v31 = vld [vmem:[#allocation2 + $0x243] ss:$4 sm:$0xff] }
 0x218   :  { %7973 = vst [vmem:[#allocation76_spill] sm:$0xff] %v6654_v46  ;;  %v2495_v46 = vld [vmem:[#allocation2 + $0x223] ss:$4 sm:$0xff]  ;;  %v6699_v48 = vmul.f32 %v2497_v31, %v6335_v60 }
 0x219   :  { %7974 = vst [vmem:[#allocation77_spill] sm:$0xff] %v6657_v33  ;;  %v2517_v33 = vld [vmem:[#allocation2 + $0x383] ss:$4 sm:$0xff]  ;;  %v6696_v6 = vmul.f32 %v2495_v46, %v6335_v60 }
 0x21a   :  { %7975 = vst [vmem:[#allocation78_spill] sm:$0xff] %v6660_v21  ;;  %v4823_v21 = vld [vmem:[%s7884_s5 + $0x20] sm:$0xff] }
 0x21b   :  { %7976 = vst [vmem:[#allocation79_spill] sm:$0xff] %v6668_v4  ;;  %v6684_v4 = vmul.f32 %v2442_v9, %v6335_v60  ;;  %v6702_v9 = vmul.f32 %v2499_v56, %v6335_v60  ;;  %v2519_v22 = vld [vmem:[#allocation2 + $0x3a3] ss:$4 sm:$0xff]  ;;  %v6718_v56 = vmul.f32 %v2509_v5, %v6335_v60  ;;  %2702 = vmatpush.msra.mxu3 %v4823_v21 }
 0x21c   :  { %7977 = vst [vmem:[#allocation80_spill] sm:$0xff] %v6671_v39  ;;  %v2507_v39 = vld [vmem:[#allocation2 + $0x2e3] ss:$4 sm:$0xff]  ;;  %v6737_v5 = vadd.f32 %v6352_v17, %v6344_v12  ;;  %v6758_v12 = vadd.f32 %v6352_v17, %v6361_v19  ;;  %v6778_v19 = vadd.f32 %v6352_v17, %v6385_v37  ;;  %3246 = vmatpush.msra.mxu2 %v4823_v21 }
 0x21d   :  { %7978 = vst [vmem:[#allocation81_spill] sm:$0xff] %v6674_v30  ;;  %v2505_v30 = vld [vmem:[#allocation2 + $0x2c3] ss:$4 sm:$0xff]  ;;  %v6715_v31 = vmul.f32 %v2507_v39, %v6335_v60  ;;  %v6733_v39 = vmul.f32 %v2521_v49, %v6335_v60  ;;  %v2009_v37 = vadd.f32 %v6352_v17, %v6400_v51  ;;  %v6816_v51 = vadd.f32 %v6415_v59, %v6352_v17 }
 0x21e   :  { %7979 = vst [vmem:[#allocation82_spill] sm:$0xff] %v6677_v11  ;;  %v2503_v11 = vld [vmem:[#allocation2 + $0x2a3] ss:$4 sm:$0xff]  ;;  %v6712_v46 = vmul.f32 %v2505_v30, %v6335_v60  ;;  %v6730_v30 = vmul.f32 %v2519_v22, %v6335_v60  ;;  %v6836_v59 = vadd.f32 %v6430_v2, %v6352_v17  ;;  %v6857_v2 = vadd.f32 %v6445_v20, %v6352_v17 }
 0x21f   :  { %7980 = vst [vmem:[#allocation83_spill] sm:$0xff] %v6690_v41  ;;  %v6709_v41 = vmul.f32 %v2503_v11, %v6335_v60  ;;  %v6727_v11 = vmul.f32 %v2517_v33, %v6335_v60  ;;  %v6750_v33 = vadd.f32 %v6352_v17, %v6355_v58  ;;  %v6770_v58 = vadd.f32 %v6352_v17, %v6370_v25  ;;  %v8004_v49 = vld [vmem:[#allocation17_spill] sm:$0xff]  ;;  %v8007_v44 = vld [vmem:[#allocation20_spill] sm:$0xff] }
 0x220   :  { %7981 = vst [vmem:[#allocation84_spill] sm:$0xff] %v6693_v26  ;;  %v2513_v26 = vld [vmem:[#allocation2 + $0x343] ss:$4 sm:$0xff]  ;;  %v6791_v25 = vadd.f32 %v6352_v17, %v6394_v45  ;;  %v2138_v21 = vadd.f32 %v6451_v35, %v6352_v17  ;;  %v2139_v20 = vadd.f32 %v6454_v32, %v6352_v17  ;;  %v6880_v35 = vadd.f32 %v6460_v50, %v6352_v17 }
 0x221   :  { %7982 = vst [vmem:[#allocation85_spill] sm:$0xff] %v6702_v9  ;;  %v6724_v9 = vmul.f32 %v2513_v26, %v6335_v60  ;;  %v6745_v26 = vadd.f32 %v6352_v17, %v6350_v14  ;;  %v6766_v14 = vadd.f32 %v6352_v17, %v6367_v24  ;;  %v6787_v24 = vadd.f32 %v6352_v17, %v6391_v43  ;;  %v5038_v45 = vld [vmem:[%s7884_s5 + $0x18] sm:$0xff]  ;;  %v4860_v50 = vld [vmem:[%s7884_s5 + $0x48] sm:$0xff] }
 0x222   :  { %7983 = vst [vmem:[#allocation86_spill] sm:$0xff] %v6705_v40  ;;  %v6721_v40 = vmul.f32 %v2511_v55, %v6335_v60  ;;  %v6741_v55 = vadd.f32 %v6352_v17, %v6347_v13  ;;  %v6754_v60 = vadd.f32 %v6352_v17, %v6358_v18  ;;  %v6762_v13 = vadd.f32 %v6352_v17, %v6364_v23  ;;  %v8005_v32 = vld [vmem:[#allocation18_spill] sm:$0xff] }
 0x223   :  { %7984 = vst [vmem:[#allocation87_spill] sm:$0xff] %v6715_v31  ;;  %v6774_v18 = vadd.f32 %v6352_v17, %v6373_v28  ;;  %v6783_v23 = vadd.f32 %v6352_v17, %v6388_v10  ;;  %v6795_v28 = vadd.f32 %v6352_v17, %v6397_v42  ;;  %v2058_v10 = vadd.f32 %v6403_v52, %v6352_v17 }
 0x224   :  { %7985 = vst [vmem:[#allocation88_spill] sm:$0xff] %v6718_v56  ;;  %v6805_v43 = vadd.f32 %v6409_v53, %v6352_v17  ;;  %3356 = vmatpush.msrb.mxu3 %v5038_v45  ;;  %v6812_v42 = vadd.f32 %v6412_v57, %v6352_v17  ;;  %v6820_v52 = vadd.f32 %v6418_v61, %v6352_v17  ;;  %v8011_v45 = vld [vmem:[#allocation22_spill] sm:$0xff]  ;;  %v8061_v56 = vld [vmem:[#allocation69_spill] sm:$0xff] }
 0x225   :  { %7986 = vst [vmem:[#allocation89_spill] sm:$0xff] %v6721_v40  ;;  %v6828_v53 = vadd.f32 %v6424_v0, %v6352_v17  ;;  %v6832_v57 = vadd.f32 %v6427_v1, %v6352_v17  ;;  %v6840_v61 = vadd.f32 %v6433_v3, %v6352_v17  ;;  %v6849_v0 = vadd.f32 %v6439_v15, %v6352_v17  ;;  %v4862_v15 = vld [vmem:[%s7884_s5 + $0x58] sm:$0xff] }
 0x226   :  { %7987 = vst [vmem:[#allocation90_spill] sm:$0xff] %v6724_v9  ;;  %3357 = vmatpush.msrb.mxu3 %v6288_v54  ;;  %v6853_v1 = vadd.f32 %v6442_v16, %v6352_v17  ;;  %v2073_v3 = vadd.f32 %v6448_v34, %v6352_v17  ;;  %v2074_v54 = vmax.f32 %v6737_v5, %v2058_v10  ;;  %v4861_v16 = vld [vmem:[%s7884_s5 + $0x50] sm:$0xff]  ;;  %v8047_v40 = vld [vmem:[#allocation59_spill] sm:$0xff] }
 0x227   :  { %7988 = vst [vmem:[#allocation91_spill] sm:$0xff] %v6727_v11  ;;  %v2075_v8 = vmax.f32 %v6741_v55, %v2059_v63  ;;  %v6876_v34 = vadd.f32 %v6457_v38, %v6352_v17  ;;  %2946 = vmatpush.msrb.mxu1 %v4862_v15  ;;  %v6892_v5 = vadd.f32 %v8005_v32, %v6352_v17  ;;  %v8006_v38 = vld [vmem:[#allocation19_spill] sm:$0xff]  ;;  %v8009_v10 = vld [vmem:[#allocation21_spill] sm:$0xff] }
 0x228   :  { %7989 = vst [vmem:[#allocation92_spill] sm:$0xff] %v6730_v30  ;;  %3358 = vmatpush.msrb.mxu3 %v6648_v7  ;;  %v2089_v22 = vmax.f32 %v2009_v37, %v2073_v3  ;;  %v6888_v7 = vadd.f32 %v8004_v49, %v6352_v17  ;;  %v6896_v55 = vadd.f32 %v8006_v38, %v6352_v17  ;;  %v8013_v49 = vld [vmem:[#allocation23_spill] sm:$0xff]  ;;  %v8015_v38 = vld [vmem:[#allocation24_spill] sm:$0xff] }
 0x229   :  { %7990 = vst [vmem:[#allocation93_spill] sm:$0xff] %v6733_v39  ;;  %3489 = vmatpush.msrb.mxu0 %v4862_v15  ;;  %v6903_v37 = vadd.f32 %v8007_v44, %v6352_v17  ;;  %v6907_v63 = vadd.f32 %v8009_v10, %v6352_v17  ;;  %v6911_v3 = vadd.f32 %v8011_v45, %v6352_v17  ;;  %v8017_v44 = vld [vmem:[#allocation25_spill] sm:$0xff]  ;;  %v8019_v10 = vld [vmem:[#allocation26_spill] sm:$0xff]  ;;  %v8021_v45 = vld [vmem:[#allocation27_spill] sm:$0xff] }
 0x22a   :  { %7991 = vst [vmem:[#allocation94_spill] sm:$0xff] %v6770_v58  ;;  %v6915_v32 = vadd.f32 %v8013_v49, %v6352_v17  ;;  %2947 = vmatpush.msrb.mxu1 %v4861_v16  ;;  %v6919_v15 = vadd.f32 %v8015_v38, %v6352_v17  ;;  %v6923_v39 = vadd.f32 %v8017_v44, %v6352_v17  ;;  %v4859_v49 = vld [vmem:[%s7884_s5 + $0x40] sm:$0xff]  ;;  %v8023_v44 = vld [vmem:[#allocation29_spill] sm:$0xff] }
 0x22b   :  { %7992 = vst [vmem:[#allocation95_spill] sm:$0xff] %v6774_v18  ;;  %v6927_v30 = vadd.f32 %v8019_v10, %v6352_v17  ;;  %3490 = vmatpush.msrb.mxu0 %v4861_v16  ;;  %v6934_v11 = vmax.f32 %v2075_v8, %v2139_v20  ;;  %v8022_v38 = vld [vmem:[#allocation28_spill] sm:$0xff]  ;;  %3359 = vmatpush.msrb.mxu3 %v6665_v36  ;;  %v8068_v18 = vld [vmem:[#allocation73_spill] sm:$0xff] }
 0x22c   :  { %7993 = vst [vmem:[#allocation96_spill] sm:$0xff] %v6778_v19  ;;  %2948 = vmatpush.msrb.mxu1 %v4860_v50  ;;  %v8057_v19 = vld [vmem:[#allocation67_spill] sm:$0xff] }
 0x22d   :  { %7994 = vst [vmem:[#allocation97_spill] sm:$0xff] %v6783_v23  ;;  %3491 = vmatpush.msrb.mxu0 %v4860_v50 }
 0x22e   :  { %7995 = vst [vmem:[#allocation98_spill] sm:$0xff] %v6787_v24  ;;  %v8026_v24 = vld [vmem:[#allocation45_spill] sm:$0xff]  ;;  %2949 = vmatpush.msrb.mxu1 %v4859_v49 }
 0x22f   :  { %7996 = vst [vmem:[#allocation99_spill] sm:$0xff] %v6791_v25  ;;  %v2218_v25 = vadd.f32 %v8022_v38, %v6352_v17  ;;  %v6946_v16 = vadd.f32 %v8026_v24, %v6352_v17  ;;  %v8031_v24 = vld [vmem:[#allocation50_spill] sm:$0xff]  ;;  %3492 = vmatpush.msrb.mxu0 %v4859_v49 }
 0x230   :  { %7997 = vst [vmem:[#allocation100_spill] sm:$0xff] %v6795_v28  ;;  %v2153_v28 = vadd.f32 %v8021_v45, %v6352_v17  ;;  %v8025_v45 = vld [vmem:[#allocation44_spill] sm:$0xff]  ;;  %v6966_v50 = vadd.f32 %v8031_v24, %v6352_v17  ;;  %v8040_v24 = vld [vmem:[#allocation55_spill] sm:$0xff] }
 0x231   :  { %7998 = vst [vmem:[#allocation101_spill] sm:$0xff] %v6836_v59  ;;  %v6987_v9 = vadd.f32 %v8040_v24, %v6352_v17  ;;  %v8049_v24 = vld [vmem:[#allocation61_spill] sm:$0xff] }
 0x232   :  { %7999 = vst [vmem:[#allocation102_spill] sm:$0xff] %v6840_v61  ;;  %v2169_v10 = vmax.f32 %v2089_v22, %v2153_v28  ;;  %v8029_v28 = vld [vmem:[#allocation48_spill] sm:$0xff] }
 0x233   :  { %8000 = vst [vmem:[#allocation103_spill] sm:$0xff] %v6845_v62  ;;  %v6958_v22 = vadd.f32 %v8029_v28, %v6352_v17  ;;  %v8036_v28 = vld [vmem:[#allocation53_spill] sm:$0xff]  ;;  %v8059_v61 = vld [vmem:[#allocation68_spill] sm:$0xff] }
 0x234   :  { %8001 = vst [vmem:[#allocation104_spill] sm:$0xff] %v6849_v0  ;;  %v6978_v0 = vadd.f32 %v8036_v28, %v6352_v17  ;;  %v8046_v28 = vld [vmem:[#allocation58_spill] sm:$0xff] }
 0x235   :  { %8002 = vst [vmem:[#allocation105_spill] sm:$0xff] %v6853_v1  ;;  %v2387_v36 = vadd.f32 %v8046_v28, %v6352_v17  ;;  %v8052_v28 = vld [vmem:[#allocation64_spill] sm:$0xff] }
 0x236   :  { %8003 = vst [vmem:[#allocation106_spill] sm:$0xff] %v6857_v2  ;;  %v2154_v2 = vmax.f32 %v2074_v54, %v2138_v21  ;;  %v8027_v54 = vld [vmem:[#allocation46_spill] sm:$0xff]  ;;  %v8028_v21 = vld [vmem:[#allocation47_spill] sm:$0xff] }
 0x237   :  { %8008 = vst [vmem:[#allocation17_spill] sm:$0xff] %v6903_v37  ;;  %v6950_v8 = vadd.f32 %v8027_v54, %v6352_v17  ;;  %v6954_v20 = vadd.f32 %v8028_v21, %v6352_v17  ;;  %v8034_v54 = vld [vmem:[#allocation52_spill] sm:$0xff]  ;;  %v8072_v37 = vld [vmem:[#allocation77_spill] sm:$0xff] }
 0x238   :  { %8010 = vst [vmem:[#allocation18_spill] sm:$0xff] %v6907_v63  ;;  %v6974_v21 = vadd.f32 %v8034_v54, %v6352_v17  ;;  %v8044_v54 = vld [vmem:[#allocation57_spill] sm:$0xff]  ;;  %v8063_v63 = vld [vmem:[#allocation70_spill] sm:$0xff] }
 0x239   :  { %8012 = vst [vmem:[#allocation19_spill] sm:$0xff] %v6911_v3  ;;  %v6995_v62 = vadd.f32 %v8044_v54, %v6352_v17  ;;  %v8051_v54 = vld [vmem:[#allocation63_spill] sm:$0xff] }
 0x23a   :  { %8014 = vst [vmem:[#allocation20_spill] sm:$0xff] %v6915_v32  ;;  %v7013_v49 = vadd.f32 %v8051_v54, %v6352_v17  ;;  %v7033_v54 = vadd.f32 %v8059_v61, %v6352_v17  ;;  %v2463_v61 = vadd.f32 %v8068_v18, %v6352_v17 }
 0x23b   :  { %8016 = vst [vmem:[#allocation21_spill] sm:$0xff] %v6919_v15  ;;  %v2327_v15 = vadd.f32 %v8025_v45, %v6352_v17 }
 0x23c   :  { %8018 = vst [vmem:[#allocation22_spill] sm:$0xff] %v6923_v39  ;;  %v2219_v39 = vadd.f32 %v8023_v44, %v6352_v17  ;;  %v8032_v44 = vld [vmem:[#allocation51_spill] sm:$0xff] }
 0x23d   :  { %8020 = vst [vmem:[#allocation23_spill] sm:$0xff] %v6927_v30  ;;  %v8024_v30 = vld [vmem:[#allocation43_spill] sm:$0xff]  ;;  %v6970_v45 = vadd.f32 %v8032_v44, %v6352_v17  ;;  %v8042_v44 = vld [vmem:[#allocation56_spill] sm:$0xff] }
 0x23e   :  { %v2233_v1 = vadd.f32 %v8024_v30, %v6352_v17  ;;  %v8030_v30 = vld [vmem:[#allocation49_spill] sm:$0xff]  ;;  %8035 = vst [vmem:[#allocation25_spill] sm:$0xff] %v6974_v21  ;;  %v6991_v23 = vadd.f32 %v8042_v44, %v6352_v17  ;;  %v8050_v44 = vld [vmem:[#allocation62_spill] sm:$0xff]  ;;  %v8065_v21 = vld [vmem:[#allocation71_spill] sm:$0xff] }
 0x23f   :  { %v6962_v38 = vadd.f32 %v8030_v30, %v6352_v17  ;;  %8033 = vst [vmem:[#allocation24_spill] sm:$0xff] %v6970_v45  ;;  %v8038_v30 = vld [vmem:[#allocation54_spill] sm:$0xff]  ;;  %v2234_v45 = vmax.f32 %v2154_v2, %v2218_v25 }
 0x240   :  { %8037 = vst [vmem:[#allocation26_spill] sm:$0xff] %v6978_v0  ;;  %v6983_v32 = vadd.f32 %v8038_v30, %v6352_v17  ;;  %v2388_v30 = vadd.f32 %v8047_v40, %v6352_v17  ;;  %v8053_v40 = vld [vmem:[#allocation65_spill] sm:$0xff] }
 0x241   :  { %8041 = vst [vmem:[#allocation28_spill] sm:$0xff] %v6987_v9  ;;  %v7005_v9 = vadd.f32 %v8049_v24, %v6352_v17  ;;  %v7021_v0 = vadd.f32 %v8053_v40, %v6352_v17  ;;  %v7041_v40 = vadd.f32 %v8063_v63, %v6352_v17  ;;  %v8071_v63 = vld [vmem:[#allocation76_spill] sm:$0xff] }
 0x242   :  { %8039 = vst [vmem:[#allocation27_spill] sm:$0xff] %v6983_v32  ;;  %v8048_v32 = vld [vmem:[#allocation60_spill] sm:$0xff]  ;;  %v2403_v58 = vmax.f32 %v6946_v16, %v2388_v30 }
 0x243   :  { %8043 = vst [vmem:[#allocation29_spill] sm:$0xff] %v6991_v23  ;;  %v2389_v3 = vadd.f32 %v8048_v32, %v6352_v17  ;;  %v7009_v23 = vadd.f32 %v8050_v44, %v6352_v17  ;;  %v8055_v32 = vld [vmem:[#allocation66_spill] sm:$0xff]  ;;  %v7029_v44 = vadd.f32 %v8057_v19, %v6352_v17  ;;  %v8067_v19 = vld [vmem:[#allocation72_spill] sm:$0xff] }
 0x244   :  { %8045 = vst [vmem:[#allocation43_spill] sm:$0xff] %v6995_v62  ;;  %v7017_v62 = vadd.f32 %v8052_v28, %v6352_v17  ;;  %v7025_v24 = vadd.f32 %v8055_v32, %v6352_v17  ;;  %v7037_v28 = vadd.f32 %v8061_v56, %v6352_v17  ;;  %v7045_v32 = vadd.f32 %v8065_v21, %v6352_v17  ;;  %v8070_v56 = vld [vmem:[#allocation75_spill] sm:$0xff] }
 0x245   :  { %8054 = vst [vmem:[#allocation44_spill] sm:$0xff] %v7021_v0  ;;  %v7059_v21 = vadd.f32 %v8072_v37, %v6352_v17 }
 0x246   :  { %8056 = vst [vmem:[#allocation45_spill] sm:$0xff] %v7025_v24  ;;  %v2402_v24 = vmax.f32 %v2327_v15, %v2387_v36  ;;  %v8073_v15 = vld [vmem:[#allocation78_spill] sm:$0xff] }
 0x247   :  { %8058 = vst [vmem:[#allocation46_spill] sm:$0xff] %v7029_v44  ;;  %v2462_v44 = vadd.f32 %v8067_v19, %v6352_v17  ;;  %v7063_v36 = vadd.f32 %v8073_v15, %v6352_v17  ;;  %v8074_v19 = vld [vmem:[#allocation79_spill] sm:$0xff]  ;;  %v7083_v15 = vadd.f32 %v6684_v4, %v6352_v17  ;;  %v2076_v4 = vmax.f32 %v6745_v26, %v6805_v43 }
 0x248   :  { %8060 = vst [vmem:[#allocation47_spill] sm:$0xff] %v7033_v54  ;;  %v8069_v54 = vld [vmem:[#allocation74_spill] sm:$0xff]  ;;  %v7067_v18 = vadd.f32 %v8074_v19, %v6352_v17  ;;  %v7087_v19 = vadd.f32 %v6687_v29, %v6352_v17  ;;  %v2250_v29 = vmax.f32 %v2234_v45, 0.0  ;;  %v2478_v26 = vmax.f32 %v2403_v58, %v2463_v61  ;;  %v8087_v43 = vld [vmem:[#allocation31_spill] sm:$0xff] }
 0x249   :  { %8062 = vst [vmem:[#allocation48_spill] sm:$0xff] %v7037_v28  ;;  %v2464_v59 = vadd.f32 %v8069_v54, %v6352_v17  ;;  %v2465_v28 = vadd.f32 %v8070_v56, %v6352_v17  ;;  %v8076_v54 = vld [vmem:[#allocation80_spill] sm:$0xff]  ;;  %v8078_v56 = vld [vmem:[#allocation81_spill] sm:$0xff]  ;;  %v2156_v25 = vmax.f32 %v2076_v4, %v6876_v34  ;;  %v2539_v34 = vadd.f32 %v6699_v48, %v6352_v17 }
 0x24a   :  { %8064 = vst [vmem:[#allocation49_spill] sm:$0xff] %v7041_v40  ;;  %v2466_v40 = vadd.f32 %v8071_v63, %v6352_v17  ;;  %v7075_v31 = vadd.f32 %v8078_v56, %v6352_v17  ;;  %v8080_v63 = vld [vmem:[#allocation82_spill] sm:$0xff]  ;;  %v8085_v56 = vld [vmem:[#allocation84_spill] sm:$0xff]  ;;  %v8089_v48 = vld [vmem:[#allocation85_spill] sm:$0xff]  ;;  %v2080_v4 = vmax.f32 %v6762_v13, %v6824_v47 }
 0x24b   :  { %8066 = vst [vmem:[#allocation50_spill] sm:$0xff] %v7045_v32  ;;  %v7071_v32 = vadd.f32 %v8076_v54, %v6352_v17  ;;  %v7079_v37 = vadd.f32 %v8080_v63, %v6352_v17  ;;  %v2235_v63 = vmax.f32 %v6934_v11, %v2219_v39  ;;  %v2077_v11 = vmax.f32 %v6750_v33, %v6812_v42 }
 0x24c   :  { %8075 = vst [vmem:[#allocation51_spill] sm:$0xff] %v7067_v18  ;;  %v8084_v18 = vld [vmem:[#allocation83_spill] sm:$0xff]  ;;  %v2078_v33 = vmax.f32 %v6754_v60, %v6816_v51  ;;  %v2540_v45 = vadd.f32 %v8089_v48, %v6352_v17  ;;  %v2160_v47 = vmax.f32 %v2080_v4, %v6892_v5  ;;  %v8109_v4 = vld [vmem:[#allocation102_spill] sm:$0xff] }
 0x24d   :  { %8077 = vst [vmem:[#allocation52_spill] sm:$0xff] %v7071_v32  ;;  %v7091_v54 = vadd.f32 %v8084_v18, %v6352_v17  ;;  %v2477_v32 = vmax.f32 %v2402_v24, %v2462_v44  ;;  %v2538_v24 = vadd.f32 %v6696_v6, %v6352_v17  ;;  %v2251_v44 = vmax.f32 %v2235_v63, 0.0 }
 0x24e   :  { %8079 = vst [vmem:[#allocation53_spill] sm:$0xff] %v7075_v31  ;;  %v2537_v31 = vadd.f32 %v8085_v56, %v6352_v17  ;;  %v2157_v6 = vmax.f32 %v2077_v11, %v6880_v35 }
 0x24f   :  { %8081 = vst [vmem:[#allocation54_spill] sm:$0xff] %v7079_v37  ;;  %v2249_v37 = vmax.f32 %v2169_v10, %v2233_v1  ;;  %v2221_v1 = vadd.f32 %v8087_v43, %v6352_v17  ;;  %v2553_v42 = vmax.f32 %v2478_v26, %v2538_v24  ;;  %v8088_v10 = vld [vmem:[#allocation32_spill] sm:$0xff]  ;;  %v2408_v26 = vmax.f32 %v6966_v50, %v7017_v62 }
 0x250   :  { %8082 = vst [vmem:[#allocation55_spill] sm:$0xff] %v7083_v15  ;;  %v8086_v15 = vld [vmem:[#allocation30_spill] sm:$0xff]  ;;  %v2222_v16 = vadd.f32 %v8088_v10, %v6352_v17 }
 0x251   :  { %8083 = vst [vmem:[#allocation56_spill] sm:$0xff] %v7087_v19  ;;  %v2220_v0 = vadd.f32 %v8086_v15, %v6352_v17  ;;  %v2552_v19 = vmax.f32 %v2477_v32, %v2537_v31  ;;  %v2265_v18 = vmax.f32 %v2249_v37, 0.0  ;;  %v2404_v31 = vmax.f32 %v6950_v8, %v2389_v3 }
 0x252   :  { %2266 = vst.msk [vmem:[#allocation3] sm:$0xff] %vm207_vm1, %v2250_v29  ;;  %v2405_v3 = vmax.f32 %v6954_v20, %v7005_v9  ;;  %v2237_v35 = vmax.f32 %v2157_v6, %v2221_v1  ;;  %v2158_v8 = vmax.f32 %v2078_v33, %v6884_v27  ;;  %v2568_v60 = vmax.f32 %v2553_v42, 0.0  ;;  %v8090_v9 = vld [vmem:[#allocation33_spill] sm:$0xff]  ;;  %v8092_v29 = vld [vmem:[#allocation34_spill] sm:$0xff]  ;;  %v8095_v6 = vld [vmem:[#allocation36_spill] sm:$0xff] }
 0x253   :  { %v2567_v39 = vmax.f32 %v2552_v19, 0.0  ;;  %2267 = vst.msk [vmem:[#allocation3 + $0x8] sm:$0xff] %vm207_vm1, %v2251_v44  ;;  %v2236_v2 = vmax.f32 %v2156_v25, %v2220_v0  ;;  %v2479_v58 = vmax.f32 %v2404_v31, %v2464_v59  ;;  %v2079_v59 = vmax.f32 %v6758_v12, %v6820_v52  ;;  %v8094_v31 = vld [vmem:[#allocation94_spill] sm:$0xff]  ;;  %v8096_v33 = vld [vmem:[#allocation44_spill] sm:$0xff] }
 0x254   :  { %2281 = vst.msk [vmem:[#allocation3 + $0x78] sm:$0xff] %vm207_vm1, %v2265_v18  ;;  %v2480_v30 = vmax.f32 %v2405_v3, %v2465_v28  ;;  %v2253_v32 = vmax.f32 %v2237_v35, 0.0  ;;  %v2238_v61 = vmax.f32 %v2158_v8, %v2222_v16  ;;  %v2223_v20 = vadd.f32 %v8090_v9, %v6352_v17  ;;  %v8091_v28 = vld [vmem:[#allocation86_spill] sm:$0xff]  ;;  %v8099_v3 = vld [vmem:[#allocation17_spill] sm:$0xff]  ;;  %v8101_v35 = vld [vmem:[#allocation95_spill] sm:$0xff] }
 0x255   :  { %2582 = vst.msk [vmem:[#allocation3 + $0x80] sm:$0xff] %vm207_vm1, %v2567_v39  ;;  %v2252_v0 = vmax.f32 %v2236_v2, 0.0  ;;  %v2554_v51 = vmax.f32 %v2479_v58, %v2539_v34  ;;  %v2406_v37 = vmax.f32 %v6958_v22, %v7009_v23  ;;  %v2159_v19 = vmax.f32 %v2079_v59, %v6888_v7  ;;  %v8104_v59 = vld [vmem:[#allocation45_spill] sm:$0xff] }
 0x256   :  { %2583 = vst.msk [vmem:[#allocation3 + $0x88] sm:$0xff] %vm207_vm1, %v2568_v60  ;;  %v2555_v15 = vmax.f32 %v2480_v30, %v2540_v45  ;;  %v2541_v56 = vadd.f32 %v8091_v28, %v6352_v17  ;;  %v2254_v52 = vmax.f32 %v2238_v61, 0.0  ;;  %v2224_v23 = vadd.f32 %v8092_v29, %v6352_v17  ;;  %v8102_v45 = vld [vmem:[#allocation51_spill] sm:$0xff]  ;;  %v8110_v29 = vld [vmem:[#allocation96_spill] sm:$0xff] }
 0x257   :  { %2268 = vst.msk [vmem:[#allocation3 + $0x10] sm:$0xff] %vm207_vm1, %v2252_v0  ;;  %v2569_v27 = vmax.f32 %v2554_v51, 0.0  ;;  %v2481_v63 = vmax.f32 %v2406_v37, %v2466_v40  ;;  %v2239_v24 = vmax.f32 %v2159_v19, %v2223_v20  ;;  %v2407_v44 = vmax.f32 %v6962_v38, %v7013_v49  ;;  %v8100_v0 = vld [vmem:[#allocation101_spill] sm:$0xff]  ;;  %v8107_v19 = vld [vmem:[#allocation88_spill] sm:$0xff] }
 0x258   :  { %2269 = vst.msk [vmem:[#allocation3 + $0x18] sm:$0xff] %vm207_vm1, %v2253_v32  ;;  %v2570_v7 = vmax.f32 %v2555_v15, 0.0  ;;  %v2542_v18 = vadd.f32 %v6709_v41, %v6352_v17  ;;  %v2081_v25 = vmax.f32 %v6766_v14, %v6828_v53  ;;  %v8093_v41 = vld [vmem:[#allocation35_spill] sm:$0xff]  ;;  %v2240_v43 = vmax.f32 %v2160_v47, %v2224_v23  ;;  %v8103_v51 = vld [vmem:[#allocation37_spill] sm:$0xff] }
 0x259   :  { %v2598_v12 = vld [vmem:[#allocation3] sm:$0xff]  ;;  %2584 = vst.msk [vmem:[#allocation3 + $0x90] sm:$0xff] %vm207_vm1, %v2569_v27  ;;  %v2556_v13 = vmax.f32 %v2481_v63, %v2541_v56  ;;  %v2255_v38 = vmax.f32 %v2239_v24, 0.0  ;;  %v2482_v49 = vmax.f32 %v2407_v44, %v7059_v21  ;;  %v2225_v39 = vadd.f32 %v8093_v41, %v6352_v17  ;;  %v8105_v32 = vld [vmem:[#allocation25_spill] sm:$0xff]  ;;  %v8106_v27 = vld [vmem:[#allocation18_spill] sm:$0xff] }
 0x25a   :  { %v2618_v22 = vld [vmem:[#allocation3 + $0x1] sm:$0xff]  ;;  %4843 = vmatmul.msk.f32.vlgmr.msra.gmra.mxu0 %vm207_vm1, %v2598_v12  ;;  %2270 = vst.msk [vmem:[#allocation3 + $0x20] sm:$0xff] %vm207_vm1, %v2254_v52  ;;  %v2161_v14 = vmax.f32 %v2081_v25, %v6896_v55  ;;  %v2543_v53 = vadd.f32 %v6712_v46, %v6352_v17  ;;  %v2483_v21 = vmax.f32 %v2408_v26, %v7063_v36  ;;  %v2256_v50 = vmax.f32 %v2240_v43, 0.0  ;;  %v8111_v44 = vld [vmem:[#allocation38_spill] sm:$0xff]  ;;  %v8115_v41 = vld [vmem:[#allocation89_spill] sm:$0xff] }
 0x25b   :  { %4827 = vmatmul.msk.f32.vlgmr.msra.gmra.mxu3 %vm207_vm1, %v2618_v22  ;;  %v2613_v40 = vld [vmem:[#allocation3 + $0x78] sm:$0x3]  ;;  %2585 = vst.msk [vmem:[#allocation3 + $0x98] sm:$0xff] %vm207_vm1, %v2570_v7  ;;  %v2571_v5 = vmax.f32 %v2556_v13, 0.0  ;;  %v2557_v1 = vmax.f32 %v2482_v49, %v2542_v18  ;;  %v2082_v2 = vmax.f32 %v8094_v31, %v6832_v57  ;;  %v2226_v62 = vadd.f32 %v8095_v6, %v6352_v17  ;;  %v8097_v55 = vld [vmem:[#allocation24_spill] sm:$0xff]  ;;  %v8098_v46 = vld [vmem:[#allocation87_spill] sm:$0xff] }
 0x25c   :  { %4858 = vmatmul.msk.f32.vlgmr.msra.gmra.mxu1 %vm207_vm1, %v2613_v40  ;;  %v3163_v11 = vld [vmem:[#allocation3 + $0x7d] sm:$0xff]  ;;  %2271 = vst.msk [vmem:[#allocation3 + $0x28] sm:$0xff] %vm207_vm1, %v2255_v38  ;;  %v2241_v34 = vmax.f32 %v2161_v14, %v2225_v39  ;;  %v2409_v42 = vmax.f32 %v8097_v55, %v8096_v33  ;;  %v2544_v58 = vadd.f32 %v8098_v46, %v6352_v17  ;;  %v2599_v8 = vld [vmem:[#allocation3 + $0x8] sm:$0xff]  ;;  %v8112_v40 = vld [vmem:[#allocation46_spill] sm:$0xff] }
 0x25d   :  { %4883 = vmatmul.msk.f32.vlgmr.msra.gmra.mxu2 %vm207_vm1, %v3163_v11  ;;  %2586 = vst.msk [vmem:[#allocation3 + $0xa0] sm:$0xff] %vm207_vm1, %v2571_v5  ;;  %v2572_v10 = vmax.f32 %v2557_v1, 0.0  ;;  %v2558_v16 = vmax.f32 %v2483_v21, %v2543_v53  ;;  %v2162_v36 = vmax.f32 %v2082_v2, %v8099_v3  ;;  %v2083_v57 = vmax.f32 %v8101_v35, %v8100_v0  ;;  %v2865_v56 = vld [vmem:[#allocation3 + $0x2] sm:$0xff]  ;;  %v8113_v13 = vld [vmem:[#allocation26_spill] sm:$0xff]  ;;  %v8116_v5 = vld [vmem:[#allocation53_spill] sm:$0xff] }
 0x25e   :  { %2272 = vst.msk [vmem:[#allocation3 + $0x30] sm:$0xff] %vm207_vm1, %v2256_v50  ;;  %v2257_v48 = vmax.f32 %v2241_v34, 0.0  ;;  %v2484_v60 = vmax.f32 %v2409_v42, %v8102_v45  ;;  %v2227_v30 = vadd.f32 %v8103_v51, %v6352_v17  ;;  %v2410_v61 = vmax.f32 %v8105_v32, %v8104_v59  ;;  %v2619_v9 = vld [vmem:[#allocation3 + $0x9] sm:$0xff]  ;;  %v8114_v38 = vld [vmem:[#allocation19_spill] sm:$0xff]  ;;  %v8122_v33 = vld [vmem:[#allocation90_spill] sm:$0xff] }
 0x25f   :  { %2587 = vst.msk [vmem:[#allocation3 + $0xa8] sm:$0xff] %vm207_vm1, %v2572_v10  ;;  %v2573_v20 = vmax.f32 %v2558_v16, 0.0  ;;  %v2242_v37 = vmax.f32 %v2162_v36, %v2226_v62  ;;  %v2163_v15 = vmax.f32 %v2083_v57, %v8106_v27  ;;  %v2545_v28 = vadd.f32 %v8107_v19, %v6352_v17  ;;  %v8108_v52 = vld [vmem:[#allocation52_spill] sm:$0xff]  ;;  %v8117_v14 = vld [vmem:[#allocation103_spill] sm:$0xff]  ;;  %v8118_v53 = vld [vmem:[#allocation97_spill] sm:$0xff] }
 0x260   :  { %2273 = vst.msk [vmem:[#allocation3 + $0x38] sm:$0xff] %vm207_vm1, %v2257_v48  ;;  %v2559_v12 = vmax.f32 %v2484_v60, %v2544_v58  ;;  %v2485_v63 = vmax.f32 %v2410_v61, %v8108_v52  ;;  %v2084_v23 = vmax.f32 %v8110_v29, %v8109_v4  ;;  %v3164_v22 = vld [vmem:[#allocation3 + $0x85] sm:$0xff]  ;;  %v2228_v18 = vadd.f32 %v8111_v44, %v6352_v17  ;;  %v8119_v21 = vld [vmem:[#allocation39_spill] sm:$0xff]  ;;  %v8125_v16 = vld [vmem:[#allocation98_spill] sm:$0xff] }
 0x261   :  { %2588 = vst.msk [vmem:[#allocation3 + $0xb0] sm:$0xff] %vm207_vm1, %v2573_v20  ;;  %v2258_v7 = vmax.f32 %v2242_v37, 0.0  ;;  %v2243_v24 = vmax.f32 %v2163_v15, %v2227_v30  ;;  %v2411_v47 = vmax.f32 %v8113_v13, %v8112_v40  ;;  %v2546_v39 = vadd.f32 %v8115_v41, %v6352_v17  ;;  %v8120_v62 = vld [vmem:[#allocation47_spill] sm:$0xff]  ;;  %v8123_v46 = vld [vmem:[#allocation20_spill] sm:$0xff]  ;;  %v2600_v35 = vld [vmem:[#allocation3 + $0x10] sm:$0xff] }
 0x262   :  { %4844 = vmatmul.msk.f32.gmra.mxu0 %vm207_vm1, %v2599_v8  ;;  %v2574_v25 = vmax.f32 %v2559_v12, 0.0  ;;  %v2560_v11 = vmax.f32 %v2485_v63, %v2545_v28  ;;  %v2164_v49 = vmax.f32 %v2084_v23, %v8114_v38  ;;  %v2085_v1 = vmax.f32 %v8118_v53, %v8117_v14  ;;  %v8121_v50 = vld [vmem:[#allocation27_spill] sm:$0xff]  ;;  %v8124_v10 = vld [vmem:[#allocation104_spill] sm:$0xff]  ;;  %v8127_v8 = vld [vmem:[#allocation54_spill] sm:$0xff] }
 0x263   :  { %4828 = vmatmul.msk.f32.gmra.mxu3 %vm207_vm1, %v2619_v9  ;;  %2274 = vst.msk [vmem:[#allocation3 + $0x40] sm:$0xff] %vm207_vm1, %v2258_v7  ;;  %v2259_v26 = vmax.f32 %v2243_v24, 0.0  ;;  %v2486_v43 = vmax.f32 %v2411_v47, %v8116_v5  ;;  %v2229_v31 = vadd.f32 %v8119_v21, %v6352_v17  ;;  %v2412_v34 = vmax.f32 %v8121_v50, %v8120_v62  ;;  %v8126_v36 = vld [vmem:[#allocation40_spill] sm:$0xff]  ;;  %v8128_v45 = vld [vmem:[#allocation15_spill] sm:$0xff]  ;;  %v8129_v60 = vld [vmem:[#allocation14_spill] sm:$0xff] }
 0x264   :  { %4863 = vmatmul.msk.f32.vlgmr.msrb.gmra.mxu1 %vm207_vm1, %v2865_v56  ;;  %2589 = vst.msk [vmem:[#allocation3 + $0xb8] sm:$0xff] %vm207_vm1, %v2574_v25  ;;  %v2575_v2 = vmax.f32 %v2560_v11, 0.0  ;;  %v2244_v6 = vmax.f32 %v2164_v49, %v2228_v18  ;;  %v2547_v55 = vadd.f32 %v8122_v33, %v6352_v17  ;;  %v2165_v58 = vmax.f32 %v2085_v1, %v8123_v46  ;;  %v8130_v30 = vld [vmem:[#allocation13_spill] sm:$0xff]  ;;  %v8133_v15 = vld [vmem:[#allocation99_spill] sm:$0xff]  ;;  %v8134_v12 = vld [vmem:[#allocation16_spill] sm:$0xff] }
 0x265   :  { %4884 = vmatmul.msk.f32.gmra.mxu2 %vm207_vm1, %v3164_v22  ;;  %2275 = vst.msk [vmem:[#allocation3 + $0x48] sm:$0xff] %vm207_vm1, %v2259_v26  ;;  %v2561_v42 = vmax.f32 %v2486_v43, %v2546_v39  ;;  %v2086_v3 = vmax.f32 %v8125_v16, %v8124_v10  ;;  %v2230_v0 = vadd.f32 %v8126_v36, %v6352_v17  ;;  %v2620_v32 = vld [vmem:[#allocation3 + $0x11] sm:$0xff]  ;;  %v8137_v44 = vld [vmem:[#allocation48_spill] sm:$0xff]  ;;  %v8139_v25 = vld [vmem:[#allocation91_spill] sm:$0xff] }
 0x266   :  { %2590 = vst.msk [vmem:[#allocation3 + $0xc0] sm:$0xff] %vm207_vm1, %v2575_v2  ;;  %v2260_v57 = vmax.f32 %v2244_v6, 0.0  ;;  %v2487_v48 = vmax.f32 %v2412_v34, %v8127_v8  ;;  %v2413_v51 = vmax.f32 %v8129_v60, %v8128_v45  ;;  %v2548_v59 = vadd.f32 %v8130_v30, %v6352_v17  ;;  %v8131_v20 = vld [vmem:[#allocation21_spill] sm:$0xff]  ;;  %v8136_v7 = vld [vmem:[#allocation22_spill] sm:$0xff]  ;;  %v8138_v18 = vld [vmem:[#allocation28_spill] sm:$0xff] }
 0x267   :  { %v2576_v61 = vmax.f32 %v2561_v42, 0.0  ;;  %v2245_v9 = vmax.f32 %v2165_v58, %v2229_v31  ;;  %v2166_v37 = vmax.f32 %v2086_v3, %v8131_v20  ;;  %v8132_v27 = vld [vmem:[#allocation105_spill] sm:$0xff]  ;;  %v2414_v40 = vmax.f32 %v8138_v18, %v8137_v44  ;;  %v8140_v38 = vld [vmem:[#allocation106_spill] sm:$0xff]  ;;  %v8141_v49 = vld [vmem:[#allocation100_spill] sm:$0xff] }
 0x268   :  { %v2087_v19 = vmax.f32 %v8133_v15, %v8132_v27  ;;  %v2866_v28 = vld [vmem:[#allocation3 + $0xa] sm:$0xff]  ;;  %2276 = vst.msk [vmem:[#allocation3 + $0x50] sm:$0xff] %vm207_vm1, %v2260_v57  ;;  %v2562_v56 = vmax.f32 %v2487_v48, %v2547_v55  ;;  %v2488_v52 = vmax.f32 %v2413_v51, %v8134_v12  ;;  %v2549_v11 = vadd.f32 %v8139_v25, %v6352_v17  ;;  %v8142_v5 = vld [vmem:[#allocation55_spill] sm:$0xff]  ;;  %v8143_v14 = vld [vmem:[#allocation42_spill] sm:$0xff] }
 0x269   :  { %v8135_v63 = vld [vmem:[#allocation41_spill] sm:$0xff]  ;;  %2591 = vst.msk [vmem:[#allocation3 + $0xc8] sm:$0xff] %vm207_vm1, %v2576_v61  ;;  %v2261_v23 = vmax.f32 %v2245_v9, 0.0  ;;  %v2246_v22 = vmax.f32 %v2166_v37, %v2230_v0  ;;  %v2088_v41 = vmax.f32 %v8141_v49, %v8140_v38  ;;  %v2489_v43 = vmax.f32 %v2414_v40, %v8142_v5  ;;  %v8144_v21 = vld [vmem:[#allocation23_spill] sm:$0xff]  ;;  %v8147_v50 = vld [vmem:[#allocation92_spill] sm:$0xff] }
 0x26a   :  { %4845 = vmatmul.msk.f32.gmra.mxu0 %vm207_vm1, %v2600_v35  ;;  %v2231_v4 = vadd.f32 %v8135_v63, %v6352_v17  ;;  %v3165_v29 = vld [vmem:[#allocation3 + $0x8d] sm:$0xff]  ;;  %v2167_v24 = vmax.f32 %v2087_v19, %v8136_v7  ;;  %v2577_v13 = vmax.f32 %v2562_v56, 0.0  ;;  %v2563_v47 = vmax.f32 %v2488_v52, %v2548_v59  ;;  %v8149_v46 = vld [vmem:[#allocation43_spill] sm:$0xff]  ;;  %v8151_v0 = vld [vmem:[#allocation56_spill] sm:$0xff] }
 0x26b   :  { %4829 = vmatmul.msk.f32.gmra.mxu3 %vm207_vm1, %v2620_v32  ;;  %2277 = vst.msk [vmem:[#allocation3 + $0x58] sm:$0xff] %vm207_vm1, %v2261_v23  ;;  %v2262_v39 = vmax.f32 %v2246_v22, 0.0  ;;  %v2232_v53 = vadd.f32 %v8143_v14, %v6352_v17  ;;  %v2168_v31 = vmax.f32 %v2088_v41, %v8144_v21  ;;  %v8145_v2 = vld [vmem:[#allocation49_spill] sm:$0xff]  ;;  %v2550_v34 = vadd.f32 %v8147_v50, %v6352_v17  ;;  %v8148_v42 = vld [vmem:[#allocation50_spill] sm:$0xff]  ;;  %v2622_v61 = vld [vmem:[#allocation3 + $0x21] sm:$0xff] }
 0x26c   :  { %4864 = vmatmul.msk.f32.gmra.mxu1 %vm207_vm1, %v2866_v28  ;;  %v2247_v26 = vmax.f32 %v2167_v24, %v2231_v4  ;;  %2592 = vst.msk [vmem:[#allocation3 + $0xd0] sm:$0xff] %vm207_vm1, %v2577_v13  ;;  %v2578_v1 = vmax.f32 %v2563_v47, 0.0  ;;  %v8146_v6 = vld [vmem:[#allocation29_spill] sm:$0xff]  ;;  %v2564_v55 = vmax.f32 %v2489_v43, %v2549_v11  ;;  %v2416_v58 = vmax.f32 %v8149_v46, %v8148_v42  ;;  %v2601_v3 = vld [vmem:[#allocation3 + $0x18] sm:$0xff]  ;;  %v2869_v15 = vld [vmem:[#allocation3 + $0x22] sm:$0xff] }
 0x26d   :  { %4885 = vmatmul.msk.f32.gmra.mxu2 %vm207_vm1, %v3165_v29  ;;  %v2415_v62 = vmax.f32 %v8146_v6, %v8145_v2  ;;  %2278 = vst.msk [vmem:[#allocation3 + $0x60] sm:$0xff] %vm207_vm1, %v2262_v39  ;;  %v8150_v10 = vld [vmem:[#allocation93_spill] sm:$0xff]  ;;  %v2248_v36 = vmax.f32 %v2168_v31, %v2232_v53  ;;  %v2621_v57 = vld [vmem:[#allocation3 + $0x19] sm:$0xff]  ;;  %v2626_v7 = vld [vmem:[#allocation3 + $0x41] sm:$0xff] }
 0x26e   :  { %v2263_v33 = vmax.f32 %v2247_v26, 0.0  ;;  %v2551_v16 = vadd.f32 %v8150_v10, %v6352_v17  ;;  %2593 = vst.msk [vmem:[#allocation3 + $0xd8] sm:$0xff] %vm207_vm1, %v2578_v1  ;;  %v2579_v8 = vmax.f32 %v2564_v55, 0.0  ;;  %v2491_v48 = vmax.f32 %v2416_v58, %v7091_v54  ;;  %v2867_v45 = vld [vmem:[#allocation3 + $0x12] sm:$0xff]  ;;  %v2602_v54 = vld [vmem:[#allocation3 + $0x20] sm:$0xff]  ;;  %v2603_v37 = vld [vmem:[#allocation3 + $0x28] sm:$0xff] }
 0x26f   :  { %v2490_v35 = vmax.f32 %v2415_v62, %v8151_v0  ;;  %v2264_v60 = vmax.f32 %v2248_v36, 0.0  ;;  %v3166_v17 = vld [vmem:[#allocation3 + $0x95] sm:$0xff]  ;;  %v3167_v20 = vld [vmem:[#allocation3 + $0x9d] sm:$0xff]  ;;  %v2623_v27 = vld [vmem:[#allocation3 + $0x29] sm:$0xff] }
 0x270   :  { %2279 = vst.msk [vmem:[#allocation3 + $0x68] sm:$0xff] %vm207_vm1, %v2263_v33  ;;  %v2566_v30 = vmax.f32 %v2491_v48, %v2551_v16  ;;  %v2868_v9 = vld [vmem:[#allocation3 + $0x1a] sm:$0xff]  ;;  %v3168_v19 = vld [vmem:[#allocation3 + $0xa5] sm:$0xff]  ;;  %v2604_v28 = vld [vmem:[#allocation3 + $0x30] sm:$0xff] }
 0x271   :  { %v2565_v51 = vmax.f32 %v2490_v35, %v2550_v34  ;;  %2594 = vst.msk [vmem:[#allocation3 + $0xe0] sm:$0xff] %vm207_vm1, %v2579_v8  ;;  %v2624_v56 = vld [vmem:[#allocation3 + $0x31] sm:$0xff]  ;;  %v2625_v4 = vld [vmem:[#allocation3 + $0x39] sm:$0xff]  ;;  %v2607_v18 = vld [vmem:[#allocation3 + $0x48] sm:$0xff] }
 0x272   :  { %4846 = vmatmul.msk.f32.gmra.mxu0 %vm207_vm1, %v2601_v3  ;;  %2280 = vst.msk [vmem:[#allocation3 + $0x70] sm:$0xff] %vm207_vm1, %v2264_v60  ;;  %v2581_v32 = vmax.f32 %v2566_v30, 0.0  ;;  %v2870_v12 = vld [vmem:[#allocation3 + $0x2a] sm:$0xff]  ;;  %v2605_v63 = vld [vmem:[#allocation3 + $0x38] sm:$0xff]  ;;  %v2606_v22 = vld [vmem:[#allocation3 + $0x40] sm:$0xff] }
 0x273   :  { %4830 = vmatmul.msk.f32.gmra.mxu3 %vm207_vm1, %v2621_v57  ;;  %v2580_v59 = vmax.f32 %v2565_v51, 0.0  ;;  %v3169_v52 = vld [vmem:[#allocation3 + $0xad] sm:$0xff]  ;;  %v3170_v23 = vld [vmem:[#allocation3 + $0xb5] sm:$0xff]  ;;  %v3171_v44 = vld [vmem:[#allocation3 + $0xbd] sm:$0xff] }
 0x274   :  { %4865 = vmatmul.msk.f32.gmra.mxu1 %vm207_vm1, %v2867_v45  ;;  %2596 = vst.msk [vmem:[#allocation3 + $0xf0] sm:$0xff] %vm207_vm1, %v2581_v32  ;;  %v2871_v29 = vld [vmem:[#allocation3 + $0x32] sm:$0xff]  ;;  %v2872_v24 = vld [vmem:[#allocation3 + $0x3a] sm:$0xff]  ;;  %v2627_v40 = vld [vmem:[#allocation3 + $0x49] sm:$0xff] }
 0x275   :  { %4886 = vmatmul.msk.f32.gmra.mxu2 %vm207_vm1, %v3166_v17  ;;  %2595 = vst.msk [vmem:[#allocation3 + $0xe8] sm:$0xff] %vm207_vm1, %v2580_v59  ;;  %v2873_v13 = vld [vmem:[#allocation3 + $0x42] sm:$0xff]  ;;  %v2608_v25 = vld [vmem:[#allocation3 + $0x50] sm:$0xff]  ;;  %v2609_v41 = vld [vmem:[#allocation3 + $0x58] sm:$0xff] }
 0x276   :  { %v3172_v47 = vld [vmem:[#allocation3 + $0xc5] sm:$0xff]  ;;  %v2628_v11 = vld [vmem:[#allocation3 + $0x51] sm:$0xff]  ;;  %v2629_v39 = vld [vmem:[#allocation3 + $0x59] sm:$0xff] }
 0x277   :  { %v2874_v38 = vld [vmem:[#allocation3 + $0x4a] sm:$0xff]  ;;  %v2875_v26 = vld [vmem:[#allocation3 + $0x52] sm:$0xff]  ;;  %v2610_v43 = vld [vmem:[#allocation3 + $0x60] sm:$0xff] }
 0x278   :  { %v3173_v49 = vld [vmem:[#allocation3 + $0xcd] sm:$0xff]  ;;  %v3174_v5 = vld [vmem:[#allocation3 + $0xd5] sm:$0xff]  ;;  %v2630_v14 = vld [vmem:[#allocation3 + $0x61] sm:$0xff] }
 0x279   :  { %v2876_v53 = vld [vmem:[#allocation3 + $0x5a] sm:$0xff]  ;;  %v2611_v21 = vld [vmem:[#allocation3 + $0x68] sm:$0xff]  ;;  %v2612_v62 = vld [vmem:[#allocation3 + $0x70] sm:$0xff] }
 0x27a   :  { %4847 = vmatmul.msk.f32.gmra.mxu0 %vm207_vm1, %v2602_v54  ;;  %v3175_v1 = vld [vmem:[#allocation3 + $0xdd] sm:$0xff]  ;;  %v2631_v31 = vld [vmem:[#allocation3 + $0x69] sm:$0xff]  ;;  %v2632_v50 = vld [vmem:[#allocation3 + $0x71] sm:$0xff] }
 0x27b   :  { %4831 = vmatmul.msk.f32.gmra.mxu3 %vm207_vm1, %v2622_v61  ;;  %v2877_v2 = vld [vmem:[#allocation3 + $0x62] sm:$0xff]  ;;  %v2878_v34 = vld [vmem:[#allocation3 + $0x6a] sm:$0xff]  ;;  %v2633_v42 = vld [vmem:[#allocation3 + $0x79] sm:$0x3] }
 0x27c   :  { %4866 = vmatmul.msk.f32.gmra.mxu1 %vm207_vm1, %v2868_v9  ;;  %v3176_v6 = vld [vmem:[#allocation3 + $0xe5] sm:$0xff]  ;;  %v3177_v33 = vld [vmem:[#allocation3 + $0xed] sm:$0xff]  ;;  %v3178_v58 = vld [vmem:[#allocation3 + $0xf5] sm:$0x3] }
 0x27d   :  { %4887 = vmatmul.msk.f32.gmra.mxu2 %vm207_vm1, %v3167_v20  ;;  %v3409_v55 = vld [vmem:[#allocation3 + $0x7e] sm:$0xff]  ;;  %v2879_v46 = vld [vmem:[#allocation3 + $0x72] sm:$0xff]  ;;  %v3410_v3 = vld [vmem:[#allocation3 + $0x86] sm:$0xff] }
 0x27e   :  { %v3143_v36 = vld [vmem:[#allocation3 + $0x7c] sm:$0xff]  ;;  %v2880_v0 = vld [vmem:[#allocation3 + $0x7a] sm:$0x3]  ;;  %v3411_v60 = vld [vmem:[#allocation3 + $0x8e] sm:$0xff] }
 0x27f   :  { %v7328_v48 = vld [vmem:[%s7885_s6] ss:$0 sm:$0xff]  ;;  %v3144_v17 = vld [vmem:[#allocation3 + $0x84] sm:$0xff]  ;;  %v3412_v9 = vld [vmem:[#allocation3 + $0x96] sm:$0xff] }
 0x282   :  { %4848 = vmatmul.msk.f32.gmra.mxu0 %vm207_vm1, %v2603_v37  ;;  %v3145_v37 = vld [vmem:[#allocation3 + $0x8c] sm:$0xff] }
 0x283   :  { %4832 = vmatmul.msk.f32.gmra.mxu3 %vm207_vm1, %v2623_v27 }
 0x284   :  { %4867 = vmatmul.msk.f32.gmra.mxu1 %vm207_vm1, %v2869_v15 }
 0x285   :  { %4888 = vmatmul.msk.f32.gmra.mxu2 %vm207_vm1, %v3168_v19 }
 0x28a   :  { %4849 = vmatmul.msk.f32.gmra.mxu0 %vm207_vm1, %v2604_v28 }
 0x28b   :  { %4833 = vmatmul.msk.f32.gmra.mxu3 %vm207_vm1, %v2624_v56 }
 0x28c   :  { %4868 = vmatmul.msk.f32.gmra.mxu1 %vm207_vm1, %v2870_v12 }
 0x28d   :  { %4889 = vmatmul.msk.f32.gmra.mxu2 %vm207_vm1, %v3169_v52 }
 0x292   :  { %4850 = vmatmul.msk.f32.gmra.mxu0 %vm207_vm1, %v2605_v63 }
 0x293   :  { %4834 = vmatmul.msk.f32.gmra.mxu3 %vm207_vm1, %v2625_v4 }
 0x294   :  { %4869 = vmatmul.msk.f32.gmra.mxu1 %vm207_vm1, %v2871_v29 }
 0x295   :  { %4890 = vmatmul.msk.f32.gmra.mxu2 %vm207_vm1, %v3170_v23 }
 0x29a   :  { %4851 = vmatmul.msk.f32.gmra.mxu0 %vm207_vm1, %v2606_v22 }
 0x29b   :  { %4835 = vmatmul.msk.f32.gmra.mxu3 %vm207_vm1, %v2626_v7 }
 0x29c   :  { %4870 = vmatmul.msk.f32.gmra.mxu1 %vm207_vm1, %v2872_v24  ;;  %v3413_v24 = vld [vmem:[#allocation3 + $0x9e] sm:$0xff] }
 0x29d   :  { %4891 = vmatmul.msk.f32.gmra.mxu2 %vm207_vm1, %v3171_v44 }
 0x2a2   :  { %4852 = vmatmul.msk.f32.gmra.mxu0 %vm207_vm1, %v2607_v18  ;;  %v3146_v18 = vld [vmem:[#allocation3 + $0x94] sm:$0xff] }
 0x2a3   :  { %4836 = vmatmul.msk.f32.gmra.mxu3 %vm207_vm1, %v2627_v40 }
 0x2a4   :  { %4871 = vmatmul.msk.f32.gmra.mxu1 %vm207_vm1, %v2873_v13 }
 0x2a5   :  { %4892 = vmatmul.msk.f32.gmra.mxu2 %vm207_vm1, %v3172_v47 }
 0x2aa   :  { %4853 = vmatmul.msk.f32.gmra.mxu0 %vm207_vm1, %v2608_v25 }
 0x2ab   :  { %4837 = vmatmul.msk.f32.gmra.mxu3 %vm207_vm1, %v2628_v11 }
 0x2ac   :  { %4872 = vmatmul.msk.f32.gmra.mxu1 %vm207_vm1, %v2874_v38 }
 0x2ad   :  { %4893 = vmatmul.msk.f32.gmra.mxu2 %vm207_vm1, %v3173_v49 }
 0x2b2   :  { %4854 = vmatmul.msk.f32.gmra.mxu0 %vm207_vm1, %v2609_v41 }
 0x2b3   :  { %4838 = vmatmul.msk.f32.gmra.mxu3 %vm207_vm1, %v2629_v39 }
 0x2b4   :  { %4873 = vmatmul.msk.f32.gmra.mxu1 %vm207_vm1, %v2875_v26 }
 0x2b5   :  { %4894 = vmatmul.msk.f32.gmra.mxu2 %vm207_vm1, %v3174_v5  ;;  %v3414_v5 = vld [vmem:[#allocation3 + $0xa6] sm:$0xff] }
 0x2ba   :  { %4855 = vmatmul.msk.f32.gmra.mxu0 %vm207_vm1, %v2610_v43 }
 0x2bb   :  { %4839 = vmatmul.msk.f32.gmra.mxu3 %vm207_vm1, %v2630_v14  ;;  %v3147_v14 = vld [vmem:[#allocation3 + $0x9c] sm:$0xff] }
 0x2bc   :  { %4874 = vmatmul.msk.f32.gmra.mxu1 %vm207_vm1, %v2876_v53 }
 0x2bd   :  { %4895 = vmatmul.msk.f32.gmra.mxu2 %vm207_vm1, %v3175_v1 }
 0x2c2   :  { %4856 = vmatmul.msk.f32.gmra.mxu0 %vm207_vm1, %v2611_v21 }
 0x2c3   :  { %4840 = vmatmul.msk.f32.gmra.mxu3 %vm207_vm1, %v2631_v31 }
 0x2c4   :  { %4875 = vmatmul.msk.f32.gmra.mxu1 %vm207_vm1, %v2877_v2 }
 0x2c5   :  { %4896 = vmatmul.msk.f32.gmra.mxu2 %vm207_vm1, %v3176_v6 }
 0x2ca   :  { %4857 = vmatmul.msk.f32.gmra.mxu0 %vm207_vm1, %v2612_v62 }
 0x2cb   :  { %4841 = vmatmul.msk.f32.gmra.mxu3 %vm207_vm1, %v2632_v50 }
 0x2cc   :  { %4876 = vmatmul.msk.f32.gmra.mxu1 %vm207_vm1, %v2878_v34 }
 0x2cd   :  { %4897 = vmatmul.msk.f32.gmra.mxu2 %vm207_vm1, %v3177_v33 }
 0x2d2   :  { %4919 = vmatmul.msk.f32.vlgmr.msrb.gmra.mxu0 %vm207_vm1, %v3409_v55  ;;  %v3415_v55 = vld [vmem:[#allocation3 + $0xae] sm:$0xff] }
 0x2d3   :  { %4842 = vmatmul.msk.f32.gmra.mxu3 %vm207_vm1, %v2633_v42 }
 0x2d4   :  { %4877 = vmatmul.msk.f32.gmra.mxu1 %vm207_vm1, %v2879_v46  ;;  %v3148_v46 = vld [vmem:[#allocation3 + $0xa4] sm:$0xff] }
 0x2d5   :  { %4898 = vmatmul.msk.f32.gmra.mxu2 %vm207_vm1, %v3178_v58 }
 0x2d7   :  { %v2817_v10 = vpop.f32.mrf.mxu0 }
 0x2d9   :  { %v7320_v16 = vpop.f32.mrf.mxu1 }
 0x2da   :  { %4920 = vmatmul.msk.f32.gmra.mxu0 %vm207_vm1, %v3410_v3 }
 0x2db   :  { %4899 = vmatmul.msk.f32.vlgmr.msrb.gmra.mxu3 %vm207_vm1, %v3143_v36 }
 0x2dc   :  { %4878 = vmatmul.msk.f32.gmra.mxu1 %vm207_vm1, %v2880_v0 }
 0x2de   :  { %v2704_v35 = vpop.f32.mrf.mxu3 }
 0x2df   :  { %v2818_v57 = vadd.f32 %v2817_v10, %v2704_v35  ;;  %v2820_v8 = vpop.f32.mrf.mxu0 }
 0x2e1   :  { %v2951_v45 = vpop.f32.mrf.mxu1 }
 0x2e2   :  { %v2999_v51 = vadd.f32 %v2951_v45, %v2818_v57  ;;  %4921 = vmatmul.msk.f32.gmra.mxu0 %vm207_vm1, %v3411_v60 }
 0x2e3   :  { %4900 = vmatmul.msk.f32.gmra.mxu3 %vm207_vm1, %v3144_v17 }
 0x2e4   :  { %v3018_v30 = vadd.f32 %v7328_v48, %v2999_v51  ;;  %v3416_v51 = vld [vmem:[#allocation3 + $0xb6] sm:$0xff] }
 0x2e6   :  { %3034 = vst.msk [vmem:[#allocation4] sm:$0xff] %vm207_vm1, %v3018_v30  ;;  %v2707_v59 = vpop.f32.mrf.mxu3  ;;  %v3089_v27 = vmul.f32 %v3018_v30, %v3018_v30  ;;  %v3051_v19 = vsel %vm207_vm1, %v3018_v30, 0.0  ;;  %v3149_v30 = vld [vmem:[#allocation3 + $0xac] sm:$0xff] }
 0x2e7   :  { %v2821_v32 = vadd.f32 %v2820_v8, %v2707_v59  ;;  %v2823_v54 = vpop.f32.mrf.mxu0 }
 0x2e8   :  { %v3105_v29 = vsel %vm207_vm1, %v3089_v27, 0.0 }
 0x2e9   :  { %v2954_v61 = vpop.f32.mrf.mxu1 }
 0x2ea   :  { %v3000_v20 = vadd.f32 %v2954_v61, %v2821_v32  ;;  %4922 = vmatmul.msk.f32.gmra.mxu0 %vm207_vm1, %v3412_v9 }
 0x2eb   :  { %4901 = vmatmul.msk.f32.gmra.mxu3 %vm207_vm1, %v3145_v37 }
 0x2ec   :  { %v3019_v15 = vadd.f32 %v7328_v48, %v3000_v20 }
 0x2ee   :  { %3035 = vst.msk [vmem:[#allocation4 + $0x8] sm:$0xff] %vm207_vm1, %v3019_v15  ;;  %v3052_v28 = vsel %vm207_vm1, %v3019_v15, 0.0  ;;  %v3090_v56 = vmul.f32 %v3019_v15, %v3019_v15  ;;  %v2710_v12 = vpop.f32.mrf.mxu3 }
 0x2ef   :  { %v3053_v52 = vadd.f32 %v3052_v28, %v3051_v19  ;;  %v2824_v63 = vadd.f32 %v2823_v54, %v2710_v12  ;;  %v2826_v4 = vpop.f32.mrf.mxu0  ;;  %v3417_v28 = vld [vmem:[#allocation3 + $0xbe] sm:$0xff]  ;;  %v3150_v12 = vld [vmem:[#allocation3 + $0xb4] sm:$0xff] }
 0x2f0   :  { %v3106_v23 = vsel %vm207_vm1, %v3090_v56, 0.0 }
 0x2f1   :  { %v3107_v22 = vadd.f32 %v3106_v23, %v3105_v29  ;;  %v2957_v7 = vpop.f32.mrf.mxu1 }
 0x2f2   :  { %v3001_v44 = vadd.f32 %v2957_v7, %v2824_v63  ;;  %4923 = vmatmul.msk.f32.gmra.mxu0 %vm207_vm1, %v3413_v24 }
 0x2f3   :  { %4902 = vmatmul.msk.f32.gmra.mxu3 %vm207_vm1, %v3146_v18 }
 0x2f4   :  { %v3020_v40 = vadd.f32 %v7328_v48, %v3001_v44 }
 0x2f6   :  { %3036 = vst.msk [vmem:[#allocation4 + $0x10] sm:$0xff] %vm207_vm1, %v3020_v40  ;;  %v3054_v13 = vsel %vm207_vm1, %v3020_v40, 0.0  ;;  %v3091_v47 = vmul.f32 %v3020_v40, %v3020_v40  ;;  %v2713_v25 = vpop.f32.mrf.mxu3  ;;  %v3418_v40 = vld [vmem:[#allocation3 + $0xc6] sm:$0xff] }
 0x2f7   :  { %v3055_v11 = vadd.f32 %v3054_v13, %v3053_v52  ;;  %v2827_v38 = vadd.f32 %v2826_v4, %v2713_v25  ;;  %v2829_v49 = vpop.f32.mrf.mxu0 }
 0x2f8   :  { %v3108_v41 = vsel %vm207_vm1, %v3091_v47, 0.0  ;;  %v3151_v47 = vld [vmem:[#allocation3 + $0xbc] sm:$0xff] }
 0x2f9   :  { %v3109_v39 = vadd.f32 %v3108_v41, %v3107_v22  ;;  %v2960_v26 = vpop.f32.mrf.mxu1 }
 0x2fa   :  { %v3002_v43 = vadd.f32 %v2960_v26, %v2827_v38  ;;  %4924 = vmatmul.msk.f32.gmra.mxu0 %vm207_vm1, %v3414_v5 }
 0x2fb   :  { %4903 = vmatmul.msk.f32.gmra.mxu3 %vm207_vm1, %v3147_v14 }
 0x2fc   :  { %v3021_v53 = vadd.f32 %v7328_v48, %v3002_v43 }
 0x2fe   :  { %3037 = vst.msk [vmem:[#allocation4 + $0x18] sm:$0xff] %vm207_vm1, %v3021_v53  ;;  %v3056_v1 = vsel %vm207_vm1, %v3021_v53, 0.0  ;;  %v3092_v21 = vmul.f32 %v3021_v53, %v3021_v53  ;;  %v2716_v31 = vpop.f32.mrf.mxu3  ;;  %v3419_v53 = vld [vmem:[#allocation3 + $0xce] sm:$0xff] }
 0x2ff   :  { %v3057_v2 = vadd.f32 %v3056_v1, %v3055_v11  ;;  %v2830_v6 = vadd.f32 %v2829_v49, %v2716_v31  ;;  %v2832_v62 = vpop.f32.mrf.mxu0 }
 0x300   :  { %v3110_v50 = vsel %vm207_vm1, %v3092_v21, 0.0  ;;  %v3152_v21 = vld [vmem:[#allocation3 + $0xc4] sm:$0xff] }
 0x301   :  { %v3111_v34 = vadd.f32 %v3110_v50, %v3109_v39  ;;  %v2963_v33 = vpop.f32.mrf.mxu1 }
 0x302   :  { %v3003_v42 = vadd.f32 %v2963_v33, %v2830_v6  ;;  %4925 = vmatmul.msk.f32.gmra.mxu0 %vm207_vm1, %v3415_v55 }
 0x303   :  { %4904 = vmatmul.msk.f32.gmra.mxu3 %vm207_vm1, %v3148_v46 }
 0x304   :  { %v3022_v58 = vadd.f32 %v7328_v48, %v3003_v42 }
 0x306   :  { %3038 = vst.msk [vmem:[#allocation4 + $0x20] sm:$0xff] %vm207_vm1, %v3022_v58  ;;  %v3058_v10 = vsel %vm207_vm1, %v3022_v58, 0.0  ;;  %v3093_v3 = vmul.f32 %v3022_v58, %v3022_v58  ;;  %v2719_v36 = vpop.f32.mrf.mxu3  ;;  %v3420_v58 = vld [vmem:[#allocation3 + $0xd6] sm:$0xff] }
 0x307   :  { %v3059_v0 = vadd.f32 %v3058_v10, %v3057_v2  ;;  %v2833_v35 = vadd.f32 %v2832_v62, %v2719_v36  ;;  %v2835_v57 = vpop.f32.mrf.mxu0 }
 0x308   :  { %v3112_v8 = vsel %vm207_vm1, %v3093_v3, 0.0  ;;  %v3153_v3 = vld [vmem:[#allocation3 + $0xcc] sm:$0xff] }
 0x309   :  { %v3113_v45 = vadd.f32 %v3112_v8, %v3111_v34  ;;  %v2966_v60 = vpop.f32.mrf.mxu1 }
 0x30a   :  { %v3004_v17 = vadd.f32 %v2966_v60, %v2833_v35  ;;  %4926 = vmatmul.msk.f32.gmra.mxu0 %vm207_vm1, %v3416_v51 }
 0x30b   :  { %4905 = vmatmul.msk.f32.gmra.mxu3 %vm207_vm1, %v3149_v30 }
 0x30c   :  { %v3023_v59 = vadd.f32 %v7328_v48, %v3004_v17 }
 0x30e   :  { %3039 = vst.msk [vmem:[#allocation4 + $0x28] sm:$0xff] %vm207_vm1, %v3023_v59  ;;  %v3060_v32 = vsel %vm207_vm1, %v3023_v59, 0.0  ;;  %v3094_v54 = vmul.f32 %v3023_v59, %v3023_v59  ;;  %v2722_v61 = vpop.f32.mrf.mxu3  ;;  %v3421_v59 = vld [vmem:[#allocation3 + $0xde] sm:$0xff] }
 0x30f   :  { %v3061_v9 = vadd.f32 %v3060_v32, %v3059_v0  ;;  %v2836_v20 = vadd.f32 %v2835_v57, %v2722_v61  ;;  %v2838_v37 = vpop.f32.mrf.mxu0 }
 0x310   :  { %v3114_v27 = vsel %vm207_vm1, %v3094_v54, 0.0  ;;  %v3154_v54 = vld [vmem:[#allocation3 + $0xd4] sm:$0xff] }
 0x311   :  { %v3115_v15 = vadd.f32 %v3114_v27, %v3113_v45  ;;  %v2969_v19 = vpop.f32.mrf.mxu1 }
 0x312   :  { %v3005_v56 = vadd.f32 %v2969_v19, %v2836_v20  ;;  %4927 = vmatmul.msk.f32.gmra.mxu0 %vm207_vm1, %v3417_v28 }
 0x313   :  { %4906 = vmatmul.msk.f32.gmra.mxu3 %vm207_vm1, %v3150_v12 }
 0x314   :  { %v3024_v52 = vadd.f32 %v7328_v48, %v3005_v56 }
 0x316   :  { %3040 = vst.msk [vmem:[#allocation4 + $0x30] sm:$0xff] %vm207_vm1, %v3024_v52  ;;  %v3062_v63 = vsel %vm207_vm1, %v3024_v52, 0.0  ;;  %v3095_v4 = vmul.f32 %v3024_v52, %v3024_v52  ;;  %v2725_v29 = vpop.f32.mrf.mxu3  ;;  %v3422_v52 = vld [vmem:[#allocation3 + $0xe6] sm:$0xff] }
 0x317   :  { %v3063_v23 = vadd.f32 %v3062_v63, %v3061_v9  ;;  %v2839_v22 = vadd.f32 %v2838_v37, %v2725_v29  ;;  %v2841_v7 = vpop.f32.mrf.mxu0 }
 0x318   :  { %v3116_v24 = vsel %vm207_vm1, %v3095_v4, 0.0  ;;  %v3155_v4 = vld [vmem:[#allocation3 + $0xdc] sm:$0xff] }
 0x319   :  { %v3117_v44 = vadd.f32 %v3116_v24, %v3115_v15  ;;  %v2972_v18 = vpop.f32.mrf.mxu1 }
 0x31a   :  { %v3006_v13 = vadd.f32 %v2972_v18, %v2839_v22  ;;  %4928 = vmatmul.msk.f32.gmra.mxu0 %vm207_vm1, %v3418_v40  ;;  %v3248_v40 = vpop.f32.mrf.mxu2 }
 0x31b   :  { %4907 = vmatmul.msk.f32.gmra.mxu3 %vm207_vm1, %v3151_v47 }
 0x31c   :  { %v3025_v25 = vadd.f32 %v7328_v48, %v3006_v13 }
 0x31e   :  { %3041 = vst.msk [vmem:[#allocation4 + $0x38] sm:$0xff] %vm207_vm1, %v3025_v25  ;;  %v3064_v11 = vsel %vm207_vm1, %v3025_v25, 0.0  ;;  %v3096_v38 = vmul.f32 %v3025_v25, %v3025_v25  ;;  %v2728_v49 = vpop.f32.mrf.mxu3 }
 0x31f   :  { %v3065_v41 = vadd.f32 %v3064_v11, %v3063_v23  ;;  %v2842_v39 = vadd.f32 %v2841_v7, %v2728_v49  ;;  %v2844_v26 = vpop.f32.mrf.mxu0  ;;  %v3423_v11 = vld [vmem:[#allocation3 + $0xee] sm:$0xff]  ;;  %v3156_v49 = vld [vmem:[#allocation3 + $0xe4] sm:$0xff] }
 0x320   :  { %v3118_v5 = vsel %vm207_vm1, %v3096_v38, 0.0 }
 0x321   :  { %v3119_v43 = vadd.f32 %v3118_v5, %v3117_v44  ;;  %v2975_v14 = vpop.f32.mrf.mxu1 }
 0x322   :  { %v3007_v1 = vadd.f32 %v2975_v14, %v2842_v39  ;;  %4929 = vmatmul.msk.f32.gmra.mxu0 %vm207_vm1, %v3419_v53 }
 0x323   :  { %4908 = vmatmul.msk.f32.gmra.mxu3 %vm207_vm1, %v3152_v21 }
 0x324   :  { %v3026_v31 = vadd.f32 %v7328_v48, %v3007_v1 }
 0x326   :  { %3042 = vst.msk [vmem:[#allocation4 + $0x40] sm:$0xff] %vm207_vm1, %v3026_v31  ;;  %v3066_v2 = vsel %vm207_vm1, %v3026_v31, 0.0  ;;  %v3097_v6 = vmul.f32 %v3026_v31, %v3026_v31  ;;  %v2731_v62 = vpop.f32.mrf.mxu3 }
 0x327   :  { %v3067_v50 = vadd.f32 %v3066_v2, %v3065_v41  ;;  %v2845_v34 = vadd.f32 %v2844_v26, %v2731_v62  ;;  %v2847_v33 = vpop.f32.mrf.mxu0  ;;  %v3424_v2 = vld [vmem:[#allocation3 + $0xf6] sm:$0x3] }
 0x328   :  { %v3120_v55 = vsel %vm207_vm1, %v3097_v6, 0.0  ;;  %v3251_v6 = vpop.f32.mrf.mxu2 }
 0x329   :  { %v3121_v42 = vadd.f32 %v3120_v55, %v3119_v43  ;;  %v2978_v46 = vpop.f32.mrf.mxu1 }
 0x32a   :  { %v3008_v10 = vadd.f32 %v2978_v46, %v2845_v34  ;;  %4930 = vmatmul.msk.f32.gmra.mxu0 %vm207_vm1, %v3420_v58 }
 0x32b   :  { %4909 = vmatmul.msk.f32.gmra.mxu3 %vm207_vm1, %v3153_v3 }
 0x32c   :  { %v3027_v36 = vadd.f32 %v7328_v48, %v3008_v10 }
 0x32e   :  { %3043 = vst.msk [vmem:[#allocation4 + $0x48] sm:$0xff] %vm207_vm1, %v3027_v36  ;;  %v3068_v0 = vsel %vm207_vm1, %v3027_v36, 0.0  ;;  %v3098_v35 = vmul.f32 %v3027_v36, %v3027_v36  ;;  %v2734_v57 = vpop.f32.mrf.mxu3 }
 0x32f   :  { %v3069_v8 = vadd.f32 %v3068_v0, %v3067_v50  ;;  %v2848_v45 = vadd.f32 %v2847_v33, %v2734_v57  ;;  %v2850_v60 = vpop.f32.mrf.mxu0  ;;  %v3157_v50 = vld [vmem:[#allocation3 + $0xec] sm:$0xff]  ;;  %v3158_v57 = vld [vmem:[#allocation3 + $0xf4] sm:$0x3] }
 0x330   :  { %v3122_v51 = vsel %vm207_vm1, %v3098_v35, 0.0 }
 0x331   :  { %v3123_v17 = vadd.f32 %v3122_v51, %v3121_v42  ;;  %v2981_v30 = vpop.f32.mrf.mxu1 }
 0x332   :  { %v3009_v32 = vadd.f32 %v2981_v30, %v2848_v45  ;;  %4931 = vmatmul.msk.f32.gmra.mxu0 %vm207_vm1, %v3421_v59 }
 0x333   :  { %4910 = vmatmul.msk.f32.gmra.mxu3 %vm207_vm1, %v3154_v54 }
 0x334   :  { %v3028_v61 = vadd.f32 %v7328_v48, %v3009_v32 }
 0x336   :  { %3044 = vst.msk [vmem:[#allocation4 + $0x50] sm:$0xff] %vm207_vm1, %v3028_v61  ;;  %v3070_v9 = vsel %vm207_vm1, %v3028_v61, 0.0  ;;  %v3099_v20 = vmul.f32 %v3028_v61, %v3028_v61  ;;  %v2737_v37 = vpop.f32.mrf.mxu3 }
 0x337   :  { %v3071_v27 = vadd.f32 %v3070_v9, %v3069_v8  ;;  %v2851_v15 = vadd.f32 %v2850_v60, %v2737_v37  ;;  %v2853_v19 = vpop.f32.mrf.mxu0  ;;  %v3254_v8 = vpop.f32.mrf.mxu2 }
 0x338   :  { %v3124_v28 = vsel %vm207_vm1, %v3099_v20, 0.0 }
 0x339   :  { %v3125_v56 = vadd.f32 %v3124_v28, %v3123_v17  ;;  %v2984_v12 = vpop.f32.mrf.mxu1 }
 0x33a   :  { %v3010_v63 = vadd.f32 %v2984_v12, %v2851_v15  ;;  %4932 = vmatmul.msk.f32.gmra.mxu0 %vm207_vm1, %v3422_v52 }
 0x33b   :  { %4911 = vmatmul.msk.f32.gmra.mxu3 %vm207_vm1, %v3155_v4 }
 0x33c   :  { %v3029_v29 = vadd.f32 %v7328_v48, %v3010_v63 }
 0x33e   :  { %3045 = vst.msk [vmem:[#allocation4 + $0x58] sm:$0xff] %vm207_vm1, %v3029_v29  ;;  %v3072_v23 = vsel %vm207_vm1, %v3029_v29, 0.0  ;;  %v3100_v22 = vmul.f32 %v3029_v29, %v3029_v29  ;;  %v2740_v7 = vpop.f32.mrf.mxu3 }
 0x33f   :  { %v3073_v24 = vadd.f32 %v3072_v23, %v3071_v27  ;;  %v2854_v44 = vadd.f32 %v2853_v19, %v2740_v7  ;;  %v2856_v18 = vpop.f32.mrf.mxu0  ;;  %v3257_v27 = vpop.f32.mrf.mxu2 }
 0x340   :  { %v3126_v13 = vsel %vm207_vm1, %v3100_v22, 0.0 }
 0x341   :  { %v3127_v47 = vadd.f32 %v3126_v13, %v3125_v56  ;;  %v2987_v25 = vpop.f32.mrf.mxu1 }
 0x342   :  { %v3011_v38 = vadd.f32 %v2987_v25, %v2854_v44  ;;  %4933 = vmatmul.msk.f32.gmra.mxu0 %vm207_vm1, %v3423_v11 }
 0x343   :  { %4912 = vmatmul.msk.f32.gmra.mxu3 %vm207_vm1, %v3156_v49 }
 0x344   :  { %v3030_v41 = vadd.f32 %v7328_v48, %v3011_v38 }
 0x346   :  { %3046 = vst.msk [vmem:[#allocation4 + $0x60] sm:$0xff] %vm207_vm1, %v3030_v41  ;;  %v3074_v39 = vsel %vm207_vm1, %v3030_v41, 0.0  ;;  %v3101_v26 = vmul.f32 %v3030_v41, %v3030_v41  ;;  %v2743_v5 = vpop.f32.mrf.mxu3 }
 0x347   :  { %v3075_v43 = vadd.f32 %v3074_v39, %v3073_v24  ;;  %v2857_v14 = vadd.f32 %v2856_v18, %v2743_v5  ;;  %v2859_v53 = vpop.f32.mrf.mxu0  ;;  %v3260_v24 = vpop.f32.mrf.mxu2 }
 0x348   :  { %v3128_v1 = vsel %vm207_vm1, %v3101_v26, 0.0 }
 0x349   :  { %v3129_v21 = vadd.f32 %v3128_v1, %v3127_v47  ;;  %v2990_v31 = vpop.f32.mrf.mxu1 }
 0x34a   :  { %v3012_v62 = vadd.f32 %v2990_v31, %v2857_v14  ;;  %4934 = vmatmul.msk.f32.gmra.mxu0 %vm207_vm1, %v3424_v2 }
 0x34b   :  { %4913 = vmatmul.msk.f32.gmra.mxu3 %vm207_vm1, %v3157_v50 }
 0x34c   :  { %v3031_v34 = vadd.f32 %v7328_v48, %v3012_v62 }
 0x34e   :  { %3047 = vst.msk [vmem:[#allocation4 + $0x68] sm:$0xff] %vm207_vm1, %v3031_v34  ;;  %v3076_v33 = vsel %vm207_vm1, %v3031_v34, 0.0  ;;  %v3102_v55 = vmul.f32 %v3031_v34, %v3031_v34  ;;  %v2746_v42 = vpop.f32.mrf.mxu3 }
 0x34f   :  { %v3077_v46 = vadd.f32 %v3076_v33, %v3075_v43  ;;  %v2860_v58 = vadd.f32 %v2859_v53, %v2746_v42  ;;  %v3494_v10 = vpop.f32.mrf.mxu0  ;;  %v3263_v14 = vpop.f32.mrf.mxu2 }
 0x350   :  { %v3130_v3 = vsel %vm207_vm1, %v3102_v55, 0.0 }
 0x351   :  { %v3131_v36 = vadd.f32 %v3130_v3, %v3129_v21  ;;  %v2993_v0 = vpop.f32.mrf.mxu1 }
 0x352   :  { %v3013_v35 = vadd.f32 %v2993_v0, %v2860_v58 }
 0x353   :  { %4914 = vmatmul.msk.f32.gmra.mxu3 %vm207_vm1, %v3158_v57 }
 0x354   :  { %v3032_v45 = vadd.f32 %v7328_v48, %v3013_v35 }
 0x356   :  { %3048 = vst.msk [vmem:[#allocation4 + $0x70] sm:$0xff] %vm207_vm1, %v3032_v45  ;;  %v3078_v60 = vsel %vm207_vm1, %v3032_v45, 0.0  ;;  %v3103_v51 = vmul.f32 %v3032_v45, %v3032_v45  ;;  %v2749_v17 = vpop.f32.mrf.mxu3 }
 0x357   :  { %v3079_v30 = vadd.f32 %v3078_v60, %v3077_v46  ;;  %v2863_v59 = vadd.f32 %v7320_v16, %v2749_v17  ;;  %v3497_v32 = vpop.f32.mrf.mxu0  ;;  %v3266_v42 = vpop.f32.mrf.mxu2 }
 0x358   :  { %v3132_v54 = vsel %vm207_vm1, %v3103_v51, 0.0 }
 0x359   :  { %v3133_v61 = vadd.f32 %v3132_v54, %v3131_v36  ;;  %v2996_v9 = vpop.f32.mrf.mxu1 }
 0x35a   :  { %v3014_v20 = vadd.f32 %v2996_v9, %v2863_v59 }
 0x35c   :  { %v3033_v37 = vadd.f32 %v7328_v48, %v3014_v20  ;;  %v7450_v20 = vld [vmem:[%s7888_s9 + $0x18] sm:$0xff] }
 0x35d   :  { %3957 = vmatpush.msrb.mxu2 %v7450_v20 }
 0x35e   :  { %v3104_v15 = vmul.f32 %v3033_v37, %v3033_v37  ;;  %v3361_v19 = vpop.f32.mrf.mxu3  ;;  %v3080_v28 = vsel %vm3049_vm5, %v3033_v37, 0.0 }
 0x35f   :  { %v3362_v56 = vadd.f32 %v3361_v19, %v3248_v40  ;;  %v3500_v12 = vpop.f32.mrf.mxu0  ;;  %v7422_v52 = vadd.f32 %v3080_v28, %v3079_v30  ;;  %v3269_v17 = vpop.f32.mrf.mxu2 }
 0x360   :  { %v3134_v16 = vsel %vm3049_vm5, %v3104_v15, 0.0 }
 0x361   :  { %v7425_v63 = vadd.f32 %v3134_v16, %v3133_v61  ;;  %v3542_v4 = vadd.f32 %v3494_v10, %v3362_v56 }
 0x363   :  { %v3558_v29 = vadd.f32 %v7328_v48, %v3542_v4 }
 0x365   :  { %3574 = vst.msk [vmem:[#allocation4 + $0x7a] sm:$0xff] %vm207_vm1, %v3558_v29  ;;  %v3628_v18 = vmul.f32 %v3558_v29, %v3558_v29  ;;  %v3590_v13 = vsel %vm207_vm1, %v3558_v29, 0.0 }
 0x366   :  { %v3364_v23 = vpop.f32.mrf.mxu3 }
 0x367   :  { %v3365_v22 = vadd.f32 %v3364_v23, %v3251_v6  ;;  %v3503_v7 = vpop.f32.mrf.mxu0  ;;  %v3644_v49 = vsel %vm207_vm1, %v3628_v18, 0.0  ;;  %v3272_v4 = vpop.f32.mrf.mxu2  ;;  %v7464_v23 = vld [vmem:[%s7888_s9 + $0x38] sm:$0xff] }
 0x368   :  { %3916 = vmatpush.msra.mxu1 %v7464_v23 }
 0x369   :  { %v3543_v44 = vadd.f32 %v3497_v32, %v3365_v22 }
 0x36b   :  { %v3559_v40 = vadd.f32 %v7328_v48, %v3543_v44 }
 0x36d   :  { %3575 = vst.msk [vmem:[#allocation4 + $0x82] sm:$0xff] %vm207_vm1, %v3559_v40  ;;  %v3591_v47 = vsel %vm207_vm1, %v3559_v40, 0.0  ;;  %v3629_v25 = vmul.f32 %v3559_v40, %v3559_v40 }
 0x36e   :  { %v3592_v11 = vadd.f32 %v3591_v47, %v3590_v13  ;;  %v3367_v38 = vpop.f32.mrf.mxu3 }
 0x36f   :  { %v3645_v41 = vsel %vm207_vm1, %v3629_v25, 0.0  ;;  %v3368_v39 = vadd.f32 %v3367_v38, %v3254_v8  ;;  %v3506_v26 = vpop.f32.mrf.mxu0  ;;  %v3275_v13 = vpop.f32.mrf.mxu2 }
 0x370   :  { %v3646_v5 = vadd.f32 %v3645_v41, %v3644_v49 }
 0x371   :  { %v3544_v43 = vadd.f32 %v3500_v12, %v3368_v39 }
 0x373   :  { %v3560_v53 = vadd.f32 %v7328_v48, %v3544_v43 }
 0x375   :  { %3576 = vst.msk [vmem:[#allocation4 + $0x8a] sm:$0xff] %vm207_vm1, %v3560_v53  ;;  %v3593_v1 = vsel %vm207_vm1, %v3560_v53, 0.0  ;;  %v3630_v21 = vmul.f32 %v3560_v53, %v3560_v53 }
 0x376   :  { %v3594_v31 = vadd.f32 %v3593_v1, %v3592_v11  ;;  %v3370_v2 = vpop.f32.mrf.mxu3 }
 0x377   :  { %v3647_v6 = vsel %vm207_vm1, %v3630_v21, 0.0  ;;  %v3371_v62 = vadd.f32 %v3370_v2, %v3257_v27  ;;  %v3509_v50 = vpop.f32.mrf.mxu0  ;;  %v3278_v39 = vpop.f32.mrf.mxu2 }
 0x378   :  { %v3648_v34 = vadd.f32 %v3647_v6, %v3646_v5 }
 0x379   :  { %v3545_v33 = vadd.f32 %v3503_v7, %v3371_v62  ;;  %v7484_v62 = vld [vmem:[%s7888_s9 + $0x30] sm:$0xff] }
 0x37a   :  { %3917 = vmatpush.msra.mxu1 %v7484_v62 }
 0x37b   :  { %v3561_v55 = vadd.f32 %v7328_v48, %v3545_v33 }
 0x37d   :  { %3577 = vst.msk [vmem:[#allocation4 + $0x92] sm:$0xff] %vm207_vm1, %v3561_v55  ;;  %v3595_v46 = vsel %vm207_vm1, %v3561_v55, 0.0  ;;  %v3631_v58 = vmul.f32 %v3561_v55, %v3561_v55 }
 0x37e   :  { %v3596_v10 = vadd.f32 %v3595_v46, %v3594_v31  ;;  %v3373_v3 = vpop.f32.mrf.mxu3 }
 0x37f   :  { %v3649_v36 = vsel %vm207_vm1, %v3631_v58, 0.0  ;;  %v3374_v0 = vadd.f32 %v3373_v3, %v3260_v24  ;;  %v3512_v35 = vpop.f32.mrf.mxu0  ;;  %v3281_v21 = vpop.f32.mrf.mxu2 }
 0x380   :  { %v3650_v57 = vadd.f32 %v3649_v36, %v3648_v34 }
 0x381   :  { %v3546_v8 = vadd.f32 %v3506_v26, %v3374_v0 }
 0x383   :  { %v3562_v45 = vadd.f32 %v7328_v48, %v3546_v8 }
 0x385   :  { %3578 = vst.msk [vmem:[#allocation4 + $0x9a] sm:$0xff] %vm207_vm1, %v3562_v45  ;;  %v3597_v60 = vsel %vm207_vm1, %v3562_v45, 0.0  ;;  %v3632_v51 = vmul.f32 %v3562_v45, %v3562_v45 }
 0x386   :  { %v3598_v30 = vadd.f32 %v3597_v60, %v3596_v10  ;;  %v3376_v59 = vpop.f32.mrf.mxu3 }
 0x387   :  { %v3651_v32 = vsel %vm207_vm1, %v3632_v51, 0.0  ;;  %v3377_v54 = vadd.f32 %v3376_v59, %v3263_v14  ;;  %v3515_v9 = vpop.f32.mrf.mxu0  ;;  %v7476_v14 = vld [vmem:[%s7888_s9 + $0x10] sm:$0xff] }
 0x388   :  { %v3652_v61 = vadd.f32 %v3651_v32, %v3650_v57  ;;  %3958 = vmatpush.msrb.mxu2 %v7476_v14 }
 0x389   :  { %v3547_v37 = vadd.f32 %v3509_v50, %v3377_v54 }
 0x38b   :  { %v3563_v27 = vadd.f32 %v7328_v48, %v3547_v37 }
 0x38d   :  { %3579 = vst.msk [vmem:[#allocation4 + $0xa2] sm:$0xff] %vm207_vm1, %v3563_v27  ;;  %v3599_v15 = vsel %vm207_vm1, %v3563_v27, 0.0  ;;  %v3633_v19 = vmul.f32 %v3563_v27, %v3563_v27 }
 0x38e   :  { %v7456_v28 = vadd.f32 %v3599_v15, %v3598_v30  ;;  %v3379_v56 = vpop.f32.mrf.mxu3 }
 0x38f   :  { %v3653_v12 = vsel %vm207_vm1, %v3633_v19, 0.0  ;;  %v3380_v16 = vadd.f32 %v3379_v56, %v3266_v42  ;;  %v3518_v7 = vpop.f32.mrf.mxu0  ;;  %v3284_v42 = vpop.f32.mrf.mxu2 }
 0x390   :  { %v7459_v29 = vadd.f32 %v3653_v12, %v3652_v61 }
 0x391   :  { %v3548_v22 = vadd.f32 %v3512_v35, %v3380_v16 }
 0x393   :  { %v3564_v24 = vadd.f32 %v7328_v48, %v3548_v22 }
 0x395   :  { %3580 = vst.msk [vmem:[#allocation4 + $0xaa] sm:$0xff] %vm207_vm1, %v3564_v24  ;;  %v3634_v60 = vmul.f32 %v3564_v24, %v3564_v24  ;;  %v3601_v59 = vsel %vm207_vm1, %v3564_v24, 0.0 }
 0x396   :  { %v3382_v44 = vpop.f32.mrf.mxu3  ;;  %v3602_v27 = vadd.f32 %v3601_v59, %v7456_v28 }
 0x397   :  { %v3383_v18 = vadd.f32 %v3382_v44, %v3269_v17  ;;  %v3521_v25 = vpop.f32.mrf.mxu0  ;;  %v3287_v35 = vpop.f32.mrf.mxu2  ;;  %v3655_v32 = vsel %vm207_vm1, %v3634_v60, 0.0 }
 0x398   :  { %v3656_v56 = vadd.f32 %v3655_v32, %v7459_v29 }
 0x399   :  { %v3549_v40 = vadd.f32 %v3515_v9, %v3383_v18 }
 0x39b   :  { %v3565_v47 = vadd.f32 %v7328_v48, %v3549_v40 }
 0x39d   :  { %3581 = vst.msk [vmem:[#allocation4 + $0xb2] sm:$0xff] %vm207_vm1, %v3565_v47  ;;  %v3635_v17 = vmul.f32 %v3565_v47, %v3565_v47  ;;  %v3603_v37 = vsel %vm207_vm1, %v3565_v47, 0.0 }
 0x39e   :  { %v3385_v11 = vpop.f32.mrf.mxu3  ;;  %v3604_v22 = vadd.f32 %v3603_v37, %v3602_v27 }
 0x39f   :  { %v3386_v38 = vadd.f32 %v3385_v11, %v3272_v4  ;;  %v3524_v26 = vpop.f32.mrf.mxu0  ;;  %v3290_v9 = vpop.f32.mrf.mxu2  ;;  %v3657_v15 = vsel %vm207_vm1, %v3635_v17, 0.0 }
 0x3a0   :  { %v3658_v18 = vadd.f32 %v3657_v15, %v3656_v56 }
 0x3a1   :  { %v3550_v49 = vadd.f32 %v3518_v7, %v3386_v38 }
 0x3a3   :  { %v3566_v41 = vadd.f32 %v7328_v48, %v3550_v49 }
 0x3a5   :  { %3582 = vst.msk [vmem:[#allocation4 + $0xba] sm:$0xff] %vm207_vm1, %v3566_v41  ;;  %v3636_v54 = vmul.f32 %v3566_v41, %v3566_v41  ;;  %v3605_v12 = vsel %vm207_vm1, %v3566_v41, 0.0 }
 0x3a6   :  { %v3388_v5 = vpop.f32.mrf.mxu3  ;;  %v3606_v28 = vadd.f32 %v3605_v12, %v3604_v22 }
 0x3a7   :  { %v3389_v43 = vadd.f32 %v3388_v5, %v3275_v13  ;;  %v3527_v6 = vpop.f32.mrf.mxu0  ;;  %v3659_v7 = vsel %vm207_vm1, %v3636_v54, 0.0 }
 0x3a8   :  { %v3660_v11 = vadd.f32 %v3659_v7, %v3658_v18 }
 0x3a9   :  { %v3551_v53 = vadd.f32 %v3521_v25, %v3389_v43 }
 0x3ab   :  { %v3567_v1 = vadd.f32 %v7328_v48, %v3551_v53 }
 0x3ad   :  { %3583 = vst.msk [vmem:[#allocation4 + $0xc2] sm:$0xff] %vm207_vm1, %v3567_v1  ;;  %v3637_v19 = vmul.f32 %v3567_v1, %v3567_v1  ;;  %v3607_v40 = vsel %vm207_vm1, %v3567_v1, 0.0 }
 0x3ae   :  { %v3391_v31 = vpop.f32.mrf.mxu3  ;;  %v3608_v38 = vadd.f32 %v3607_v40, %v3606_v28 }
 0x3af   :  { %v3392_v2 = vadd.f32 %v3391_v31, %v3278_v39  ;;  %v3530_v58 = vpop.f32.mrf.mxu0  ;;  %v3661_v13 = vsel %vm207_vm1, %v3637_v19, 0.0  ;;  %v3082_v31 = vrot.slane %v7422_v52, 4 }
 0x3b1   :  { %v3552_v50 = vadd.f32 %v3524_v26, %v3392_v2  ;;  %v3662_v26 = vadd.f32 %v3661_v13, %v3660_v11 }
 0x3b3   :  { %v3568_v34 = vadd.f32 %v7328_v48, %v3552_v50 }
 0x3b5   :  { %3584 = vst.msk [vmem:[#allocation4 + $0xca] sm:$0xff] %vm207_vm1, %v3568_v34  ;;  %v3638_v24 = vmul.f32 %v3568_v34, %v3568_v34  ;;  %v3609_v29 = vsel %vm207_vm1, %v3568_v34, 0.0 }
 0x3b6   :  { %v3394_v33 = vpop.f32.mrf.mxu3  ;;  %v3610_v43 = vadd.f32 %v3609_v29, %v3608_v38 }
 0x3b7   :  { %v3395_v55 = vadd.f32 %v3394_v33, %v3281_v21  ;;  %v3533_v8 = vpop.f32.mrf.mxu0  ;;  %v3663_v49 = vsel %vm207_vm1, %v3638_v24, 0.0  ;;  %v3293_v21 = vpop.f32.mrf.mxu2 }
 0x3b8   :  { %v3664_v2 = vadd.f32 %v3663_v49, %v3662_v26 }
 0x3b9   :  { %v3553_v46 = vadd.f32 %v3527_v6, %v3395_v55 }
 0x3bb   :  { %v3569_v10 = vadd.f32 %v7328_v48, %v3553_v46  ;;  %v3136_v46 = vrot.slane %v7425_v63, 4 }
 0x3bd   :  { %3585 = vst.msk [vmem:[#allocation4 + $0xd2] sm:$0xff] %vm207_vm1, %v3569_v10  ;;  %v3639_v47 = vmul.f32 %v3569_v10, %v3569_v10  ;;  %v3611_v5 = vsel %vm207_vm1, %v3569_v10, 0.0 }
 0x3be   :  { %v3397_v3 = vpop.f32.mrf.mxu3  ;;  %v3612_v34 = vadd.f32 %v3611_v5, %v3610_v43  ;;  %v7527_v43 = vld [vmem:[%s7888_s9 + $0x8] sm:$0xff] }
 0x3bf   :  { %v3398_v36 = vadd.f32 %v3397_v3, %v3284_v42  ;;  %v3536_v16 = vpop.f32.mrf.mxu0  ;;  %v3665_v53 = vsel %vm207_vm1, %v3639_v47, 0.0  ;;  %3959 = vmatpush.msrb.mxu2 %v7527_v43 }
 0x3c1   :  { %v3554_v0 = vadd.f32 %v3530_v58, %v3398_v36  ;;  %v3666_v58 = vadd.f32 %v3665_v53, %v3664_v2 }
 0x3c3   :  { %v3570_v57 = vadd.f32 %v7328_v48, %v3554_v0 }
 0x3c5   :  { %3586 = vst.msk [vmem:[#allocation4 + $0xda] sm:$0xff] %vm207_vm1, %v3570_v57  ;;  %v3640_v41 = vmul.f32 %v3570_v57, %v3570_v57  ;;  %v3613_v6 = vsel %vm207_vm1, %v3570_v57, 0.0  ;;  %v3083_v57 = vadd.f32 %v3082_v31, %v7422_v52  ;;  %v4935_v31 = vld [vmem:[%s7888_s9 + $0x20] sm:$0xff] }
 0x3c6   :  { %v3400_v45 = vpop.f32.mrf.mxu3  ;;  %v3614_v36 = vadd.f32 %v3613_v6, %v3612_v34 }
 0x3c7   :  { %v3401_v51 = vadd.f32 %v3400_v45, %v3287_v35  ;;  %v3667_v33 = vsel %vm207_vm1, %v3640_v41, 0.0  ;;  %v3539_v3 = vpop.f32.mrf.mxu0  ;;  %v3084_v37 = vrot.slane %v3083_v57, 2 }
 0x3c9   :  { %v3555_v30 = vadd.f32 %v3533_v8, %v3401_v51  ;;  %v3668_v8 = vadd.f32 %v3667_v33, %v3666_v58 }
 0x3cb   :  { %v3571_v61 = vadd.f32 %v7328_v48, %v3555_v30  ;;  %v3137_v30 = vadd.f32 %v3136_v46, %v7425_v63 }
 0x3cd   :  { %3587 = vst.msk [vmem:[#allocation4 + $0xe2] sm:$0xff] %vm207_vm1, %v3571_v61  ;;  %v3641_v1 = vmul.f32 %v3571_v61, %v3571_v61  ;;  %v3615_v10 = vsel %vm207_vm1, %v3571_v61, 0.0  ;;  %v3138_v19 = vrot.slane %v3137_v30, 2 }
 0x3ce   :  { %v3403_v4 = vpop.f32.mrf.mxu3  ;;  %v3616_v60 = vadd.f32 %v3615_v10, %v3614_v36  ;;  %v3702_v10 = vld [vmem:[#allocation4] ss:$4 sm:$0xff] }
 0x3cf   :  { %v3404_v44 = vadd.f32 %v3403_v4, %v3290_v9  ;;  %v3669_v0 = vsel %vm207_vm1, %v3641_v1, 0.0  ;;  %v3139_v22 = vadd.f32 %v3138_v19, %v3137_v30  ;;  %v4936_v1 = vld [vmem:[%s7888_s9 + $0x28] sm:$0xff] }
 0x3d0   :  { %v3670_v59 = vadd.f32 %v3669_v0, %v3668_v8  ;;  %3918 = vmatpush.msra.mxu1 %v4936_v1  ;;  %v3742_v8 = vld [vmem:[#allocation4 + $0x2] ss:$4 sm:$0xff]  ;;  %v3768_v19 = vld [vmem:[#allocation4 + $0x63] ss:$4 sm:$0x3f] }
 0x3d1   :  { %v3556_v25 = vadd.f32 %v3536_v16, %v3404_v44  ;;  %v3085_v16 = vadd.f32 %v3084_v37, %v3083_v57  ;;  %v3140_v18 = vrot.slane %v3139_v22, 1  ;;  %v3706_v57 = vld [vmem:[#allocation4 + $0x40] ss:$4 sm:$0xff]  ;;  %v3746_v30 = vld [vmem:[#allocation4 + $0x42] ss:$4 sm:$0xff] }
 0x3d2   :  { %3919 = vmatpush.msra.mxu1 %v4935_v31  ;;  %v3764_v37 = vld [vmem:[#allocation4 + $0x23] ss:$4 sm:$0xff] }
 0x3d3   :  { %v3572_v39 = vadd.f32 %v7328_v48, %v3556_v25  ;;  %v3086_v24 = vrot.slane %v3085_v16, 1  ;;  %v3141_v11 = vadd.f32 %v3140_v18, %v3139_v22  ;;  %v3807_v22 = vld [vmem:[#allocation4 + $0x7b] ss:$4 sm:$0xff]  ;;  %v3793_v18 = vld [vmem:[#allocation4 + $0x9a] ss:$4 sm:$0xff] }
 0x3d5   :  { %3588 = vst.msk [vmem:[#allocation4 + $0xea] sm:$0xff] %vm207_vm1, %v3572_v39  ;;  %v3642_v55 = vmul.f32 %v3572_v39, %v3572_v39  ;;  %v3617_v45 = vsel %vm207_vm1, %v3572_v39, 0.0  ;;  %v3087_v47 = vadd.f32 %v3086_v24, %v3085_v16 }
 0x3d6   :  { %v3406_v50 = vpop.f32.mrf.mxu3  ;;  %v3618_v32 = vadd.f32 %v3617_v45, %v3616_v60  ;;  %v3724_v45 = vld [vmem:[#allocation4 + $0x21] ss:$4 sm:$0xff] }
 0x3d7   :  { %v3407_v42 = vadd.f32 %v3406_v50, %v3293_v21  ;;  %v3671_v51 = vsel %vm207_vm1, %v3642_v55, 0.0  ;;  %v7536_v21 = vld [vmem:[%s7888_s9] sm:$0xff] }
 0x3d8   :  { %v3672_v61 = vadd.f32 %v3671_v51, %v3670_v59  ;;  %3960 = vmatpush.msrb.mxu2 %v7536_v21  ;;  %v3726_v60 = vld [vmem:[#allocation4 + $0x41] ss:$4 sm:$0xff]  ;;  %v3762_v51 = vld [vmem:[#allocation4 + $0x3] ss:$4 sm:$0xff] }
 0x3d9   :  { %v3557_v35 = vadd.f32 %v3539_v3, %v3407_v42  ;;  %v3697_v42 = vld [vmem:[%s7886_s7] sm:$0x1] }
 0x3da   :  { %4113 = vmatpush.msra.mxu2 %v7464_v23  ;;  %v3699_v23 = vld [vmem:[%s7887_s8] sm:$0x1] }
 0x3db   :  { %v3573_v17 = vadd.f32 %v7328_v48, %v3557_v35  ;;  %v3704_v3 = vld [vmem:[#allocation4 + $0x20] ss:$4 sm:$0xff] }
 0x3dc   :  { %4114 = vmatpush.msra.mxu2 %v7484_v62  ;;  %v3722_v62 = vld [vmem:[#allocation4 + $0x1] ss:$4 sm:$0xff]  ;;  %v3708_v59 = vld [vmem:[#allocation4 + $0x60] ss:$4 sm:$0x3f] }
 0x3dd   :  { %v3643_v54 = vmul.f32 %v3573_v17, %v3573_v17  ;;  %v3619_v9 = vsel %vm3049_vm5, %v3573_v17, 0.0  ;;  %v7555_v35 = vld [vmem:[%s7888_s9 + $0x58] sm:$0xff] }
 0x3de   :  { %v3620_v27 = vadd.f32 %v3619_v9, %v3618_v32  ;;  %4115 = vmatpush.msra.mxu2 %v4936_v1  ;;  %4007 = vmatpush.msrb.mxu1 %v7555_v35  ;;  %v3744_v17 = vld [vmem:[#allocation4 + $0x22] ss:$4 sm:$0xff]  ;;  %v3728_v32 = vld [vmem:[#allocation4 + $0x61] ss:$4 sm:$0x3f] }
 0x3df   :  { %v3673_v15 = vsel %vm3049_vm5, %v3643_v54, 0.0  ;;  %v3813_v1 = vld [vmem:[#allocation4 + $0xdb] ss:$4 sm:$0x3f]  ;;  %vm4669_vm5 = vcmask 279552  }
 0x3e0   :  { %v3674_v56 = vadd.f32 %v3673_v15, %v3672_v61  ;;  %v3621_v52 = vrot.slane %v3620_v27, 4  ;;  %4116 = vmatpush.msra.mxu2 %v4935_v31  ;;  %v3748_v15 = vld [vmem:[#allocation4 + $0x62] ss:$4 sm:$0x3f] }
 0x3e2   :  { %v3675_v12 = vrot.slane %v3674_v56, 4  ;;  %v3622_v4 = vadd.f32 %v3621_v52, %v3620_v27  ;;  %v3766_v27 = vld [vmem:[#allocation4 + $0x43] ss:$4 sm:$0xff] }
 0x3e4   :  { %v3676_v48 = vadd.f32 %v3675_v12, %v3674_v56  ;;  %v3623_v7 = vrot.slane %v3622_v4, 2 }
 0x3e6   :  { %v3677_v63 = vrot.slane %v3676_v48, 2  ;;  %v3624_v44 = vadd.f32 %v3623_v7, %v3622_v4  ;;  %v3791_v4 = vld [vmem:[#allocation4 + $0x7a] ss:$4 sm:$0xff] }
 0x3e8   :  { %v3678_v40 = vadd.f32 %v3677_v63, %v3676_v48  ;;  %v3625_v28 = vrot.slane %v3624_v44, 1 }
 0x3ea   :  { %v3679_v13 = vrot.slane %v3678_v40, 1  ;;  %v3626_v25 = vadd.f32 %v3625_v28, %v3624_v44  ;;  %v3827_v44 = vld [vmem:[#allocation4 + $0x7c] ss:$4 sm:$0xff] }
 0x3ec   :  { %v3680_v29 = vadd.f32 %v3679_v13, %v3678_v40  ;;  %v3627_v38 = vadd.f32 %v3626_v25, %v3087_v47  ;;  %v3809_v40 = vld [vmem:[#allocation4 + $0x9b] ss:$4 sm:$0xff] }
 0x3ee   :  { %v3681_v49 = vadd.f32 %v3680_v29, %v3141_v11  ;;  %v3682_v41 = vmul.f32 0.0040983604, %v3627_v38  ;;  %v3847_v11 = vld [vmem:[#allocation4 + $0x7d] ss:$4 sm:$0xff]  ;;  %v3829_v29 = vld [vmem:[#allocation4 + $0x9c] ss:$4 sm:$0xff] }
 0x3ef   :  { %v3795_v38 = vld [vmem:[#allocation4 + $0xba] ss:$4 sm:$0xff] }
 0x3f0   :  { %v3683_v39 = vmul.f32 0.0040983604, %v3681_v49  ;;  %v3684_v26 = vmul.f32 %v3682_v41, %v3682_v41  ;;  %v3797_v49 = vld [vmem:[#allocation4 + $0xda] ss:$4 sm:$0x3f] }
 0x3f2   :  { %v3685_v5 = vsub.f32 %v3683_v39, %v3684_v26 }
 0x3f4   :  { %v3686_v53 = vadd.f32 1e-05, %v3685_v5 }
 0x3f6   :  { %5026 = vrsqrt.f32 %v3686_v53  ;;  %vm3693_vm7 = vweird.f32 %v3686_v53 }
 0x3fc   :  { %v5027_v2 = vpop.eup %5026 }
 0x3fd   :  { %v3688_v6 = vmul.f32 %v5027_v2, %v3686_v53  ;;  %vm3694_vm6 = vweird.f32 %v5027_v2  ;;  %v3811_v53 = vld [vmem:[#allocation4 + $0xbb] ss:$4 sm:$0xff] }
 0x3fe   :  { %vm3695_vm8 = vmor %vm3693_vm7, %vm3694_vm6 }
 0x3ff   :  { %v3689_v50 = vmul.f32 %v5027_v2, %v3688_v6 }
 0x401   :  { %v3690_v34 = vmul.f32 0.5, %v3689_v50 }
 0x403   :  { %v3691_v33 = vsub.f32 1.5, %v3690_v34  ;;  %v3849_v34 = vld [vmem:[#allocation4 + $0x9d] ss:$4 sm:$0xff] }
 0x405   :  { %v3692_v55 = vmul.f32 %v5027_v2, %v3691_v33  ;;  %v3831_v33 = vld [vmem:[#allocation4 + $0xbc] ss:$4 sm:$0xff] }
 0x407   :  { %v3696_v46 = vsel %vm3695_vm8, %v5027_v2, %v3692_v55 }
 0x408   :  { %v3698_v58 = vmul.f32 %v3697_v42, %v3696_v46 }
 0x40a   :  { %v3700_v36 = vmul.f32 %v3698_v58, %v3682_v41  ;;  %v7550_v0 = vperm.slane %v3698_v58, 0 }
 0x40c   :  { %v3701_v54 = vsub.f32 %v3699_v23, %v3700_v36  ;;  %v3710_v61 = vmul.f32 %v7550_v0, %v3702_v10  ;;  %v3711_v9 = vmul.f32 %v7550_v0, %v3704_v3  ;;  %v3712_v56 = vmul.f32 %v7550_v0, %v3706_v57  ;;  %v7592_v10 = vld [vmem:[%s7888_s9 + $0x50] sm:$0xff] }
 0x40d   :  { %v3713_v52 = vmul.f32 %v7550_v0, %v3708_v59  ;;  %v3729_v12 = vmul.f32 %v3722_v62, %v7550_v0  ;;  %v3730_v16 = vmul.f32 %v3724_v45, %v7550_v0  ;;  %v3731_v7 = vmul.f32 %v3726_v60, %v7550_v0  ;;  %4008 = vmatpush.msrb.mxu1 %v7592_v10 }
 0x40e   :  { %v7564_v48 = vperm.slane %v3701_v54, 0  ;;  %v3732_v63 = vmul.f32 %v3728_v32, %v7550_v0  ;;  %v3749_v24 = vmul.f32 %v3742_v8, %v7550_v0  ;;  %v3750_v28 = vmul.f32 %v3744_v17, %v7550_v0 }
 0x40f   :  { %v3751_v13 = vmul.f32 %v3746_v30, %v7550_v0  ;;  %v3752_v47 = vmul.f32 %v3748_v15, %v7550_v0  ;;  %v3769_v25 = vmul.f32 %v3762_v51, %v7550_v0  ;;  %v3770_v41 = vmul.f32 %v3764_v37, %v7550_v0 }
 0x410   :  { %v3771_v39 = vmul.f32 %v3766_v27, %v7550_v0  ;;  %v3772_v26 = vmul.f32 %v3768_v19, %v7550_v0  ;;  %v3798_v5 = vmul.f32 %v3791_v4, %v7550_v0  ;;  %v3799_v31 = vmul.f32 %v3793_v18, %v7550_v0 }
 0x411   :  { %v3800_v2 = vmul.f32 %v3795_v38, %v7550_v0  ;;  %v7580_v6 = vmul.f32 %v3797_v49, %v7550_v0  ;;  %v3814_v50 = vmul.f32 %v3807_v22, %v7550_v0  ;;  %v3815_v55 = vmul.f32 %v3809_v40, %v7550_v0 }
 0x412   :  { %v3816_v42 = vmul.f32 %v3811_v53, %v7550_v0  ;;  %v7586_v46 = vmul.f32 %v3813_v1, %v7550_v0  ;;  %v3834_v58 = vmul.f32 %v3827_v44, %v7550_v0  ;;  %v3835_v23 = vmul.f32 %v3829_v29, %v7550_v0 }
 0x413   :  { %v3836_v62 = vmul.f32 %v3831_v33, %v7550_v0  ;;  %v3854_v3 = vmul.f32 %v3847_v11, %v7550_v0  ;;  %v3855_v36 = vmul.f32 %v3849_v34, %v7550_v0  ;;  %v3717_v8 = vadd.f32 %v7564_v48, %v3710_v61 }
 0x414   :  { %v3718_v45 = vadd.f32 %v7564_v48, %v3711_v9  ;;  %v3719_v57 = vadd.f32 %v7564_v48, %v3712_v56  ;;  %v3720_v60 = vadd.f32 %v7564_v48, %v3713_v52  ;;  %v3733_v51 = vadd.f32 %v3729_v12, %v7564_v48 }
 0x415   :  { %v3734_v17 = vadd.f32 %v3730_v16, %v7564_v48  ;;  %v3735_v30 = vadd.f32 %v3731_v7, %v7564_v48  ;;  %v3736_v59 = vadd.f32 %v3732_v63, %v7564_v48  ;;  %v3753_v32 = vadd.f32 %v3749_v24, %v7564_v48 }
 0x416   :  { %v3754_v54 = vadd.f32 %v3750_v28, %v7564_v48  ;;  %v3773_v61 = vadd.f32 %v3769_v25, %v7564_v48  ;;  %v3774_v9 = vadd.f32 %v3770_v41, %v7564_v48  ;;  %v3802_v37 = vadd.f32 %v3798_v5, %v7564_v48  ;;  %v4948_v28 = vld [vmem:[%s7888_s9 + $0x48] sm:$0xff] }
 0x417   :  { %v3803_v27 = vadd.f32 %v3799_v31, %v7564_v48  ;;  %v3818_v15 = vadd.f32 %v3814_v50, %v7564_v48  ;;  %v3819_v19 = vadd.f32 %v3815_v55, %v7564_v48  ;;  %v3838_v56 = vadd.f32 %v3834_v58, %v7564_v48  ;;  %v3833_v25 = vld [vmem:[#allocation4 + $0xdc] ss:$4 sm:$0x3f]  ;;  %4009 = vmatpush.msrb.mxu1 %v4948_v28 }
 0x418   :  { %v3839_v52 = vadd.f32 %v3835_v23, %v7564_v48  ;;  %v3858_v12 = vadd.f32 %v3854_v3, %v7564_v48  ;;  %v3859_v16 = vadd.f32 %v3855_v36, %v7564_v48  ;;  %v3737_v4 = vmax.f32 %v3717_v8, %v3733_v51  ;;  %v3851_v36 = vld [vmem:[#allocation4 + $0xbd] ss:$4 sm:$0xff] }
 0x419   :  { %v3738_v22 = vmax.f32 %v3718_v45, %v3734_v17  ;;  %v3822_v7 = vmax.f32 %v3802_v37, %v3818_v15  ;;  %v3823_v63 = vmax.f32 %v3803_v27, %v3819_v19  ;;  %v3739_v24 = vmax.f32 %v3719_v57, %v3735_v30 }
 0x41a   :  { %v3755_v44 = vadd.f32 %v3751_v13, %v7564_v48  ;;  %v3775_v18 = vadd.f32 %v3771_v39, %v7564_v48  ;;  %v3740_v40 = vmax.f32 %v3720_v60, %v3736_v59  ;;  %v3757_v29 = vmax.f32 %v3737_v4, %v3753_v32  ;;  %v3853_v60 = vld [vmem:[#allocation4 + $0xdd] ss:$4 sm:$0x3f] }
 0x41b   :  { %v3758_v11 = vmax.f32 %v3738_v22, %v3754_v54  ;;  %v3756_v38 = vadd.f32 %v3752_v47, %v7564_v48  ;;  %v3776_v49 = vadd.f32 %v3772_v26, %v7564_v48  ;;  %v3837_v41 = vmul.f32 %v3833_v25, %v7550_v0 }
 0x41c   :  { %v3759_v5 = vmax.f32 %v3739_v24, %v3755_v44  ;;  %v3842_v53 = vmax.f32 %v3822_v7, %v3838_v56  ;;  %v3843_v13 = vmax.f32 %v3823_v63, %v3839_v52  ;;  %v3777_v1 = vmax.f32 %v3757_v29, %v3773_v61 }
 0x41d   :  { %v3778_v39 = vmax.f32 %v3758_v11, %v3774_v9  ;;  %v3760_v31 = vmax.f32 %v3740_v40, %v3756_v38  ;;  %v3804_v50 = vadd.f32 %v3800_v2, %v7564_v48  ;;  %v3820_v58 = vadd.f32 %v3816_v42, %v7564_v48 }
 0x41e   :  { %v3779_v34 = vmax.f32 %v3759_v5, %v3775_v18  ;;  %v3862_v33 = vmax.f32 %v3842_v53, %v3858_v12  ;;  %v3863_v55 = vmax.f32 %v3843_v13, %v3859_v16  ;;  %v3781_v23 = vmax.f32 %v3777_v1, 0.0  ;;  %v7683_v13 = vld [vmem:[%s7892_s13 + $0xb8] sm:$0xff] }
 0x41f   :  { %v3782_v47 = vmax.f32 %v3778_v39, 0.0  ;;  %v3780_v3 = vmax.f32 %v3760_v31, %v3776_v49  ;;  %v3840_v26 = vadd.f32 %v3836_v62, %v7564_v48  ;;  %v3824_v57 = vmax.f32 %v3804_v50, %v3820_v58  ;;  %v4947_v62 = vld [vmem:[%s7888_s9 + $0x40] sm:$0xff]  ;;  %4417 = vmatpush.msra.mxu3 %v7683_v13 }
 0x420   :  { %v3783_v8 = vmax.f32 %v3779_v34, 0.0  ;;  %v3866_v45 = vmax.f32 %v3862_v33, 0.0  ;;  %3785 = vst.msk [vmem:[#allocation5] sm:$0xff] %vm207_vm1, %v3781_v23  ;;  %v3856_v2 = vmul.f32 %v3851_v36, %v7550_v0  ;;  %v3805_v17 = vadd.f32 %v7580_v6, %v7564_v48  ;;  %4010 = vmatpush.msrb.mxu1 %v4947_v62  ;;  %v7689_v34 = vld [vmem:[%s7889_s10] ss:$0 sm:$0xff] }
 0x421   :  { %v3784_v51 = vmax.f32 %v3780_v3, 0.0  ;;  %v3821_v42 = vadd.f32 %v7586_v46, %v7564_v48  ;;  %3786 = vst.msk [vmem:[#allocation5 + $0x8] sm:$0xff] %vm207_vm1, %v3782_v47  ;;  %v3867_v30 = vmax.f32 %v3863_v55, 0.0  ;;  %v3844_v59 = vmax.f32 %v3824_v57, %v3840_v26 }
 0x422   :  { %v3841_v32 = vadd.f32 %v3837_v41, %v7564_v48  ;;  %v3857_v54 = vmul.f32 %v3853_v60, %v7550_v0  ;;  %3787 = vst.msk [vmem:[#allocation5 + $0x10] sm:$0xff] %vm207_vm1, %v3783_v8  ;;  %v3860_v6 = vadd.f32 %v3856_v2, %v7564_v48  ;;  %v7697_v8 = vld [vmem:[%s7892_s13 + $0xb0] sm:$0xff] }
 0x423   :  { %v3825_v61 = vmax.f32 %v3805_v17, %v3821_v42  ;;  %3789 = vst.msk [vmem:[#allocation5 + $0x18] sm:$0x3f] %vm3788_vm9, %v3784_v51  ;;  %4418 = vmatpush.msra.mxu3 %v7697_v8 }
 0x424   :  { %v3861_v46 = vadd.f32 %v3857_v54, %v7564_v48  ;;  %3870 = vst.msk [vmem:[#allocation5 + $0x1e] sm:$0xff] %vm207_vm1, %v3866_v45  ;;  %v3864_v9 = vmax.f32 %v3844_v59, %v3860_v6  ;;  %v7702_v45 = vld [vmem:[%s7892_s13 + $0xa8] sm:$0xff]  ;;  %v7714_v6 = vld [vmem:[%s7892_s13 + $0xa0] sm:$0xff] }
 0x425   :  { %v3845_v37 = vmax.f32 %v3825_v61, %v3841_v32  ;;  %3871 = vst.msk [vmem:[#allocation5 + $0x26] sm:$0xff] %vm207_vm1, %v3867_v30  ;;  %4419 = vmatpush.msra.mxu3 %v7702_v45 }
 0x426   :  { %v3868_v27 = vmax.f32 %v3864_v9, 0.0 }
 0x427   :  { %v3865_v15 = vmax.f32 %v3845_v37, %v3861_v46  ;;  %v3875_v19 = vld [vmem:[#allocation5] sm:$0xff]  ;;  %4420 = vmatpush.msra.mxu3 %v7714_v6 }
 0x428   :  { %v3883_v0 = vld [vmem:[#allocation5 + $0x1] sm:$0xff]  ;;  %4943 = vmatmul.msk.f32.vlgmr.msrb.gmra.mxu2 %vm207_vm1, %v3875_v19  ;;  %3872 = vst.msk [vmem:[#allocation5 + $0x2e] sm:$0xff] %vm207_vm1, %v3868_v27 }
 0x429   :  { %v3869_v56 = vmax.f32 %v3865_v15, 0.0  ;;  %4939 = vmatmul.msk.f32.vlgmr.msra.gmra.mxu1 %vm207_vm1, %v3883_v0  ;;  %4203 = vmatpush.msrb.mxu2 %v7555_v35  ;;  %v3876_v48 = vld [vmem:[#allocation5 + $0x8] sm:$0xff]  ;;  %v3877_v35 = vld [vmem:[#allocation5 + $0x10] sm:$0xff] }
 0x42a   :  { %4154 = vmatpush.msra.mxu1 %v7450_v20  ;;  %v3884_v52 = vld [vmem:[#allocation5 + $0x9] sm:$0xff]  ;;  %v3885_v20 = vld [vmem:[#allocation5 + $0x11] sm:$0xff]  ;;  %v3977_v63 = vld [vmem:[#allocation5 + $0x1a] sm:$0xf] }
 0x42b   :  { %4204 = vmatpush.msrb.mxu2 %v7592_v10  ;;  %3873 = vst.msk [vmem:[#allocation5 + $0x36] sm:$0x3f] %vm3788_vm9, %v3869_v56  ;;  %v3878_v10 = vld [vmem:[#allocation5 + $0x18] sm:$0xf]  ;;  %v3974_v12 = vld [vmem:[#allocation5 + $0x2] sm:$0xff]  ;;  %v3975_v16 = vld [vmem:[#allocation5 + $0xa] sm:$0xff] }
 0x42c   :  { %4155 = vmatpush.msra.mxu1 %v7476_v14  ;;  %v3886_v14 = vld [vmem:[#allocation5 + $0x19] sm:$0xf]  ;;  %v4171_v24 = vld [vmem:[#allocation5 + $0x20] sm:$0xff] }
 0x42d   :  { %4205 = vmatpush.msrb.mxu2 %v4948_v28  ;;  %v3976_v22 = vld [vmem:[#allocation5 + $0x12] sm:$0xff]  ;;  %v4073_v44 = vld [vmem:[#allocation5 + $0x1e] sm:$0xff]  ;;  %v4074_v40 = vld [vmem:[#allocation5 + $0x26] sm:$0xff] }
 0x42e   :  { %4156 = vmatpush.msra.mxu1 %v7527_v43  ;;  %v4081_v43 = vld [vmem:[#allocation5 + $0x1f] sm:$0xff] }
 0x42f   :  { %4206 = vmatpush.msrb.mxu2 %v4947_v62  ;;  %v4172_v18 = vld [vmem:[#allocation5 + $0x28] sm:$0xff] }
 0x430   :  { %4944 = vmatmul.msk.f32.gmra.mxu2 %vm207_vm1, %v3876_v48  ;;  %4157 = vmatpush.msra.mxu1 %v7536_v21  ;;  %v4082_v21 = vld [vmem:[#allocation5 + $0x27] sm:$0xff] }
 0x431   :  { %4940 = vmatmul.msk.f32.gmra.mxu1 %vm207_vm1, %v3884_v52  ;;  %v4075_v25 = vld [vmem:[#allocation5 + $0x2e] sm:$0xff] }
 0x432   :  { %v4083_v4 = vld [vmem:[#allocation5 + $0x2f] sm:$0xff]  ;;  %v4084_v7 = vld [vmem:[#allocation5 + $0x37] sm:$0xf] }
 0x433   :  { %v4173_v28 = vld [vmem:[#allocation5 + $0x30] sm:$0xff]  ;;  %v4174_v11 = vld [vmem:[#allocation5 + $0x38] sm:$0xf] }
 0x434   :  { %v4076_v29 = vld [vmem:[#allocation5 + $0x36] sm:$0xf] }
 0x438   :  { %4945 = vmatmul.msk.f32.gmra.mxu2 %vm207_vm1, %v3877_v35 }
 0x439   :  { %4941 = vmatmul.msk.f32.gmra.mxu1 %vm207_vm1, %v3885_v20 }
 0x440   :  { %4946 = vmatmul.msk.f32.gmra.mxu2 %vm207_vm1, %v3878_v10 }
 0x441   :  { %4942 = vmatmul.msk.f32.gmra.mxu1 %vm207_vm1, %v3886_v14 }
 0x448   :  { %4959 = vmatmul.msk.f32.vlgmr.msra.gmra.mxu2 %vm207_vm1, %v4081_v43 }
 0x449   :  { %4951 = vmatmul.msk.f32.vlgmr.msrb.gmra.mxu1 %vm207_vm1, %v3974_v12 }
 0x450   :  { %4960 = vmatmul.msk.f32.gmra.mxu2 %vm207_vm1, %v4082_v21 }
 0x451   :  { %4952 = vmatmul.msk.f32.gmra.mxu1 %vm207_vm1, %v3975_v16 }
 0x458   :  { %4961 = vmatmul.msk.f32.gmra.mxu2 %vm207_vm1, %v4083_v4 }
 0x459   :  { %4953 = vmatmul.msk.f32.gmra.mxu1 %vm207_vm1, %v3976_v22 }
 0x460   :  { %4962 = vmatmul.msk.f32.gmra.mxu2 %vm207_vm1, %v4084_v7 }
 0x461   :  { %4954 = vmatmul.msk.f32.gmra.mxu1 %vm207_vm1, %v3977_v63 }
 0x468   :  { %4971 = vmatmul.msk.f32.vlgmr.msrb.gmra.mxu2 %vm207_vm1, %v4171_v24 }
 0x469   :  { %4963 = vmatmul.msk.f32.vlgmr.msra.gmra.mxu1 %vm207_vm1, %v4073_v44 }
 0x470   :  { %4972 = vmatmul.msk.f32.gmra.mxu2 %vm207_vm1, %v4172_v18 }
 0x471   :  { %4964 = vmatmul.msk.f32.gmra.mxu1 %vm207_vm1, %v4074_v40 }
 0x478   :  { %4973 = vmatmul.msk.f32.gmra.mxu2 %vm207_vm1, %v4173_v28 }
 0x479   :  { %4965 = vmatmul.msk.f32.gmra.mxu1 %vm207_vm1, %v4075_v25 }
 0x480   :  { %4974 = vmatmul.msk.f32.gmra.mxu2 %vm207_vm1, %v4174_v11 }
 0x481   :  { %4966 = vmatmul.msk.f32.gmra.mxu1 %vm207_vm1, %v4076_v29 }
 0x4a6   :  { %v3921_v38 = vpop.f32.mrf.mxu1 }
 0x4ab   :  { %v3962_v49 = vpop.f32.mrf.mxu2 }
 0x4ac   :  { %v3963_v50 = vadd.f32 %v3962_v49, %v3921_v38 }
 0x4ae   :  { %v3924_v41 = vpop.f32.mrf.mxu1 }
 0x4b3   :  { %v3965_v5 = vpop.f32.mrf.mxu2 }
 0x4b4   :  { %v3966_v47 = vadd.f32 %v3965_v5, %v3924_v41 }
 0x4b6   :  { %v3927_v53 = vpop.f32.mrf.mxu1 }
 0x4bb   :  { %v3968_v1 = vpop.f32.mrf.mxu2 }
 0x4bc   :  { %v3969_v60 = vadd.f32 %v3968_v1, %v3927_v53 }
 0x4be   :  { %v3930_v39 = vpop.f32.mrf.mxu1 }
 0x4c3   :  { %v3971_v31 = vpop.f32.mrf.mxu2 }
 0x4c4   :  { %v3972_v62 = vadd.f32 %v3971_v31, %v3930_v39 }
 0x4c6   :  { %v4012_v33 = vpop.f32.mrf.mxu1 }
 0x4c7   :  { %v4024_v55 = vadd.f32 %v4012_v33, %v3963_v50 }
 0x4c9   :  { %v4031_v58 = vadd.f32 %v7689_v34, %v4024_v55 }
 0x4cb   :  { %4036 = vst.msk [vmem:[#allocation6] sm:$0xff] %vm4035_vm10, %v4031_v58  ;;  %v4118_v23 = vpop.f32.mrf.mxu2  ;;  %v4055_v52 = vmul.f32 %v4031_v58, %v4031_v58  ;;  %v4041_v43 = vsel %vm4035_vm10, %v4031_v58, 0.0 }
 0x4cd   :  { %v4059_v22 = vsel %vm4035_vm10, %v4055_v52, 0.0 }
 0x4ce   :  { %v4015_v3 = vpop.f32.mrf.mxu1 }
 0x4cf   :  { %v4025_v26 = vadd.f32 %v4015_v3, %v3966_v47 }
 0x4d1   :  { %v4032_v36 = vadd.f32 %v7689_v34, %v4025_v26 }
 0x4d3   :  { %4037 = vst.msk [vmem:[#allocation6 + $0x8] sm:$0xff] %vm4035_vm10, %v4032_v36  ;;  %v4121_v57 = vpop.f32.mrf.mxu2  ;;  %v4056_v56 = vmul.f32 %v4032_v36, %v4032_v36  ;;  %v4042_v35 = vsel %vm4035_vm10, %v4032_v36, 0.0 }
 0x4d4   :  { %v4043_v4 = vadd.f32 %v4042_v35, %v4041_v43 }
 0x4d5   :  { %v4060_v12 = vsel %vm4035_vm10, %v4056_v56, 0.0 }
 0x4d6   :  { %v4018_v51 = vpop.f32.mrf.mxu1  ;;  %v4061_v44 = vadd.f32 %v4060_v12, %v4059_v22 }
 0x4d7   :  { %v4026_v2 = vadd.f32 %v4018_v51, %v3969_v60 }
 0x4d9   :  { %v4033_v17 = vadd.f32 %v7689_v34, %v4026_v2 }
 0x4db   :  { %4038 = vst.msk [vmem:[#allocation6 + $0x10] sm:$0xff] %vm4035_vm10, %v4033_v17  ;;  %v4124_v42 = vpop.f32.mrf.mxu2  ;;  %v4057_v20 = vmul.f32 %v4033_v17, %v4033_v17  ;;  %v4044_v21 = vsel %vm4035_vm10, %v4033_v17, 0.0 }
 0x4dc   :  { %v4045_v18 = vadd.f32 %v4044_v21, %v4043_v4 }
 0x4dd   :  { %v4062_v7 = vsel %vm4035_vm10, %v4057_v20, 0.0 }
 0x4de   :  { %v4021_v30 = vpop.f32.mrf.mxu1  ;;  %v4063_v11 = vadd.f32 %v4062_v7, %v4061_v44 }
 0x4df   :  { %v4027_v59 = vadd.f32 %v4021_v30, %v3972_v62 }
 0x4e1   :  { %v4034_v32 = vadd.f32 %v7689_v34, %v4027_v59 }
 0x4e3   :  { %4040 = vst.msk [vmem:[#allocation6 + $0x18] sm:$0xf] %vm4039_vm11, %v4034_v32  ;;  %v4127_v54 = vpop.f32.mrf.mxu2  ;;  %v4058_v16 = vmul.f32 %v4034_v32, %v4034_v32  ;;  %v4046_v63 = vsel %vm4039_vm11, %v4034_v32, 0.0 }
 0x4e4   :  { %v4047_v29 = vadd.f32 %v4046_v63, %v4045_v18 }
 0x4e5   :  { %v4064_v28 = vsel %vm4039_vm11, %v4058_v16, 0.0 }
 0x4e6   :  { %v4159_v61 = vpop.f32.mrf.mxu1  ;;  %v4065_v49 = vadd.f32 %v4064_v28, %v4063_v11  ;;  %v4048_v53 = vrot.slane %v4047_v29, 4  ;;  %v4988_v28 = vld [vmem:[%s7892_s13 + $0x98] sm:$0xff] }
 0x4e7   :  { %v4160_v46 = vadd.f32 %v4159_v61, %v4118_v23  ;;  %v4339_v11 = vld [vmem:[%s7892_s13 + $0x38] sm:$0xff]  ;;  %4421 = vmatpush.msra.mxu3 %v4988_v28 }
 0x4e8   :  { %v4066_v33 = vrot.slane %v4065_v49, 4  ;;  %v4049_v26 = vadd.f32 %v4048_v53, %v4047_v29  ;;  %4384 = vmatpush.msra.mxu2 %v4339_v11  ;;  %v4338_v29 = vld [vmem:[%s7892_s13 + $0x30] sm:$0xff]  ;;  %v4980_v53 = vld [vmem:[%s7892_s13 + $0x68] sm:$0xff] }
 0x4ea   :  { %v4067_v2 = vadd.f32 %v4066_v33, %v4065_v49  ;;  %v4050_v59 = vrot.slane %v4049_v26, 2  ;;  %v4986_v49 = vld [vmem:[%s7892_s13 + $0x88] sm:$0xff]  ;;  %4385 = vmatpush.msra.mxu2 %v4338_v29  ;;  %v4978_v33 = vld [vmem:[%s7892_s13 + $0x58] sm:$0xff] }
 0x4eb   :  { %v4208_v9 = vpop.f32.mrf.mxu2 }
 0x4ec   :  { %v4220_v37 = vadd.f32 %v4208_v9, %v4160_v46  ;;  %v4068_v46 = vrot.slane %v4067_v2, 2 }
 0x4ee   :  { %v4224_v27 = vadd.f32 %v7689_v34, %v4220_v37  ;;  %v4162_v15 = vpop.f32.mrf.mxu1 }
 0x4ef   :  { %v4163_v19 = vadd.f32 %v4162_v15, %v4121_v57 }
 0x4f0   :  { %4228 = vst.msk [vmem:[#allocation6 + $0x1c] sm:$0xff] %vm4035_vm10, %v4224_v27  ;;  %v4246_v1 = vmul.f32 %v4224_v27, %v4224_v27  ;;  %v4232_v58 = vsel %vm4035_vm10, %v4224_v27, 0.0  ;;  %v4051_v27 = vadd.f32 %v4050_v59, %v4049_v26 }
 0x4f2   :  { %v4250_v57 = vsel %vm4035_vm10, %v4246_v1, 0.0  ;;  %v4336_v1 = vld [vmem:[%s7892_s13 + $0x20] sm:$0xff] }
 0x4f3   :  { %v4211_v0 = vpop.f32.mrf.mxu2 }
 0x4f4   :  { %v4221_v48 = vadd.f32 %v4211_v0, %v4163_v19 }
 0x4f6   :  { %v4225_v10 = vadd.f32 %v7689_v34, %v4221_v48  ;;  %v4165_v14 = vpop.f32.mrf.mxu1  ;;  %v4052_v48 = vrot.slane %v4051_v27, 1 }
 0x4f7   :  { %v4166_v24 = vadd.f32 %v4165_v14, %v4124_v42 }
 0x4f8   :  { %4229 = vst.msk [vmem:[#allocation6 + $0x24] sm:$0xff] %vm4035_vm10, %v4225_v10  ;;  %v4247_v5 = vmul.f32 %v4225_v10, %v4225_v10  ;;  %v4233_v39 = vsel %vm4035_vm10, %v4225_v10, 0.0  ;;  %v4053_v43 = vadd.f32 %v4052_v48, %v4051_v27 }
 0x4f9   :  { %v4234_v36 = vadd.f32 %v4233_v39, %v4232_v58  ;;  %v4985_v39 = vld [vmem:[%s7892_s13 + $0x80] sm:$0xff]  ;;  %v4334_v58 = vld [vmem:[%s7892_s13 + $0x10] sm:$0xff] }
 0x4fa   :  { %v4251_v23 = vsel %vm4035_vm10, %v4247_v5, 0.0  ;;  %v4981_v5 = vld [vmem:[%s7892_s13 + $0x70] sm:$0xff] }
 0x4fb   :  { %v4214_v40 = vpop.f32.mrf.mxu2  ;;  %v4252_v17 = vadd.f32 %v4251_v23, %v4250_v57 }
 0x4fc   :  { %v4222_v25 = vadd.f32 %v4214_v40, %v4166_v24 }
 0x4fe   :  { %v4226_v38 = vadd.f32 %v7689_v34, %v4222_v25  ;;  %v4168_v41 = vpop.f32.mrf.mxu1  ;;  %v4987_v25 = vld [vmem:[%s7892_s13 + $0x90] sm:$0xff] }
 0x4ff   :  { %v4169_v50 = vadd.f32 %v4168_v41, %v4127_v54  ;;  %v4337_v41 = vld [vmem:[%s7892_s13 + $0x28] sm:$0xff]  ;;  %4422 = vmatpush.msra.mxu3 %v4987_v25 }
 0x500   :  { %4230 = vst.msk [vmem:[#allocation6 + $0x2c] sm:$0xff] %vm4035_vm10, %v4226_v38  ;;  %v4248_v31 = vmul.f32 %v4226_v38, %v4226_v38  ;;  %v4235_v47 = vsel %vm4035_vm10, %v4226_v38, 0.0  ;;  %v4982_v38 = vld [vmem:[%s7892_s13 + $0x78] sm:$0xff]  ;;  %4386 = vmatpush.msra.mxu2 %v4337_v41 }
 0x501   :  { %v4236_v42 = vadd.f32 %v4235_v47, %v4234_v36  ;;  %4361 = vmatpush.msrb.mxu1 %v4982_v38  ;;  %4423 = vmatpush.msra.mxu3 %v4986_v49  ;;  %v4977_v47 = vld [vmem:[%s7892_s13 + $0x50] sm:$0xff]  ;;  %v4976_v36 = vld [vmem:[%s7892_s13 + $0x48] sm:$0xff] }
 0x502   :  { %v4253_v60 = vsel %vm4035_vm10, %v4248_v31, 0.0  ;;  %v4979_v31 = vld [vmem:[%s7892_s13 + $0x60] sm:$0xff]  ;;  %4387 = vmatpush.msra.mxu2 %v4336_v1 }
 0x503   :  { %v4217_v55 = vpop.f32.mrf.mxu2  ;;  %v4254_v32 = vadd.f32 %v4253_v60, %v4252_v17  ;;  %4362 = vmatpush.msrb.mxu1 %v4981_v5  ;;  %4424 = vmatpush.msra.mxu3 %v4985_v39  ;;  %v4281_v17 = vld [vmem:[%s7891_s12] sm:$0x1] }
 0x504   :  { %v4223_v3 = vadd.f32 %v4217_v55, %v4169_v50  ;;  %v4335_v50 = vld [vmem:[%s7892_s13 + $0x18] sm:$0xff] }
 0x505   :  { %4363 = vmatpush.msrb.mxu1 %v4980_v53  ;;  %4537 = vmatpush.msrb.mxu3 %v7683_v13  ;;  %v7804_v13 = vld [vmem:[%s7892_s13] sm:$0xff] }
 0x506   :  { %v4227_v51 = vadd.f32 %v7689_v34, %v4223_v3  ;;  %v4069_v34 = vadd.f32 %v4068_v46, %v4067_v2  ;;  %4388 = vmatpush.msra.mxu2 %v4335_v50  ;;  %v4333_v3 = vld [vmem:[%s7892_s13 + $0x8] sm:$0xff] }
 0x507   :  { %4364 = vmatpush.msrb.mxu1 %v4979_v31  ;;  %4538 = vmatpush.msrb.mxu3 %v7697_v8  ;;  %v7810_v8 = vld [vmem:[%s7892_s13 + $0x40] sm:$0xff]  ;;  %s4690_s13 = sshll.u32 %s7898_s19, 4  ;;  %s4691_s13 = int_to_ptr.hbm [resolvable:$true] %s4690_s13 }
 0x508   :  { %4231 = vst.msk [vmem:[#allocation6 + $0x34] sm:$0xf] %vm4039_vm11, %v4227_v51  ;;  %v4237_v62 = vsel %vm4039_vm11, %v4227_v51, 0.0  ;;  %v4249_v30 = vmul.f32 %v4227_v51, %v4227_v51  ;;  %v4070_v20 = vrot.slane %v4069_v34, 1  ;;  %4389 = vmatpush.msra.mxu2 %v4334_v58 }
 0x509   :  { %v4238_v54 = vadd.f32 %v4237_v62, %v4236_v42  ;;  %4365 = vmatpush.msrb.mxu1 %v4978_v33  ;;  %4539 = vmatpush.msrb.mxu3 %v7702_v45  ;;  %v4279_v45 = vld [vmem:[%s7890_s11] sm:$0x1]  ;;  %v4292_v46 = vld [vmem:[#allocation6 + $0x1] ss:$4 sm:$0x7f] }
 0x50a   :  { %v4255_v61 = vsel %vm4039_vm11, %v4249_v30, 0.0  ;;  %v4071_v16 = vadd.f32 %v4070_v20, %v4069_v34  ;;  %4390 = vmatpush.msra.mxu2 %v4333_v3  ;;  %v4284_v30 = vld [vmem:[#allocation6] ss:$4 sm:$0x7f] }
 0x50b   :  { %v4239_v9 = vrot.slane %v4238_v54, 4  ;;  %v4256_v37 = vadd.f32 %v4255_v61, %v4254_v32  ;;  %4366 = vmatpush.msrb.mxu1 %v4977_v47  ;;  %4540 = vmatpush.msrb.mxu3 %v7714_v6  ;;  %v4641_v32 = vld [vmem:[%s7896_s17 + $0x38] sm:$0xff] }
 0x50c   :  { %4391 = vmatpush.msra.mxu2 %v7804_v13  ;;  %4657 = vmatpush.msra.mxu0 %v4641_v32 }
 0x50d   :  { %v4240_v15 = vadd.f32 %v4239_v9, %v4238_v54  ;;  %v4257_v19 = vrot.slane %v4256_v37, 4  ;;  %4367 = vmatpush.msrb.mxu1 %v4976_v36  ;;  %4541 = vmatpush.msrb.mxu3 %v4988_v28 }
 0x50e   :  { %4505 = vmatpush.msrb.mxu2 %v4339_v11 }
 0x50f   :  { %v4241_v0 = vrot.slane %v4240_v15, 2  ;;  %v4258_v56 = vadd.f32 %v4257_v19, %v4256_v37  ;;  %4368 = vmatpush.msrb.mxu1 %v7810_v8  ;;  %4542 = vmatpush.msrb.mxu3 %v4987_v25  ;;  %v4310_v54 = vld [vmem:[#allocation6 + $0x1c] ss:$4 sm:$0x7f] }
 0x510   :  { %4506 = vmatpush.msrb.mxu2 %v4338_v29  ;;  %v4314_v61 = vld [vmem:[#allocation6 + $0x1d] ss:$4 sm:$0x7f]  ;;  %v4324_v20 = vld [vmem:[#allocation6 + $0x1f] ss:$4 sm:$0x7f] }
 0x511   :  { %v4242_v52 = vadd.f32 %v4241_v0, %v4240_v15  ;;  %v4259_v35 = vrot.slane %v4258_v56, 2  ;;  %4482 = vmatpush.msra.mxu1 %v4982_v38  ;;  %4543 = vmatpush.msrb.mxu3 %v4986_v49  ;;  %v4319_v15 = vld [vmem:[#allocation6 + $0x1e] ss:$4 sm:$0x7f] }
 0x512   :  { %4507 = vmatpush.msrb.mxu2 %v4337_v41  ;;  %v4640_v0 = vld [vmem:[%s7896_s17 + $0x30] sm:$0xff] }
 0x513   :  { %v4243_v10 = vrot.slane %v4242_v52, 1  ;;  %v4260_v14 = vadd.f32 %v4259_v35, %v4258_v56  ;;  %4483 = vmatpush.msra.mxu1 %v4981_v5  ;;  %4544 = vmatpush.msrb.mxu3 %v4985_v39  ;;  %v4297_v56 = vld [vmem:[#allocation6 + $0x2] ss:$4 sm:$0x7f] }
 0x514   :  { %4508 = vmatpush.msrb.mxu2 %v4336_v1  ;;  %4658 = vmatpush.msra.mxu0 %v4640_v0 }
 0x515   :  { %v4244_v12 = vadd.f32 %v4243_v10, %v4242_v52  ;;  %v4261_v21 = vrot.slane %v4260_v14, 1  ;;  %4484 = vmatpush.msra.mxu1 %v4980_v53 }
 0x516   :  { %4509 = vmatpush.msrb.mxu2 %v4335_v50 }
 0x517   :  { %v4245_v4 = vadd.f32 %v4244_v12, %v4053_v43  ;;  %v4262_v22 = vadd.f32 %v4261_v21, %v4260_v14  ;;  %4485 = vmatpush.msra.mxu1 %v4979_v31  ;;  %v4639_v12 = vld [vmem:[%s7896_s17 + $0x28] sm:$0xff]  ;;  %v4638_v31 = vld [vmem:[%s7896_s17 + $0x20] sm:$0xff] }
 0x518   :  { %4510 = vmatpush.msrb.mxu2 %v4334_v58  ;;  %v4302_v21 = vld [vmem:[#allocation6 + $0x3] ss:$4 sm:$0x7f]  ;;  %4659 = vmatpush.msra.mxu0 %v4639_v12 }
 0x519   :  { %v4263_v7 = vadd.f32 %v4262_v22, %v4071_v16  ;;  %v7741_v63 = vmul.f32 0.017857144, %v4245_v4  ;;  %4486 = vmatpush.msra.mxu1 %v4978_v33 }
 0x51a   :  { %4511 = vmatpush.msrb.mxu2 %v4333_v3  ;;  %4660 = vmatpush.msra.mxu0 %v4638_v31  ;;  %v4586_v31 = vld [vmem:[%s7895_s16] sm:$0x1] }
 0x51b   :  { %v4265_v24 = vmul.f32 0.017857144, %v4263_v7  ;;  %v4266_v44 = vmul.f32 %v7741_v63, %v7741_v63  ;;  %4487 = vmatpush.msra.mxu1 %v4977_v47 }
 0x51c   :  { %4512 = vmatpush.msrb.mxu2 %v7804_v13 }
 0x51d   :  { %v4267_v18 = vsub.f32 %v4265_v24, %v4266_v44  ;;  %4488 = vmatpush.msra.mxu1 %v4976_v36 }
 0x51f   :  { %v4268_v40 = vadd.f32 1e-05, %v4267_v18  ;;  %4489 = vmatpush.msra.mxu1 %v7810_v8 }
 0x521   :  { %5028 = vrsqrt.f32 %v4268_v40  ;;  %vm4275_vm13 = vweird.f32 %v4268_v40 }
 0x527   :  { %v5029_v55 = vpop.eup %5028 }
 0x528   :  { %v4270_v23 = vmul.f32 %v5029_v55, %v4268_v40  ;;  %vm4276_vm12 = vweird.f32 %v5029_v55 }
 0x529   :  { %vm4277_vm14 = vmor %vm4275_vm13, %vm4276_vm12 }
 0x52a   :  { %v4271_v26 = vmul.f32 %v5029_v55, %v4270_v23  ;;  %v5022_v23 = vld [vmem:[%s7893_s14] ss:$0 sm:$0xff] }
 0x52c   :  { %v4272_v57 = vmul.f32 0.5, %v4271_v26 }
 0x52e   :  { %v4273_v60 = vsub.f32 1.5, %v4272_v57 }
 0x530   :  { %v4274_v51 = vmul.f32 %v5029_v55, %v4273_v60 }
 0x532   :  { %v4278_v2 = vsel %vm4277_vm14, %v5029_v55, %v4274_v51 }
 0x533   :  { %v4280_v6 = vmul.f32 %v4279_v45, %v4278_v2 }
 0x535   :  { %v4282_v42 = vmul.f32 %v4280_v6, %v7741_v63  ;;  %v4285_v62 = vperm.slane %v4280_v6, 0 }
 0x537   :  { %v4283_v59 = vsub.f32 %v4281_v17, %v4282_v42  ;;  %v4311_v37 = vmul.f32 %v4310_v54, %v4285_v62  ;;  %v4315_v27 = vmul.f32 %v4314_v61, %v4285_v62  ;;  %v4286_v19 = vmul.f32 %v4285_v62, %v4284_v30 }
 0x538   :  { %v4293_v34 = vmul.f32 %v4292_v46, %v4285_v62  ;;  %v4320_v35 = vmul.f32 %v4319_v15, %v4285_v62  ;;  %v4298_v43 = vmul.f32 %v4297_v56, %v4285_v62  ;;  %v4325_v22 = vmul.f32 %v4324_v20, %v4285_v62 }
 0x539   :  { %v4288_v9 = vperm.slane %v4283_v59, 0  ;;  %v4303_v24 = vmul.f32 %v4302_v21, %v4285_v62 }
 0x53b   :  { %v4312_v48 = vadd.f32 %v4311_v37, %v4288_v9  ;;  %v4316_v52 = vadd.f32 %v4315_v27, %v4288_v9  ;;  %v4290_v10 = vadd.f32 %v4288_v9, %v4286_v19  ;;  %v4294_v14 = vadd.f32 %v4293_v34, %v4288_v9 }
 0x53c   :  { %v4321_v4 = vadd.f32 %v4320_v35, %v4288_v9  ;;  %v4299_v63 = vadd.f32 %v4298_v43, %v4288_v9  ;;  %v4326_v18 = vadd.f32 %v4325_v22, %v4288_v9  ;;  %v4304_v28 = vadd.f32 %v4303_v24, %v4288_v9 }
 0x53d   :  { %v4317_v16 = vmax.f32 %v4312_v48, %v4316_v52  ;;  %v4295_v7 = vmax.f32 %v4290_v10, %v4294_v14 }
 0x53f   :  { %v4322_v44 = vmax.f32 %v4317_v16, %v4321_v4  ;;  %v4300_v40 = vmax.f32 %v4295_v7, %v4299_v63 }
 0x541   :  { %v4327_v25 = vmax.f32 %v4322_v44, %v4326_v18  ;;  %v4305_v11 = vmax.f32 %v4300_v40, %v4304_v28  ;;  %v4637_v44 = vld [vmem:[%s7896_s17 + $0x18] sm:$0xff]  ;;  %v4636_v18 = vld [vmem:[%s7896_s17 + $0x10] sm:$0xff]  ;;  %v4635_v28 = vld [vmem:[%s7896_s17 + $0x8] sm:$0xff] }
 0x542   :  { %4661 = vmatpush.msra.mxu0 %v4637_v44 }
 0x543   :  { %v4328_v29 = vmax.f32 %v4327_v25, 0.0  ;;  %v4306_v38 = vmax.f32 %v4305_v11, 0.0  ;;  %v4634_v25 = vld [vmem:[%s7896_s17] sm:$0xff]  ;;  %s5065_s17 = smov [#allocation10]  }
 0x544   :  { %4662 = vmatpush.msra.mxu0 %v4636_v18  ;;  %s4688_s10 = sshll.u32 %s5065_s17, 4  ;;  %s4689_s10 = int_to_ptr.vmem [resolvable:$true] %s4688_s10 }
 0x545   :  { %4329 = vst.msk [vmem:[#allocation7 + $0x7] sm:$0x7f] %vm4307_vm15, %v4328_v29 }
 0x546   :  { %4308 = vst.msk [vmem:[#allocation7] sm:$0x7f] %vm4307_vm15, %v4306_v38  ;;  %4663 = vmatpush.msra.mxu0 %v4635_v28 }
 0x548   :  { %4664 = vmatpush.msra.mxu0 %v4634_v25 }
 0x54c   :  { %v4462_v53 = vld [vmem:[#allocation7 + $0x8] sm:$0x1f] }
 0x54d   :  { %v4340_v49 = vld [vmem:[#allocation7 + $0x1] sm:$0x1f]  ;;  %v4453_v1 = vld [vmem:[#allocation7 + $0x7] sm:$0x1f] }
 0x54e   :  { %v4331_v41 = vld [vmem:[#allocation7] sm:$0x1f]  ;;  %4983 = vmatmul.msk.f32.vlgmr.msrb.gmra.mxu1 %vm4035_vm10, %v4340_v49  ;;  %v4517_v39 = vld [vmem:[#allocation7 + $0x9] sm:$0x1f] }
 0x54f   :  { %v4396_v5 = vld [vmem:[#allocation7 + $0x2] sm:$0x1f]  ;;  %4984 = vmatmul.msk.f32.vlgmr.msra.gmra.mxu2 %vm4035_vm10, %v4331_v41 }
 0x550   :  { %4993 = vmatmul.msk.f32.vlgmr.msra.gmra.mxu3 %vm4035_vm10, %v4396_v5 }
 0x556   :  { %5002 = vmatmul.msk.f32.vlgmr.msra.gmra.mxu1 %vm4035_vm10, %v4462_v53  ;;  %v4584_v53 = vld [vmem:[%s7894_s15] sm:$0x1] }
 0x557   :  { %5003 = vmatmul.msk.f32.vlgmr.msrb.gmra.mxu2 %vm4035_vm10, %v4453_v1 }
 0x558   :  { %5012 = vmatmul.msk.f32.vlgmr.msrb.gmra.mxu3 %vm4035_vm10, %v4517_v39 }
 0x5cb   :  { %v4370_v50 = vpop.f32.mrf.mxu1 }
 0x5d2   :  { %v4393_v33 = vpop.f32.mrf.mxu2 }
 0x5d3   :  { %v4394_v55 = vadd.f32 %v4393_v33, %v4370_v50  ;;  %v4426_v58 = vpop.f32.mrf.mxu3  ;;  %v4491_v57 = vpop.f32.mrf.mxu1 }
 0x5d5   :  { %v4429_v47 = vadd.f32 %v4426_v58, %v4394_v55 }
 0x5d7   :  { %v4433_v3 = vadd.f32 %v5022_v23, %v4429_v47 }
 0x5d9   :  { %4435 = vst.msk [vmem:[#allocation8] sm:$0x1f] %vm4434_vm0, %v4433_v3  ;;  %v4436_v26 = vsel %vm4434_vm0, %v4433_v3, 0.0  ;;  %v4444_v36 = vmul.f32 %v4433_v3, %v4433_v3 }
 0x5da   :  { %v4437_v13 = vrot.slane %v4436_v26, 4  ;;  %v4514_v8 = vpop.f32.mrf.mxu2 }
 0x5db   :  { %v4445_v60 = vsel %vm4434_vm0, %v4444_v36, 0.0  ;;  %v4515_v51 = vadd.f32 %v4514_v8, %v4491_v57  ;;  %v4546_v2 = vpop.f32.mrf.mxu3 }
 0x5dc   :  { %v4446_v45 = vrot.slane %v4445_v60, 4  ;;  %v4438_v17 = vadd.f32 %v4437_v13, %v4436_v26 }
 0x5dd   :  { %v4549_v6 = vadd.f32 %v4546_v2, %v4515_v51 }
 0x5de   :  { %v4447_v42 = vadd.f32 %v4446_v45, %v4445_v60  ;;  %v4439_v59 = vrot.slane %v4438_v17, 2 }
 0x5df   :  { %v4550_v62 = vadd.f32 %v5022_v23, %v4549_v6 }
 0x5e0   :  { %v4448_v32 = vrot.slane %v4447_v42, 2  ;;  %v4440_v37 = vadd.f32 %v4439_v59, %v4438_v17  ;;  %v4589_v58 = vld [vmem:[#allocation8] ss:$4 sm:$0x1] }
 0x5e1   :  { %v4560_v30 = vmul.f32 %v4550_v62, %v4550_v62  ;;  %4551 = vst.msk [vmem:[#allocation8 + $0x5] sm:$0x1f] %vm4434_vm0, %v4550_v62  ;;  %v4552_v54 = vsel %vm4434_vm0, %v4550_v62, 0.0  ;;  %v4593_v23 = vld [vmem:[#allocation8 + $0x1] ss:$4 sm:$0x1] }
 0x5e2   :  { %v4553_v46 = vrot.slane %v4552_v54, 4  ;;  %v4449_v27 = vadd.f32 %v4448_v32, %v4447_v42  ;;  %v4441_v56 = vrot.slane %v4440_v37, 1  ;;  %v4598_v8 = vld [vmem:[#allocation8 + $0x2] ss:$4 sm:$0x1] }
 0x5e3   :  { %v4561_v61 = vsel %vm4434_vm0, %v4560_v30, 0.0  ;;  %v4603_v62 = vld [vmem:[#allocation8 + $0x3] ss:$4 sm:$0x1] }
 0x5e4   :  { %v4562_v9 = vrot.slane %v4561_v61, 4  ;;  %v4554_v15 = vadd.f32 %v4553_v46, %v4552_v54  ;;  %v4450_v48 = vrot.slane %v4449_v27, 1  ;;  %v4442_v14 = vadd.f32 %v4441_v56, %v4440_v37 }
 0x5e6   :  { %v4563_v19 = vadd.f32 %v4562_v9, %v4561_v61  ;;  %v4555_v34 = vrot.slane %v4554_v15, 2  ;;  %v4451_v43 = vadd.f32 %v4450_v48, %v4449_v27 }
 0x5e8   :  { %v4564_v0 = vrot.slane %v4563_v19, 2  ;;  %v4556_v52 = vadd.f32 %v4555_v34, %v4554_v15  ;;  %v4612_v33 = vld [vmem:[#allocation8 + $0x5] ss:$4 sm:$0x1] }
 0x5e9   :  { %v4616_v55 = vld [vmem:[#allocation8 + $0x6] ss:$4 sm:$0x1]  ;;  %v4621_v36 = vld [vmem:[#allocation8 + $0x7] ss:$4 sm:$0x1] }
 0x5ea   :  { %v4565_v35 = vadd.f32 %v4564_v0, %v4563_v19  ;;  %v4557_v20 = vrot.slane %v4556_v52, 1  ;;  %v4626_v2 = vld [vmem:[#allocation8 + $0x8] ss:$4 sm:$0x1] }
 0x5ec   :  { %v4566_v10 = vrot.slane %v4565_v35, 1  ;;  %v4558_v12 = vadd.f32 %v4557_v20, %v4556_v52  ;;  %v5023_v52 = vld [vmem:[%s7897_s18] ss:$0 sm:$0xff] }
 0x5ee   :  { %v4567_v21 = vadd.f32 %v4566_v10, %v4565_v35  ;;  %v4559_v16 = vadd.f32 %v4558_v12, %v4442_v14 }
 0x5f0   :  { %v4568_v4 = vadd.f32 %v4567_v21, %v4451_v43  ;;  %v4569_v22 = vmul.f32 0.1, %v4559_v16 }
 0x5f2   :  { %v4570_v7 = vmul.f32 0.1, %v4568_v4  ;;  %v4571_v63 = vmul.f32 %v4569_v22, %v4569_v22 }
 0x5f4   :  { %v4572_v24 = vsub.f32 %v4570_v7, %v4571_v63 }
 0x5f6   :  { %v4573_v40 = vadd.f32 1e-05, %v4572_v24 }
 0x5f8   :  { %5030 = vrsqrt.f32 %v4573_v40  ;;  %vm4580_vm2 = vweird.f32 %v4573_v40 }
 0x5fe   :  { %v5031_v11 = vpop.eup %5030 }
 0x5ff   :  { %v4575_v29 = vmul.f32 %v5031_v11, %v4573_v40  ;;  %vm4581_vm1 = vweird.f32 %v5031_v11 }
 0x600   :  { %vm4582_vm3 = vmor %vm4580_vm2, %vm4581_vm1 }
 0x601   :  { %v4576_v38 = vmul.f32 %v5031_v11, %v4575_v29 }
 0x603   :  { %v4577_v49 = vmul.f32 0.5, %v4576_v38 }
 0x605   :  { %v4578_v41 = vsub.f32 1.5, %v4577_v49 }
 0x607   :  { %v4579_v5 = vmul.f32 %v5031_v11, %v4578_v41 }
 0x609   :  { %v4583_v1 = vsel %vm4582_vm3, %v5031_v11, %v4579_v5 }
 0x60a   :  { %v4585_v39 = vmul.f32 %v4584_v53, %v4583_v1 }
 0x60c   :  { %v4587_v50 = vmul.f32 %v4585_v39, %v4569_v22  ;;  %v4613_v3 = vmul.f32 %v4612_v33, %v4585_v39  ;;  %v4617_v26 = vmul.f32 %v4616_v55, %v4585_v39  ;;  %v4590_v13 = vmul.f32 %v4589_v58, %v4585_v39 }
 0x60d   :  { %v4594_v57 = vmul.f32 %v4593_v23, %v4585_v39  ;;  %v4622_v45 = vmul.f32 %v4621_v36, %v4585_v39  ;;  %v4599_v42 = vmul.f32 %v4598_v8, %v4585_v39  ;;  %v4627_v32 = vmul.f32 %v4626_v2, %v4585_v39 }
 0x60e   :  { %v4588_v47 = vsub.f32 %v4586_v31, %v4587_v50  ;;  %v4604_v46 = vmul.f32 %v4603_v62, %v4585_v39 }
 0x610   :  { %v4614_v60 = vadd.f32 %v4613_v3, %v4588_v47  ;;  %v4618_v51 = vadd.f32 %v4617_v26, %v4588_v47  ;;  %v4591_v6 = vadd.f32 %v4590_v13, %v4588_v47  ;;  %v4595_v17 = vadd.f32 %v4594_v57, %v4588_v47 }
 0x611   :  { %v4623_v59 = vadd.f32 %v4622_v45, %v4588_v47  ;;  %v4600_v61 = vadd.f32 %v4599_v42, %v4588_v47  ;;  %v4628_v37 = vadd.f32 %v4627_v32, %v4588_v47  ;;  %v4605_v15 = vadd.f32 %v4604_v46, %v4588_v47 }
 0x612   :  { %v4619_v30 = vmax.f32 %v4614_v60, %v4618_v51  ;;  %v4596_v54 = vmax.f32 %v4591_v6, %v4595_v17 }
 0x614   :  { %v4624_v9 = vmax.f32 %v4619_v30, %v4623_v59  ;;  %v4601_v27 = vmax.f32 %v4596_v54, %v4600_v61 }
 0x616   :  { %v4629_v19 = vmax.f32 %v4624_v9, %v4628_v37  ;;  %v4606_v34 = vmax.f32 %v4601_v27, %v4605_v15 }
 0x618   :  { %v4630_v0 = vmax.f32 %v4629_v19, 0.0  ;;  %v4607_v56 = vmax.f32 %v4606_v34, 0.0 }
 0x61a   :  { %4632 = vst.msk [vmem:[#allocation9 + $0x1] sm:$0x1] %vm4609_vm4, %v4630_v0 }
 0x61b   :  { %4610 = vst.msk [vmem:[#allocation9] sm:$0x1] %vm4609_vm4, %v4607_v56 }
 0x622   :  { %v4633_v48 = vld [vmem:[#allocation9] sm:$0x3] }
 0x623   :  { %5013 = vmatmul.msk.f32.vlgmr.msra.gmra.mxu0 %vm4035_vm10, %v4633_v48 }
 0x6a0   :  { %v4666_v35 = vpop.f32.mrf.mxu0 }
 0x6a1   :  { %v4667_v20 = vadd.f32 %v5023_v52, %v4666_v35 }
 0x6a3   :  { %v4670_v10 = vsel %vm4669_vm5, %v4667_v20, -inf }
 0x6a4   :  { %4671 = vmax.xlane.f32.xlu0 %v4670_v10 }
 0x717   :  { %v4672_v14 = vpop.xlane.xlu0 %4671 }
 0x718   :  { %v4673_v43 = vsub.f32 %v4667_v20, %v4672_v14 }
 0x71a   :  { %v4674_v12 = vmul.f32 1.442695, %v4673_v43 }
 0x71c   :  { %5032 = vpow2.f32 %v4674_v12 }
 0x722   :  { %v5033_v21 = vpop.eup %5032 }
 0x723   :  { %v4676_v16 = vsel %vm4669_vm5, %v5033_v21, 0.0 }
 0x724   :  { %4677 = vadd.xlane.f32.xlu0 %v4676_v16 }
 0x797   :  { %v4678_v4 = vpop.xlane.xlu0 %4677 }
 0x798   :  { %5034 = vlog2.f32 %v4678_v4 }
 0x79e   :  { %v5035_v22 = vpop.eup %5034 }
 0x79f   :  { %v4680_v7 = vmul.f32 0.6931472, %v5035_v22 }
 0x7a1   :  { %v4681_v63 = vsub.f32 %v4673_v43, %v4680_v7 }
 0x7a3   :  { %4682 = vst.msk [vmem:[#allocation10] sm:$0x3] %vm4669_vm5, %v4681_v63 }
 0x7a4   :  { %4693 = dma.vmem_to_hbm [thread:$0]  %s4689_s10, 32, %s4691_s13, [#allocation11]  }
 0x7a5   :  { %5063 = dma.done.wait [#allocation11], 32  }
 0x7a6   :  { %5064 = vsyncadd [#allocation11], 4294967264 }
 0x7a7   :  { %4698 = vsyncpa [#allocation11], 1 }

</bundles_post_ra>
